<compile_context>
chip_gen: v6e
topology: v6e:2x2x1
jax: 0.10.0
libtpu: 0.0.40
codegen_flags: <defaults>
</compile_context>

<pallas_src>
import functools

import jax
import jax.numpy as jnp
from jax import lax
from jax.experimental import pallas as pl
from jax.experimental.pallas import tpu as pltpu


def _vmem_limit(est_bytes):
    # generous but capped at v7x's 64 MiB physical VMEM; always above the
    # v5e/v6e default scoped limits.
    return int(min(64 << 20, max(32 << 20, est_bytes + (4 << 20))))


# --------------------------------------------------------------------------
# Tiled linear kernel: hoisted LSTM input projections and the generator.
# --------------------------------------------------------------------------
def _linear_kernel(x_ref, w_ref, b_ref, o_ref, *, trans_b):
    if trans_b:
        acc = lax.dot_general(x_ref[...], w_ref[...],
                              dimension_numbers=(((1,), (1,)), ((), ())),
                              preferred_element_type=jnp.float32)
    else:
        acc = jnp.dot(x_ref[...], w_ref[...],
                      preferred_element_type=jnp.float32)
    o_ref[...] = (acc + b_ref[...]).astype(o_ref.dtype)


def _tile(dim, pref):
    """Return (tile, padded_dim); never produces a block larger than pref."""
    if dim <= pref:
        return dim, dim
    return pref, pl.cdiv(dim, pref) * pref


def linear(x, w, b, *, trans_b=False, tm=256, tn=512, out_dtype=jnp.float32):
    """y = x @ w + b (or x @ w.T + b when trans_b=True).

    x: (M, K); w: (K, N) or (N, K) if trans_b; b: (N,).  K is kept whole.
    Operands are cast to bf16 (f32 MXU accumulation); output dtype selectable.
    """
    M, K = x.shape
    N = w.shape[0] if trans_b else w.shape[1]
    x = x.astype(jnp.bfloat16)
    w = w.astype(jnp.bfloat16)
    b = b.astype(jnp.float32).reshape(1, N)

    tm, m_pad = _tile(M, tm)
    tn, n_pad = _tile(N, tn)
    if m_pad != M:
        x = jnp.pad(x, ((0, m_pad - M), (0, 0)))
    if n_pad != N:
        b = jnp.pad(b, ((0, 0), (0, n_pad - N)))
        if trans_b:
            w = jnp.pad(w, ((0, n_pad - N), (0, 0)))
        else:
            w = jnp.pad(w, ((0, 0), (0, n_pad - N)))
    grid = (m_pad // tm, n_pad // tn)

    if trans_b:
        w_spec = pl.BlockSpec((tn, K), lambda i, j: (j, 0))
    else:
        w_spec = pl.BlockSpec((K, tn), lambda i, j: (0, j))

    est = 2 * (tm * K * 2 + tn * K * 2 + tn * 4 +
               tm * tn * jnp.dtype(out_dtype).itemsize)

    out = pl.pallas_call(
        functools.partial(_linear_kernel, trans_b=trans_b),
        out_shape=jax.ShapeDtypeStruct((m_pad, n_pad), out_dtype),
        grid_spec=pltpu.PrefetchScalarGridSpec(
            num_scalar_prefetch=0,
            grid=grid,
            in_specs=[pl.BlockSpec((tm, K), lambda i, j: (i, 0)),
                      w_spec,
                      pl.BlockSpec((1, tn), lambda i, j: (0, j))],
            out_specs=pl.BlockSpec((tm, tn), lambda i, j: (i, j)),
        ),
        compiler_params=pltpu.CompilerParams(
            dimension_semantics=("parallel", "parallel"),
            vmem_limit_bytes=_vmem_limit(est)),
    )(x, w, b)
    if (m_pad, n_pad) != (M, N):
        out = out[:M, :N]
    return out


# --------------------------------------------------------------------------
# LSTM recurrence kernel: Tc timesteps per grid step, (h, c) in VMEM scratch.
# Shared by the fused bidirectional encoder (bidir=True, emit_outputs=False)
# and the unidirectional decoder (bidir=False, emit_outputs=True).
# Packed-sequence semantics via in-kernel length masking (carry-through h/c).
# Backward direction: reversed chunk order via index_map + reversed in-chunk
# order via scalar index arithmetic (no gathers, no separate kernel).
# --------------------------------------------------------------------------
def _lstm_chunk_kernel(gx_ref, len_ref, h0_ref, c0_ref, whh_ref, *rest,
                       tc, emit_outputs, masked, bidir):
    if emit_outputs:
        out_ref, hN_ref, cN_ref, h_scr, c_scr = rest
    else:
        hN_ref, cN_ref, h_scr, c_scr = rest
        out_ref = None

    if bidir:
        d = pl.program_id(0)            # 0 = forward, 1 = backward
        t = pl.program_id(1)
        n = pl.num_programs(1)
    else:
        d = None
        t = pl.program_id(0)
        n = pl.num_programs(0)

    @pl.when(t == 0)
    def _():
        h_scr[...] = h0_ref[...]
        c_scr[...] = c0_ref[...]

    H = h_scr.shape[-1]
    chunk = (t + d * (n - 1 - 2 * t)) if bidir else t     # reversed for d == 1
    base = chunk * tc
    lens = len_ref[...] if masked else None               # (B, 1) int32

    def step(k, carry):
        h, c = carry
        local = (k + d * (tc - 1 - 2 * k)) if bidir else k
        # input projection x @ W_ih (+ bias) was hoisted; only h @ W_hh here.
        gates = gx_ref[local] + jnp.dot(h.astype(whh_ref.dtype), whh_ref[...],
                                        preferred_element_type=jnp.float32)
        # gates packed [i, f, o, g]: one wide sigmoid + one tanh.
        sig = jax.nn.sigmoid(gates[:, :3 * H])
        i_g = sig[:, 0 * H:1 * H]
        f_g = sig[:, 1 * H:2 * H]
        o_g = sig[:, 2 * H:3 * H]
        g_g = jnp.tanh(gates[:, 3 * H:4 * H])
        c_new = f_g * c + i_g * g_g
        h_new = o_g * jnp.tanh(c_new)
        if masked:
            valid = (base + local) < lens                  # (B, 1) bool
            h_out = jnp.where(valid, h_new, 0.0)           # pad positions -> 0
            h_new = jnp.where(valid, h_new, h)             # carry state through
            c_new = jnp.where(valid, c_new, c)
        else:
            h_out = h_new
        if emit_outputs:
            out_ref[local] = h_out
        return (h_new, c_new)

    h, c = lax.fori_loop(0, tc, step, (h_scr[...], c_scr[...]),
                         unroll=True if tc <= 8 else 4)
    h_scr[...] = h
    c_scr[...] = c

    @pl.when(t == n - 1)                                   # final state, once
    def _():
        hN_ref[...] = h
        cN_ref[...] = c


def bilstm_encoder(gx, lengths, w_hh, *, tc=16):
    """Fused bidirectional encoder recurrence (no per-timestep outputs).

    gx: (T, B, 2*G) hoisted gate inputs; forward gates in [..., :G],
        backward in [..., G:] (G = 4*He).  bf16 or f32.
    lengths: (B, 1) int32.  w_hh: (2, He, G) stacked [fwd, bwd].
    Returns (hN, cN), each (2, B, He) f32 with index 0 = fwd, 1 = bwd.
    """
    T, B, G2 = gx.shape
    G = G2 // 2
    He = w_hh.shape[1]

    tc = max(1, min(tc, T))
    per_step = B * G * gx.dtype.itemsize
    fixed = 2 * He * G * 2 + 6 * B * He * 4 + (1 << 20)
    while tc > 1 and fixed + 2 * tc * per_step > (44 << 20):
        tc = max(1, tc // 2)

    t_pad = pl.cdiv(T, tc) * tc
    if t_pad != T:
        gx = jnp.pad(gx, ((0, t_pad - T), (0, 0), (0, 0)))
    n = t_pad // tc
    w_hh = w_hh.astype(jnp.bfloat16)
    zeros = jnp.zeros((B, He), jnp.float32)

    # direction d selects: reversed time chunk and the d-th 4He column block.
    gx_map = lambda d, t: (t + d * (n - 1 - 2 * t), 0, d)
    const2 = lambda d, t: (0, 0)
    dir_map3 = lambda d, t: (d, 0, 0)

    est = fixed + 2 * tc * per_step
    hN, cN = pl.pallas_call(
        functools.partial(_lstm_chunk_kernel, tc=tc, emit_outputs=False,
                          masked=True, bidir=True),
        out_shape=(jax.ShapeDtypeStruct((2, B, He), jnp.float32),
                   jax.ShapeDtypeStruct((2, B, He), jnp.float32)),
        grid_spec=pltpu.PrefetchScalarGridSpec(
            num_scalar_prefetch=0,
            grid=(2, n),
            in_specs=[
                pl.BlockSpec((tc, B, G), gx_map),          # gate inputs
                pl.BlockSpec((B, 1), const2),              # lengths (resident)
                pl.BlockSpec((B, He), const2),             # h0 (zeros)
                pl.BlockSpec((B, He), const2),             # c0 (zeros)
                pl.BlockSpec((None, He, G), dir_map3),     # W_hh[d] (resident)
            ],
            out_specs=[
                pl.BlockSpec((None, B, He), dir_map3),     # final h per dir
                pl.BlockSpec((None, B, He), dir_map3),     # final c per dir
            ],
            scratch_shapes=[pltpu.VMEM((B, He), jnp.float32),
                            pltpu.VMEM((B, He), jnp.float32)],
        ),
        compiler_params=pltpu.CompilerParams(
            # direction axis parallel (2 TCs on v7x), time axis sequential
            dimension_semantics=("parallel", "arbitrary"),
            vmem_limit_bytes=_vmem_limit(est)),
    )(gx, lengths, zeros, zeros, w_hh)
    return hN, cN


def lstm_decoder(gy, h0, c0, w_hh, *, tc=16):
    """Unidirectional decoder recurrence with per-timestep outputs.

    gy: (T, B, 4H) hoisted gate inputs.  h0/c0: (B, H).  w_hh: (H, 4H).
    Returns (out (T, B, H) f32, final_h (B, H), final_c (B, H)).
    """
    T, B, G = gy.shape
    H = h0.shape[-1]

    tc = max(1, min(tc, T))
    per_step = B * G * gy.dtype.itemsize + B * H * 4
    fixed = 2 * H * G * 2 + 6 * B * H * 4 + (1 << 20)
    while tc > 1 and fixed + 2 * tc * per_step > (44 << 20):
        tc = max(1, tc // 2)

    t_pad = pl.cdiv(T, tc) * tc
    masked = False
    lens = jnp.full((B, 1), T, jnp.int32)
    if t_pad != T:
        gy = jnp.pad(gy, ((0, t_pad - T), (0, 0), (0, 0)))
        masked = True                 # mask padded steps so final state exact
    n = t_pad // tc
    w_hh = w_hh.astype(jnp.bfloat16)

    time_map = lambda t: (t, 0, 0)
    const2 = lambda t: (0, 0)

    est = fixed + 2 * tc * per_step
    out, hN, cN = pl.pallas_call(
        functools.partial(_lstm_chunk_kernel, tc=tc, emit_outputs=True,
                          masked=masked, bidir=False),
        out_shape=(jax.ShapeDtypeStruct((t_pad, B, H), jnp.float32),
                   jax.ShapeDtypeStruct((B, H), jnp.float32),
                   jax.ShapeDtypeStruct((B, H), jnp.float32)),
        grid_spec=pltpu.PrefetchScalarGridSpec(
            num_scalar_prefetch=0,
            grid=(n,),
            in_specs=[
                pl.BlockSpec((tc, B, G), time_map),
                pl.BlockSpec((B, 1), const2),
                pl.BlockSpec((B, H), const2),
                pl.BlockSpec((B, H), const2),
                pl.BlockSpec((H, G), const2),              # W_hh (resident)
            ],
            out_specs=[
                pl.BlockSpec((tc, B, H), time_map),
                pl.BlockSpec((B, H), const2),
                pl.BlockSpec((B, H), const2),
            ],
            scratch_shapes=[pltpu.VMEM((B, H), jnp.float32),
                            pltpu.VMEM((B, H), jnp.float32)],
        ),
        compiler_params=pltpu.CompilerParams(
            dimension_semantics=("arbitrary",),            # sequential recurrence
            vmem_limit_bytes=_vmem_limit(est)),
    )(gy, lens, h0, c0, w_hh)
    return out[:T], hN, cN


# --------------------------------------------------------------------------
# Deterministic parameter initialization (shapes implied by the module).
# A single fused bias (b_ih + b_hh) per LSTM; gates packed [i, f, o, g];
# the two encoder directions' input projections are pre-concatenated.
# --------------------------------------------------------------------------
def init_params(key, src_vocab, tgt_vocab, hidden_size, padding_idx=0):
    H = hidden_size
    He = H // 2                       # per-direction encoder hidden size
    ks = jax.random.split(key, 12)

    def uni(k, shape, scale):
        return jax.random.uniform(k, shape, jnp.float32, -scale, scale)

    emb_src = 0.1 * jax.random.normal(ks[0], (src_vocab, H), jnp.float32)
    emb_src = emb_src.at[padding_idx].set(0.0)
    emb_tgt = 0.1 * jax.random.normal(ks[1], (tgt_vocab, H), jnp.float32)
    emb_tgt = emb_tgt.at[padding_idx].set(0.0)

    se = 1.0 / (He ** 0.5)
    sd = 1.0 / (H ** 0.5)
    enc_f_wih = uni(ks[2], (H, 4 * He), se)
    enc_f_whh = uni(ks[3], (He, 4 * He), se)
    enc_f_b = uni(ks[4], (4 * He,), se)
    enc_b_wih = uni(ks[5], (H, 4 * He), se)
    enc_b_whh = uni(ks[6], (He, 4 * He), se)
    enc_b_b = uni(ks[7], (4 * He,), se)
    return dict(
        emb_src=emb_src,
        emb_tgt=emb_tgt,              # also the (tied) generator weight
        enc_wih=jnp.concatenate([enc_f_wih, enc_b_wih], axis=1),   # (H, 8He)
        enc_b=jnp.concatenate([enc_f_b, enc_b_b], axis=0),         # (8He,)
        enc_whh=jnp.stack([enc_f_whh, enc_b_whh], axis=0),         # (2, He, 4He)
        dec_wih=uni(ks[8], (H, 4 * H), sd),
        dec_whh=uni(ks[9], (H, 4 * H), sd),
        dec_b=uni(ks[10], (4 * H,), sd),
        gen_b=uni(ks[11], (tgt_vocab,), sd),
    )


# --------------------------------------------------------------------------
# Seq2Seq.forward
# --------------------------------------------------------------------------
def seq2seq_forward(params, src, src_lengths, tgt, dec_hidden=None):
    B, S = src.shape
    _, Tt = tgt.shape
    H = params["emb_src"].shape[1]

    # ---------------- Encoder: embedding + bidirectional LSTM ---------------
    # TODO(synk): nn.Dropout in encoder/decoder is identity here (eval mode).
    x_tm = params["emb_src"][src.T]                              # (S, B, H) f32
    x_flat = x_tm.reshape(S * B, H)
    lens = src_lengths.astype(jnp.int32).reshape(B, 1)

    # Single fused input projection for BOTH directions, emitted in bf16.
    gx = linear(x_flat, params["enc_wih"], params["enc_b"],
                out_dtype=jnp.bfloat16).reshape(S, B, -1)        # (S, B, 8He)

    # Fused fwd/bwd recurrence; no per-timestep outputs (attention is None).
    # TODO(synk): if an attention module is added, re-enable emit_outputs for
    # the encoder to produce the (S, B, H) context states.
    hN, cN = bilstm_encoder(gx, lens, params["enc_whh"])         # (2, B, He)
    final_h = jnp.concatenate([hN[0], hN[1]], axis=-1)[None]     # (1, B, H)
    final_c = jnp.concatenate([cN[0], cN[1]], axis=-1)[None]     # (1, B, H)

    if dec_hidden is None:
        dec_hidden = (final_h, final_c)

    # ---------------- Decoder: embedding + unidirectional LSTM --------------
    y_tm = params["emb_tgt"][tgt.T]                              # (Tt, B, H)
    gy = linear(y_tm.reshape(Tt * B, H), params["dec_wih"], params["dec_b"],
                out_dtype=jnp.bfloat16).reshape(Tt, B, 4 * H)
    dec_out_tm, dec_hN, dec_cN = lstm_decoder(
        gy, dec_hidden[0][0], dec_hidden[1][0], params["dec_whh"])
    dec_output = jnp.transpose(dec_out_tm, (1, 0, 2))            # (B, Tt, H)

    # ---------------- Generator (weight tied to decoder embedding) ----------
    logits_flat = linear(dec_output.reshape(B * Tt, H),
                         params["emb_tgt"], params["gen_b"], trans_b=True)
    logits = logits_flat.reshape(B, Tt, -1)                      # (B, Tt, V)
    return logits, (dec_hN[None], dec_cN[None])


if __name__ == "__main__":
    key = jax.random.PRNGKey(0)
    # He = hidden // 2 is kept a multiple of 128 so every gate slice / block
    # stays lane-aligned (feedback: keep He, H multiples of 128).
    src_vocab, tgt_vocab, hidden = 16, 16, 256
    B, S, Tt = 2, 8, 7

    pkey, skey, tkey = jax.random.split(key, 3)
    params = init_params(pkey, src_vocab, tgt_vocab, hidden)

    src = jax.random.randint(skey, (B, S), 1, src_vocab, dtype=jnp.int32)
    src_lengths = jnp.array([S, S - 3], dtype=jnp.int32)
    # zero out padding positions like a real padded batch (padding_idx = 0)
    src = jnp.where(jnp.arange(S)[None, :] < src_lengths[:, None], src, 0)
    tgt = jax.random.randint(tkey, (B, Tt), 1, tgt_vocab, dtype=jnp.int32)

    fwd = jax.jit(functools.partial(seq2seq_forward, params))
    logits, (h, c) = fwd(src, src_lengths, tgt)
    jax.block_until_ready((logits, h, c))

    assert logits.shape == (B, Tt, tgt_vocab)
    assert h.shape == (1, B, hidden) and c.shape == (1, B, hidden)
    assert bool(jnp.all(jnp.isfinite(logits)))
    assert bool(jnp.all(jnp.isfinite(h))) and bool(jnp.all(jnp.isfinite(c)))
    print("KERNEL_OK")
</pallas_src>

<mosaic_0001>
module attributes {stable_mosaic.version = 11 : i64} {
  func.func @_linear_kernel(%arg0: i32, %arg1: i32, %arg2: memref<16x256xbf16, #tpu.memory_space<vmem>>, %arg3: memref<256x512xbf16, #tpu.memory_space<vmem>>, %arg4: memref<1x512xf32, #tpu.memory_space<vmem>>, %arg5: memref<16x512xbf16, #tpu.memory_space<vmem>>) attributes {dimension_semantics = [#tpu.dimension_semantics<parallel>, #tpu.dimension_semantics<parallel>], iteration_bounds = array<i64: 1, 2>, scalar_prefetch = 0 : i64, scratch_operands = 0 : i64, tpu.core_type = #tpu.core_type<tc>, window_params = [{transform_indices = @transform_0, window_bounds = array<i64: 16, 256>}, {transform_indices = @transform_1, window_bounds = array<i64: 256, 512>}, {transform_indices = @transform_2, window_bounds = array<i64: 1, 512>}, {transform_indices = @transform_3, window_bounds = array<i64: 16, 512>}]} {
    %c0 = arith.constant 0 : index
    %c0_0 = arith.constant 0 : index
    %0 = vector.load %arg2[%c0, %c0_0] : memref<16x256xbf16, #tpu.memory_space<vmem>>, vector<16x256xbf16>
    %c0_1 = arith.constant 0 : index
    %c0_2 = arith.constant 0 : index
    %1 = vector.load %arg3[%c0_1, %c0_2] : memref<256x512xbf16, #tpu.memory_space<vmem>>, vector<256x512xbf16>
    %cst = arith.constant dense<0.000000e+00> : vector<16x512xf32>
    %2 = tpu.matmul %0, %1, %cst {dimension_numbers = #tpu.dot_dimension_numbers<[1], [0], [0], [1], [0, 0, 1, 1], [], []>} : vector<16x256xbf16>, vector<256x512xbf16>, vector<16x512xf32> -> vector<16x512xf32>
    %c0_3 = arith.constant 0 : index
    %c0_4 = arith.constant 0 : index
    %3 = vector.load %arg4[%c0_3, %c0_4] : memref<1x512xf32, #tpu.memory_space<vmem>>, vector<1x512xf32>
    %4 = vector.broadcast %3 : vector<1x512xf32> to vector<16x512xf32>
    %5 = arith.addf %2, %4 : vector<16x512xf32>
    %6 = arith.truncf %5 : vector<16x512xf32> to vector<16x512xbf16>
    %c0_5 = arith.constant 0 : index
    %c0_6 = arith.constant 0 : index
    %7 = vector.load %arg5[%c0_5, %c0_6] : memref<16x512xbf16, #tpu.memory_space<vmem>>, vector<16x512xbf16>
    tpu.vector_store %arg5[%c0_5, %c0_6], %6 {strides = array<i32>} : memref<16x512xbf16, #tpu.memory_space<vmem>>, vector<16x512xbf16>,
    return
  }
  func.func @transform_0(%arg0: i32, %arg1: i32) -> (i32, i32) {
    %c0_i32 = arith.constant 0 : i32
    %c0_i32_0 = arith.constant 0 : i32
    return %arg0, %c0_i32 : i32, i32
  }
  func.func @transform_1(%arg0: i32, %arg1: i32) -> (i32, i32) {
    %c0_i32 = arith.constant 0 : i32
    %c0_i32_0 = arith.constant 0 : i32
    return %c0_i32, %arg1 : i32, i32
  }
  func.func @transform_2(%arg0: i32, %arg1: i32) -> (i32, i32) {
    %c0_i32 = arith.constant 0 : i32
    %c0_i32_0 = arith.constant 0 : i32
    return %c0_i32, %arg1 : i32, i32
  }
  func.func @transform_3(%arg0: i32, %arg1: i32) -> (i32, i32) {
    %c0_i32 = arith.constant 0 : i32
    return %arg0, %arg1 : i32, i32
  }
}

module attributes {stable_mosaic.version = 11 : i64} {
  func.func @_lstm_chunk_kernel(%arg0: i32, %arg1: i32, %arg2: memref<8x2x512xbf16, #tpu.memory_space<vmem>>, %arg3: memref<2x1xi32, #tpu.memory_space<vmem>>, %arg4: memref<2x128xf32, #tpu.memory_space<vmem>>, %arg5: memref<2x128xf32, #tpu.memory_space<vmem>>, %arg6: memref<1x128x512xbf16, #tpu.memory_space<vmem>>, %arg7: memref<1x2x128xf32, #tpu.memory_space<vmem>>, %arg8: memref<1x2x128xf32, #tpu.memory_space<vmem>>, %arg9: memref<2x128xf32, #tpu.memory_space<vmem>>, %arg10: memref<2x128xf32, #tpu.memory_space<vmem>>) attributes {dimension_semantics = [#tpu.dimension_semantics<parallel>, #tpu.dimension_semantics<arbitrary>], iteration_bounds = array<i64: 2, 1>, scalar_prefetch = 0 : i64, scratch_operands = 2 : i64, tpu.core_type = #tpu.core_type<tc>, window_params = [{transform_indices = @transform_0, window_bounds = array<i64: 8, 2, 512>}, {pipeline_mode = #tpu.pipeline_mode<synchronous>, transform_indices = @transform_1, window_bounds = array<i64: 2, 1>}, {pipeline_mode = #tpu.pipeline_mode<synchronous>, transform_indices = @transform_2, window_bounds = array<i64: 2, 128>}, {pipeline_mode = #tpu.pipeline_mode<synchronous>, transform_indices = @transform_3, window_bounds = array<i64: 2, 128>}, {transform_indices = @transform_4, window_bounds = array<i64: 1, 128, 512>}, {transform_indices = @transform_5, window_bounds = array<i64: 1, 2, 128>}, {transform_indices = @transform_6, window_bounds = array<i64: 1, 2, 128>}]} {
    %c0_i32 = arith.constant 0 : i32
    %0 = arith.cmpi eq, %arg1, %c0_i32 : i32
    %1 = arith.extui %0 : i1 to i32
    %c0_i32_0 = arith.constant 0 : i32
    %2 = arith.cmpi ne, %1, %c0_i32_0 : i32
    scf.if %2 {
      %c0_87 = arith.constant 0 : index
      %c0_88 = arith.constant 0 : index
      %320 = vector.load %arg4[%c0_87, %c0_88] : memref<2x128xf32, #tpu.memory_space<vmem>>, vector<2x128xf32>
      %c0_89 = arith.constant 0 : index
      %c0_90 = arith.constant 0 : index
      %321 = vector.load %arg9[%c0_89, %c0_90] : memref<2x128xf32, #tpu.memory_space<vmem>>, vector<2x128xf32>
      tpu.vector_store %arg9[%c0_89, %c0_90], %320 {strides = array<i32>} : memref<2x128xf32, #tpu.memory_space<vmem>>, vector<2x128xf32>,
      %c0_91 = arith.constant 0 : index
      %c0_92 = arith.constant 0 : index
      %322 = vector.load %arg5[%c0_91, %c0_92] : memref<2x128xf32, #tpu.memory_space<vmem>>, vector<2x128xf32>
      %c0_93 = arith.constant 0 : index
      %c0_94 = arith.constant 0 : index
      %323 = vector.load %arg10[%c0_93, %c0_94] : memref<2x128xf32, #tpu.memory_space<vmem>>, vector<2x128xf32>
      tpu.vector_store %arg10[%c0_93, %c0_94], %322 {strides = array<i32>} : memref<2x128xf32, #tpu.memory_space<vmem>>, vector<2x128xf32>,
    } else {
    }
    %c2_i32 = arith.constant 2 : i32
    %3 = arith.muli %c2_i32, %arg1 : i32
    %c0_i32_1 = arith.constant 0 : i32
    %4 = arith.subi %c0_i32_1, %3 : i32
    %5 = arith.muli %arg0, %4 : i32
    %6 = arith.addi %arg1, %5 : i32
    %c8_i32 = arith.constant 8 : i32
    %7 = arith.muli %6, %c8_i32 : i32
    %c0 = arith.constant 0 : index
    %c0_2 = arith.constant 0 : index
    %8 = vector.load %arg3[%c0, %c0_2] : memref<2x1xi32, #tpu.memory_space<vmem>>, vector<2x1xi32>
    %c0_3 = arith.constant 0 : index
    %c0_4 = arith.constant 0 : index
    %9 = vector.load %arg9[%c0_3, %c0_4] : memref<2x128xf32, #tpu.memory_space<vmem>>, vector<2x128xf32>
    %c0_5 = arith.constant 0 : index
    %c0_6 = arith.constant 0 : index
    %10 = vector.load %arg10[%c0_5, %c0_6] : memref<2x128xf32, #tpu.memory_space<vmem>>, vector<2x128xf32>
    %c0_i32_7 = arith.constant 0 : i32
    %c2_i32_8 = arith.constant 2 : i32
    %11 = arith.muli %c2_i32_8, %c0_i32_7 : i32
    %c7_i32 = arith.constant 7 : i32
    %12 = arith.subi %c7_i32, %11 : i32
    %13 = arith.muli %arg0, %12 : i32
    %14 = arith.addi %c0_i32_7, %13 : i32
    %15 = arith.index_cast %14 : i32 to index
    %c0_9 = arith.constant 0 : index
    %c0_10 = arith.constant 0 : index
    %16 = vector.load %arg2[%15, %c0_9, %c0_10] : memref<8x2x512xbf16, #tpu.memory_space<vmem>>, vector<1x2x512xbf16>
    %17 = vector.shape_cast %16 : vector<1x2x512xbf16> to vector<2x512xbf16>
    %18 = arith.truncf %9 : vector<2x128xf32> to vector<2x128xbf16>
    %c0_11 = arith.constant 0 : index
    %c0_12 = arith.constant 0 : index
    %c0_13 = arith.constant 0 : index
    %19 = vector.load %arg6[%c0_11, %c0_12, %c0_13] : memref<1x128x512xbf16, #tpu.memory_space<vmem>>, vector<1x128x512xbf16>
    %20 = vector.shape_cast %19 : vector<1x128x512xbf16> to vector<128x512xbf16>
    %cst = arith.constant dense<0.000000e+00> : vector<2x512xf32>
    %21 = tpu.matmul %18, %20, %cst {dimension_numbers = #tpu.dot_dimension_numbers<[1], [0], [0], [1], [0, 0, 1, 1], [], []>} : vector<2x128xbf16>, vector<128x512xbf16>, vector<2x512xf32> -> vector<2x512xf32>
    %22 = arith.extf %17 : vector<2x512xbf16> to vector<2x512xf32>
    %23 = arith.addf %22, %21 : vector<2x512xf32>
    %24 = vector.extract_strided_slice %23 {offsets = [0, 0], sizes = [2, 384], strides = [1, 1]} : vector<2x512xf32> to vector<2x384xf32>
    %25 = arith.negf %24 : vector<2x384xf32>
    %26 = math.exp %25 : vector<2x384xf32>
    %cst_14 = arith.constant 1.000000e+00 : f32
    %27 = vector.broadcast %cst_14 : f32 to vector<2x384xf32>
    %28 = arith.addf %27, %26 : vector<2x384xf32>
    %29 = arith.divf %27, %28 : vector<2x384xf32>
    %30 = vector.extract_strided_slice %29 {offsets = [0, 0], sizes = [2, 128], strides = [1, 1]} : vector<2x384xf32> to vector<2x128xf32>
    %31 = vector.extract_strided_slice %29 {offsets = [0, 128], sizes = [2, 128], strides = [1, 1]} : vector<2x384xf32> to vector<2x128xf32>
    %32 = vector.extract_strided_slice %29 {offsets = [0, 256], sizes = [2, 128], strides = [1, 1]} : vector<2x384xf32> to vector<2x128xf32>
    %33 = vector.extract_strided_slice %23 {offsets = [0, 384], sizes = [2, 128], strides = [1, 1]} : vector<2x512xf32> to vector<2x128xf32>
    %34 = math.tanh %33 : vector<2x128xf32>
    %35 = arith.mulf %31, %10 : vector<2x128xf32>
    %36 = arith.mulf %30, %34 : vector<2x128xf32>
    %37 = arith.addf %35, %36 : vector<2x128xf32>
    %38 = math.tanh %37 : vector<2x128xf32>
    %39 = arith.mulf %32, %38 : vector<2x128xf32>
    %40 = arith.addi %7, %14 : i32
    %41 = vector.broadcast %40 : i32 to vector<2x1xi32>
    %42 = arith.cmpi slt, %41, %8 : vector<2x1xi32>
    %43 = vector.shape_cast %42 : vector<2x1xi1> to vector<2x1xi1>
    %44 = vector.broadcast %43 : vector<2x1xi1> to vector<2x128xi1>
    %45 = arith.select %44, %39, %9 : vector<2x128xi1>, vector<2x128xf32>
    %46 = vector.shape_cast %42 : vector<2x1xi1> to vector<2x1xi1>
    %47 = vector.broadcast %46 : vector<2x1xi1> to vector<2x128xi1>
    %48 = arith.select %47, %37, %10 : vector<2x128xi1>, vector<2x128xf32>
    %c1_i32 = arith.constant 1 : i32
    %c2_i32_15 = arith.constant 2 : i32
    %49 = arith.muli %c2_i32_15, %c1_i32 : i32
    %c7_i32_16 = arith.constant 7 : i32
    %50 = arith.subi %c7_i32_16, %49 : i32
    %51 = arith.muli %arg0, %50 : i32
    %52 = arith.addi %c1_i32, %51 : i32
    %53 = arith.index_cast %52 : i32 to index
    %c0_17 = arith.constant 0 : index
    %c0_18 = arith.constant 0 : index
    %54 = vector.load %arg2[%53, %c0_17, %c0_18] : memref<8x2x512xbf16, #tpu.memory_space<vmem>>, vector<1x2x512xbf16>
    %55 = vector.shape_cast %54 : vector<1x2x512xbf16> to vector<2x512xbf16>
    %56 = arith.truncf %45 : vector<2x128xf32> to vector<2x128xbf16>
    %c0_19 = arith.constant 0 : index
    %c0_20 = arith.constant 0 : index
    %c0_21 = arith.constant 0 : index
    %57 = vector.load %arg6[%c0_19, %c0_20, %c0_21] : memref<1x128x512xbf16, #tpu.memory_space<vmem>>, vector<1x128x512xbf16>
    %58 = vector.shape_cast %57 : vector<1x128x512xbf16> to vector<128x512xbf16>
    %cst_22 = arith.constant dense<0.000000e+00> : vector<2x512xf32>
    %59 = tpu.matmul %56, %58, %cst_22 {dimension_numbers = #tpu.dot_dimension_numbers<[1], [0], [0], [1], [0, 0, 1, 1], [], []>} : vector<2x128xbf16>, vector<128x512xbf16>, vector<2x512xf32> -> vector<2x512xf32>
    %60 = arith.extf %55 : vector<2x512xbf16> to vector<2x512xf32>
    %61 = arith.addf %60, %59 : vector<2x512xf32>
    %62 = vector.extract_strided_slice %61 {offsets = [0, 0], sizes = [2, 384], strides = [1, 1]} : vector<2x512xf32> to vector<2x384xf32>
    %63 = arith.negf %62 : vector<2x384xf32>
    %64 = math.exp %63 : vector<2x384xf32>
    %cst_23 = arith.constant 1.000000e+00 : f32
    %65 = vector.broadcast %cst_23 : f32 to vector<2x384xf32>
    %66 = arith.addf %65, %64 : vector<2x384xf32>
    %67 = arith.divf %65, %66 : vector<2x384xf32>
    %68 = vector.extract_strided_slice %67 {offsets = [0, 0], sizes = [2, 128], strides = [1, 1]} : vector<2x384xf32> to vector<2x128xf32>
    %69 = vector.extract_strided_slice %67 {offsets = [0, 128], sizes = [2, 128], strides = [1, 1]} : vector<2x384xf32> to vector<2x128xf32>
    %70 = vector.extract_strided_slice %67 {offsets = [0, 256], sizes = [2, 128], strides = [1, 1]} : vector<2x384xf32> to vector<2x128xf32>
    %71 = vector.extract_strided_slice %61 {offsets = [0, 384], sizes = [2, 128], strides = [1, 1]} : vector<2x512xf32> to vector<2x128xf32>
    %72 = math.tanh %71 : vector<2x128xf32>
    %73 = arith.mulf %69, %48 : vector<2x128xf32>
    %74 = arith.mulf %68, %72 : vector<2x128xf32>
    %75 = arith.addf %73, %74 : vector<2x128xf32>
    %76 = math.tanh %75 : vector<2x128xf32>
    %77 = arith.mulf %70, %76 : vector<2x128xf32>
    %78 = arith.addi %7, %52 : i32
    %79 = vector.broadcast %78 : i32 to vector<2x1xi32>
    %80 = arith.cmpi slt, %79, %8 : vector<2x1xi32>
    %81 = vector.shape_cast %80 : vector<2x1xi1> to vector<2x1xi1>
    %82 = vector.broadcast %81 : vector<2x1xi1> to vector<2x128xi1>
    %83 = arith.select %82, %77, %45 : vector<2x128xi1>, vector<2x128xf32>
    %84 = vector.shape_cast %80 : vector<2x1xi1> to vector<2x1xi1>
    %85 = vector.broadcast %84 : vector<2x1xi1> to vector<2x128xi1>
    %86 = arith.select %85, %75, %48 : vector<2x128xi1>, vector<2x128xf32>
    %c2_i32_24 = arith.constant 2 : i32
    %c2_i32_25 = arith.constant 2 : i32
    %87 = arith.muli %c2_i32_25, %c2_i32_24 : i32
    %c7_i32_26 = arith.constant 7 : i32
    %88 = arith.subi %c7_i32_26, %87 : i32
    %89 = arith.muli %arg0, %88 : i32
    %90 = arith.addi %c2_i32_24, %89 : i32
    %91 = arith.index_cast %90 : i32 to index
    %c0_27 = arith.constant 0 : index
    %c0_28 = arith.constant 0 : index
    %92 = vector.load %arg2[%91, %c0_27, %c0_28] : memref<8x2x512xbf16, #tpu.memory_space<vmem>>, vector<1x2x512xbf16>
    %93 = vector.shape_cast %92 : vector<1x2x512xbf16> to vector<2x512xbf16>
    %94 = arith.truncf %83 : vector<2x128xf32> to vector<2x128xbf16>
    %c0_29 = arith.constant 0 : index
    %c0_30 = arith.constant 0 : index
    %c0_31 = arith.constant 0 : index
    %95 = vector.load %arg6[%c0_29, %c0_30, %c0_31] : memref<1x128x512xbf16, #tpu.memory_space<vmem>>, vector<1x128x512xbf16>
    %96 = vector.shape_cast %95 : vector<1x128x512xbf16> to vector<128x512xbf16>
    %cst_32 = arith.constant dense<0.000000e+00> : vector<2x512xf32>
    %97 = tpu.matmul %94, %96, %cst_32 {dimension_numbers = #tpu.dot_dimension_numbers<[1], [0], [0], [1], [0, 0, 1, 1], [], []>} : vector<2x128xbf16>, vector<128x512xbf16>, vector<2x512xf32> -> vector<2x512xf32>
    %98 = arith.extf %93 : vector<2x512xbf16> to vector<2x512xf32>
    %99 = arith.addf %98, %97 : vector<2x512xf32>
    %100 = vector.extract_strided_slice %99 {offsets = [0, 0], sizes = [2, 384], strides = [1, 1]} : vector<2x512xf32> to vector<2x384xf32>
    %101 = arith.negf %100 : vector<2x384xf32>
    %102 = math.exp %101 : vector<2x384xf32>
    %cst_33 = arith.constant 1.000000e+00 : f32
    %103 = vector.broadcast %cst_33 : f32 to vector<2x384xf32>
    %104 = arith.addf %103, %102 : vector<2x384xf32>
    %105 = arith.divf %103, %104 : vector<2x384xf32>
    %106 = vector.extract_strided_slice %105 {offsets = [0, 0], sizes = [2, 128], strides = [1, 1]} : vector<2x384xf32> to vector<2x128xf32>
    %107 = vector.extract_strided_slice %105 {offsets = [0, 128], sizes = [2, 128], strides = [1, 1]} : vector<2x384xf32> to vector<2x128xf32>
    %108 = vector.extract_strided_slice %105 {offsets = [0, 256], sizes = [2, 128], strides = [1, 1]} : vector<2x384xf32> to vector<2x128xf32>
    %109 = vector.extract_strided_slice %99 {offsets = [0, 384], sizes = [2, 128], strides = [1, 1]} : vector<2x512xf32> to vector<2x128xf32>
    %110 = math.tanh %109 : vector<2x128xf32>
    %111 = arith.mulf %107, %86 : vector<2x128xf32>
    %112 = arith.mulf %106, %110 : vector<2x128xf32>
    %113 = arith.addf %111, %112 : vector<2x128xf32>
    %114 = math.tanh %113 : vector<2x128xf32>
    %115 = arith.mulf %108, %114 : vector<2x128xf32>
    %116 = arith.addi %7, %90 : i32
    %117 = vector.broadcast %116 : i32 to vector<2x1xi32>
    %118 = arith.cmpi slt, %117, %8 : vector<2x1xi32>
    %119 = vector.shape_cast %118 : vector<2x1xi1> to vector<2x1xi1>
    %120 = vector.broadcast %119 : vector<2x1xi1> to vector<2x128xi1>
    %121 = arith.select %120, %115, %83 : vector<2x128xi1>, vector<2x128xf32>
    %122 = vector.shape_cast %118 : vector<2x1xi1> to vector<2x1xi1>
    %123 = vector.broadcast %122 : vector<2x1xi1> to vector<2x128xi1>
    %124 = arith.select %123, %113, %86 : vector<2x128xi1>, vector<2x128xf32>
    %c3_i32 = arith.constant 3 : i32
    %c2_i32_34 = arith.constant 2 : i32
    %125 = arith.muli %c2_i32_34, %c3_i32 : i32
    %c7_i32_35 = arith.constant 7 : i32
    %126 = arith.subi %c7_i32_35, %125 : i32
    %127 = arith.muli %arg0, %126 : i32
    %128 = arith.addi %c3_i32, %127 : i32
    %129 = arith.index_cast %128 : i32 to index
    %c0_36 = arith.constant 0 : index
    %c0_37 = arith.constant 0 : index
    %130 = vector.load %arg2[%129, %c0_36, %c0_37] : memref<8x2x512xbf16, #tpu.memory_space<vmem>>, vector<1x2x512xbf16>
    %131 = vector.shape_cast %130 : vector<1x2x512xbf16> to vector<2x512xbf16>
    %132 = arith.truncf %121 : vector<2x128xf32> to vector<2x128xbf16>
    %c0_38 = arith.constant 0 : index
    %c0_39 = arith.constant 0 : index
    %c0_40 = arith.constant 0 : index
    %133 = vector.load %arg6[%c0_38, %c0_39, %c0_40] : memref<1x128x512xbf16, #tpu.memory_space<vmem>>, vector<1x128x512xbf16>
    %134 = vector.shape_cast %133 : vector<1x128x512xbf16> to vector<128x512xbf16>
    %cst_41 = arith.constant dense<0.000000e+00> : vector<2x512xf32>
    %135 = tpu.matmul %132, %134, %cst_41 {dimension_numbers = #tpu.dot_dimension_numbers<[1], [0], [0], [1], [0, 0, 1, 1], [], []>} : vector<2x128xbf16>, vector<128x512xbf16>, vector<2x512xf32> -> vector<2x512xf32>
    %136 = arith.extf %131 : vector<2x512xbf16> to vector<2x512xf32>
    %137 = arith.addf %136, %135 : vector<2x512xf32>
    %138 = vector.extract_strided_slice %137 {offsets = [0, 0], sizes = [2, 384], strides = [1, 1]} : vector<2x512xf32> to vector<2x384xf32>
    %139 = arith.negf %138 : vector<2x384xf32>
    %140 = math.exp %139 : vector<2x384xf32>
    %cst_42 = arith.constant 1.000000e+00 : f32
    %141 = vector.broadcast %cst_42 : f32 to vector<2x384xf32>
    %142 = arith.addf %141, %140 : vector<2x384xf32>
    %143 = arith.divf %141, %142 : vector<2x384xf32>
    %144 = vector.extract_strided_slice %143 {offsets = [0, 0], sizes = [2, 128], strides = [1, 1]} : vector<2x384xf32> to vector<2x128xf32>
    %145 = vector.extract_strided_slice %143 {offsets = [0, 128], sizes = [2, 128], strides = [1, 1]} : vector<2x384xf32> to vector<2x128xf32>
    %146 = vector.extract_strided_slice %143 {offsets = [0, 256], sizes = [2, 128], strides = [1, 1]} : vector<2x384xf32> to vector<2x128xf32>
    %147 = vector.extract_strided_slice %137 {offsets = [0, 384], sizes = [2, 128], strides = [1, 1]} : vector<2x512xf32> to vector<2x128xf32>
    %148 = math.tanh %147 : vector<2x128xf32>
    %149 = arith.mulf %145, %124 : vector<2x128xf32>
    %150 = arith.mulf %144, %148 : vector<2x128xf32>
    %151 = arith.addf %149, %150 : vector<2x128xf32>
    %152 = math.tanh %151 : vector<2x128xf32>
    %153 = arith.mulf %146, %152 : vector<2x128xf32>
    %154 = arith.addi %7, %128 : i32
    %155 = vector.broadcast %154 : i32 to vector<2x1xi32>
    %156 = arith.cmpi slt, %155, %8 : vector<2x1xi32>
    %157 = vector.shape_cast %156 : vector<2x1xi1> to vector<2x1xi1>
    %158 = vector.broadcast %157 : vector<2x1xi1> to vector<2x128xi1>
    %159 = arith.select %158, %153, %121 : vector<2x128xi1>, vector<2x128xf32>
    %160 = vector.shape_cast %156 : vector<2x1xi1> to vector<2x1xi1>
    %161 = vector.broadcast %160 : vector<2x1xi1> to vector<2x128xi1>
    %162 = arith.select %161, %151, %124 : vector<2x128xi1>, vector<2x128xf32>
    %c4_i32 = arith.constant 4 : i32
    %c2_i32_43 = arith.constant 2 : i32
    %163 = arith.muli %c2_i32_43, %c4_i32 : i32
    %c7_i32_44 = arith.constant 7 : i32
    %164 = arith.subi %c7_i32_44, %163 : i32
    %165 = arith.muli %arg0, %164 : i32
    %166 = arith.addi %c4_i32, %165 : i32
    %167 = arith.index_cast %166 : i32 to index
    %c0_45 = arith.constant 0 : index
    %c0_46 = arith.constant 0 : index
    %168 = vector.load %arg2[%167, %c0_45, %c0_46] : memref<8x2x512xbf16, #tpu.memory_space<vmem>>, vector<1x2x512xbf16>
    %169 = vector.shape_cast %168 : vector<1x2x512xbf16> to vector<2x512xbf16>
    %170 = arith.truncf %159 : vector<2x128xf32> to vector<2x128xbf16>
    %c0_47 = arith.constant 0 : index
    %c0_48 = arith.constant 0 : index
    %c0_49 = arith.constant 0 : index
    %171 = vector.load %arg6[%c0_47, %c0_48, %c0_49] : memref<1x128x512xbf16, #tpu.memory_space<vmem>>, vector<1x128x512xbf16>
    %172 = vector.shape_cast %171 : vector<1x128x512xbf16> to vector<128x512xbf16>
    %cst_50 = arith.constant dense<0.000000e+00> : vector<2x512xf32>
    %173 = tpu.matmul %170, %172, %cst_50 {dimension_numbers = #tpu.dot_dimension_numbers<[1], [0], [0], [1], [0, 0, 1, 1], [], []>} : vector<2x128xbf16>, vector<128x512xbf16>, vector<2x512xf32> -> vector<2x512xf32>
    %174 = arith.extf %169 : vector<2x512xbf16> to vector<2x512xf32>
    %175 = arith.addf %174, %173 : vector<2x512xf32>
    %176 = vector.extract_strided_slice %175 {offsets = [0, 0], sizes = [2, 384], strides = [1, 1]} : vector<2x512xf32> to vector<2x384xf32>
    %177 = arith.negf %176 : vector<2x384xf32>
    %178 = math.exp %177 : vector<2x384xf32>
    %cst_51 = arith.constant 1.000000e+00 : f32
    %179 = vector.broadcast %cst_51 : f32 to vector<2x384xf32>
    %180 = arith.addf %179, %178 : vector<2x384xf32>
    %181 = arith.divf %179, %180 : vector<2x384xf32>
    %182 = vector.extract_strided_slice %181 {offsets = [0, 0], sizes = [2, 128], strides = [1, 1]} : vector<2x384xf32> to vector<2x128xf32>
    %183 = vector.extract_strided_slice %181 {offsets = [0, 128], sizes = [2, 128], strides = [1, 1]} : vector<2x384xf32> to vector<2x128xf32>
    %184 = vector.extract_strided_slice %181 {offsets = [0, 256], sizes = [2, 128], strides = [1, 1]} : vector<2x384xf32> to vector<2x128xf32>
    %185 = vector.extract_strided_slice %175 {offsets = [0, 384], sizes = [2, 128], strides = [1, 1]} : vector<2x512xf32> to vector<2x128xf32>
    %186 = math.tanh %185 : vector<2x128xf32>
    %187 = arith.mulf %183, %162 : vector<2x128xf32>
    %188 = arith.mulf %182, %186 : vector<2x128xf32>
    %189 = arith.addf %187, %188 : vector<2x128xf32>
    %190 = math.tanh %189 : vector<2x128xf32>
    %191 = arith.mulf %184, %190 : vector<2x128xf32>
    %192 = arith.addi %7, %166 : i32
    %193 = vector.broadcast %192 : i32 to vector<2x1xi32>
    %194 = arith.cmpi slt, %193, %8 : vector<2x1xi32>
    %195 = vector.shape_cast %194 : vector<2x1xi1> to vector<2x1xi1>
    %196 = vector.broadcast %195 : vector<2x1xi1> to vector<2x128xi1>
    %197 = arith.select %196, %191, %159 : vector<2x128xi1>, vector<2x128xf32>
    %198 = vector.shape_cast %194 : vector<2x1xi1> to vector<2x1xi1>
    %199 = vector.broadcast %198 : vector<2x1xi1> to vector<2x128xi1>
    %200 = arith.select %199, %189, %162 : vector<2x128xi1>, vector<2x128xf32>
    %c5_i32 = arith.constant 5 : i32
    %c2_i32_52 = arith.constant 2 : i32
    %201 = arith.muli %c2_i32_52, %c5_i32 : i32
    %c7_i32_53 = arith.constant 7 : i32
    %202 = arith.subi %c7_i32_53, %201 : i32
    %203 = arith.muli %arg0, %202 : i32
    %204 = arith.addi %c5_i32, %203 : i32
    %205 = arith.index_cast %204 : i32 to index
    %c0_54 = arith.constant 0 : index
    %c0_55 = arith.constant 0 : index
    %206 = vector.load %arg2[%205, %c0_54, %c0_55] : memref<8x2x512xbf16, #tpu.memory_space<vmem>>, vector<1x2x512xbf16>
    %207 = vector.shape_cast %206 : vector<1x2x512xbf16> to vector<2x512xbf16>
    %208 = arith.truncf %197 : vector<2x128xf32> to vector<2x128xbf16>
    %c0_56 = arith.constant 0 : index
    %c0_57 = arith.constant 0 : index
    %c0_58 = arith.constant 0 : index
    %209 = vector.load %arg6[%c0_56, %c0_57, %c0_58] : memref<1x128x512xbf16, #tpu.memory_space<vmem>>, vector<1x128x512xbf16>
    %210 = vector.shape_cast %209 : vector<1x128x512xbf16> to vector<128x512xbf16>
    %cst_59 = arith.constant dense<0.000000e+00> : vector<2x512xf32>
    %211 = tpu.matmul %208, %210, %cst_59 {dimension_numbers = #tpu.dot_dimension_numbers<[1], [0], [0], [1], [0, 0, 1, 1], [], []>} : vector<2x128xbf16>, vector<128x512xbf16>, vector<2x512xf32> -> vector<2x512xf32>
    %212 = arith.extf %207 : vector<2x512xbf16> to vector<2x512xf32>
    %213 = arith.addf %212, %211 : vector<2x512xf32>
    %214 = vector.extract_strided_slice %213 {offsets = [0, 0], sizes = [2, 384], strides = [1, 1]} : vector<2x512xf32> to vector<2x384xf32>
    %215 = arith.negf %214 : vector<2x384xf32>
    %216 = math.exp %215 : vector<2x384xf32>
    %cst_60 = arith.constant 1.000000e+00 : f32
    %217 = vector.broadcast %cst_60 : f32 to vector<2x384xf32>
    %218 = arith.addf %217, %216 : vector<2x384xf32>
    %219 = arith.divf %217, %218 : vector<2x384xf32>
    %220 = vector.extract_strided_slice %219 {offsets = [0, 0], sizes = [2, 128], strides = [1, 1]} : vector<2x384xf32> to vector<2x128xf32>
    %221 = vector.extract_strided_slice %219 {offsets = [0, 128], sizes = [2, 128], strides = [1, 1]} : vector<2x384xf32> to vector<2x128xf32>
    %222 = vector.extract_strided_slice %219 {offsets = [0, 256], sizes = [2, 128], strides = [1, 1]} : vector<2x384xf32> to vector<2x128xf32>
    %223 = vector.extract_strided_slice %213 {offsets = [0, 384], sizes = [2, 128], strides = [1, 1]} : vector<2x512xf32> to vector<2x128xf32>
    %224 = math.tanh %223 : vector<2x128xf32>
    %225 = arith.mulf %221, %200 : vector<2x128xf32>
    %226 = arith.mulf %220, %224 : vector<2x128xf32>
    %227 = arith.addf %225, %226 : vector<2x128xf32>
    %228 = math.tanh %227 : vector<2x128xf32>
    %229 = arith.mulf %222, %228 : vector<2x128xf32>
    %230 = arith.addi %7, %204 : i32
    %231 = vector.broadcast %230 : i32 to vector<2x1xi32>
    %232 = arith.cmpi slt, %231, %8 : vector<2x1xi32>
    %233 = vector.shape_cast %232 : vector<2x1xi1> to vector<2x1xi1>
    %234 = vector.broadcast %233 : vector<2x1xi1> to vector<2x128xi1>
    %235 = arith.select %234, %229, %197 : vector<2x128xi1>, vector<2x128xf32>
    %236 = vector.shape_cast %232 : vector<2x1xi1> to vector<2x1xi1>
    %237 = vector.broadcast %236 : vector<2x1xi1> to vector<2x128xi1>
    %238 = arith.select %237, %227, %200 : vector<2x128xi1>, vector<2x128xf32>
    %c6_i32 = arith.constant 6 : i32
    %c2_i32_61 = arith.constant 2 : i32
    %239 = arith.muli %c2_i32_61, %c6_i32 : i32
    %c7_i32_62 = arith.constant 7 : i32
    %240 = arith.subi %c7_i32_62, %239 : i32
    %241 = arith.muli %arg0, %240 : i32
    %242 = arith.addi %c6_i32, %241 : i32
    %243 = arith.index_cast %242 : i32 to index
    %c0_63 = arith.constant 0 : index
    %c0_64 = arith.constant 0 : index
    %244 = vector.load %arg2[%243, %c0_63, %c0_64] : memref<8x2x512xbf16, #tpu.memory_space<vmem>>, vector<1x2x512xbf16>
    %245 = vector.shape_cast %244 : vector<1x2x512xbf16> to vector<2x512xbf16>
    %246 = arith.truncf %235 : vector<2x128xf32> to vector<2x128xbf16>
    %c0_65 = arith.constant 0 : index
    %c0_66 = arith.constant 0 : index
    %c0_67 = arith.constant 0 : index
    %247 = vector.load %arg6[%c0_65, %c0_66, %c0_67] : memref<1x128x512xbf16, #tpu.memory_space<vmem>>, vector<1x128x512xbf16>
    %248 = vector.shape_cast %247 : vector<1x128x512xbf16> to vector<128x512xbf16>
    %cst_68 = arith.constant dense<0.000000e+00> : vector<2x512xf32>
    %249 = tpu.matmul %246, %248, %cst_68 {dimension_numbers = #tpu.dot_dimension_numbers<[1], [0], [0], [1], [0, 0, 1, 1], [], []>} : vector<2x128xbf16>, vector<128x512xbf16>, vector<2x512xf32> -> vector<2x512xf32>
    %250 = arith.extf %245 : vector<2x512xbf16> to vector<2x512xf32>
    %251 = arith.addf %250, %249 : vector<2x512xf32>
    %252 = vector.extract_strided_slice %251 {offsets = [0, 0], sizes = [2, 384], strides = [1, 1]} : vector<2x512xf32> to vector<2x384xf32>
    %253 = arith.negf %252 : vector<2x384xf32>
    %254 = math.exp %253 : vector<2x384xf32>
    %cst_69 = arith.constant 1.000000e+00 : f32
    %255 = vector.broadcast %cst_69 : f32 to vector<2x384xf32>
    %256 = arith.addf %255, %254 : vector<2x384xf32>
    %257 = arith.divf %255, %256 : vector<2x384xf32>
    %258 = vector.extract_strided_slice %257 {offsets = [0, 0], sizes = [2, 128], strides = [1, 1]} : vector<2x384xf32> to vector<2x128xf32>
    %259 = vector.extract_strided_slice %257 {offsets = [0, 128], sizes = [2, 128], strides = [1, 1]} : vector<2x384xf32> to vector<2x128xf32>
    %260 = vector.extract_strided_slice %257 {offsets = [0, 256], sizes = [2, 128], strides = [1, 1]} : vector<2x384xf32> to vector<2x128xf32>
    %261 = vector.extract_strided_slice %251 {offsets = [0, 384], sizes = [2, 128], strides = [1, 1]} : vector<2x512xf32> to vector<2x128xf32>
    %262 = math.tanh %261 : vector<2x128xf32>
    %263 = arith.mulf %259, %238 : vector<2x128xf32>
    %264 = arith.mulf %258, %262 : vector<2x128xf32>
    %265 = arith.addf %263, %264 : vector<2x128xf32>
    %266 = math.tanh %265 : vector<2x128xf32>
    %267 = arith.mulf %260, %266 : vector<2x128xf32>
    %268 = arith.addi %7, %242 : i32
    %269 = vector.broadcast %268 : i32 to vector<2x1xi32>
    %270 = arith.cmpi slt, %269, %8 : vector<2x1xi32>
    %271 = vector.shape_cast %270 : vector<2x1xi1> to vector<2x1xi1>
    %272 = vector.broadcast %271 : vector<2x1xi1> to vector<2x128xi1>
    %273 = arith.select %272, %267, %235 : vector<2x128xi1>, vector<2x128xf32>
    %274 = vector.shape_cast %270 : vector<2x1xi1> to vector<2x1xi1>
    %275 = vector.broadcast %274 : vector<2x1xi1> to vector<2x128xi1>
    %276 = arith.select %275, %265, %238 : vector<2x128xi1>, vector<2x128xf32>
    %c7_i32_70 = arith.constant 7 : i32
    %c2_i32_71 = arith.constant 2 : i32
    %277 = arith.muli %c2_i32_71, %c7_i32_70 : i32
    %c7_i32_72 = arith.constant 7 : i32
    %278 = arith.subi %c7_i32_72, %277 : i32
    %279 = arith.muli %arg0, %278 : i32
    %280 = arith.addi %c7_i32_70, %279 : i32
    %281 = arith.index_cast %280 : i32 to index
    %c0_73 = arith.constant 0 : index
    %c0_74 = arith.constant 0 : index
    %282 = vector.load %arg2[%281, %c0_73, %c0_74] : memref<8x2x512xbf16, #tpu.memory_space<vmem>>, vector<1x2x512xbf16>
    %283 = vector.shape_cast %282 : vector<1x2x512xbf16> to vector<2x512xbf16>
    %284 = arith.truncf %273 : vector<2x128xf32> to vector<2x128xbf16>
    %c0_75 = arith.constant 0 : index
    %c0_76 = arith.constant 0 : index
    %c0_77 = arith.constant 0 : index
    %285 = vector.load %arg6[%c0_75, %c0_76, %c0_77] : memref<1x128x512xbf16, #tpu.memory_space<vmem>>, vector<1x128x512xbf16>
    %286 = vector.shape_cast %285 : vector<1x128x512xbf16> to vector<128x512xbf16>
    %cst_78 = arith.constant dense<0.000000e+00> : vector<2x512xf32>
    %287 = tpu.matmul %284, %286, %cst_78 {dimension_numbers = #tpu.dot_dimension_numbers<[1], [0], [0], [1], [0, 0, 1, 1], [], []>} : vector<2x128xbf16>, vector<128x512xbf16>, vector<2x512xf32> -> vector<2x512xf32>
    %288 = arith.extf %283 : vector<2x512xbf16> to vector<2x512xf32>
    %289 = arith.addf %288, %287 : vector<2x512xf32>
    %290 = vector.extract_strided_slice %289 {offsets = [0, 0], sizes = [2, 384], strides = [1, 1]} : vector<2x512xf32> to vector<2x384xf32>
    %291 = arith.negf %290 : vector<2x384xf32>
    %292 = math.exp %291 : vector<2x384xf32>
    %cst_79 = arith.constant 1.000000e+00 : f32
    %293 = vector.broadcast %cst_79 : f32 to vector<2x384xf32>
    %294 = arith.addf %293, %292 : vector<2x384xf32>
    %295 = arith.divf %293, %294 : vector<2x384xf32>
    %296 = vector.extract_strided_slice %295 {offsets = [0, 0], sizes = [2, 128], strides = [1, 1]} : vector<2x384xf32> to vector<2x128xf32>
    %297 = vector.extract_strided_slice %295 {offsets = [0, 128], sizes = [2, 128], strides = [1, 1]} : vector<2x384xf32> to vector<2x128xf32>
    %298 = vector.extract_strided_slice %295 {offsets = [0, 256], sizes = [2, 128], strides = [1, 1]} : vector<2x384xf32> to vector<2x128xf32>
    %299 = vector.extract_strided_slice %289 {offsets = [0, 384], sizes = [2, 128], strides = [1, 1]} : vector<2x512xf32> to vector<2x128xf32>
    %300 = math.tanh %299 : vector<2x128xf32>
    %301 = arith.mulf %297, %276 : vector<2x128xf32>
    %302 = arith.mulf %296, %300 : vector<2x128xf32>
    %303 = arith.addf %301, %302 : vector<2x128xf32>
    %304 = math.tanh %303 : vector<2x128xf32>
    %305 = arith.mulf %298, %304 : vector<2x128xf32>
    %306 = arith.addi %7, %280 : i32
    %307 = vector.broadcast %306 : i32 to vector<2x1xi32>
    %308 = arith.cmpi slt, %307, %8 : vector<2x1xi32>
    %309 = vector.shape_cast %308 : vector<2x1xi1> to vector<2x1xi1>
    %310 = vector.broadcast %309 : vector<2x1xi1> to vector<2x128xi1>
    %311 = arith.select %310, %305, %273 : vector<2x128xi1>, vector<2x128xf32>
    %312 = vector.shape_cast %308 : vector<2x1xi1> to vector<2x1xi1>
    %313 = vector.broadcast %312 : vector<2x1xi1> to vector<2x128xi1>
    %314 = arith.select %313, %303, %276 : vector<2x128xi1>, vector<2x128xf32>
    %c8_i32_80 = arith.constant 8 : i32
    %c0_81 = arith.constant 0 : index
    %c0_82 = arith.constant 0 : index
    %315 = vector.load %arg9[%c0_81, %c0_82] : memref<2x128xf32, #tpu.memory_space<vmem>>, vector<2x128xf32>
    tpu.vector_store %arg9[%c0_81, %c0_82], %311 {strides = array<i32>} : memref<2x128xf32, #tpu.memory_space<vmem>>, vector<2x128xf32>,
    %c0_83 = arith.constant 0 : index
    %c0_84 = arith.constant 0 : index
    %316 = vector.load %arg10[%c0_83, %c0_84] : memref<2x128xf32, #tpu.memory_space<vmem>>, vector<2x128xf32>
    tpu.vector_store %arg10[%c0_83, %c0_84], %314 {strides = array<i32>} : memref<2x128xf32, #tpu.memory_space<vmem>>, vector<2x128xf32>,
    %c0_i32_85 = arith.constant 0 : i32
    %317 = arith.cmpi eq, %arg1, %c0_i32_85 : i32
    %318 = arith.extui %317 : i1 to i32
    %c0_i32_86 = arith.constant 0 : i32
    %319 = arith.cmpi ne, %318, %c0_i32_86 : i32
    scf.if %319 {
      %c0_87 = arith.constant 0 : index
      %c0_88 = arith.constant 0 : index
      %c0_89 = arith.constant 0 : index
      %320 = vector.load %arg7[%c0_87, %c0_88, %c0_89] : memref<1x2x128xf32, #tpu.memory_space<vmem>>, vector<1x2x128xf32>
      %321 = vector.shape_cast %320 : vector<1x2x128xf32> to vector<2x128xf32>
      %322 = vector.shape_cast %311 : vector<2x128xf32> to vector<1x2x128xf32>
      tpu.vector_store %arg7[%c0_87, %c0_88, %c0_89], %322 {strides = array<i32>} : memref<1x2x128xf32, #tpu.memory_space<vmem>>, vector<1x2x128xf32>,
      %c0_90 = arith.constant 0 : index
      %c0_91 = arith.constant 0 : index
      %c0_92 = arith.constant 0 : index
      %323 = vector.load %arg8[%c0_90, %c0_91, %c0_92] : memref<1x2x128xf32, #tpu.memory_space<vmem>>, vector<1x2x128xf32>
      %324 = vector.shape_cast %323 : vector<1x2x128xf32> to vector<2x128xf32>
      %325 = vector.shape_cast %314 : vector<2x128xf32> to vector<1x2x128xf32>
      tpu.vector_store %arg8[%c0_90, %c0_91, %c0_92], %325 {strides = array<i32>} : memref<1x2x128xf32, #tpu.memory_space<vmem>>, vector<1x2x128xf32>,
    } else {
    }
    return
  }
  func.func @transform_0(%arg0: i32, %arg1: i32) -> (i32, i32, i32) {
    %c2_i32 = arith.constant 2 : i32
    %0 = arith.muli %c2_i32, %arg1 : i32
    %c0_i32 = arith.constant 0 : i32
    %1 = arith.subi %c0_i32, %0 : i32
    %2 = arith.muli %arg0, %1 : i32
    %3 = arith.addi %arg1, %2 : i32
    %c0_i32_0 = arith.constant 0 : i32
    %c0_i32_1 = arith.constant 0 : i32
    return %3, %c0_i32_0, %arg0 : i32, i32, i32
  }
  func.func @transform_1(%arg0: i32, %arg1: i32) -> (i32, i32) {
    %c0_i32 = arith.constant 0 : i32
    %c0_i32_0 = arith.constant 0 : i32
    %c0_i32_1 = arith.constant 0 : i32
    return %c0_i32, %c0_i32_0 : i32, i32
  }
  func.func @transform_2(%arg0: i32, %arg1: i32) -> (i32, i32) {
    %c0_i32 = arith.constant 0 : i32
    %c0_i32_0 = arith.constant 0 : i32
    %c0_i32_1 = arith.constant 0 : i32
    return %c0_i32, %c0_i32_0 : i32, i32
  }
  func.func @transform_3(%arg0: i32, %arg1: i32) -> (i32, i32) {
    %c0_i32 = arith.constant 0 : i32
    %c0_i32_0 = arith.constant 0 : i32
    %c0_i32_1 = arith.constant 0 : i32
    return %c0_i32, %c0_i32_0 : i32, i32
  }
  func.func @transform_4(%arg0: i32, %arg1: i32) -> (i32, i32, i32) {
    %c0_i32 = arith.constant 0 : i32
    %c0_i32_0 = arith.constant 0 : i32
    %c0_i32_1 = arith.constant 0 : i32
    return %arg0, %c0_i32, %c0_i32_0 : i32, i32, i32
  }
  func.func @transform_5(%arg0: i32, %arg1: i32) -> (i32, i32, i32) {
    %c0_i32 = arith.constant 0 : i32
    %c0_i32_0 = arith.constant 0 : i32
    %c0_i32_1 = arith.constant 0 : i32
    return %arg0, %c0_i32, %c0_i32_0 : i32, i32, i32
  }
  func.func @transform_6(%arg0: i32, %arg1: i32) -> (i32, i32, i32) {
    %c0_i32 = arith.constant 0 : i32
    %c0_i32_0 = arith.constant 0 : i32
    %c0_i32_1 = arith.constant 0 : i32
    return %arg0, %c0_i32, %c0_i32_0 : i32, i32, i32
  }
}

module attributes {stable_mosaic.version = 11 : i64} {
  func.func @_linear_kernel(%arg0: i32, %arg1: i32, %arg2: memref<14x256xbf16, #tpu.memory_space<vmem>>, %arg3: memref<256x512xbf16, #tpu.memory_space<vmem>>, %arg4: memref<1x512xf32, #tpu.memory_space<vmem>>, %arg5: memref<14x512xbf16, #tpu.memory_space<vmem>>) attributes {dimension_semantics = [#tpu.dimension_semantics<parallel>, #tpu.dimension_semantics<parallel>], iteration_bounds = array<i64: 1, 2>, scalar_prefetch = 0 : i64, scratch_operands = 0 : i64, tpu.core_type = #tpu.core_type<tc>, window_params = [{transform_indices = @transform_0, window_bounds = array<i64: 14, 256>}, {transform_indices = @transform_1, window_bounds = array<i64: 256, 512>}, {transform_indices = @transform_2, window_bounds = array<i64: 1, 512>}, {transform_indices = @transform_3, window_bounds = array<i64: 14, 512>}]} {
    %c0 = arith.constant 0 : index
    %c0_0 = arith.constant 0 : index
    %0 = vector.load %arg2[%c0, %c0_0] : memref<14x256xbf16, #tpu.memory_space<vmem>>, vector<14x256xbf16>
    %c0_1 = arith.constant 0 : index
    %c0_2 = arith.constant 0 : index
    %1 = vector.load %arg3[%c0_1, %c0_2] : memref<256x512xbf16, #tpu.memory_space<vmem>>, vector<256x512xbf16>
    %cst = arith.constant dense<0.000000e+00> : vector<14x512xf32>
    %2 = tpu.matmul %0, %1, %cst {dimension_numbers = #tpu.dot_dimension_numbers<[1], [0], [0], [1], [0, 0, 1, 1], [], []>} : vector<14x256xbf16>, vector<256x512xbf16>, vector<14x512xf32> -> vector<14x512xf32>
    %c0_3 = arith.constant 0 : index
    %c0_4 = arith.constant 0 : index
    %3 = vector.load %arg4[%c0_3, %c0_4] : memref<1x512xf32, #tpu.memory_space<vmem>>, vector<1x512xf32>
    %4 = vector.broadcast %3 : vector<1x512xf32> to vector<14x512xf32>
    %5 = arith.addf %2, %4 : vector<14x512xf32>
    %6 = arith.truncf %5 : vector<14x512xf32> to vector<14x512xbf16>
    %c0_5 = arith.constant 0 : index
    %c0_6 = arith.constant 0 : index
    %7 = vector.load %arg5[%c0_5, %c0_6] : memref<14x512xbf16, #tpu.memory_space<vmem>>, vector<14x512xbf16>
    tpu.vector_store %arg5[%c0_5, %c0_6], %6 {strides = array<i32>} : memref<14x512xbf16, #tpu.memory_space<vmem>>, vector<14x512xbf16>,
    return
  }
  func.func @transform_0(%arg0: i32, %arg1: i32) -> (i32, i32) {
    %c0_i32 = arith.constant 0 : i32
    %c0_i32_0 = arith.constant 0 : i32
    return %arg0, %c0_i32 : i32, i32
  }
  func.func @transform_1(%arg0: i32, %arg1: i32) -> (i32, i32) {
    %c0_i32 = arith.constant 0 : i32
    %c0_i32_0 = arith.constant 0 : i32
    return %c0_i32, %arg1 : i32, i32
  }
  func.func @transform_2(%arg0: i32, %arg1: i32) -> (i32, i32) {
    %c0_i32 = arith.constant 0 : i32
    %c0_i32_0 = arith.constant 0 : i32
    return %c0_i32, %arg1 : i32, i32
  }
  func.func @transform_3(%arg0: i32, %arg1: i32) -> (i32, i32) {
    %c0_i32 = arith.constant 0 : i32
    return %arg0, %arg1 : i32, i32
  }
}

module attributes {stable_mosaic.version = 11 : i64} {
  func.func @_lstm_chunk_kernel(%arg0: i32, %arg1: memref<7x2x1024xbf16, #tpu.memory_space<vmem>>, %arg2: memref<2x1xi32, #tpu.memory_space<vmem>>, %arg3: memref<2x256xf32, #tpu.memory_space<vmem>>, %arg4: memref<2x256xf32, #tpu.memory_space<vmem>>, %arg5: memref<256x1024xbf16, #tpu.memory_space<vmem>>, %arg6: memref<7x2x256xf32, #tpu.memory_space<vmem>>, %arg7: memref<2x256xf32, #tpu.memory_space<vmem>>, %arg8: memref<2x256xf32, #tpu.memory_space<vmem>>, %arg9: memref<2x256xf32, #tpu.memory_space<vmem>>, %arg10: memref<2x256xf32, #tpu.memory_space<vmem>>) attributes {dimension_semantics = [#tpu.dimension_semantics<arbitrary>], iteration_bounds = array<i64: 1>, scalar_prefetch = 0 : i64, scratch_operands = 2 : i64, tpu.core_type = #tpu.core_type<tc>, window_params = [{transform_indices = @transform_0, window_bounds = array<i64: 7, 2, 1024>}, {pipeline_mode = #tpu.pipeline_mode<synchronous>, transform_indices = @transform_1, window_bounds = array<i64: 2, 1>}, {pipeline_mode = #tpu.pipeline_mode<synchronous>, transform_indices = @transform_2, window_bounds = array<i64: 2, 256>}, {pipeline_mode = #tpu.pipeline_mode<synchronous>, transform_indices = @transform_3, window_bounds = array<i64: 2, 256>}, {pipeline_mode = #tpu.pipeline_mode<synchronous>, transform_indices = @transform_4, window_bounds = array<i64: 256, 1024>}, {transform_indices = @transform_5, window_bounds = array<i64: 7, 2, 256>}, {pipeline_mode = #tpu.pipeline_mode<synchronous>, transform_indices = @transform_6, window_bounds = array<i64: 2, 256>}, {pipeline_mode = #tpu.pipeline_mode<synchronous>, transform_indices = @transform_7, window_bounds = array<i64: 2, 256>}]} {
    %c0_i32 = arith.constant 0 : i32
    %0 = arith.cmpi eq, %arg0, %c0_i32 : i32
    %1 = arith.extui %0 : i1 to i32
    %c0_i32_0 = arith.constant 0 : i32
    %2 = arith.cmpi ne, %1, %c0_i32_0 : i32
    scf.if %2 {
      %c0_66 = arith.constant 0 : index
      %c0_67 = arith.constant 0 : index
      %206 = vector.load %arg3[%c0_66, %c0_67] : memref<2x256xf32, #tpu.memory_space<vmem>>, vector<2x256xf32>
      %c0_68 = arith.constant 0 : index
      %c0_69 = arith.constant 0 : index
      %207 = vector.load %arg9[%c0_68, %c0_69] : memref<2x256xf32, #tpu.memory_space<vmem>>, vector<2x256xf32>
      tpu.vector_store %arg9[%c0_68, %c0_69], %206 {strides = array<i32>} : memref<2x256xf32, #tpu.memory_space<vmem>>, vector<2x256xf32>,
      %c0_70 = arith.constant 0 : index
      %c0_71 = arith.constant 0 : index
      %208 = vector.load %arg4[%c0_70, %c0_71] : memref<2x256xf32, #tpu.memory_space<vmem>>, vector<2x256xf32>
      %c0_72 = arith.constant 0 : index
      %c0_73 = arith.constant 0 : index
      %209 = vector.load %arg10[%c0_72, %c0_73] : memref<2x256xf32, #tpu.memory_space<vmem>>, vector<2x256xf32>
      tpu.vector_store %arg10[%c0_72, %c0_73], %208 {strides = array<i32>} : memref<2x256xf32, #tpu.memory_space<vmem>>, vector<2x256xf32>,
    } else {
    }
    %c0 = arith.constant 0 : index
    %c0_1 = arith.constant 0 : index
    %3 = vector.load %arg9[%c0, %c0_1] : memref<2x256xf32, #tpu.memory_space<vmem>>, vector<2x256xf32>
    %c0_2 = arith.constant 0 : index
    %c0_3 = arith.constant 0 : index
    %4 = vector.load %arg10[%c0_2, %c0_3] : memref<2x256xf32, #tpu.memory_space<vmem>>, vector<2x256xf32>
    %c0_i32_4 = arith.constant 0 : i32
    %5 = arith.index_cast %c0_i32_4 : i32 to index
    %c0_5 = arith.constant 0 : index
    %c0_6 = arith.constant 0 : index
    %6 = vector.load %arg1[%5, %c0_5, %c0_6] : memref<7x2x1024xbf16, #tpu.memory_space<vmem>>, vector<1x2x1024xbf16>
    %7 = vector.shape_cast %6 : vector<1x2x1024xbf16> to vector<2x1024xbf16>
    %8 = arith.truncf %3 : vector<2x256xf32> to vector<2x256xbf16>
    %c0_7 = arith.constant 0 : index
    %c0_8 = arith.constant 0 : index
    %9 = vector.load %arg5[%c0_7, %c0_8] : memref<256x1024xbf16, #tpu.memory_space<vmem>>, vector<256x1024xbf16>
    %cst = arith.constant dense<0.000000e+00> : vector<2x1024xf32>
    %10 = tpu.matmul %8, %9, %cst {dimension_numbers = #tpu.dot_dimension_numbers<[1], [0], [0], [1], [0, 0, 1, 1], [], []>} : vector<2x256xbf16>, vector<256x1024xbf16>, vector<2x1024xf32> -> vector<2x1024xf32>
    %11 = arith.extf %7 : vector<2x1024xbf16> to vector<2x1024xf32>
    %12 = arith.addf %11, %10 : vector<2x1024xf32>
    %13 = vector.extract_strided_slice %12 {offsets = [0, 0], sizes = [2, 768], strides = [1, 1]} : vector<2x1024xf32> to vector<2x768xf32>
    %14 = arith.negf %13 : vector<2x768xf32>
    %15 = math.exp %14 : vector<2x768xf32>
    %cst_9 = arith.constant 1.000000e+00 : f32
    %16 = vector.broadcast %cst_9 : f32 to vector<2x768xf32>
    %17 = arith.addf %16, %15 : vector<2x768xf32>
    %18 = arith.divf %16, %17 : vector<2x768xf32>
    %19 = vector.extract_strided_slice %18 {offsets = [0, 0], sizes = [2, 256], strides = [1, 1]} : vector<2x768xf32> to vector<2x256xf32>
    %20 = vector.extract_strided_slice %18 {offsets = [0, 256], sizes = [2, 256], strides = [1, 1]} : vector<2x768xf32> to vector<2x256xf32>
    %21 = vector.extract_strided_slice %18 {offsets = [0, 512], sizes = [2, 256], strides = [1, 1]} : vector<2x768xf32> to vector<2x256xf32>
    %22 = vector.extract_strided_slice %12 {offsets = [0, 768], sizes = [2, 256], strides = [1, 1]} : vector<2x1024xf32> to vector<2x256xf32>
    %23 = math.tanh %22 : vector<2x256xf32>
    %24 = arith.mulf %20, %4 : vector<2x256xf32>
    %25 = arith.mulf %19, %23 : vector<2x256xf32>
    %26 = arith.addf %24, %25 : vector<2x256xf32>
    %27 = math.tanh %26 : vector<2x256xf32>
    %28 = arith.mulf %21, %27 : vector<2x256xf32>
    %29 = arith.index_cast %c0_i32_4 : i32 to index
    %c0_10 = arith.constant 0 : index
    %c0_11 = arith.constant 0 : index
    %30 = vector.load %arg6[%29, %c0_10, %c0_11] : memref<7x2x256xf32, #tpu.memory_space<vmem>>, vector<1x2x256xf32>
    %31 = vector.shape_cast %30 : vector<1x2x256xf32> to vector<2x256xf32>
    %32 = vector.shape_cast %28 : vector<2x256xf32> to vector<1x2x256xf32>
    tpu.vector_store %arg6[%29, %c0_10, %c0_11], %32 {strides = array<i32>} : memref<7x2x256xf32, #tpu.memory_space<vmem>>, vector<1x2x256xf32>,
    %c1_i32 = arith.constant 1 : i32
    %33 = arith.index_cast %c1_i32 : i32 to index
    %c0_12 = arith.constant 0 : index
    %c0_13 = arith.constant 0 : index
    %34 = vector.load %arg1[%33, %c0_12, %c0_13] : memref<7x2x1024xbf16, #tpu.memory_space<vmem>>, vector<1x2x1024xbf16>
    %35 = vector.shape_cast %34 : vector<1x2x1024xbf16> to vector<2x1024xbf16>
    %36 = arith.truncf %28 : vector<2x256xf32> to vector<2x256xbf16>
    %c0_14 = arith.constant 0 : index
    %c0_15 = arith.constant 0 : index
    %37 = vector.load %arg5[%c0_14, %c0_15] : memref<256x1024xbf16, #tpu.memory_space<vmem>>, vector<256x1024xbf16>
    %cst_16 = arith.constant dense<0.000000e+00> : vector<2x1024xf32>
    %38 = tpu.matmul %36, %37, %cst_16 {dimension_numbers = #tpu.dot_dimension_numbers<[1], [0], [0], [1], [0, 0, 1, 1], [], []>} : vector<2x256xbf16>, vector<256x1024xbf16>, vector<2x1024xf32> -> vector<2x1024xf32>
    %39 = arith.extf %35 : vector<2x1024xbf16> to vector<2x1024xf32>
    %40 = arith.addf %39, %38 : vector<2x1024xf32>
    %41 = vector.extract_strided_slice %40 {offsets = [0, 0], sizes = [2, 768], strides = [1, 1]} : vector<2x1024xf32> to vector<2x768xf32>
    %42 = arith.negf %41 : vector<2x768xf32>
    %43 = math.exp %42 : vector<2x768xf32>
    %cst_17 = arith.constant 1.000000e+00 : f32
    %44 = vector.broadcast %cst_17 : f32 to vector<2x768xf32>
    %45 = arith.addf %44, %43 : vector<2x768xf32>
    %46 = arith.divf %44, %45 : vector<2x768xf32>
    %47 = vector.extract_strided_slice %46 {offsets = [0, 0], sizes = [2, 256], strides = [1, 1]} : vector<2x768xf32> to vector<2x256xf32>
    %48 = vector.extract_strided_slice %46 {offsets = [0, 256], sizes = [2, 256], strides = [1, 1]} : vector<2x768xf32> to vector<2x256xf32>
    %49 = vector.extract_strided_slice %46 {offsets = [0, 512], sizes = [2, 256], strides = [1, 1]} : vector<2x768xf32> to vector<2x256xf32>
    %50 = vector.extract_strided_slice %40 {offsets = [0, 768], sizes = [2, 256], strides = [1, 1]} : vector<2x1024xf32> to vector<2x256xf32>
    %51 = math.tanh %50 : vector<2x256xf32>
    %52 = arith.mulf %48, %26 : vector<2x256xf32>
    %53 = arith.mulf %47, %51 : vector<2x256xf32>
    %54 = arith.addf %52, %53 : vector<2x256xf32>
    %55 = math.tanh %54 : vector<2x256xf32>
    %56 = arith.mulf %49, %55 : vector<2x256xf32>
    %57 = arith.index_cast %c1_i32 : i32 to index
    %c0_18 = arith.constant 0 : index
    %c0_19 = arith.constant 0 : index
    %58 = vector.load %arg6[%57, %c0_18, %c0_19] : memref<7x2x256xf32, #tpu.memory_space<vmem>>, vector<1x2x256xf32>
    %59 = vector.shape_cast %58 : vector<1x2x256xf32> to vector<2x256xf32>
    %60 = vector.shape_cast %56 : vector<2x256xf32> to vector<1x2x256xf32>
    tpu.vector_store %arg6[%57, %c0_18, %c0_19], %60 {strides = array<i32>} : memref<7x2x256xf32, #tpu.memory_space<vmem>>, vector<1x2x256xf32>,
    %c2_i32 = arith.constant 2 : i32
    %61 = arith.index_cast %c2_i32 : i32 to index
    %c0_20 = arith.constant 0 : index
    %c0_21 = arith.constant 0 : index
    %62 = vector.load %arg1[%61, %c0_20, %c0_21] : memref<7x2x1024xbf16, #tpu.memory_space<vmem>>, vector<1x2x1024xbf16>
    %63 = vector.shape_cast %62 : vector<1x2x1024xbf16> to vector<2x1024xbf16>
    %64 = arith.truncf %56 : vector<2x256xf32> to vector<2x256xbf16>
    %c0_22 = arith.constant 0 : index
    %c0_23 = arith.constant 0 : index
    %65 = vector.load %arg5[%c0_22, %c0_23] : memref<256x1024xbf16, #tpu.memory_space<vmem>>, vector<256x1024xbf16>
    %cst_24 = arith.constant dense<0.000000e+00> : vector<2x1024xf32>
    %66 = tpu.matmul %64, %65, %cst_24 {dimension_numbers = #tpu.dot_dimension_numbers<[1], [0], [0], [1], [0, 0, 1, 1], [], []>} : vector<2x256xbf16>, vector<256x1024xbf16>, vector<2x1024xf32> -> vector<2x1024xf32>
    %67 = arith.extf %63 : vector<2x1024xbf16> to vector<2x1024xf32>
    %68 = arith.addf %67, %66 : vector<2x1024xf32>
    %69 = vector.extract_strided_slice %68 {offsets = [0, 0], sizes = [2, 768], strides = [1, 1]} : vector<2x1024xf32> to vector<2x768xf32>
    %70 = arith.negf %69 : vector<2x768xf32>
    %71 = math.exp %70 : vector<2x768xf32>
    %cst_25 = arith.constant 1.000000e+00 : f32
    %72 = vector.broadcast %cst_25 : f32 to vector<2x768xf32>
    %73 = arith.addf %72, %71 : vector<2x768xf32>
    %74 = arith.divf %72, %73 : vector<2x768xf32>
    %75 = vector.extract_strided_slice %74 {offsets = [0, 0], sizes = [2, 256], strides = [1, 1]} : vector<2x768xf32> to vector<2x256xf32>
    %76 = vector.extract_strided_slice %74 {offsets = [0, 256], sizes = [2, 256], strides = [1, 1]} : vector<2x768xf32> to vector<2x256xf32>
    %77 = vector.extract_strided_slice %74 {offsets = [0, 512], sizes = [2, 256], strides = [1, 1]} : vector<2x768xf32> to vector<2x256xf32>
    %78 = vector.extract_strided_slice %68 {offsets = [0, 768], sizes = [2, 256], strides = [1, 1]} : vector<2x1024xf32> to vector<2x256xf32>
    %79 = math.tanh %78 : vector<2x256xf32>
    %80 = arith.mulf %76, %54 : vector<2x256xf32>
    %81 = arith.mulf %75, %79 : vector<2x256xf32>
    %82 = arith.addf %80, %81 : vector<2x256xf32>
    %83 = math.tanh %82 : vector<2x256xf32>
    %84 = arith.mulf %77, %83 : vector<2x256xf32>
    %85 = arith.index_cast %c2_i32 : i32 to index
    %c0_26 = arith.constant 0 : index
    %c0_27 = arith.constant 0 : index
    %86 = vector.load %arg6[%85, %c0_26, %c0_27] : memref<7x2x256xf32, #tpu.memory_space<vmem>>, vector<1x2x256xf32>
    %87 = vector.shape_cast %86 : vector<1x2x256xf32> to vector<2x256xf32>
    %88 = vector.shape_cast %84 : vector<2x256xf32> to vector<1x2x256xf32>
    tpu.vector_store %arg6[%85, %c0_26, %c0_27], %88 {strides = array<i32>} : memref<7x2x256xf32, #tpu.memory_space<vmem>>, vector<1x2x256xf32>,
    %c3_i32 = arith.constant 3 : i32
    %89 = arith.index_cast %c3_i32 : i32 to index
    %c0_28 = arith.constant 0 : index
    %c0_29 = arith.constant 0 : index
    %90 = vector.load %arg1[%89, %c0_28, %c0_29] : memref<7x2x1024xbf16, #tpu.memory_space<vmem>>, vector<1x2x1024xbf16>
    %91 = vector.shape_cast %90 : vector<1x2x1024xbf16> to vector<2x1024xbf16>
    %92 = arith.truncf %84 : vector<2x256xf32> to vector<2x256xbf16>
    %c0_30 = arith.constant 0 : index
    %c0_31 = arith.constant 0 : index
    %93 = vector.load %arg5[%c0_30, %c0_31] : memref<256x1024xbf16, #tpu.memory_space<vmem>>, vector<256x1024xbf16>
    %cst_32 = arith.constant dense<0.000000e+00> : vector<2x1024xf32>
    %94 = tpu.matmul %92, %93, %cst_32 {dimension_numbers = #tpu.dot_dimension_numbers<[1], [0], [0], [1], [0, 0, 1, 1], [], []>} : vector<2x256xbf16>, vector<256x1024xbf16>, vector<2x1024xf32> -> vector<2x1024xf32>
    %95 = arith.extf %91 : vector<2x1024xbf16> to vector<2x1024xf32>
    %96 = arith.addf %95, %94 : vector<2x1024xf32>
    %97 = vector.extract_strided_slice %96 {offsets = [0, 0], sizes = [2, 768], strides = [1, 1]} : vector<2x1024xf32> to vector<2x768xf32>
    %98 = arith.negf %97 : vector<2x768xf32>
    %99 = math.exp %98 : vector<2x768xf32>
    %cst_33 = arith.constant 1.000000e+00 : f32
    %100 = vector.broadcast %cst_33 : f32 to vector<2x768xf32>
    %101 = arith.addf %100, %99 : vector<2x768xf32>
    %102 = arith.divf %100, %101 : vector<2x768xf32>
    %103 = vector.extract_strided_slice %102 {offsets = [0, 0], sizes = [2, 256], strides = [1, 1]} : vector<2x768xf32> to vector<2x256xf32>
    %104 = vector.extract_strided_slice %102 {offsets = [0, 256], sizes = [2, 256], strides = [1, 1]} : vector<2x768xf32> to vector<2x256xf32>
    %105 = vector.extract_strided_slice %102 {offsets = [0, 512], sizes = [2, 256], strides = [1, 1]} : vector<2x768xf32> to vector<2x256xf32>
    %106 = vector.extract_strided_slice %96 {offsets = [0, 768], sizes = [2, 256], strides = [1, 1]} : vector<2x1024xf32> to vector<2x256xf32>
    %107 = math.tanh %106 : vector<2x256xf32>
    %108 = arith.mulf %104, %82 : vector<2x256xf32>
    %109 = arith.mulf %103, %107 : vector<2x256xf32>
    %110 = arith.addf %108, %109 : vector<2x256xf32>
    %111 = math.tanh %110 : vector<2x256xf32>
    %112 = arith.mulf %105, %111 : vector<2x256xf32>
    %113 = arith.index_cast %c3_i32 : i32 to index
    %c0_34 = arith.constant 0 : index
    %c0_35 = arith.constant 0 : index
    %114 = vector.load %arg6[%113, %c0_34, %c0_35] : memref<7x2x256xf32, #tpu.memory_space<vmem>>, vector<1x2x256xf32>
    %115 = vector.shape_cast %114 : vector<1x2x256xf32> to vector<2x256xf32>
    %116 = vector.shape_cast %112 : vector<2x256xf32> to vector<1x2x256xf32>
    tpu.vector_store %arg6[%113, %c0_34, %c0_35], %116 {strides = array<i32>} : memref<7x2x256xf32, #tpu.memory_space<vmem>>, vector<1x2x256xf32>,
    %c4_i32 = arith.constant 4 : i32
    %117 = arith.index_cast %c4_i32 : i32 to index
    %c0_36 = arith.constant 0 : index
    %c0_37 = arith.constant 0 : index
    %118 = vector.load %arg1[%117, %c0_36, %c0_37] : memref<7x2x1024xbf16, #tpu.memory_space<vmem>>, vector<1x2x1024xbf16>
    %119 = vector.shape_cast %118 : vector<1x2x1024xbf16> to vector<2x1024xbf16>
    %120 = arith.truncf %112 : vector<2x256xf32> to vector<2x256xbf16>
    %c0_38 = arith.constant 0 : index
    %c0_39 = arith.constant 0 : index
    %121 = vector.load %arg5[%c0_38, %c0_39] : memref<256x1024xbf16, #tpu.memory_space<vmem>>, vector<256x1024xbf16>
    %cst_40 = arith.constant dense<0.000000e+00> : vector<2x1024xf32>
    %122 = tpu.matmul %120, %121, %cst_40 {dimension_numbers = #tpu.dot_dimension_numbers<[1], [0], [0], [1], [0, 0, 1, 1], [], []>} : vector<2x256xbf16>, vector<256x1024xbf16>, vector<2x1024xf32> -> vector<2x1024xf32>
    %123 = arith.extf %119 : vector<2x1024xbf16> to vector<2x1024xf32>
    %124 = arith.addf %123, %122 : vector<2x1024xf32>
    %125 = vector.extract_strided_slice %124 {offsets = [0, 0], sizes = [2, 768], strides = [1, 1]} : vector<2x1024xf32> to vector<2x768xf32>
    %126 = arith.negf %125 : vector<2x768xf32>
    %127 = math.exp %126 : vector<2x768xf32>
    %cst_41 = arith.constant 1.000000e+00 : f32
    %128 = vector.broadcast %cst_41 : f32 to vector<2x768xf32>
    %129 = arith.addf %128, %127 : vector<2x768xf32>
    %130 = arith.divf %128, %129 : vector<2x768xf32>
    %131 = vector.extract_strided_slice %130 {offsets = [0, 0], sizes = [2, 256], strides = [1, 1]} : vector<2x768xf32> to vector<2x256xf32>
    %132 = vector.extract_strided_slice %130 {offsets = [0, 256], sizes = [2, 256], strides = [1, 1]} : vector<2x768xf32> to vector<2x256xf32>
    %133 = vector.extract_strided_slice %130 {offsets = [0, 512], sizes = [2, 256], strides = [1, 1]} : vector<2x768xf32> to vector<2x256xf32>
    %134 = vector.extract_strided_slice %124 {offsets = [0, 768], sizes = [2, 256], strides = [1, 1]} : vector<2x1024xf32> to vector<2x256xf32>
    %135 = math.tanh %134 : vector<2x256xf32>
    %136 = arith.mulf %132, %110 : vector<2x256xf32>
    %137 = arith.mulf %131, %135 : vector<2x256xf32>
    %138 = arith.addf %136, %137 : vector<2x256xf32>
    %139 = math.tanh %138 : vector<2x256xf32>
    %140 = arith.mulf %133, %139 : vector<2x256xf32>
    %141 = arith.index_cast %c4_i32 : i32 to index
    %c0_42 = arith.constant 0 : index
    %c0_43 = arith.constant 0 : index
    %142 = vector.load %arg6[%141, %c0_42, %c0_43] : memref<7x2x256xf32, #tpu.memory_space<vmem>>, vector<1x2x256xf32>
    %143 = vector.shape_cast %142 : vector<1x2x256xf32> to vector<2x256xf32>
    %144 = vector.shape_cast %140 : vector<2x256xf32> to vector<1x2x256xf32>
    tpu.vector_store %arg6[%141, %c0_42, %c0_43], %144 {strides = array<i32>} : memref<7x2x256xf32, #tpu.memory_space<vmem>>, vector<1x2x256xf32>,
    %c5_i32 = arith.constant 5 : i32
    %145 = arith.index_cast %c5_i32 : i32 to index
    %c0_44 = arith.constant 0 : index
    %c0_45 = arith.constant 0 : index
    %146 = vector.load %arg1[%145, %c0_44, %c0_45] : memref<7x2x1024xbf16, #tpu.memory_space<vmem>>, vector<1x2x1024xbf16>
    %147 = vector.shape_cast %146 : vector<1x2x1024xbf16> to vector<2x1024xbf16>
    %148 = arith.truncf %140 : vector<2x256xf32> to vector<2x256xbf16>
    %c0_46 = arith.constant 0 : index
    %c0_47 = arith.constant 0 : index
    %149 = vector.load %arg5[%c0_46, %c0_47] : memref<256x1024xbf16, #tpu.memory_space<vmem>>, vector<256x1024xbf16>
    %cst_48 = arith.constant dense<0.000000e+00> : vector<2x1024xf32>
    %150 = tpu.matmul %148, %149, %cst_48 {dimension_numbers = #tpu.dot_dimension_numbers<[1], [0], [0], [1], [0, 0, 1, 1], [], []>} : vector<2x256xbf16>, vector<256x1024xbf16>, vector<2x1024xf32> -> vector<2x1024xf32>
    %151 = arith.extf %147 : vector<2x1024xbf16> to vector<2x1024xf32>
    %152 = arith.addf %151, %150 : vector<2x1024xf32>
    %153 = vector.extract_strided_slice %152 {offsets = [0, 0], sizes = [2, 768], strides = [1, 1]} : vector<2x1024xf32> to vector<2x768xf32>
    %154 = arith.negf %153 : vector<2x768xf32>
    %155 = math.exp %154 : vector<2x768xf32>
    %cst_49 = arith.constant 1.000000e+00 : f32
    %156 = vector.broadcast %cst_49 : f32 to vector<2x768xf32>
    %157 = arith.addf %156, %155 : vector<2x768xf32>
    %158 = arith.divf %156, %157 : vector<2x768xf32>
    %159 = vector.extract_strided_slice %158 {offsets = [0, 0], sizes = [2, 256], strides = [1, 1]} : vector<2x768xf32> to vector<2x256xf32>
    %160 = vector.extract_strided_slice %158 {offsets = [0, 256], sizes = [2, 256], strides = [1, 1]} : vector<2x768xf32> to vector<2x256xf32>
    %161 = vector.extract_strided_slice %158 {offsets = [0, 512], sizes = [2, 256], strides = [1, 1]} : vector<2x768xf32> to vector<2x256xf32>
    %162 = vector.extract_strided_slice %152 {offsets = [0, 768], sizes = [2, 256], strides = [1, 1]} : vector<2x1024xf32> to vector<2x256xf32>
    %163 = math.tanh %162 : vector<2x256xf32>
    %164 = arith.mulf %160, %138 : vector<2x256xf32>
    %165 = arith.mulf %159, %163 : vector<2x256xf32>
    %166 = arith.addf %164, %165 : vector<2x256xf32>
    %167 = math.tanh %166 : vector<2x256xf32>
    %168 = arith.mulf %161, %167 : vector<2x256xf32>
    %169 = arith.index_cast %c5_i32 : i32 to index
    %c0_50 = arith.constant 0 : index
    %c0_51 = arith.constant 0 : index
    %170 = vector.load %arg6[%169, %c0_50, %c0_51] : memref<7x2x256xf32, #tpu.memory_space<vmem>>, vector<1x2x256xf32>
    %171 = vector.shape_cast %170 : vector<1x2x256xf32> to vector<2x256xf32>
    %172 = vector.shape_cast %168 : vector<2x256xf32> to vector<1x2x256xf32>
    tpu.vector_store %arg6[%169, %c0_50, %c0_51], %172 {strides = array<i32>} : memref<7x2x256xf32, #tpu.memory_space<vmem>>, vector<1x2x256xf32>,
    %c6_i32 = arith.constant 6 : i32
    %173 = arith.index_cast %c6_i32 : i32 to index
    %c0_52 = arith.constant 0 : index
    %c0_53 = arith.constant 0 : index
    %174 = vector.load %arg1[%173, %c0_52, %c0_53] : memref<7x2x1024xbf16, #tpu.memory_space<vmem>>, vector<1x2x1024xbf16>
    %175 = vector.shape_cast %174 : vector<1x2x1024xbf16> to vector<2x1024xbf16>
    %176 = arith.truncf %168 : vector<2x256xf32> to vector<2x256xbf16>
    %c0_54 = arith.constant 0 : index
    %c0_55 = arith.constant 0 : index
    %177 = vector.load %arg5[%c0_54, %c0_55] : memref<256x1024xbf16, #tpu.memory_space<vmem>>, vector<256x1024xbf16>
    %cst_56 = arith.constant dense<0.000000e+00> : vector<2x1024xf32>
    %178 = tpu.matmul %176, %177, %cst_56 {dimension_numbers = #tpu.dot_dimension_numbers<[1], [0], [0], [1], [0, 0, 1, 1], [], []>} : vector<2x256xbf16>, vector<256x1024xbf16>, vector<2x1024xf32> -> vector<2x1024xf32>
    %179 = arith.extf %175 : vector<2x1024xbf16> to vector<2x1024xf32>
    %180 = arith.addf %179, %178 : vector<2x1024xf32>
    %181 = vector.extract_strided_slice %180 {offsets = [0, 0], sizes = [2, 768], strides = [1, 1]} : vector<2x1024xf32> to vector<2x768xf32>
    %182 = arith.negf %181 : vector<2x768xf32>
    %183 = math.exp %182 : vector<2x768xf32>
    %cst_57 = arith.constant 1.000000e+00 : f32
    %184 = vector.broadcast %cst_57 : f32 to vector<2x768xf32>
    %185 = arith.addf %184, %183 : vector<2x768xf32>
    %186 = arith.divf %184, %185 : vector<2x768xf32>
    %187 = vector.extract_strided_slice %186 {offsets = [0, 0], sizes = [2, 256], strides = [1, 1]} : vector<2x768xf32> to vector<2x256xf32>
    %188 = vector.extract_strided_slice %186 {offsets = [0, 256], sizes = [2, 256], strides = [1, 1]} : vector<2x768xf32> to vector<2x256xf32>
    %189 = vector.extract_strided_slice %186 {offsets = [0, 512], sizes = [2, 256], strides = [1, 1]} : vector<2x768xf32> to vector<2x256xf32>
    %190 = vector.extract_strided_slice %180 {offsets = [0, 768], sizes = [2, 256], strides = [1, 1]} : vector<2x1024xf32> to vector<2x256xf32>
    %191 = math.tanh %190 : vector<2x256xf32>
    %192 = arith.mulf %188, %166 : vector<2x256xf32>
    %193 = arith.mulf %187, %191 : vector<2x256xf32>
    %194 = arith.addf %192, %193 : vector<2x256xf32>
    %195 = math.tanh %194 : vector<2x256xf32>
    %196 = arith.mulf %189, %195 : vector<2x256xf32>
    %197 = arith.index_cast %c6_i32 : i32 to index
    %c0_58 = arith.constant 0 : index
    %c0_59 = arith.constant 0 : index
    %198 = vector.load %arg6[%197, %c0_58, %c0_59] : memref<7x2x256xf32, #tpu.memory_space<vmem>>, vector<1x2x256xf32>
    %199 = vector.shape_cast %198 : vector<1x2x256xf32> to vector<2x256xf32>
    %200 = vector.shape_cast %196 : vector<2x256xf32> to vector<1x2x256xf32>
    tpu.vector_store %arg6[%197, %c0_58, %c0_59], %200 {strides = array<i32>} : memref<7x2x256xf32, #tpu.memory_space<vmem>>, vector<1x2x256xf32>,
    %c7_i32 = arith.constant 7 : i32
    %c0_60 = arith.constant 0 : index
    %c0_61 = arith.constant 0 : index
    %201 = vector.load %arg9[%c0_60, %c0_61] : memref<2x256xf32, #tpu.memory_space<vmem>>, vector<2x256xf32>
    tpu.vector_store %arg9[%c0_60, %c0_61], %196 {strides = array<i32>} : memref<2x256xf32, #tpu.memory_space<vmem>>, vector<2x256xf32>,
    %c0_62 = arith.constant 0 : index
    %c0_63 = arith.constant 0 : index
    %202 = vector.load %arg10[%c0_62, %c0_63] : memref<2x256xf32, #tpu.memory_space<vmem>>, vector<2x256xf32>
    tpu.vector_store %arg10[%c0_62, %c0_63], %194 {strides = array<i32>} : memref<2x256xf32, #tpu.memory_space<vmem>>, vector<2x256xf32>,
    %c0_i32_64 = arith.constant 0 : i32
    %203 = arith.cmpi eq, %arg0, %c0_i32_64 : i32
    %204 = arith.extui %203 : i1 to i32
    %c0_i32_65 = arith.constant 0 : i32
    %205 = arith.cmpi ne, %204, %c0_i32_65 : i32
    scf.if %205 {
      %c0_66 = arith.constant 0 : index
      %c0_67 = arith.constant 0 : index
      %206 = vector.load %arg7[%c0_66, %c0_67] : memref<2x256xf32, #tpu.memory_space<vmem>>, vector<2x256xf32>
      tpu.vector_store %arg7[%c0_66, %c0_67], %196 {strides = array<i32>} : memref<2x256xf32, #tpu.memory_space<vmem>>, vector<2x256xf32>,
      %c0_68 = arith.constant 0 : index
      %c0_69 = arith.constant 0 : index
      %207 = vector.load %arg8[%c0_68, %c0_69] : memref<2x256xf32, #tpu.memory_space<vmem>>, vector<2x256xf32>
      tpu.vector_store %arg8[%c0_68, %c0_69], %194 {strides = array<i32>} : memref<2x256xf32, #tpu.memory_space<vmem>>, vector<2x256xf32>,
    } else {
    }
    return
  }
  func.func @transform_0(%arg0: i32) -> (i32, i32, i32) {
    %c0_i32 = arith.constant 0 : i32
    %c0_i32_0 = arith.constant 0 : i32
    %c0_i32_1 = arith.constant 0 : i32
    return %arg0, %c0_i32, %c0_i32_0 : i32, i32, i32
  }
  func.func @transform_1(%arg0: i32) -> (i32, i32) {
    %c0_i32 = arith.constant 0 : i32
    %c0_i32_0 = arith.constant 0 : i32
    %c0_i32_1 = arith.constant 0 : i32
    return %c0_i32, %c0_i32_0 : i32, i32
  }
  func.func @transform_2(%arg0: i32) -> (i32, i32) {
    %c0_i32 = arith.constant 0 : i32
    %c0_i32_0 = arith.constant 0 : i32
    %c0_i32_1 = arith.constant 0 : i32
    return %c0_i32, %c0_i32_0 : i32, i32
  }
  func.func @transform_3(%arg0: i32) -> (i32, i32) {
    %c0_i32 = arith.constant 0 : i32
    %c0_i32_0 = arith.constant 0 : i32
    %c0_i32_1 = arith.constant 0 : i32
    return %c0_i32, %c0_i32_0 : i32, i32
  }
  func.func @transform_4(%arg0: i32) -> (i32, i32) {
    %c0_i32 = arith.constant 0 : i32
    %c0_i32_0 = arith.constant 0 : i32
    %c0_i32_1 = arith.constant 0 : i32
    return %c0_i32, %c0_i32_0 : i32, i32
  }
  func.func @transform_5(%arg0: i32) -> (i32, i32, i32) {
    %c0_i32 = arith.constant 0 : i32
    %c0_i32_0 = arith.constant 0 : i32
    %c0_i32_1 = arith.constant 0 : i32
    return %arg0, %c0_i32, %c0_i32_0 : i32, i32, i32
  }
  func.func @transform_6(%arg0: i32) -> (i32, i32) {
    %c0_i32 = arith.constant 0 : i32
    %c0_i32_0 = arith.constant 0 : i32
    %c0_i32_1 = arith.constant 0 : i32
    return %c0_i32, %c0_i32_0 : i32, i32
  }
  func.func @transform_7(%arg0: i32) -> (i32, i32) {
    %c0_i32 = arith.constant 0 : i32
    %c0_i32_0 = arith.constant 0 : i32
    %c0_i32_1 = arith.constant 0 : i32
    return %c0_i32, %c0_i32_0 : i32, i32
  }
}

module attributes {stable_mosaic.version = 11 : i64} {
  func.func @_linear_kernel(%arg0: i32, %arg1: i32, %arg2: memref<14x256xbf16, #tpu.memory_space<vmem>>, %arg3: memref<16x256xbf16, #tpu.memory_space<vmem>>, %arg4: memref<1x16xf32, #tpu.memory_space<vmem>>, %arg5: memref<14x16xf32, #tpu.memory_space<vmem>>) attributes {dimension_semantics = [#tpu.dimension_semantics<parallel>, #tpu.dimension_semantics<parallel>], iteration_bounds = array<i64: 1, 1>, scalar_prefetch = 0 : i64, scratch_operands = 0 : i64, tpu.core_type = #tpu.core_type<tc>, window_params = [{transform_indices = @transform_0, window_bounds = array<i64: 14, 256>}, {transform_indices = @transform_1, window_bounds = array<i64: 16, 256>}, {transform_indices = @transform_2, window_bounds = array<i64: 1, 16>}, {transform_indices = @transform_3, window_bounds = array<i64: 14, 16>}]} {
    %c0 = arith.constant 0 : index
    %c0_0 = arith.constant 0 : index
    %0 = vector.load %arg2[%c0, %c0_0] : memref<14x256xbf16, #tpu.memory_space<vmem>>, vector<14x256xbf16>
    %c0_1 = arith.constant 0 : index
    %c0_2 = arith.constant 0 : index
    %1 = vector.load %arg3[%c0_1, %c0_2] : memref<16x256xbf16, #tpu.memory_space<vmem>>, vector<16x256xbf16>
    %cst = arith.constant dense<0.000000e+00> : vector<14x16xf32>
    %2 = tpu.matmul %0, %1, %cst {dimension_numbers = #tpu.dot_dimension_numbers<[1], [1], [0], [0], [0, 0, 1, 0], [], []>} : vector<14x256xbf16>, vector<16x256xbf16>, vector<14x16xf32> -> vector<14x16xf32>
    %c0_3 = arith.constant 0 : index
    %c0_4 = arith.constant 0 : index
    %3 = vector.load %arg4[%c0_3, %c0_4] : memref<1x16xf32, #tpu.memory_space<vmem>>, vector<1x16xf32>
    %4 = vector.broadcast %3 : vector<1x16xf32> to vector<14x16xf32>
    %5 = arith.addf %2, %4 : vector<14x16xf32>
    %c0_5 = arith.constant 0 : index
    %c0_6 = arith.constant 0 : index
    %6 = vector.load %arg5[%c0_5, %c0_6] : memref<14x16xf32, #tpu.memory_space<vmem>>, vector<14x16xf32>
    tpu.vector_store %arg5[%c0_5, %c0_6], %5 {strides = array<i32>} : memref<14x16xf32, #tpu.memory_space<vmem>>, vector<14x16xf32>,
    return
  }
  func.func @transform_0(%arg0: i32, %arg1: i32) -> (i32, i32) {
    %c0_i32 = arith.constant 0 : i32
    %c0_i32_0 = arith.constant 0 : i32
    return %arg0, %c0_i32 : i32, i32
  }
  func.func @transform_1(%arg0: i32, %arg1: i32) -> (i32, i32) {
    %c0_i32 = arith.constant 0 : i32
    %c0_i32_0 = arith.constant 0 : i32
    return %arg1, %c0_i32 : i32, i32
  }
  func.func @transform_2(%arg0: i32, %arg1: i32) -> (i32, i32) {
    %c0_i32 = arith.constant 0 : i32
    %c0_i32_0 = arith.constant 0 : i32
    return %c0_i32, %arg1 : i32, i32
  }
  func.func @transform_3(%arg0: i32, %arg1: i32) -> (i32, i32) {
    %c0_i32 = arith.constant 0 : i32
    return %arg0, %arg1 : i32, i32
  }
}

</mosaic_0001>

<bundles_post_ra>
// kernel: seq2seq_forward.5
= control target key start
LH: loop header
LB: loop body
LE: loop exit
PB: predicated region body
PF: predicated region fallthrough
CT: control target
= control target key end

     0   :  { %8 = vsyncpa [#allocation3], 0  ;;  %s1449_s0 = inlined_call_operand.vmem [shape: bf16[16,256], index: 0, kind: input, shape index: {}]   ;;  %s1450_s1 = inlined_call_operand.hbm [shape: bf16[256,1024], index: 1, kind: input, shape index: {}]   ;;  %s1451_s2 = inlined_call_operand.vmem [shape: f32[1,1024], index: 2, kind: input, shape index: {}]   ;;  %s1452_s3 = inlined_call_operand.vmem [shape: bf16[16,1024], index: 3, kind: output, shape index: {}]  }
   0x1   :  { %10 = vsyncpa [#allocation3 + $0x1], 0  ;;  %s1265_s12 = smov 0   ;;  %s1267_s13 = smov 0  }
   0x2   :  { %s1269_s14 = smov 0   ;;  %s1271_s15 = smov 0  }
   0x3   :  { %s1273_s16 = smov 0   ;;  %s1275_s17 = smov 0  }
   0x4 LB: > { %s911_s18 = sadd.s32 4294967295, %s1239_s17   ;;  %s25_s19 = sadd.s32 1, %s1235_s16  ;;  %s1239_s17 = sphi %s1275_s17, %s16_s17   ;;  %s1235_s16 = sphi %s1273_s16, %s1461_s16   ;;  %s1231_s15 = sphi %s1271_s15, %s1460_s15   ;;  %s1227_s14 = sphi %s1269_s14, %s1459_s14   ;;  %s1223_s13 = sphi %s1267_s13, %s1458_s13   ;;  %s1219_s12 = sphi %s1265_s12, %s1457_s12  }
   0x5   : > { %p26_p0 = scmp.ge.s32.totalorder %s25_s19, 2  ;;  %s61_s20 = sadd.s32 1, %s1227_s14 }
   0x6   : > { %p68_p1 = scmp.ne.s32.totalorder %s1227_s14, %s1223_s13  ;;  %p69_p2 = scmp.eq.s32.totalorder %s1239_s17, 0 }
   0x7   : > { %s1463_s19 = smov (%p26_p0, %s25_s19), 0  ;;  %p74_p4 = scmp.ne.s32.totalorder %s1223_s13, %s1219_s12 }
   0x8   : > { %p1301_p3 = por %p69_p2, %p68_p1  ;;  %s58_s22 = ssub.s32 %s1235_s16, %s1463_s19 }
   0x9   : > { %p75_p5 = scmp.eq.s32.totalorder %s911_s18, 0  ;;  %p59_p6 = scmp.eq.s32.totalorder %s58_s22, 0 }
   0xa   : > { %p126_p7 = scmp.eq.s32.totalorder %s911_s18, 1  ;;  %p1010_p10 = scmp.lt.s32.totalorder %s1239_s17, 2 }
   0xb   : > { %p1308_p8 = por %p75_p5, %p74_p4  ;;  %s162_s26 = sand.u32 1, %s1227_s14  }
   0xc   : > { %s1313_s24 = scalar_select %p59_p6, %s1227_s14, %s61_s20  }
   0xd   : > { %p1315_p9 = por %p126_p7, %p68_p1  ;;  %s998_s27 = sshll.u32 %s1235_s16, 8 }
   0xe   : > { %s916_s28 = sshll.u32 %s162_s26, 9  ;;  %s172_s4 = scalar_lea.hbm %s1450_s1, %s998_s27 }
   0xf   : > { %s166_s5 = scalar_lea.vmem [#allocation2], %s916_s28  ;;  %p1327_p11 = pnand %p1010_p10, %p1301_p3 }
  0x10   : > { %s173_s6 = sshll.u32 %s166_s5, 4  ;;  %p919_p12 = scmp.ge.s32.totalorder %s1239_s17, 1  ;;  %s174_s6 = int_to_ptr.vmem [resolvable:$true] %s173_s6 }
  0x11   : > { %s163_s8 = scalar_lea.sflag [#allocation3], %s162_s26  ;;  %p1163_p13 = pneg %p1327_p11 }
  0x12   : > { %s1174_s9 = scalar_lea.vmem %s174_s6, 8192  ;;  %s1241_s10 = smov [#allocation2]  }
  0x13   : > { %p1175_p0 = scmp.ne.s32.totalorder %s174_s6, %s1174_s9  ;;  %s1179_s11 = sshll.u32 %s1241_s10, 4  ;;  %s1180_s11 = int_to_ptr.vmem [resolvable:$false] %s1179_s11 }
  0x14   : > { %s1181_s12 = scalar_lea.vmem %s1180_s11, 16384  ;;  %p1182_p4 = scmp.lt.s32.totalorder %s174_s6, %s1180_s11 }
  0x15   : > { %p1177_p1 = pnand %p1175_p0, %p1163_p13  ;;  %p1183_p5 = scmp.lt.s32.totalorder %s1181_s12, %s1174_s9 }
  0x17   : > { %p1178_p2 = pneg %p1177_p1  ;;  %p1184_p3 = por %p1183_p5, %p1182_p4 }
  0x19   : > { %p1185_p6 = pnand %p1184_p3, %p1178_p2 }
  0x1b   : > { %1188 = shalt.err (!%p1185_p6)
}
  0x1c   : > { %s1242_s18 = smov 512   ;;  %s1243_s20 = smov 256  }
  0x1d   : > { %s1244_s21 = smov 16   ;;  %p189_p7 = scmp.lt.s32.totalorder %s1239_s17, 3 }
  0x1e   : > { %1009 = dma.hbm_to_vmem [thread:$0]  (!%p1327_p11), %s172_s4, 8192, %s174_s6, %s163_s8, %s1242_s18, %s1243_s20, %s1244_s21  }
  0x1f   : > { %p190_p10 = pnand %p919_p12, %p189_p7 }
  0x20   : > { %s1340_s22 = sand.u32 (!%p190_p10), 1, %s1223_s13  }
  0x21   : > { %193 = sbr.rel (%p190_p10) target bundleno = 316 (0x13c), region = 32  ;;  %s920_s26 = sshll.u32 (!%p190_p10), %s1340_s22, 9 }
  0x22   : > { %s196_s27 = scalar_lea.sflag (!%p190_p10), [#allocation3], %s1340_s22  ;;  %s1344_s28 = scalar_lea.vmem (!%p190_p10), [#allocation2], %s920_s26 }
  0x26   : > { %1214 = dma.done.wait (%p1308_p8), %s196_s27, 8192  }
  0x27   : > { %1216 = vsyncadd (%p1308_p8), %s196_s27, 4294959104  ;;  %v1062_v0 = vld [vmem:[%s1344_s28 + $0xe4] ss:$16 sps:$4 sm:$0xff]   ;;  %v1064_v1 = vld [vmem:[%s1344_s28 + $0xec] ss:$16 sps:$4 sm:$0xff]   ;;  %s922_s5 = sshll.u32 %s1231_s15, 2 }
  0x28   : > { %664 = vmatprep.subr.bf16.mxu0 %v1062_v0  ;;  %v1066_v2 = vld [vmem:[%s1344_s28 + $0xe0] ss:$16 sps:$4 sm:$0xff]   ;;  %v1067_v3 = vld [vmem:[%s1344_s28 + $0xe8] ss:$16 sps:$4 sm:$0xff]   ;;  %707 = vmatprep.subr.bf16.mxu1 %v1064_v1  ;;  %v1068_v4 = vld [vmem:[%s1344_s28 + $0xc4] ss:$16 sps:$4 sm:$0xff]  }
  0x29   : > { %665 = vmatpush1.bf16.msra.mxu0 %v1066_v2  ;;  %708 = vmatpush1.bf16.msra.mxu1 %v1067_v3  ;;  %v1070_v5 = vld [vmem:[%s1344_s28 + $0xcc] ss:$16 sps:$4 sm:$0xff]   ;;  %v1072_v6 = vld [vmem:[%s1344_s28 + $0xc0] ss:$16 sps:$4 sm:$0xff]   ;;  %v1073_v7 = vld [vmem:[%s1344_s28 + $0xc8] ss:$16 sps:$4 sm:$0xff]   ;;  %v314_v2 = vlaneseq }
  0x2a   : > { %666 = vmatprep.subr.bf16.mxu0 %v1068_v4  ;;  %709 = vmatprep.subr.bf16.mxu1 %v1070_v5  ;;  %v1074_v8 = vld [vmem:[%s1344_s28 + $0xa4] ss:$16 sps:$4 sm:$0xff]   ;;  %v1076_v9 = vld [vmem:[%s1344_s28 + $0xac] ss:$16 sps:$4 sm:$0xff]   ;;  %v1078_v10 = vld [vmem:[%s1344_s28 + $0xa0] ss:$16 sps:$4 sm:$0xff]  }
  0x2b   : > { %v1079_v11 = vld [vmem:[%s1344_s28 + $0xa8] ss:$16 sps:$4 sm:$0xff]   ;;  %v1080_v12 = vld [vmem:[%s1344_s28 + $0x84] ss:$16 sps:$4 sm:$0xff]   ;;  %v1082_v13 = vld [vmem:[%s1344_s28 + $0x8c] ss:$16 sps:$4 sm:$0xff]  }
  0x2c   : > { %v1084_v14 = vld [vmem:[%s1344_s28 + $0x80] ss:$16 sps:$4 sm:$0xff]   ;;  %v1085_v15 = vld [vmem:[%s1344_s28 + $0x88] ss:$16 sps:$4 sm:$0xff]   ;;  %v1086_v16 = vld [vmem:[%s1344_s28 + $0x64] ss:$16 sps:$4 sm:$0xff]  }
  0x2d   : > { %667 = vmatpush1.bf16.msra.mxu0 %v1072_v6  ;;  %710 = vmatpush1.bf16.msra.mxu1 %v1073_v7  ;;  %v1088_v17 = vld [vmem:[%s1344_s28 + $0x6c] ss:$16 sps:$4 sm:$0xff]   ;;  %v1090_v18 = vld [vmem:[%s1344_s28 + $0x60] ss:$16 sps:$4 sm:$0xff]   ;;  %v1091_v19 = vld [vmem:[%s1344_s28 + $0x68] ss:$16 sps:$4 sm:$0xff]  }
  0x2e   : > { %668 = vmatprep.subr.bf16.mxu0 %v1074_v8  ;;  %711 = vmatprep.subr.bf16.mxu1 %v1076_v9  ;;  %v1092_v20 = vld [vmem:[%s1344_s28 + $0x44] ss:$16 sps:$4 sm:$0xff]   ;;  %v1094_v21 = vld [vmem:[%s1344_s28 + $0x4c] ss:$16 sps:$4 sm:$0xff]   ;;  %v1096_v22 = vld [vmem:[%s1344_s28 + $0x40] ss:$16 sps:$4 sm:$0xff]  }
  0x2f   : > { %v1097_v23 = vld [vmem:[%s1344_s28 + $0x48] ss:$16 sps:$4 sm:$0xff]   ;;  %v1098_v24 = vld [vmem:[%s1344_s28 + $0x24] ss:$16 sps:$4 sm:$0xff]   ;;  %v1100_v25 = vld [vmem:[%s1344_s28 + $0x2c] ss:$16 sps:$4 sm:$0xff]  }
  0x30   : > { %v1102_v26 = vld [vmem:[%s1344_s28 + $0x20] ss:$16 sps:$4 sm:$0xff]   ;;  %v1103_v27 = vld [vmem:[%s1344_s28 + $0x28] ss:$16 sps:$4 sm:$0xff]   ;;  %v1104_v28 = vld [vmem:[%s1344_s28 + $0x4] ss:$16 sps:$4 sm:$0xff]  }
  0x31   : > { %669 = vmatpush1.bf16.msra.mxu0 %v1078_v10  ;;  %712 = vmatpush1.bf16.msra.mxu1 %v1079_v11  ;;  %v1106_v29 = vld [vmem:[%s1344_s28 + $0xc] ss:$16 sps:$4 sm:$0xff]   ;;  %v1108_v30 = vld [vmem:[%s1344_s28] ss:$16 sps:$4 sm:$0xff]   ;;  %v1109_v31 = vld [vmem:[%s1344_s28 + $0x8] ss:$16 sps:$4 sm:$0xff]  }
  0x32   : > { %670 = vmatprep.subr.bf16.mxu0 %v1080_v12  ;;  %713 = vmatprep.subr.bf16.mxu1 %v1082_v13  ;;  %v1110_v32 = vld [vmem:[%s1344_s28 + $0x1e4] ss:$16 sps:$4 sm:$0xff]   ;;  %v1112_v33 = vld [vmem:[%s1344_s28 + $0x1ec] ss:$16 sps:$4 sm:$0xff]   ;;  %v1114_v34 = vld [vmem:[%s1344_s28 + $0x1e0] ss:$16 sps:$4 sm:$0xff]  }
  0x33   : > { %v1115_v35 = vld [vmem:[%s1344_s28 + $0x1e8] ss:$16 sps:$4 sm:$0xff]   ;;  %v1116_v36 = vld [vmem:[%s1344_s28 + $0x1c4] ss:$16 sps:$4 sm:$0xff]   ;;  %v1118_v37 = vld [vmem:[%s1344_s28 + $0x1cc] ss:$16 sps:$4 sm:$0xff]  }
  0x34   : > { %v1120_v38 = vld [vmem:[%s1344_s28 + $0x1c0] ss:$16 sps:$4 sm:$0xff]   ;;  %v1121_v39 = vld [vmem:[%s1344_s28 + $0x1c8] ss:$16 sps:$4 sm:$0xff]   ;;  %v1122_v40 = vld [vmem:[%s1344_s28 + $0x1a4] ss:$16 sps:$4 sm:$0xff]  }
  0x35   : > { %671 = vmatpush1.bf16.msra.mxu0 %v1084_v14  ;;  %714 = vmatpush1.bf16.msra.mxu1 %v1085_v15  ;;  %v1124_v41 = vld [vmem:[%s1344_s28 + $0x1ac] ss:$16 sps:$4 sm:$0xff]   ;;  %v1126_v42 = vld [vmem:[%s1344_s28 + $0x1a0] ss:$16 sps:$4 sm:$0xff]   ;;  %v1127_v43 = vld [vmem:[%s1344_s28 + $0x1a8] ss:$16 sps:$4 sm:$0xff]  }
  0x36   : > { %672 = vmatprep.subr.bf16.mxu0 %v1086_v16  ;;  %715 = vmatprep.subr.bf16.mxu1 %v1088_v17  ;;  %v1128_v44 = vld [vmem:[%s1344_s28 + $0x184] ss:$16 sps:$4 sm:$0xff]   ;;  %v1130_v45 = vld [vmem:[%s1344_s28 + $0x18c] ss:$16 sps:$4 sm:$0xff]   ;;  %v1132_v47 = vld [vmem:[%s1344_s28 + $0x180] ss:$16 sps:$4 sm:$0xff]  }
  0x37   : > { %v1160_v46 = vld [vmem:[%s1449_s0 + $0x4] ss:$8 sps:$4 sm:$0xff]   ;;  %v1133_v48 = vld [vmem:[%s1344_s28 + $0x188] ss:$16 sps:$4 sm:$0xff]   ;;  %v1138_v51 = vld [vmem:[%s1344_s28 + $0x160] ss:$16 sps:$4 sm:$0xff]  }
  0x38   : > { %v1134_v49 = vld [vmem:[%s1344_s28 + $0x164] ss:$16 sps:$4 sm:$0xff]   ;;  %v1136_v50 = vld [vmem:[%s1344_s28 + $0x16c] ss:$16 sps:$4 sm:$0xff]   ;;  %696 = vmatprep.mubr.bf16.mxu0 %v1160_v46  ;;  %739 = vmatprep.mubr.bf16.mxu1 %v1160_v46  ;;  %v1139_v52 = vld [vmem:[%s1344_s28 + $0x168] ss:$16 sps:$4 sm:$0xff]  }
  0x39   : > { %673 = vmatpush1.bf16.msra.mxu0 %v1090_v18  ;;  %716 = vmatpush1.bf16.msra.mxu1 %v1091_v19  ;;  %v1140_v53 = vld [vmem:[%s1344_s28 + $0x144] ss:$16 sps:$4 sm:$0xff]   ;;  %v1142_v54 = vld [vmem:[%s1344_s28 + $0x14c] ss:$16 sps:$4 sm:$0xff]   ;;  %v1144_v55 = vld [vmem:[%s1344_s28 + $0x140] ss:$16 sps:$4 sm:$0xff]  }
  0x3a   : > { %674 = vmatprep.subr.bf16.mxu0 %v1092_v20  ;;  %717 = vmatprep.subr.bf16.mxu1 %v1094_v21  ;;  %v1145_v56 = vld [vmem:[%s1344_s28 + $0x148] ss:$16 sps:$4 sm:$0xff]   ;;  %v1146_v57 = vld [vmem:[%s1344_s28 + $0x124] ss:$16 sps:$4 sm:$0xff]   ;;  %v1148_v58 = vld [vmem:[%s1344_s28 + $0x12c] ss:$16 sps:$4 sm:$0xff]  }
  0x3b   : > { %v1150_v59 = vld [vmem:[%s1344_s28 + $0x120] ss:$16 sps:$4 sm:$0xff]   ;;  %v1151_v60 = vld [vmem:[%s1344_s28 + $0x128] ss:$16 sps:$4 sm:$0xff]   ;;  %v1152_v61 = vld [vmem:[%s1344_s28 + $0x104] ss:$16 sps:$4 sm:$0xff]  }
  0x3c   : > { %v1154_v62 = vld [vmem:[%s1344_s28 + $0x10c] ss:$16 sps:$4 sm:$0xff]   ;;  %v1156_v63 = vld [vmem:[%s1344_s28 + $0x100] ss:$16 sps:$4 sm:$0xff]   ;;  %v1157_v0 = vld [vmem:[%s1344_s28 + $0x108] ss:$16 sps:$4 sm:$0xff]  }
  0x3d   : > { %675 = vmatpush1.bf16.msra.mxu0 %v1096_v22  ;;  %718 = vmatpush1.bf16.msra.mxu1 %v1097_v23  ;;  %v1158_v1 = vld [vmem:[%s1449_s0] ss:$8 sps:$4 sm:$0xff]   ;;  %p240_p8 = scmp.lt.s32.totalorder %s922_s5, 7  ;;  %v315_v3 = vshrl.u32 %v314_v2, 7  ;;  %s921_s9 = sshll.u32 %s1340_s22, 5 }
  0x3e   : > { %676 = vmatprep.subr.bf16.mxu0 %v1098_v24  ;;  %719 = vmatprep.subr.bf16.mxu1 %v1100_v25  ;;  %s230_s10 = scalar_lea.vmem [#allocation4], %s921_s9  ;;  %s1003_s11 = sshll.u32 (%p1315_p9), %s1231_s15, 4 }
  0x3f   : > { %s1465_s5 = smov (!%p240_p8, %s922_s5), 7  ;;  %v316_v4 = vsub.s32 0, %v315_v3  ;;  %v324_v5 = vsub.s32 2, %v315_v3  ;;  %v320_v6 = vsub.s32 1, %v315_v3  ;;  %v328_v7 = vsub.s32 3, %v315_v3  ;;  %s790_s20 = scalar_lea.vmem (%p1315_p9), %s1452_s3, %s1003_s11 }
  0x40   : > { %s242_s8 = scalar_lea.vmem %s1451_s2, %s1465_s5 }
  0x41   : > { %677 = vmatpush1.bf16.msra.mxu0 %v1102_v26  ;;  %720 = vmatpush1.bf16.msra.mxu1 %v1103_v27  ;;  %v312_v8 = vld [vmem:[%s242_s8] sm:$0xf] }
  0x42   : > { %678 = vmatprep.subr.bf16.mxu0 %v1104_v28  ;;  %721 = vmatprep.subr.bf16.mxu1 %v1106_v29  ;;  %v317_v9 = vrot.slane %v312_v8, %v316_v4  ;;  %v325_v10 = vrot.slane %v312_v8, %v324_v5  ;;  %v321_v11 = vrot.slane %v312_v8, %v320_v6 }
  0x43   : > { %v329_v12 = vrot.slane %v312_v8, %v328_v7 }
  0x45   : > { %679 = vmatpush1.bf16.msra.mxu0 %v1108_v30  ;;  %722 = vmatpush1.bf16.msra.mxu1 %v1109_v31 }
  0x46   : > { %680 = vmatprep.subr.bf16.mxu0 %v1110_v32  ;;  %723 = vmatprep.subr.bf16.mxu1 %v1112_v33 }
  0x49   : > { %681 = vmatpush2.bf16.msra.mxu0 %v1114_v34  ;;  %724 = vmatpush2.bf16.msra.mxu1 %v1115_v35 }
  0x4a   : > { %682 = vmatprep.subr.bf16.mxu0 %v1116_v36  ;;  %725 = vmatprep.subr.bf16.mxu1 %v1118_v37 }
  0x4d   : > { %683 = vmatpush2.bf16.msra.mxu0 %v1120_v38  ;;  %726 = vmatpush2.bf16.msra.mxu1 %v1121_v39 }
  0x4e   : > { %684 = vmatprep.subr.bf16.mxu0 %v1122_v40  ;;  %727 = vmatprep.subr.bf16.mxu1 %v1124_v41 }
  0x51   : > { %685 = vmatpush2.bf16.msra.mxu0 %v1126_v42  ;;  %728 = vmatpush2.bf16.msra.mxu1 %v1127_v43 }
  0x52   : > { %686 = vmatprep.subr.bf16.mxu0 %v1128_v44  ;;  %729 = vmatprep.subr.bf16.mxu1 %v1130_v45 }
  0x55   : > { %687 = vmatpush2.bf16.msra.mxu0 %v1132_v47  ;;  %730 = vmatpush2.bf16.msra.mxu1 %v1133_v48 }
  0x56   : > { %688 = vmatprep.subr.bf16.mxu0 %v1134_v49  ;;  %731 = vmatprep.subr.bf16.mxu1 %v1136_v50 }
  0x59   : > { %689 = vmatpush2.bf16.msra.mxu0 %v1138_v51  ;;  %732 = vmatpush2.bf16.msra.mxu1 %v1139_v52 }
  0x5a   : > { %690 = vmatprep.subr.bf16.mxu0 %v1140_v53  ;;  %733 = vmatprep.subr.bf16.mxu1 %v1142_v54 }
  0x5d   : > { %691 = vmatpush2.bf16.msra.mxu0 %v1144_v55  ;;  %734 = vmatpush2.bf16.msra.mxu1 %v1145_v56 }
  0x5e   : > { %692 = vmatprep.subr.bf16.mxu0 %v1146_v57  ;;  %735 = vmatprep.subr.bf16.mxu1 %v1148_v58 }
  0x61   : > { %693 = vmatpush2.bf16.msra.mxu0 %v1150_v59  ;;  %736 = vmatpush2.bf16.msra.mxu1 %v1151_v60 }
  0x62   : > { %694 = vmatprep.subr.bf16.mxu0 %v1152_v61  ;;  %737 = vmatprep.subr.bf16.mxu1 %v1154_v62 }
  0x65   : > { %695 = vmatpush2.bf16.msra.mxu0 %v1156_v63  ;;  %738 = vmatpush2.bf16.msra.mxu1 %v1157_v0 }
  0x68   : > { %697 = vmatmul.mubr.bf16.vlgmr.msra.gmra.mxu0 %v1158_v1  ;;  %740 = vmatmul.mubr.bf16.vlgmr.msra.gmra.mxu1 %v1158_v1 }
 0x128   : > { %v698_v13 = vpop.f32.mrf.mxu0  ;;  %v741_v14 = vpop.f32.mrf.mxu1 }
 0x129   : > { %v699_v17 = vadd.f32 %v698_v13, %v317_v9  ;;  %v742_v18 = vadd.f32 %v741_v14, %v325_v10 }
 0x12a   : > { %v700_v15 = vpop.f32.mrf.mxu0  ;;  %v743_v16 = vpop.f32.mrf.mxu1 }
 0x12b   : > { %v701_v19 = vadd.f32 %v700_v15, %v321_v11  ;;  %v744_v20 = vadd.f32 %v743_v16, %v329_v12 }
 0x12c   : > { %v702_v21 = vpop.f32.mrf.mxu0  ;;  %v745_v22 = vpop.f32.mrf.mxu1 }
 0x12d   : > { %v999_v23 = vpack.c.bf16 %v701_v19, %v699_v17  ;;  %v1000_v24 = vpack.c.bf16 %v744_v20, %v742_v18  ;;  %v703_v27 = vadd.f32 %v702_v21, %v317_v9  ;;  %v746_v28 = vadd.f32 %v745_v22, %v325_v10 }
 0x12e   : > { %v704_v25 = vpop.f32.mrf.mxu0  ;;  %v747_v26 = vpop.f32.mrf.mxu1 }
 0x12f   : > { %774 = vst [vmem:[%s230_s10] sm:$0xff] %v999_v23  ;;  %775 = vst [vmem:[%s230_s10 + $0x8] sm:$0xff] %v1000_v24  ;;  %v705_v29 = vadd.f32 %v704_v25, %v321_v11  ;;  %v748_v30 = vadd.f32 %v747_v26, %v329_v12  ;;  %784 = sbr.rel (!%p1315_p9) target bundleno = 316 (0x13c), region = 40 }
 0x131   : > { %v1001_v31 = vpack.c.bf16 %v705_v29, %v703_v27  ;;  %v1002_v32 = vpack.c.bf16 %v748_v30, %v746_v28 }
 0x133   : > { %776 = vst [vmem:[%s230_s10 + $0x10] sm:$0xff] %v1001_v31  ;;  %777 = vst [vmem:[%s230_s10 + $0x18] sm:$0xff] %v1002_v32 }
 0x136   : > { %v803_v33 = vld [vmem:[%s230_s10] sm:$0xff]  ;;  %v805_v34 = vld [vmem:[%s230_s10 + $0x8] sm:$0xff] }
 0x137   : > { %804 = vst [vmem:[%s790_s20] sm:$0xff] %v803_v33  ;;  %806 = vst [vmem:[%s790_s20 + $0x8] sm:$0xff] %v805_v34 }
 0x13a   : > { %v807_v35 = vld [vmem:[%s230_s10 + $0x10] sm:$0xff]  ;;  %v809_v36 = vld [vmem:[%s230_s10 + $0x18] sm:$0xff] }
 0x13b   : > { %808 = vst [vmem:[%s790_s20 + $0x20] sm:$0xff] %v807_v35  ;;  %810 = vst [vmem:[%s790_s20 + $0x28] sm:$0xff] %v809_v36 }
 0x13c PF: > { %s16_s17 = sadd.s32 1, %s1239_s17   ;;  %s1457_s12 = smov %s1223_s13 }
 0x13d   : > { %p13_p11 = scmp.ge.s32.totalorder %s16_s17, 4   ;;  %s1458_s13 = smov %s1227_s14 }
 0x13e   : > { %s1459_s14 = smov %s1313_s24  ;;  %s1460_s15 = smov %s1235_s16 }
 0x13f   : > { %s1461_s16 = smov %s1463_s19  ;;  %15 = sbr.rel (!%p13_p11) target bundleno = 4 (0x4), region = 101 }
 0x144   :  { %826 = vsyncpa [#allocation3], 1 }
 0x145   :  { %828 = vsyncpa [#allocation3 + $0x1], 1 }

// kernel: seq2seq_forward.7
= control target key start
LH: loop header
LB: loop body
LE: loop exit
PB: predicated region body
PF: predicated region fallthrough
CT: control target
= control target key end

     0   :  { %s1324_s12 = smov 0   ;;  %s1326_s13 = smov 0   ;;  %s1608_s0 = inlined_call_operand.vmem [shape: bf16[14,256], index: 0, kind: input, shape index: {}]   ;;  %s1609_s1 = inlined_call_operand.vmem [shape: bf16[256,1024], index: 1, kind: input, shape index: {}]   ;;  %s1610_s2 = inlined_call_operand.vmem [shape: f32[1,1024], index: 2, kind: input, shape index: {}]   ;;  %s1611_s3 = inlined_call_operand.vmem [shape: bf16[14,1024], index: 3, kind: output, shape index: {}]  }
   0x1   :  { %s1328_s14 = smov 0   ;;  %s1330_s15 = smov 0  }
   0x2   :  { %s1332_s16 = smov 0  }
   0x3 LB: > { %s22_s17 = sadd.s32 1, %s1298_s15  ;;  %s1032_s18 = sadd.s32 4294967295, %s1302_s16   ;;  %s1302_s16 = sphi %s1332_s16, %s13_s16   ;;  %s1298_s15 = sphi %s1330_s15, %s1616_s15   ;;  %s1294_s14 = sphi %s1328_s14, %s1615_s14   ;;  %s1290_s13 = sphi %s1326_s13, %s1614_s13   ;;  %s1286_s12 = sphi %s1324_s12, %s1613_s12  }
   0x4   : > { %p23_p0 = scmp.ge.s32.totalorder %s22_s17, 2  ;;  %p65_p1 = scmp.ne.s32.totalorder %s1290_s13, %s1286_s12 }
   0x5   : > { %p66_p2 = scmp.eq.s32.totalorder %s1302_s16, 0  ;;  %p123_p4 = scmp.eq.s32.totalorder %s1032_s18, 1 }
   0x6   : > { %s1618_s17 = smov (%p23_p0, %s22_s17), 0  ;;  %s58_s20 = sadd.s32 1, %s1290_s13 }
   0x7   : > { %p67_p3 = por %p66_p2, %p65_p1  ;;  %s55_s19 = ssub.s32 %s1298_s15, %s1618_s17 }
   0x8   : > { %p56_p5 = scmp.eq.s32.totalorder %s55_s19, 0  ;;  %p1359_p6 = por %p123_p4, %p65_p1 }
   0x9   : > { %p1036_p7 = scmp.ge.s32.totalorder %s1302_s16, 2 }
   0xa   : > { %s1364_s22 = scalar_select %p56_p5, %s1290_s13, %s58_s20  }
   0xb   : > { %155 = sbr.rel (%p1036_p7) target bundleno = 52 (0x34), region = 20 }
  0x10   : > { %158 = sbr.rel (!%p67_p3) target bundleno = 52 (0x34), region = 24  ;;  %s160_s23 = sand.u32 (%p67_p3), 1, %s1290_s13  }
  0x11   : > { %s1119_s24 = sshll.u32 (%p67_p3), %s1298_s15, 4  ;;  %s1037_s25 = sshll.u32 (%p67_p3), %s160_s23, 9 }
  0x12   : > { %s1372_s28 = scalar_lea.vmem (%p67_p3), %s1609_s1, %s1119_s24  ;;  %s1377_s29 = scalar_lea.vmem (%p67_p3), [#allocation2], %s1037_s25 }
  0x13   : > { %v178_v0 = vld [vmem:[%s1372_s28] sm:$0xff] (%p67_p3)  ;;  %v180_v1 = vld [vmem:[%s1372_s28 + $0x8] sm:$0xff] (%p67_p3) }
  0x14   : > { %v182_v2 = vld [vmem:[%s1372_s28 + $0x20] sm:$0xff] (%p67_p3)  ;;  %179 = vst [vmem:[%s1377_s29] sm:$0xff] (%p67_p3), %v178_v0  ;;  %181 = vst [vmem:[%s1377_s29 + $0x8] sm:$0xff] (%p67_p3), %v180_v1  ;;  %v184_v3 = vld [vmem:[%s1372_s28 + $0x28] sm:$0xff] (%p67_p3) }
  0x15   : > { %183 = vst [vmem:[%s1377_s29 + $0x10] sm:$0xff] %v182_v2  ;;  %v186_v4 = vld [vmem:[%s1372_s28 + $0x40] sm:$0xff]  ;;  %v188_v5 = vld [vmem:[%s1372_s28 + $0x48] sm:$0xff]  ;;  %185 = vst [vmem:[%s1377_s29 + $0x18] sm:$0xff] %v184_v3 }
  0x16   : > { %187 = vst [vmem:[%s1377_s29 + $0x20] sm:$0xff] %v186_v4  ;;  %189 = vst [vmem:[%s1377_s29 + $0x28] sm:$0xff] %v188_v5  ;;  %v190_v6 = vld [vmem:[%s1372_s28 + $0x60] sm:$0xff]  ;;  %v192_v7 = vld [vmem:[%s1372_s28 + $0x68] sm:$0xff] }
  0x17   : > { %v194_v8 = vld [vmem:[%s1372_s28 + $0x80] sm:$0xff]  ;;  %191 = vst [vmem:[%s1377_s29 + $0x30] sm:$0xff] %v190_v6  ;;  %193 = vst [vmem:[%s1377_s29 + $0x38] sm:$0xff] %v192_v7  ;;  %v196_v9 = vld [vmem:[%s1372_s28 + $0x88] sm:$0xff] }
  0x18   : > { %195 = vst [vmem:[%s1377_s29 + $0x40] sm:$0xff] %v194_v8  ;;  %v198_v10 = vld [vmem:[%s1372_s28 + $0xa0] sm:$0xff]  ;;  %v200_v11 = vld [vmem:[%s1372_s28 + $0xa8] sm:$0xff]  ;;  %197 = vst [vmem:[%s1377_s29 + $0x48] sm:$0xff] %v196_v9 }
  0x19   : > { %199 = vst [vmem:[%s1377_s29 + $0x50] sm:$0xff] %v198_v10  ;;  %201 = vst [vmem:[%s1377_s29 + $0x58] sm:$0xff] %v200_v11  ;;  %v202_v12 = vld [vmem:[%s1372_s28 + $0xc0] sm:$0xff]  ;;  %v204_v13 = vld [vmem:[%s1372_s28 + $0xc8] sm:$0xff] }
  0x1a   : > { %v206_v14 = vld [vmem:[%s1372_s28 + $0xe0] sm:$0xff]  ;;  %203 = vst [vmem:[%s1377_s29 + $0x60] sm:$0xff] %v202_v12  ;;  %205 = vst [vmem:[%s1377_s29 + $0x68] sm:$0xff] %v204_v13  ;;  %v208_v15 = vld [vmem:[%s1372_s28 + $0xe8] sm:$0xff] }
  0x1b   : > { %207 = vst [vmem:[%s1377_s29 + $0x70] sm:$0xff] %v206_v14  ;;  %v210_v16 = vld [vmem:[%s1372_s28 + $0x100] sm:$0xff]  ;;  %v212_v17 = vld [vmem:[%s1372_s28 + $0x108] sm:$0xff]  ;;  %209 = vst [vmem:[%s1377_s29 + $0x78] sm:$0xff] %v208_v15 }
  0x1c   : > { %211 = vst [vmem:[%s1377_s29 + $0x80] sm:$0xff] %v210_v16  ;;  %213 = vst [vmem:[%s1377_s29 + $0x88] sm:$0xff] %v212_v17  ;;  %v214_v18 = vld [vmem:[%s1372_s28 + $0x120] sm:$0xff]  ;;  %v216_v19 = vld [vmem:[%s1372_s28 + $0x128] sm:$0xff] }
  0x1d   : > { %v218_v20 = vld [vmem:[%s1372_s28 + $0x140] sm:$0xff]  ;;  %215 = vst [vmem:[%s1377_s29 + $0x90] sm:$0xff] %v214_v18  ;;  %217 = vst [vmem:[%s1377_s29 + $0x98] sm:$0xff] %v216_v19  ;;  %v220_v21 = vld [vmem:[%s1372_s28 + $0x148] sm:$0xff] }
  0x1e   : > { %219 = vst [vmem:[%s1377_s29 + $0xa0] sm:$0xff] %v218_v20  ;;  %v222_v22 = vld [vmem:[%s1372_s28 + $0x160] sm:$0xff]  ;;  %v224_v23 = vld [vmem:[%s1372_s28 + $0x168] sm:$0xff]  ;;  %221 = vst [vmem:[%s1377_s29 + $0xa8] sm:$0xff] %v220_v21 }
  0x1f   : > { %223 = vst [vmem:[%s1377_s29 + $0xb0] sm:$0xff] %v222_v22  ;;  %225 = vst [vmem:[%s1377_s29 + $0xb8] sm:$0xff] %v224_v23  ;;  %v226_v24 = vld [vmem:[%s1372_s28 + $0x180] sm:$0xff]  ;;  %v228_v25 = vld [vmem:[%s1372_s28 + $0x188] sm:$0xff] }
  0x20   : > { %v230_v26 = vld [vmem:[%s1372_s28 + $0x1a0] sm:$0xff]  ;;  %227 = vst [vmem:[%s1377_s29 + $0xc0] sm:$0xff] %v226_v24  ;;  %229 = vst [vmem:[%s1377_s29 + $0xc8] sm:$0xff] %v228_v25  ;;  %v232_v27 = vld [vmem:[%s1372_s28 + $0x1a8] sm:$0xff] }
  0x21   : > { %231 = vst [vmem:[%s1377_s29 + $0xd0] sm:$0xff] %v230_v26  ;;  %v234_v28 = vld [vmem:[%s1372_s28 + $0x1c0] sm:$0xff]  ;;  %v236_v29 = vld [vmem:[%s1372_s28 + $0x1c8] sm:$0xff]  ;;  %233 = vst [vmem:[%s1377_s29 + $0xd8] sm:$0xff] %v232_v27 }
  0x22   : > { %235 = vst [vmem:[%s1377_s29 + $0xe0] sm:$0xff] %v234_v28  ;;  %237 = vst [vmem:[%s1377_s29 + $0xe8] sm:$0xff] %v236_v29  ;;  %v238_v30 = vld [vmem:[%s1372_s28 + $0x1e0] sm:$0xff]  ;;  %v240_v31 = vld [vmem:[%s1372_s28 + $0x1e8] sm:$0xff] }
  0x23   : > { %v242_v32 = vld [vmem:[%s1372_s28 + $0x200] sm:$0xff]  ;;  %239 = vst [vmem:[%s1377_s29 + $0xf0] sm:$0xff] %v238_v30  ;;  %241 = vst [vmem:[%s1377_s29 + $0xf8] sm:$0xff] %v240_v31  ;;  %v244_v33 = vld [vmem:[%s1372_s28 + $0x208] sm:$0xff] }
  0x24   : > { %243 = vst [vmem:[%s1377_s29 + $0x100] sm:$0xff] %v242_v32  ;;  %v246_v34 = vld [vmem:[%s1372_s28 + $0x220] sm:$0xff]  ;;  %v248_v35 = vld [vmem:[%s1372_s28 + $0x228] sm:$0xff]  ;;  %245 = vst [vmem:[%s1377_s29 + $0x108] sm:$0xff] %v244_v33 }
  0x25   : > { %247 = vst [vmem:[%s1377_s29 + $0x110] sm:$0xff] %v246_v34  ;;  %249 = vst [vmem:[%s1377_s29 + $0x118] sm:$0xff] %v248_v35  ;;  %v250_v36 = vld [vmem:[%s1372_s28 + $0x240] sm:$0xff]  ;;  %v252_v37 = vld [vmem:[%s1372_s28 + $0x248] sm:$0xff] }
  0x26   : > { %v254_v38 = vld [vmem:[%s1372_s28 + $0x260] sm:$0xff]  ;;  %251 = vst [vmem:[%s1377_s29 + $0x120] sm:$0xff] %v250_v36  ;;  %253 = vst [vmem:[%s1377_s29 + $0x128] sm:$0xff] %v252_v37  ;;  %v256_v39 = vld [vmem:[%s1372_s28 + $0x268] sm:$0xff] }
  0x27   : > { %255 = vst [vmem:[%s1377_s29 + $0x130] sm:$0xff] %v254_v38  ;;  %v258_v40 = vld [vmem:[%s1372_s28 + $0x280] sm:$0xff]  ;;  %v260_v41 = vld [vmem:[%s1372_s28 + $0x288] sm:$0xff]  ;;  %257 = vst [vmem:[%s1377_s29 + $0x138] sm:$0xff] %v256_v39 }
  0x28   : > { %259 = vst [vmem:[%s1377_s29 + $0x140] sm:$0xff] %v258_v40  ;;  %261 = vst [vmem:[%s1377_s29 + $0x148] sm:$0xff] %v260_v41  ;;  %v262_v42 = vld [vmem:[%s1372_s28 + $0x2a0] sm:$0xff]  ;;  %v264_v43 = vld [vmem:[%s1372_s28 + $0x2a8] sm:$0xff] }
  0x29   : > { %v266_v44 = vld [vmem:[%s1372_s28 + $0x2c0] sm:$0xff]  ;;  %263 = vst [vmem:[%s1377_s29 + $0x150] sm:$0xff] %v262_v42  ;;  %265 = vst [vmem:[%s1377_s29 + $0x158] sm:$0xff] %v264_v43  ;;  %v268_v45 = vld [vmem:[%s1372_s28 + $0x2c8] sm:$0xff] }
  0x2a   : > { %267 = vst [vmem:[%s1377_s29 + $0x160] sm:$0xff] %v266_v44  ;;  %v270_v46 = vld [vmem:[%s1372_s28 + $0x2e0] sm:$0xff]  ;;  %v272_v47 = vld [vmem:[%s1372_s28 + $0x2e8] sm:$0xff]  ;;  %269 = vst [vmem:[%s1377_s29 + $0x168] sm:$0xff] %v268_v45 }
  0x2b   : > { %271 = vst [vmem:[%s1377_s29 + $0x170] sm:$0xff] %v270_v46  ;;  %273 = vst [vmem:[%s1377_s29 + $0x178] sm:$0xff] %v272_v47  ;;  %v274_v48 = vld [vmem:[%s1372_s28 + $0x300] sm:$0xff]  ;;  %v276_v49 = vld [vmem:[%s1372_s28 + $0x308] sm:$0xff] }
  0x2c   : > { %v278_v50 = vld [vmem:[%s1372_s28 + $0x320] sm:$0xff]  ;;  %275 = vst [vmem:[%s1377_s29 + $0x180] sm:$0xff] %v274_v48  ;;  %277 = vst [vmem:[%s1377_s29 + $0x188] sm:$0xff] %v276_v49  ;;  %v280_v51 = vld [vmem:[%s1372_s28 + $0x328] sm:$0xff] }
  0x2d   : > { %279 = vst [vmem:[%s1377_s29 + $0x190] sm:$0xff] %v278_v50  ;;  %v282_v52 = vld [vmem:[%s1372_s28 + $0x340] sm:$0xff]  ;;  %v284_v53 = vld [vmem:[%s1372_s28 + $0x348] sm:$0xff]  ;;  %281 = vst [vmem:[%s1377_s29 + $0x198] sm:$0xff] %v280_v51 }
  0x2e   : > { %283 = vst [vmem:[%s1377_s29 + $0x1a0] sm:$0xff] %v282_v52  ;;  %285 = vst [vmem:[%s1377_s29 + $0x1a8] sm:$0xff] %v284_v53  ;;  %v286_v54 = vld [vmem:[%s1372_s28 + $0x360] sm:$0xff]  ;;  %v288_v55 = vld [vmem:[%s1372_s28 + $0x368] sm:$0xff] }
  0x2f   : > { %v290_v56 = vld [vmem:[%s1372_s28 + $0x380] sm:$0xff]  ;;  %287 = vst [vmem:[%s1377_s29 + $0x1b0] sm:$0xff] %v286_v54  ;;  %289 = vst [vmem:[%s1377_s29 + $0x1b8] sm:$0xff] %v288_v55  ;;  %v292_v57 = vld [vmem:[%s1372_s28 + $0x388] sm:$0xff] }
  0x30   : > { %291 = vst [vmem:[%s1377_s29 + $0x1c0] sm:$0xff] %v290_v56  ;;  %v294_v58 = vld [vmem:[%s1372_s28 + $0x3a0] sm:$0xff]  ;;  %v296_v59 = vld [vmem:[%s1372_s28 + $0x3a8] sm:$0xff]  ;;  %293 = vst [vmem:[%s1377_s29 + $0x1c8] sm:$0xff] %v292_v57 }
  0x31   : > { %295 = vst [vmem:[%s1377_s29 + $0x1d0] sm:$0xff] %v294_v58  ;;  %297 = vst [vmem:[%s1377_s29 + $0x1d8] sm:$0xff] %v296_v59  ;;  %v298_v60 = vld [vmem:[%s1372_s28 + $0x3c0] sm:$0xff]  ;;  %v300_v61 = vld [vmem:[%s1372_s28 + $0x3c8] sm:$0xff] }
  0x32   : > { %v302_v62 = vld [vmem:[%s1372_s28 + $0x3e0] sm:$0xff]  ;;  %299 = vst [vmem:[%s1377_s29 + $0x1e0] sm:$0xff] %v298_v60  ;;  %301 = vst [vmem:[%s1377_s29 + $0x1e8] sm:$0xff] %v300_v61  ;;  %v304_v63 = vld [vmem:[%s1372_s28 + $0x3e8] sm:$0xff] }
  0x33   : > { %303 = vst [vmem:[%s1377_s29 + $0x1f0] sm:$0xff] %v302_v62  ;;  %305 = vst [vmem:[%s1377_s29 + $0x1f8] sm:$0xff] %v304_v63 }
  0x34 PF: > { %p1040_p8 = scmp.ge.s32.totalorder %s1302_s16, 1  ;;  %p318_p9 = scmp.lt.s32.totalorder %s1302_s16, 3 }
  0x36   : > { %p319_p10 = pnand %p1040_p8, %p318_p9 }
  0x37   : > { %s325_s30 = sand.u32 (!%p319_p10), 1, %s1286_s12   ;;  %s1043_s10 = sshll.u32 (!%p319_p10), %s1294_s14, 2 }
  0x38   : > { %322 = sbr.rel (%p319_p10) target bundleno = 339 (0x153), region = 51  ;;  %s1041_s4 = sshll.u32 (!%p319_p10), %s325_s30, 9 }
  0x39   : > { %s1512_s7 = scalar_lea.vmem (!%p319_p10), [#allocation2], %s1041_s4  ;;  %p366_p11 = scmp.lt.s32.totalorder (!%p319_p10), %s1043_s10, 7 }
  0x3a   : > { %s1042_s20 = sshll.u32 (!%p319_p10), %s325_s30, 5 }
  0x3b   : > { %s356_s23 = scalar_lea.vmem (!%p319_p10), [#allocation3], %s1042_s20 }
  0x3d   : > { %v1263_v0 = vld [vmem:[%s1608_s0 + $0x4] ss:$8 sps:$4 sm:$0x7f]   ;;  %v1169_v3 = vld [vmem:[%s1512_s7 + $0xe0] ss:$16 sps:$4 sm:$0xff]   ;;  %s1620_s10 = smov (!%p366_p11, %s1043_s10), 7 }
  0x3e   : > { %v1165_v1 = vld [vmem:[%s1512_s7 + $0xe4] ss:$16 sps:$4 sm:$0xff]   ;;  %v1167_v2 = vld [vmem:[%s1512_s7 + $0xec] ss:$16 sps:$4 sm:$0xff]   ;;  %822 = vmatprep.mubr.bf16.mxu0 %v1263_v0  ;;  %865 = vmatprep.mubr.bf16.mxu1 %v1263_v0  ;;  %v1170_v4 = vld [vmem:[%s1512_s7 + $0xe8] ss:$16 sps:$4 sm:$0xff]   ;;  %s368_s19 = scalar_lea.vmem %s1610_s2, %s1620_s10 }
  0x3f   : > { %790 = vmatprep.subr.bf16.mxu0 %v1165_v1  ;;  %833 = vmatprep.subr.bf16.mxu1 %v1167_v2  ;;  %v1171_v5 = vld [vmem:[%s1512_s7 + $0xc4] ss:$16 sps:$4 sm:$0xff]   ;;  %v1173_v6 = vld [vmem:[%s1512_s7 + $0xcc] ss:$16 sps:$4 sm:$0xff]   ;;  %v1175_v7 = vld [vmem:[%s1512_s7 + $0xc0] ss:$16 sps:$4 sm:$0xff]   ;;  %v440_v2 = vlaneseq }
  0x40   : > { %791 = vmatpush1.bf16.msra.mxu0 %v1169_v3  ;;  %834 = vmatpush1.bf16.msra.mxu1 %v1170_v4  ;;  %v1176_v8 = vld [vmem:[%s1512_s7 + $0xc8] ss:$16 sps:$4 sm:$0xff]   ;;  %v1177_v9 = vld [vmem:[%s1512_s7 + $0xa4] ss:$16 sps:$4 sm:$0xff]   ;;  %v1179_v10 = vld [vmem:[%s1512_s7 + $0xac] ss:$16 sps:$4 sm:$0xff]  }
  0x41   : > { %792 = vmatprep.subr.bf16.mxu0 %v1171_v5  ;;  %835 = vmatprep.subr.bf16.mxu1 %v1173_v6  ;;  %v1181_v11 = vld [vmem:[%s1512_s7 + $0xa0] ss:$16 sps:$4 sm:$0xff]   ;;  %v1182_v12 = vld [vmem:[%s1512_s7 + $0xa8] ss:$16 sps:$4 sm:$0xff]   ;;  %v1183_v13 = vld [vmem:[%s1512_s7 + $0x84] ss:$16 sps:$4 sm:$0xff]  }
  0x42   : > { %v1185_v14 = vld [vmem:[%s1512_s7 + $0x8c] ss:$16 sps:$4 sm:$0xff]   ;;  %v1187_v15 = vld [vmem:[%s1512_s7 + $0x80] ss:$16 sps:$4 sm:$0xff]   ;;  %v1188_v16 = vld [vmem:[%s1512_s7 + $0x88] ss:$16 sps:$4 sm:$0xff]  }
  0x43   : > { %v1189_v17 = vld [vmem:[%s1512_s7 + $0x64] ss:$16 sps:$4 sm:$0xff]   ;;  %v1191_v18 = vld [vmem:[%s1512_s7 + $0x6c] ss:$16 sps:$4 sm:$0xff]   ;;  %v1193_v19 = vld [vmem:[%s1512_s7 + $0x60] ss:$16 sps:$4 sm:$0xff]  }
  0x44   : > { %793 = vmatpush1.bf16.msra.mxu0 %v1175_v7  ;;  %836 = vmatpush1.bf16.msra.mxu1 %v1176_v8  ;;  %v1194_v20 = vld [vmem:[%s1512_s7 + $0x68] ss:$16 sps:$4 sm:$0xff]   ;;  %v1195_v21 = vld [vmem:[%s1512_s7 + $0x44] ss:$16 sps:$4 sm:$0xff]   ;;  %v1197_v22 = vld [vmem:[%s1512_s7 + $0x4c] ss:$16 sps:$4 sm:$0xff]  }
  0x45   : > { %794 = vmatprep.subr.bf16.mxu0 %v1177_v9  ;;  %837 = vmatprep.subr.bf16.mxu1 %v1179_v10  ;;  %v1199_v23 = vld [vmem:[%s1512_s7 + $0x40] ss:$16 sps:$4 sm:$0xff]   ;;  %v1200_v24 = vld [vmem:[%s1512_s7 + $0x48] ss:$16 sps:$4 sm:$0xff]   ;;  %v1201_v25 = vld [vmem:[%s1512_s7 + $0x24] ss:$16 sps:$4 sm:$0xff]  }
  0x46   : > { %v1203_v26 = vld [vmem:[%s1512_s7 + $0x2c] ss:$16 sps:$4 sm:$0xff]   ;;  %v1205_v27 = vld [vmem:[%s1512_s7 + $0x20] ss:$16 sps:$4 sm:$0xff]   ;;  %v1206_v28 = vld [vmem:[%s1512_s7 + $0x28] ss:$16 sps:$4 sm:$0xff]  }
  0x47   : > { %v1207_v29 = vld [vmem:[%s1512_s7 + $0x4] ss:$16 sps:$4 sm:$0xff]   ;;  %v1209_v30 = vld [vmem:[%s1512_s7 + $0xc] ss:$16 sps:$4 sm:$0xff]   ;;  %v1211_v31 = vld [vmem:[%s1512_s7] ss:$16 sps:$4 sm:$0xff]  }
  0x48   : > { %795 = vmatpush1.bf16.msra.mxu0 %v1181_v11  ;;  %838 = vmatpush1.bf16.msra.mxu1 %v1182_v12  ;;  %v1212_v32 = vld [vmem:[%s1512_s7 + $0x8] ss:$16 sps:$4 sm:$0xff]   ;;  %v1213_v33 = vld [vmem:[%s1512_s7 + $0x1e4] ss:$16 sps:$4 sm:$0xff]   ;;  %v1215_v34 = vld [vmem:[%s1512_s7 + $0x1ec] ss:$16 sps:$4 sm:$0xff]  }
  0x49   : > { %796 = vmatprep.subr.bf16.mxu0 %v1183_v13  ;;  %839 = vmatprep.subr.bf16.mxu1 %v1185_v14  ;;  %v1217_v35 = vld [vmem:[%s1512_s7 + $0x1e0] ss:$16 sps:$4 sm:$0xff]   ;;  %v1218_v36 = vld [vmem:[%s1512_s7 + $0x1e8] ss:$16 sps:$4 sm:$0xff]   ;;  %v1219_v37 = vld [vmem:[%s1512_s7 + $0x1c4] ss:$16 sps:$4 sm:$0xff]  }
  0x4a   : > { %v1221_v38 = vld [vmem:[%s1512_s7 + $0x1cc] ss:$16 sps:$4 sm:$0xff]   ;;  %v1223_v39 = vld [vmem:[%s1512_s7 + $0x1c0] ss:$16 sps:$4 sm:$0xff]   ;;  %v1224_v40 = vld [vmem:[%s1512_s7 + $0x1c8] ss:$16 sps:$4 sm:$0xff]  }
  0x4b   : > { %v1225_v41 = vld [vmem:[%s1512_s7 + $0x1a4] ss:$16 sps:$4 sm:$0xff]   ;;  %v1227_v42 = vld [vmem:[%s1512_s7 + $0x1ac] ss:$16 sps:$4 sm:$0xff]   ;;  %v1229_v43 = vld [vmem:[%s1512_s7 + $0x1a0] ss:$16 sps:$4 sm:$0xff]  }
  0x4c   : > { %797 = vmatpush1.bf16.msra.mxu0 %v1187_v15  ;;  %840 = vmatpush1.bf16.msra.mxu1 %v1188_v16  ;;  %v1230_v44 = vld [vmem:[%s1512_s7 + $0x1a8] ss:$16 sps:$4 sm:$0xff]   ;;  %v1231_v45 = vld [vmem:[%s1512_s7 + $0x184] ss:$16 sps:$4 sm:$0xff]   ;;  %v1233_v46 = vld [vmem:[%s1512_s7 + $0x18c] ss:$16 sps:$4 sm:$0xff]  }
  0x4d   : > { %798 = vmatprep.subr.bf16.mxu0 %v1189_v17  ;;  %841 = vmatprep.subr.bf16.mxu1 %v1191_v18  ;;  %v1235_v47 = vld [vmem:[%s1512_s7 + $0x180] ss:$16 sps:$4 sm:$0xff]   ;;  %v1236_v48 = vld [vmem:[%s1512_s7 + $0x188] ss:$16 sps:$4 sm:$0xff]   ;;  %v1237_v49 = vld [vmem:[%s1512_s7 + $0x164] ss:$16 sps:$4 sm:$0xff]  }
  0x4e   : > { %v1239_v50 = vld [vmem:[%s1512_s7 + $0x16c] ss:$16 sps:$4 sm:$0xff]   ;;  %v1241_v51 = vld [vmem:[%s1512_s7 + $0x160] ss:$16 sps:$4 sm:$0xff]   ;;  %v1242_v52 = vld [vmem:[%s1512_s7 + $0x168] ss:$16 sps:$4 sm:$0xff]  }
  0x4f   : > { %v1243_v53 = vld [vmem:[%s1512_s7 + $0x144] ss:$16 sps:$4 sm:$0xff]   ;;  %v1245_v54 = vld [vmem:[%s1512_s7 + $0x14c] ss:$16 sps:$4 sm:$0xff]   ;;  %v1247_v55 = vld [vmem:[%s1512_s7 + $0x140] ss:$16 sps:$4 sm:$0xff]  }
  0x50   : > { %799 = vmatpush1.bf16.msra.mxu0 %v1193_v19  ;;  %842 = vmatpush1.bf16.msra.mxu1 %v1194_v20  ;;  %v1248_v56 = vld [vmem:[%s1512_s7 + $0x148] ss:$16 sps:$4 sm:$0xff]   ;;  %v1249_v57 = vld [vmem:[%s1512_s7 + $0x124] ss:$16 sps:$4 sm:$0xff]   ;;  %v1251_v58 = vld [vmem:[%s1512_s7 + $0x12c] ss:$16 sps:$4 sm:$0xff]  }
  0x51   : > { %800 = vmatprep.subr.bf16.mxu0 %v1195_v21  ;;  %843 = vmatprep.subr.bf16.mxu1 %v1197_v22  ;;  %v1253_v59 = vld [vmem:[%s1512_s7 + $0x120] ss:$16 sps:$4 sm:$0xff]   ;;  %v1254_v60 = vld [vmem:[%s1512_s7 + $0x128] ss:$16 sps:$4 sm:$0xff]   ;;  %v1255_v61 = vld [vmem:[%s1512_s7 + $0x104] ss:$16 sps:$4 sm:$0xff]  }
  0x52   : > { %v1257_v62 = vld [vmem:[%s1512_s7 + $0x10c] ss:$16 sps:$4 sm:$0xff]   ;;  %v1259_v63 = vld [vmem:[%s1512_s7 + $0x100] ss:$16 sps:$4 sm:$0xff]   ;;  %v1260_v0 = vld [vmem:[%s1512_s7 + $0x108] ss:$16 sps:$4 sm:$0xff]  }
  0x53   : > { %v1261_v1 = vld [vmem:[%s1608_s0] ss:$8 sps:$4 sm:$0x7f]   ;;  %v441_v3 = vshrl.u32 %v440_v2, 7  ;;  %s1124_s12 = sshll.u32 (%p1359_p6), %s1294_s14, 4 }
  0x54   : > { %801 = vmatpush1.bf16.msra.mxu0 %v1199_v23  ;;  %844 = vmatpush1.bf16.msra.mxu1 %v1200_v24  ;;  %v438_v8 = vld [vmem:[%s368_s19] sm:$0xf]  ;;  %s916_s26 = scalar_lea.vmem (%p1359_p6), %s1611_s3, %s1124_s12 }
  0x55   : > { %802 = vmatprep.subr.bf16.mxu0 %v1201_v25  ;;  %845 = vmatprep.subr.bf16.mxu1 %v1203_v26  ;;  %v442_v4 = vsub.s32 0, %v441_v3  ;;  %v450_v5 = vsub.s32 2, %v441_v3  ;;  %v446_v6 = vsub.s32 1, %v441_v3  ;;  %v454_v7 = vsub.s32 3, %v441_v3 }
  0x57   : > { %v443_v9 = vrot.slane %v438_v8, %v442_v4  ;;  %v451_v10 = vrot.slane %v438_v8, %v450_v5  ;;  %v447_v11 = vrot.slane %v438_v8, %v446_v6  ;;  %v455_v12 = vrot.slane %v438_v8, %v454_v7 }
  0x58   : > { %803 = vmatpush1.bf16.msra.mxu0 %v1205_v27  ;;  %846 = vmatpush1.bf16.msra.mxu1 %v1206_v28 }
  0x59   : > { %804 = vmatprep.subr.bf16.mxu0 %v1207_v29  ;;  %847 = vmatprep.subr.bf16.mxu1 %v1209_v30 }
  0x5c   : > { %805 = vmatpush1.bf16.msra.mxu0 %v1211_v31  ;;  %848 = vmatpush1.bf16.msra.mxu1 %v1212_v32 }
  0x5d   : > { %806 = vmatprep.subr.bf16.mxu0 %v1213_v33  ;;  %849 = vmatprep.subr.bf16.mxu1 %v1215_v34 }
  0x60   : > { %807 = vmatpush2.bf16.msra.mxu0 %v1217_v35  ;;  %850 = vmatpush2.bf16.msra.mxu1 %v1218_v36 }
  0x61   : > { %808 = vmatprep.subr.bf16.mxu0 %v1219_v37  ;;  %851 = vmatprep.subr.bf16.mxu1 %v1221_v38 }
  0x64   : > { %809 = vmatpush2.bf16.msra.mxu0 %v1223_v39  ;;  %852 = vmatpush2.bf16.msra.mxu1 %v1224_v40 }
  0x65   : > { %810 = vmatprep.subr.bf16.mxu0 %v1225_v41  ;;  %853 = vmatprep.subr.bf16.mxu1 %v1227_v42 }
  0x68   : > { %811 = vmatpush2.bf16.msra.mxu0 %v1229_v43  ;;  %854 = vmatpush2.bf16.msra.mxu1 %v1230_v44 }
  0x69   : > { %812 = vmatprep.subr.bf16.mxu0 %v1231_v45  ;;  %855 = vmatprep.subr.bf16.mxu1 %v1233_v46 }
  0x6c   : > { %813 = vmatpush2.bf16.msra.mxu0 %v1235_v47  ;;  %856 = vmatpush2.bf16.msra.mxu1 %v1236_v48 }
  0x6d   : > { %814 = vmatprep.subr.bf16.mxu0 %v1237_v49  ;;  %857 = vmatprep.subr.bf16.mxu1 %v1239_v50 }
  0x70   : > { %815 = vmatpush2.bf16.msra.mxu0 %v1241_v51  ;;  %858 = vmatpush2.bf16.msra.mxu1 %v1242_v52 }
  0x71   : > { %816 = vmatprep.subr.bf16.mxu0 %v1243_v53  ;;  %859 = vmatprep.subr.bf16.mxu1 %v1245_v54 }
  0x74   : > { %817 = vmatpush2.bf16.msra.mxu0 %v1247_v55  ;;  %860 = vmatpush2.bf16.msra.mxu1 %v1248_v56 }
  0x75   : > { %818 = vmatprep.subr.bf16.mxu0 %v1249_v57  ;;  %861 = vmatprep.subr.bf16.mxu1 %v1251_v58 }
  0x78   : > { %819 = vmatpush2.bf16.msra.mxu0 %v1253_v59  ;;  %862 = vmatpush2.bf16.msra.mxu1 %v1254_v60 }
  0x79   : > { %820 = vmatprep.subr.bf16.mxu0 %v1255_v61  ;;  %863 = vmatprep.subr.bf16.mxu1 %v1257_v62 }
  0x7c   : > { %821 = vmatpush2.bf16.msra.mxu0 %v1259_v63  ;;  %864 = vmatpush2.bf16.msra.mxu1 %v1260_v0 }
  0x7f   : > { %823 = vmatmul.mubr.bf16.vlgmr.msra.gmra.mxu0 %v1261_v1  ;;  %866 = vmatmul.mubr.bf16.vlgmr.msra.gmra.mxu1 %v1261_v1 }
 0x13f   : > { %v824_v13 = vpop.f32.mrf.mxu0  ;;  %v867_v14 = vpop.f32.mrf.mxu1 }
 0x140   : > { %v825_v17 = vadd.f32 %v824_v13, %v443_v9  ;;  %v868_v18 = vadd.f32 %v867_v14, %v451_v10 }
 0x141   : > { %v826_v15 = vpop.f32.mrf.mxu0  ;;  %v869_v16 = vpop.f32.mrf.mxu1 }
 0x142   : > { %v827_v19 = vadd.f32 %v826_v15, %v447_v11  ;;  %v870_v20 = vadd.f32 %v869_v16, %v455_v12 }
 0x143   : > { %v828_v21 = vpop.f32.mrf.mxu0  ;;  %v871_v22 = vpop.f32.mrf.mxu1 }
 0x144   : > { %v1120_v23 = vpack.c.bf16 %v827_v19, %v825_v17  ;;  %v1121_v24 = vpack.c.bf16 %v870_v20, %v868_v18  ;;  %v829_v27 = vadd.f32 %v828_v21, %v443_v9  ;;  %v872_v28 = vadd.f32 %v871_v22, %v451_v10 }
 0x145   : > { %v830_v25 = vpop.f32.mrf.mxu0  ;;  %v873_v26 = vpop.f32.mrf.mxu1 }
 0x146   : > { %900 = vst [vmem:[%s356_s23] sm:$0xff] %v1120_v23  ;;  %901 = vst [vmem:[%s356_s23 + $0x8] sm:$0xff] %v1121_v24  ;;  %v831_v29 = vadd.f32 %v830_v25, %v447_v11  ;;  %v874_v30 = vadd.f32 %v873_v26, %v455_v12  ;;  %910 = sbr.rel (!%p1359_p6) target bundleno = 339 (0x153), region = 59 }
 0x148   : > { %v1122_v31 = vpack.c.bf16 %v831_v29, %v829_v27  ;;  %v1123_v32 = vpack.c.bf16 %v874_v30, %v872_v28 }
 0x14a   : > { %902 = vst [vmem:[%s356_s23 + $0x10] sm:$0x77] %v1122_v31  ;;  %903 = vst [vmem:[%s356_s23 + $0x18] sm:$0x77] %v1123_v32 }
 0x14d   : > { %v929_v33 = vld [vmem:[%s356_s23] sm:$0xff]  ;;  %v931_v34 = vld [vmem:[%s356_s23 + $0x8] sm:$0xff] }
 0x14e   : > { %930 = vst [vmem:[%s916_s26] sm:$0xff] %v929_v33  ;;  %932 = vst [vmem:[%s916_s26 + $0x8] sm:$0xff] %v931_v34 }
 0x151   : > { %v933_v35 = vld [vmem:[%s356_s23 + $0x10] sm:$0xff]  ;;  %v935_v36 = vld [vmem:[%s356_s23 + $0x18] sm:$0xff] }
 0x152   : > { %934 = vst [vmem:[%s916_s26 + $0x20] sm:$0xff] %v933_v35  ;;  %936 = vst [vmem:[%s916_s26 + $0x28] sm:$0xff] %v935_v36 }
 0x153 PF: > { %s13_s16 = sadd.s32 1, %s1302_s16   ;;  %s1613_s12 = smov %s1290_s13 }
 0x154   : > { %p10_p12 = scmp.ge.s32.totalorder %s13_s16, 4   ;;  %s1614_s13 = smov %s1364_s22 }
 0x155   : > { %s1615_s14 = smov %s1298_s15  ;;  %s1616_s15 = smov %s1618_s17 }
 0x156   :  { %12 = sbr.rel (!%p10_p12) target bundleno = 3 (0x3), region = 119 }

// kernel: seq2seq_forward.6
= control target key start
LH: loop header
LB: loop body
LE: loop exit
PB: predicated region body
PF: predicated region fallthrough
CT: control target
= control target key end

     0   :  { %s2210_s21 = smov 0   ;;  %s2212_s22 = smov 0   ;;  %s2803_s0 = inlined_call_operand.vmem [shape: bf16[8,2,1024], index: 0, kind: input, shape index: {}]   ;;  %s2804_s1 = inlined_call_operand.vmem [shape: s32[2,1], index: 1, kind: input, shape index: {}]   ;;  %s2805_s2 = inlined_call_operand.vmem [shape: f32[2,128], index: 2, kind: input, shape index: {}, may-alias: {2,3}]   ;;  %s2806_s3 = inlined_call_operand.vmem [shape: f32[2,128], index: 3, kind: input, shape index: {}, may-alias: {2,3}]   ;;  %s2807_s4 = inlined_call_operand.vmem [shape: bf16[2,128,512], index: 4, kind: input, shape index: {}]   ;;  %s2808_s5 = inlined_call_operand.vmem [shape: f32[2,2,128], index: 5, kind: output, shape index: {0}]   ;;  %s2809_s6 = inlined_call_operand.vmem [shape: f32[2,2,128], index: 6, kind: output, shape index: {1}]  }
   0x1   :  { %s2214_s23 = smov 0   ;;  %s2216_s24 = smov 0  }
   0x2   :  { %s2218_s25 = smov 0  }
   0x3 LB: > { %s29_s26 = sadd.s32 1, %s2167_s24  ;;  %p53_p1 = scmp.ne.s32.totalorder %s2159_s22, %s2155_s21  ;;  %s2171_s25 = sphi %s2218_s25, %s17_s25   ;;  %s2167_s24 = sphi %s2216_s24, %s2813_s24   ;;  %s2163_s23 = sphi %s2214_s23, %s2812_s23   ;;  %s2159_s22 = sphi %s2212_s22, %s2811_s22   ;;  %s2155_s21 = sphi %s2210_s21, %s2810_s21  }
   0x4   : > { %p31_p0 = scmp.ge.s32.totalorder %s29_s26, 2  ;;  %p54_p2 = scmp.eq.s32.totalorder %s2171_s25, 0 }
   0x5   : > { %s46_s28 = sadd.s32 1, %s2159_s22  ;;  %p1879_p5 = scmp.ge.s32.totalorder %s2171_s25, 2 }
   0x6   : > { %s2815_s26 = smov (%p31_p0, %s29_s26), 0  ;;  %p55_p3 = por %p54_p2, %p53_p1 }
   0x7   : > { %s42_s27 = ssub.s32 %s2167_s24, %s2815_s26  ;;  %229 = sbr.rel (%p1879_p5) target bundleno = 21 (0x15), region = 28 }
   0x8   : > { %p44_p4 = scmp.eq.s32.totalorder %s42_s27, 0 }
   0xa   : > { %s2245_s29 = scalar_select %p44_p4, %s2159_s22, %s46_s28  }
   0xc   : > { %232 = sbr.rel (!%p55_p3) target bundleno = 21 (0x15), region = 32  ;;  %s234_s30 = sand.u32 (%p55_p3), 1, %s2159_s22  }
   0xd   : > { %s1881_s7 = sshll.u32 (%p55_p3), %s2167_s24, 2  ;;  %s1880_s8 = sshll.u32 (%p55_p3), %s234_s30, 5 }
   0xe   : > { %s245_s11 = scalar_lea.vmem (%p55_p3), %s2803_s0, %s1881_s7  ;;  %s236_s12 = scalar_lea.vmem (%p55_p3), [#allocation4], %s1880_s8 }
   0xf   : > { %v262_v0 = vld [vmem:[%s245_s11] sm:$0xf] (%p55_p3)  ;;  %v264_v1 = vld [vmem:[%s245_s11 + $0x8] sm:$0xf] (%p55_p3)  ;;  %v266_v2 = vld [vmem:[%s245_s11 + $0x10] sm:$0xf] (%p55_p3) }
  0x10   : > { %263 = vst [vmem:[%s236_s12] sm:$0xf] (%p55_p3), %v262_v0  ;;  %265 = vst [vmem:[%s236_s12 + $0x4] sm:$0xf] (%p55_p3), %v264_v1  ;;  %v268_v3 = vld [vmem:[%s245_s11 + $0x18] sm:$0xf] (%p55_p3) }
  0x11   : > { %v270_v4 = vld [vmem:[%s245_s11 + $0x20] sm:$0xf]  ;;  %267 = vst [vmem:[%s236_s12 + $0x8] sm:$0xf] %v266_v2  ;;  %269 = vst [vmem:[%s236_s12 + $0xc] sm:$0xf] %v268_v3 }
  0x12   : > { %271 = vst [vmem:[%s236_s12 + $0x10] sm:$0xf] %v270_v4  ;;  %v272_v5 = vld [vmem:[%s245_s11 + $0x28] sm:$0xf]  ;;  %v274_v6 = vld [vmem:[%s245_s11 + $0x30] sm:$0xf] }
  0x13   : > { %v276_v7 = vld [vmem:[%s245_s11 + $0x38] sm:$0xf]  ;;  %273 = vst [vmem:[%s236_s12 + $0x14] sm:$0xf] %v272_v5  ;;  %275 = vst [vmem:[%s236_s12 + $0x18] sm:$0xf] %v274_v6 }
  0x14   : > { %277 = vst [vmem:[%s236_s12 + $0x1c] sm:$0xf] %v276_v7 }
  0x15 PF: > { %p1882_p6 = scmp.ge.s32.totalorder %s2171_s25, 1  ;;  %p324_p7 = scmp.lt.s32.totalorder %s2171_s25, 3 }
  0x17   : > { %p325_p8 = pnand %p1882_p6, %p324_p7 }
  0x18   : > { %p374_p9 = scmp.lt.s32.totalorder (!%p325_p8), %s2163_s23, 1  ;;  %s404_s17 = smul.u32 (!%p325_p8), 7, %s2163_s23 }
  0x19   : > { %328 = sbr.rel (%p325_p8) target bundleno = 2146 (0x862), region = 77  ;;  %s1162_s18 = ssub.s32 (!%p325_p8), 4, %s2163_s23 }
  0x1a   : > { %s737_s20 = smul.u32 (!%p325_p8), 5, %s2163_s23  ;;  %s331_s13 = sand.u32 (!%p325_p8), 1, %s2155_s21  }
  0x1b   : > { %s1445_s9 = smul.u32 (!%p325_p8), 4294967291, %s2163_s23  ;;  %s1883_s14 = sshll.u32 (!%p325_p8), %s331_s13, 5 }
  0x1c   : > { %s738_s8 = sadd.s32 (!%p325_p8), 1, %s737_s20  ;;  %s1888_s15 = smul.u32 (!%p325_p8), 28, %s2163_s23 }
  0x1d   : > { %s1446_s10 = sadd.s32 (!%p325_p8), 6, %s1445_s9  ;;  %s2464_s16 = scalar_lea.vmem (!%p325_p8), [#allocation4], %s1883_s14 }
  0x1e   : > { %v392_v8 = vld [vmem:[%s2805_s2] sm:$0x3]  ;;  %v2173_v9 = vmov 0   ;;  %s2269_s19 = scalar_select %p374_p9, %s2163_s23, 1  ;;  %v728_v11 = vstv %s404_s17  ;;  %v1294_v13 = vstv %s1162_s18  ;;  %v870_v15 = vstv %s738_s8 }
  0x1f   : > { %633 = vmatprep.mubr.bf16.mxu0 %v2173_v9  ;;  %674 = vmatprep.mubr.bf16.mxu1 %v2173_v9  ;;  %393 = vst [vmem:[#allocation2] sm:$0x3] %v392_v8  ;;  %v2264_v10 = vld [vmem:[%s2804_s1] sm:$0x3]  ;;  %v1578_v24 = vstv %s1446_s10  ;;  %v2174_v54 = vmov 1983009808   ;;  %v693_v56 = vlaneseq  ;;  %s406_s17 = scalar_lea.vmem %s2464_s16, %s1888_s15 [#allocation4] }
  0x20   : > { %1987 = vset.pattern.permute.xlu0 %v2173_v9  ;;  %1988 = vset.pattern.permute.xlu1 %v2173_v9  ;;  %s1944_s27 = sshll.u32 %s2269_s19, 8  ;;  %vm729_vm0 = vcmp.lt.s32.totalorder %v728_v11, %v2264_v10  ;;  %vm871_vm1 = vcmp.lt.s32.totalorder %v870_v15, %v2264_v10  ;;  %vm1295_vm2 = vcmp.lt.s32.totalorder %v1294_v13, %v2264_v10  ;;  %v394_v53 = vld [vmem:[%s2806_s3] sm:$0x3]  ;;  %v691_v55 = vunpack.c.l.s4 %v2174_v54  ;;  %s879_s21 = smul.u32 3, %s2163_s23 }
  0x21   : > { %s2279_s7 = scalar_lea.vmem %s2807_s4, %s1944_s27  ;;  %v730_v12 = vsel %vm729_vm0, 1, %v2173_v9  ;;  %v872_v19 = vsel %vm871_vm1, 1, %v2173_v9  ;;  %v1296_v26 = vsel %vm1295_vm2, 1, %v2173_v9  ;;  %vm1579_vm3 = vcmp.lt.s32.totalorder %v1578_v24, %v2264_v10  ;;  %395 = vst [vmem:[#allocation3] sm:$0x3] %v394_v53  ;;  %s1021_s20 = sadd.s32 3, %s2163_s23 }
  0x22   : > { %v2285_v14 = vld [vmem:[%s2279_s7 + $0xe4] ss:$16 sps:$4 sm:$0xff]   ;;  %732 = vperm.xlu0 %1987, %v730_v12   ;;  %v2289_v16 = vld [vmem:[%s2279_s7 + $0xec] ss:$16 sps:$4 sm:$0xff]   ;;  %v2294_v17 = vld [vmem:[%s2279_s7 + $0xe0] ss:$16 sps:$4 sm:$0xff]   ;;  %v692_v57 = vunpack.c.0.s8 %v691_v55 }
  0x23   : > { %601 = vmatprep.subr.bf16.mxu0 %v2285_v14  ;;  %v2297_v18 = vld [vmem:[%s2279_s7 + $0xe8] ss:$16 sps:$4 sm:$0xff]   ;;  %642 = vmatprep.subr.bf16.mxu1 %v2289_v16  ;;  %v2302_v20 = vld [vmem:[%s2279_s7 + $0xc4] ss:$16 sps:$4 sm:$0xff]   ;;  %v2308_v21 = vld [vmem:[%s2279_s7 + $0xcc] ss:$16 sps:$4 sm:$0xff]  }
  0x24   : > { %602 = vmatpush1.bf16.msra.mxu0 %v2294_v17  ;;  %643 = vmatpush1.bf16.msra.mxu1 %v2297_v18  ;;  %v2311_v22 = vld [vmem:[%s2279_s7 + $0xc0] ss:$16 sps:$4 sm:$0xff]   ;;  %v2315_v23 = vld [vmem:[%s2279_s7 + $0xc8] ss:$16 sps:$4 sm:$0xff]   ;;  %v2319_v25 = vld [vmem:[%s2279_s7 + $0xa4] ss:$16 sps:$4 sm:$0xff]  }
  0x25   : > { %603 = vmatprep.subr.bf16.mxu0 %v2302_v20  ;;  %644 = vmatprep.subr.bf16.mxu1 %v2308_v21  ;;  %v2323_v27 = vld [vmem:[%s2279_s7 + $0xac] ss:$16 sps:$4 sm:$0xff]   ;;  %v2326_v28 = vld [vmem:[%s2279_s7 + $0xa0] ss:$16 sps:$4 sm:$0xff]   ;;  %v2329_v29 = vld [vmem:[%s2279_s7 + $0xa8] ss:$16 sps:$4 sm:$0xff]  }
  0x26   : > { %874 = vperm.xlu0 %1987, %v872_v19   ;;  %v2334_v30 = vld [vmem:[%s2279_s7 + $0x84] ss:$16 sps:$4 sm:$0xff]   ;;  %v2340_v31 = vld [vmem:[%s2279_s7 + $0x8c] ss:$16 sps:$4 sm:$0xff]   ;;  %v2343_v32 = vld [vmem:[%s2279_s7 + $0x80] ss:$16 sps:$4 sm:$0xff]  }
  0x27   : > { %v1580_v33 = vsel %vm1579_vm3, 1, %v2173_v9  ;;  %v2349_v34 = vld [vmem:[%s2279_s7 + $0x88] ss:$16 sps:$4 sm:$0xff]   ;;  %v2352_v35 = vld [vmem:[%s2279_s7 + $0x64] ss:$16 sps:$4 sm:$0xff]   ;;  %v694_v58 = vshrl.u32 %v693_v56, 7 }
  0x28   : > { %604 = vmatpush1.bf16.msra.mxu0 %v2311_v22  ;;  %645 = vmatpush1.bf16.msra.mxu1 %v2315_v23  ;;  %v2357_v36 = vld [vmem:[%s2279_s7 + $0x6c] ss:$16 sps:$4 sm:$0xff]   ;;  %v2360_v37 = vld [vmem:[%s2279_s7 + $0x60] ss:$16 sps:$4 sm:$0xff]   ;;  %v2363_v38 = vld [vmem:[%s2279_s7 + $0x68] ss:$16 sps:$4 sm:$0xff]  }
  0x29   : > { %605 = vmatprep.subr.bf16.mxu0 %v2319_v25  ;;  %646 = vmatprep.subr.bf16.mxu1 %v2323_v27  ;;  %v2368_v39 = vld [vmem:[%s2279_s7 + $0x44] ss:$16 sps:$4 sm:$0xff]   ;;  %v2373_v40 = vld [vmem:[%s2279_s7 + $0x4c] ss:$16 sps:$4 sm:$0xff]   ;;  %v2378_v41 = vld [vmem:[%s2279_s7 + $0x40] ss:$16 sps:$4 sm:$0xff]   ;;  %v2467_v61 = vsub.s32 %v692_v57, %v694_v58 }
  0x2a   : > { %1298 = vperm.xlu0 %1987, %v1296_v26   ;;  %v2381_v42 = vld [vmem:[%s2279_s7 + $0x48] ss:$16 sps:$4 sm:$0xff]   ;;  %v2386_v43 = vld [vmem:[%s2279_s7 + $0x24] ss:$16 sps:$4 sm:$0xff]   ;;  %v2389_v44 = vld [vmem:[%s2279_s7 + $0x2c] ss:$16 sps:$4 sm:$0xff]  }
  0x2b   : > { %v2394_v45 = vld [vmem:[%s2279_s7 + $0x20] ss:$16 sps:$4 sm:$0xff]   ;;  %v2397_v46 = vld [vmem:[%s2279_s7 + $0x28] ss:$16 sps:$4 sm:$0xff]   ;;  %v2402_v47 = vld [vmem:[%s2279_s7 + $0x4] ss:$16 sps:$4 sm:$0xff]  }
  0x2c   : > { %606 = vmatpush1.bf16.msra.mxu0 %v2326_v28  ;;  %647 = vmatpush1.bf16.msra.mxu1 %v2329_v29  ;;  %v2405_v48 = vld [vmem:[%s2279_s7 + $0xc] ss:$16 sps:$4 sm:$0xff]   ;;  %v2410_v49 = vld [vmem:[%s2279_s7] ss:$16 sps:$4 sm:$0xff]   ;;  %v2413_v50 = vld [vmem:[%s2279_s7 + $0x8] ss:$16 sps:$4 sm:$0xff]  }
  0x2d   : > { %607 = vmatprep.subr.bf16.mxu0 %v2334_v30  ;;  %648 = vmatprep.subr.bf16.mxu1 %v2340_v31  ;;  %v2415_v51 = vld [vmem:[#allocation2] sm:$0x3]  ;;  %s1303_s27 = smul.u32 4294967293, %s2163_s23  ;;  %s880_s28 = sadd.s32 2, %s879_s21 }
  0x2e   : > { %1582 = vperm.xlu0 %1987, %v1580_v33   ;;  %v408_v52 = vpack.c.bf16 %v2415_v51, %v2415_v51  ;;  %v407_v63 = vld [vmem:[%s406_s17] sm:$0xf]  ;;  %s1587_s30 = smul.u32 4294967289, %s2163_s23  ;;  %s1928_s14 = sshll.u32 %s2163_s23, 2 }
  0x2f   : > { %v683_v6 = vunpack.c.l.bf16 %v407_v63  ;;  %s1304_s8 = sadd.s32 5, %s1303_s27  ;;  %s1922_s10 = smul.u32 20, %s2163_s23 }
  0x30   : > { %608 = vmatpush1.bf16.msra.mxu0 %v2343_v32  ;;  %649 = vmatpush1.bf16.msra.mxu1 %v2349_v34  ;;  %s1588_s9 = sadd.s32 7, %s1587_s30  ;;  %s1925_s12 = smul.u32 12, %s2163_s23 }
  0x31   : > { %609 = vmatprep.subr.bf16.mxu0 %v2352_v35  ;;  %650 = vmatprep.subr.bf16.mxu1 %v2357_v36  ;;  %s1798_s11 = scalar_lea.vmem %s2464_s16, %s1922_s10 [#allocation4]  ;;  %s1805_s15 = scalar_lea.vmem %s2464_s16, %s1928_s14 [#allocation4] }
  0x32   : > { %s1802_s13 = scalar_lea.vmem %s2464_s16, %s1925_s12 [#allocation4]  ;;  %s1931_s17 = sshll.u32 %s1162_s18, 2 }
  0x33   : > { %s1164_s21 = scalar_lea.vmem %s2464_s16, %s1931_s17 [#allocation4]  ;;  %s1933_s18 = smul.u32 4294967284, %s2163_s23 }
  0x34   : > { %610 = vmatpush1.bf16.msra.mxu0 %v2360_v37  ;;  %651 = vmatpush1.bf16.msra.mxu1 %v2363_v38  ;;  %s1936_s27 = smul.u32 4294967276, %s2163_s23 }
  0x35   : > { %611 = vmatprep.subr.bf16.mxu0 %v2368_v39  ;;  %652 = vmatprep.subr.bf16.mxu1 %v2373_v40 }
  0x38   : > { %612 = vmatpush1.bf16.msra.mxu0 %v2378_v41  ;;  %653 = vmatpush1.bf16.msra.mxu1 %v2381_v42 }
  0x39   : > { %613 = vmatprep.subr.bf16.mxu0 %v2386_v43  ;;  %654 = vmatprep.subr.bf16.mxu1 %v2389_v44 }
  0x3c   : > { %614 = vmatpush1.bf16.msra.mxu0 %v2394_v45  ;;  %655 = vmatpush1.bf16.msra.mxu1 %v2397_v46 }
  0x3d   : > { %615 = vmatprep.subr.bf16.mxu0 %v2402_v47  ;;  %656 = vmatprep.subr.bf16.mxu1 %v2405_v48 }
  0x40   : > { %616 = vmatpush1.bf16.msra.mxu0 %v2410_v49  ;;  %657 = vmatpush1.bf16.msra.mxu1 %v2413_v50 }
  0x41   : > { %743 = vmatprep.subr.bf16.mxu0 %v2285_v14  ;;  %784 = vmatprep.subr.bf16.mxu1 %v2289_v16 }
  0x43   : > { %634 = vmatmul.mubr.bf16.vlgmr.msra.gmra.mxu0 %v408_v52  ;;  %675 = vmatmul.mubr.bf16.vlgmr.msra.gmra.mxu1 %v408_v52  ;;  %v403_v52 = vld [vmem:[#allocation3] sm:$0x3] }
  0x44   : > { %744 = vmatpush1.bf16.msra.mxu0 %v2294_v17  ;;  %785 = vmatpush1.bf16.msra.mxu1 %v2297_v18 }
  0x45   : > { %745 = vmatprep.subr.bf16.mxu0 %v2302_v20  ;;  %786 = vmatprep.subr.bf16.mxu1 %v2308_v21 }
  0x46   : > { %775 = vmatprep.mubr.bf16.mxu0 %v2173_v9  ;;  %816 = vmatprep.mubr.bf16.mxu1 %v2173_v9 }
  0x48   : > { %746 = vmatpush1.bf16.msra.mxu0 %v2311_v22  ;;  %787 = vmatpush1.bf16.msra.mxu1 %v2315_v23 }
  0x49   : > { %747 = vmatprep.subr.bf16.mxu0 %v2319_v25  ;;  %788 = vmatprep.subr.bf16.mxu1 %v2323_v27 }
  0x4c   : > { %748 = vmatpush1.bf16.msra.mxu0 %v2326_v28  ;;  %789 = vmatpush1.bf16.msra.mxu1 %v2329_v29 }
  0x4d   : > { %749 = vmatprep.subr.bf16.mxu0 %v2334_v30  ;;  %790 = vmatprep.subr.bf16.mxu1 %v2340_v31 }
  0x50   : > { %750 = vmatpush1.bf16.msra.mxu0 %v2343_v32  ;;  %791 = vmatpush1.bf16.msra.mxu1 %v2349_v34 }
  0x51   : > { %751 = vmatprep.subr.bf16.mxu0 %v2352_v35  ;;  %792 = vmatprep.subr.bf16.mxu1 %v2357_v36 }
  0x54   : > { %752 = vmatpush1.bf16.msra.mxu0 %v2360_v37  ;;  %793 = vmatpush1.bf16.msra.mxu1 %v2363_v38 }
  0x55   : > { %753 = vmatprep.subr.bf16.mxu0 %v2368_v39  ;;  %794 = vmatprep.subr.bf16.mxu1 %v2373_v40 }
  0x58   : > { %754 = vmatpush1.bf16.msra.mxu0 %v2378_v41  ;;  %795 = vmatpush1.bf16.msra.mxu1 %v2381_v42 }
  0x59   : > { %755 = vmatprep.subr.bf16.mxu0 %v2386_v43  ;;  %796 = vmatprep.subr.bf16.mxu1 %v2389_v44 }
  0x5c   : > { %756 = vmatpush1.bf16.msra.mxu0 %v2394_v45  ;;  %797 = vmatpush1.bf16.msra.mxu1 %v2397_v46 }
  0x5d   : > { %757 = vmatprep.subr.bf16.mxu0 %v2402_v47  ;;  %798 = vmatprep.subr.bf16.mxu1 %v2405_v48 }
  0x60   : > { %758 = vmatpush1.bf16.msra.mxu0 %v2410_v49  ;;  %799 = vmatpush1.bf16.msra.mxu1 %v2413_v50 }
  0x61   : > { %885 = vmatprep.subr.bf16.mxu0 %v2285_v14  ;;  %926 = vmatprep.subr.bf16.mxu1 %v2289_v16 }
  0x9d   : > { %v733_v53 = vpop.permute.xlu0 %732 }
  0x9e   : > { %vm734_vm4 = vcmp.eq.s32.totalorder %v733_v53, 1 }
 0x103   : > { %v635_v59 = vpop.f32.mrf.mxu0  ;;  %v676_v60 = vpop.f32.mrf.mxu1 }
 0x105   : > { %v637_v62 = vpop.f32.mrf.mxu0  ;;  %v678_v0 = vpop.f32.mrf.mxu1 }
 0x106   : > { %v688_v1 = vcombine.low %v635_v59, %v637_v62  ;;  %v689_v2 = vcombine.low %v676_v60, %v678_v0 }
 0x107   : > { %v639_v3 = vpop.f32.mrf.mxu0  ;;  %v680_v4 = vpop.f32.mrf.mxu1 }
 0x108   : > { %v696_v5 = vrot.slane %v688_v1, %v2467_v61  ;;  %v703_v7 = vrot.slane %v689_v2, %v2467_v61  ;;  %v1012_v2 = vstv %s880_s28  ;;  %v1436_v4 = vstv %s1304_s8  ;;  %s1815_s28 = scalar_lea.vmem %s2464_s16, %s1936_s27 [#allocation4] }
 0x109   : > { %v640_v8 = vpop.f32.mrf.mxu0  ;;  %v681_v11 = vpop.f32.mrf.mxu1  ;;  %vm1013_vm5 = vcmp.lt.s32.totalorder %v1012_v2, %v2264_v10  ;;  %vm1437_vm7 = vcmp.lt.s32.totalorder %v1436_v4, %v2264_v10 }
 0x10a   : > { %v704_v12 = vcombine.low %v696_v5, %v703_v7  ;;  %v1014_v3 = vsel %vm1013_vm5, 1, %v2173_v9  ;;  %v1438_v7 = vsel %vm1437_vm7, 1, %v2173_v9 }
 0x10b   : > { %1016 = vperm.xlu1 %1988, %v1014_v3  }
 0x10c   : > { %v706_v13 = vadd.f32 %v704_v12, %v683_v6  ;;  %v1720_v6 = vstv %s1588_s9 }
 0x10d   : > { %vm1721_vm8 = vcmp.lt.s32.totalorder %v1720_v6, %v2264_v10  ;;  %v875_v6 = vpop.permute.xlu0 %874 }
 0x10e   : > { %v1921_v15 = vmul.f32 -1.442695, %v706_v13  ;;  %v714_v26 = vrot.slane %v706_v13, 6  ;;  %v1722_v8 = vsel %vm1721_vm8, 1, %v2173_v9  ;;  %vm876_vm9 = vcmp.eq.s32.totalorder %v875_v6, 1 }
 0x110   : > { %2037 = vpow2.f32 %v1921_v15  ;;  %v1923_v15 = vld [vmem:[%s1798_s11 + $0x4] sm:$0xf] }
 0x11d   : > { %v2038_v19 = vpop.eup %2037 }
 0x11e   : > { %v710_v24 = vadd.f32 1.0, %v2038_v19 }
 0x120   : > { %2039 = vrcp.f32 %v710_v24 }
 0x121   : > { %2041 = vtanh.f32 %v714_v26 }
 0x12d   : > { %v2040_v33 = vpop.eup %2039 }
 0x12e   : > { %v718_v54 = vrot.slane %v2040_v33, 2  ;;  %v2042_v55 = vpop.eup %2041  ;;  %v724_v60 = vrot.slane %v2040_v33, 4 }
 0x12f   : > { %v721_v57 = vmul.f32 %v2042_v55, %v2040_v33 }
 0x130   : > { %v720_v56 = vmul.f32 %v718_v54, %v403_v52  ;;  %v825_v54 = vunpack.c.l.bf16 %v1923_v15 }
 0x132   : > { %v722_v58 = vadd.f32 %v721_v57, %v720_v56 }
 0x134   : > { %2043 = vtanh.f32 %v722_v58  ;;  %v2471_v59 = vsel %vm734_vm4, %v722_v58, %v403_v52 }
 0x141   : > { %v2044_v62 = vpop.eup %2043 }
 0x142   : > { %v726_v63 = vmul.f32 %v2044_v62, %v724_v60 }
 0x144   : > { %v2474_v0 = vsel %vm734_vm4, %v726_v63, %v2415_v51  ;;  %v1153_v51 = vstv %s1021_s20  ;;  %s1811_s20 = scalar_lea.vmem %s2464_s16, %s1933_s18 [#allocation4] }
 0x145   : > { %v742_v1 = vpack.c.bf16 %v2474_v0, %v2474_v0  ;;  %vm1154_vm6 = vcmp.lt.s32.totalorder %v1153_v51, %v2264_v10 }
 0x146   : > { %v1155_v5 = vsel %vm1154_vm6, 1, %v2173_v9 }
 0x147   : > { %776 = vmatmul.mubr.bf16.vlgmr.msra.gmra.mxu0 %v742_v1  ;;  %817 = vmatmul.mubr.bf16.vlgmr.msra.gmra.mxu1 %v742_v1 }
 0x148   : > { %886 = vmatpush1.bf16.msra.mxu0 %v2294_v17  ;;  %927 = vmatpush1.bf16.msra.mxu1 %v2297_v18 }
 0x149   : > { %887 = vmatprep.subr.bf16.mxu0 %v2302_v20  ;;  %928 = vmatprep.subr.bf16.mxu1 %v2308_v21 }
 0x14a   : > { %917 = vmatprep.mubr.bf16.mxu0 %v2173_v9  ;;  %958 = vmatprep.mubr.bf16.mxu1 %v2173_v9 }
 0x14b   : > { %1157 = vperm.xlu1 %1988, %v1155_v5  }
 0x14c   : > { %888 = vmatpush1.bf16.msra.mxu0 %v2311_v22  ;;  %929 = vmatpush1.bf16.msra.mxu1 %v2315_v23 }
 0x14d   : > { %889 = vmatprep.subr.bf16.mxu0 %v2319_v25  ;;  %930 = vmatprep.subr.bf16.mxu1 %v2323_v27 }
 0x14f   : > { %1440 = vperm.xlu1 %1988, %v1438_v7  }
 0x150   : > { %890 = vmatpush1.bf16.msra.mxu0 %v2326_v28  ;;  %931 = vmatpush1.bf16.msra.mxu1 %v2329_v29 }
 0x151   : > { %891 = vmatprep.subr.bf16.mxu0 %v2334_v30  ;;  %932 = vmatprep.subr.bf16.mxu1 %v2340_v31 }
 0x153   : > { %1724 = vperm.xlu1 %1988, %v1722_v8  }
 0x154   : > { %892 = vmatpush1.bf16.msra.mxu0 %v2343_v32  ;;  %933 = vmatpush1.bf16.msra.mxu1 %v2349_v34 }
 0x155   : > { %893 = vmatprep.subr.bf16.mxu0 %v2352_v35  ;;  %934 = vmatprep.subr.bf16.mxu1 %v2357_v36 }
 0x158   : > { %894 = vmatpush1.bf16.msra.mxu0 %v2360_v37  ;;  %935 = vmatpush1.bf16.msra.mxu1 %v2363_v38 }
 0x159   : > { %895 = vmatprep.subr.bf16.mxu0 %v2368_v39  ;;  %936 = vmatprep.subr.bf16.mxu1 %v2373_v40 }
 0x15c   : > { %896 = vmatpush1.bf16.msra.mxu0 %v2378_v41  ;;  %937 = vmatpush1.bf16.msra.mxu1 %v2381_v42 }
 0x15d   : > { %897 = vmatprep.subr.bf16.mxu0 %v2386_v43  ;;  %938 = vmatprep.subr.bf16.mxu1 %v2389_v44 }
 0x160   : > { %898 = vmatpush1.bf16.msra.mxu0 %v2394_v45  ;;  %939 = vmatpush1.bf16.msra.mxu1 %v2397_v46 }
 0x161   : > { %899 = vmatprep.subr.bf16.mxu0 %v2402_v47  ;;  %940 = vmatprep.subr.bf16.mxu1 %v2405_v48 }
 0x164   : > { %900 = vmatpush1.bf16.msra.mxu0 %v2410_v49  ;;  %941 = vmatpush1.bf16.msra.mxu1 %v2413_v50 }
 0x165   : > { %1026 = vmatprep.subr.bf16.mxu0 %v2285_v14  ;;  %1067 = vmatprep.subr.bf16.mxu1 %v2289_v16 }
 0x207   : > { %v777_v11 = vpop.f32.mrf.mxu0  ;;  %v818_v12 = vpop.f32.mrf.mxu1 }
 0x209   : > { %v779_v13 = vpop.f32.mrf.mxu0  ;;  %v820_v19 = vpop.f32.mrf.mxu1 }
 0x20a   : > { %v830_v24 = vcombine.low %v777_v11, %v779_v13  ;;  %v831_v26 = vcombine.low %v818_v12, %v820_v19 }
 0x20b   : > { %v781_v33 = vpop.f32.mrf.mxu0  ;;  %v822_v52 = vpop.f32.mrf.mxu1 }
 0x20c   : > { %v838_v53 = vrot.slane %v830_v24, %v2467_v61  ;;  %v845_v10 = vrot.slane %v831_v26, %v2467_v61  ;;  %v1926_v26 = vld [vmem:[%s1802_s13 + $0x8] sm:$0xf] }
 0x20d   : > { %v782_v55 = vpop.f32.mrf.mxu0  ;;  %v823_v56 = vpop.f32.mrf.mxu1 }
 0x20e   : > { %v846_v57 = vcombine.low %v838_v53, %v845_v10  ;;  %v967_v56 = vunpack.c.l.bf16 %v1926_v26 }
 0x210   : > { %v848_v58 = vadd.f32 %v846_v57, %v825_v54 }
 0x212   : > { %v1924_v60 = vmul.f32 -1.442695, %v848_v58  ;;  %v856_v1 = vrot.slane %v848_v58, 6 }
 0x214   : > { %2045 = vpow2.f32 %v1924_v60 }
 0x221   : > { %v2046_v62 = vpop.eup %2045 }
 0x222   : > { %v852_v63 = vadd.f32 1.0, %v2046_v62 }
 0x224   : > { %2047 = vrcp.f32 %v852_v63 }
 0x225   : > { %2049 = vtanh.f32 %v856_v1 }
 0x231   : > { %v2048_v51 = vpop.eup %2047 }
 0x232   : > { %v860_v2 = vrot.slane %v2048_v51, 2  ;;  %v2050_v3 = vpop.eup %2049  ;;  %v866_v11 = vrot.slane %v2048_v51, 4 }
 0x233   : > { %v863_v5 = vmul.f32 %v2050_v3, %v2048_v51 }
 0x234   : > { %v862_v4 = vmul.f32 %v860_v2, %v2471_v59 }
 0x236   : > { %v864_v7 = vadd.f32 %v863_v5, %v862_v4  ;;  %v1017_v5 = vpop.permute.xlu1 %1016 }
 0x237   : > { %vm1018_vm10 = vcmp.eq.s32.totalorder %v1017_v5, 1 }
 0x238   : > { %2051 = vtanh.f32 %v864_v7  ;;  %v2530_v8 = vsel %vm876_vm9, %v864_v7, %v2471_v59 }
 0x245   : > { %v2052_v12 = vpop.eup %2051 }
 0x246   : > { %v868_v13 = vmul.f32 %v2052_v12, %v866_v11 }
 0x248   : > { %v2533_v15 = vsel %vm876_vm9, %v868_v13, %v2474_v0 }
 0x249   : > { %v884_v19 = vpack.c.bf16 %v2533_v15, %v2533_v15 }
 0x24b   : > { %918 = vmatmul.mubr.bf16.vlgmr.msra.gmra.mxu0 %v884_v19  ;;  %959 = vmatmul.mubr.bf16.vlgmr.msra.gmra.mxu1 %v884_v19 }
 0x24c   : > { %1027 = vmatpush1.bf16.msra.mxu0 %v2294_v17  ;;  %1068 = vmatpush1.bf16.msra.mxu1 %v2297_v18 }
 0x24d   : > { %1028 = vmatprep.subr.bf16.mxu0 %v2302_v20  ;;  %1069 = vmatprep.subr.bf16.mxu1 %v2308_v21 }
 0x24e   : > { %1058 = vmatprep.mubr.bf16.mxu0 %v2173_v9  ;;  %1099 = vmatprep.mubr.bf16.mxu1 %v2173_v9 }
 0x250   : > { %1029 = vmatpush1.bf16.msra.mxu0 %v2311_v22  ;;  %1070 = vmatpush1.bf16.msra.mxu1 %v2315_v23 }
 0x251   : > { %1030 = vmatprep.subr.bf16.mxu0 %v2319_v25  ;;  %1071 = vmatprep.subr.bf16.mxu1 %v2323_v27 }
 0x254   : > { %1031 = vmatpush1.bf16.msra.mxu0 %v2326_v28  ;;  %1072 = vmatpush1.bf16.msra.mxu1 %v2329_v29 }
 0x255   : > { %1032 = vmatprep.subr.bf16.mxu0 %v2334_v30  ;;  %1073 = vmatprep.subr.bf16.mxu1 %v2340_v31 }
 0x258   : > { %1033 = vmatpush1.bf16.msra.mxu0 %v2343_v32  ;;  %1074 = vmatpush1.bf16.msra.mxu1 %v2349_v34 }
 0x259   : > { %1034 = vmatprep.subr.bf16.mxu0 %v2352_v35  ;;  %1075 = vmatprep.subr.bf16.mxu1 %v2357_v36 }
 0x25c   : > { %1035 = vmatpush1.bf16.msra.mxu0 %v2360_v37  ;;  %1076 = vmatpush1.bf16.msra.mxu1 %v2363_v38 }
 0x25d   : > { %1036 = vmatprep.subr.bf16.mxu0 %v2368_v39  ;;  %1077 = vmatprep.subr.bf16.mxu1 %v2373_v40 }
 0x260   : > { %1037 = vmatpush1.bf16.msra.mxu0 %v2378_v41  ;;  %1078 = vmatpush1.bf16.msra.mxu1 %v2381_v42 }
 0x261   : > { %1038 = vmatprep.subr.bf16.mxu0 %v2386_v43  ;;  %1079 = vmatprep.subr.bf16.mxu1 %v2389_v44 }
 0x264   : > { %1039 = vmatpush1.bf16.msra.mxu0 %v2394_v45  ;;  %1080 = vmatpush1.bf16.msra.mxu1 %v2397_v46 }
 0x265   : > { %1040 = vmatprep.subr.bf16.mxu0 %v2402_v47  ;;  %1081 = vmatprep.subr.bf16.mxu1 %v2405_v48 }
 0x268   : > { %1041 = vmatpush1.bf16.msra.mxu0 %v2410_v49  ;;  %1082 = vmatpush1.bf16.msra.mxu1 %v2413_v50 }
 0x269   : > { %1167 = vmatprep.subr.bf16.mxu0 %v2285_v14  ;;  %1208 = vmatprep.subr.bf16.mxu1 %v2289_v16 }
 0x30b   : > { %v919_v59 = vpop.f32.mrf.mxu0  ;;  %v960_v0 = vpop.f32.mrf.mxu1 }
 0x30d   : > { %v921_v24 = vpop.f32.mrf.mxu0  ;;  %v962_v33 = vpop.f32.mrf.mxu1 }
 0x30e   : > { %v972_v52 = vcombine.low %v919_v59, %v921_v24  ;;  %v973_v53 = vcombine.low %v960_v0, %v962_v33 }
 0x30f   : > { %v923_v54 = vpop.f32.mrf.mxu0  ;;  %v964_v10 = vpop.f32.mrf.mxu1 }
 0x310   : > { %v980_v55 = vrot.slane %v972_v52, %v2467_v61  ;;  %v987_v57 = vrot.slane %v973_v53, %v2467_v61  ;;  %v1929_v53 = vld [vmem:[%s1805_s15 + $0xc] sm:$0xf] }
 0x311   : > { %v924_v58 = vpop.f32.mrf.mxu0  ;;  %v965_v60 = vpop.f32.mrf.mxu1 }
 0x312   : > { %v988_v62 = vcombine.low %v980_v55, %v987_v57  ;;  %v1108_v60 = vunpack.c.l.bf16 %v1929_v53 }
 0x314   : > { %v990_v63 = vadd.f32 %v988_v62, %v967_v56 }
 0x316   : > { %v1927_v1 = vmul.f32 -1.442695, %v990_v63  ;;  %v998_v3 = vrot.slane %v990_v63, 6 }
 0x318   : > { %2053 = vpow2.f32 %v1927_v1 }
 0x325   : > { %v2054_v51 = vpop.eup %2053 }
 0x326   : > { %v994_v2 = vadd.f32 1.0, %v2054_v51 }
 0x328   : > { %2055 = vrcp.f32 %v994_v2 }
 0x329   : > { %2057 = vtanh.f32 %v998_v3 }
 0x335   : > { %v2056_v4 = vpop.eup %2055 }
 0x336   : > { %v1002_v6 = vrot.slane %v2056_v4, 2  ;;  %v2058_v7 = vpop.eup %2057  ;;  %v1008_v59 = vrot.slane %v2056_v4, 4 }
 0x337   : > { %v1005_v12 = vmul.f32 %v2058_v7, %v2056_v4 }
 0x338   : > { %v1004_v11 = vmul.f32 %v1002_v6, %v2530_v8 }
 0x33a   : > { %v1006_v13 = vadd.f32 %v1005_v12, %v1004_v11 }
 0x33c   : > { %2059 = vtanh.f32 %v1006_v13  ;;  %v2577_v19 = vsel %vm1018_vm10, %v1006_v13, %v2530_v8 }
 0x349   : > { %v2060_v0 = vpop.eup %2059 }
 0x34a   : > { %v1010_v24 = vmul.f32 %v2060_v0, %v1008_v59  ;;  %v1158_v0 = vpop.permute.xlu1 %1157 }
 0x34b   : > { %vm1159_vm11 = vcmp.eq.s32.totalorder %v1158_v0, 1 }
 0x34c   : > { %v2580_v26 = vsel %vm1018_vm10, %v1010_v24, %v2533_v15 }
 0x34d   : > { %v1025_v33 = vpack.c.bf16 %v2580_v26, %v2580_v26 }
 0x34f   : > { %1059 = vmatmul.mubr.bf16.vlgmr.msra.gmra.mxu0 %v1025_v33  ;;  %1100 = vmatmul.mubr.bf16.vlgmr.msra.gmra.mxu1 %v1025_v33 }
 0x350   : > { %1168 = vmatpush1.bf16.msra.mxu0 %v2294_v17  ;;  %1209 = vmatpush1.bf16.msra.mxu1 %v2297_v18 }
 0x351   : > { %1169 = vmatprep.subr.bf16.mxu0 %v2302_v20  ;;  %1210 = vmatprep.subr.bf16.mxu1 %v2308_v21 }
 0x352   : > { %1199 = vmatprep.mubr.bf16.mxu0 %v2173_v9  ;;  %1240 = vmatprep.mubr.bf16.mxu1 %v2173_v9 }
 0x354   : > { %1170 = vmatpush1.bf16.msra.mxu0 %v2311_v22  ;;  %1211 = vmatpush1.bf16.msra.mxu1 %v2315_v23 }
 0x355   : > { %1171 = vmatprep.subr.bf16.mxu0 %v2319_v25  ;;  %1212 = vmatprep.subr.bf16.mxu1 %v2323_v27 }
 0x358   : > { %1172 = vmatpush1.bf16.msra.mxu0 %v2326_v28  ;;  %1213 = vmatpush1.bf16.msra.mxu1 %v2329_v29 }
 0x359   : > { %1173 = vmatprep.subr.bf16.mxu0 %v2334_v30  ;;  %1214 = vmatprep.subr.bf16.mxu1 %v2340_v31 }
 0x35c   : > { %1174 = vmatpush1.bf16.msra.mxu0 %v2343_v32  ;;  %1215 = vmatpush1.bf16.msra.mxu1 %v2349_v34 }
 0x35d   : > { %1175 = vmatprep.subr.bf16.mxu0 %v2352_v35  ;;  %1216 = vmatprep.subr.bf16.mxu1 %v2357_v36 }
 0x360   : > { %1176 = vmatpush1.bf16.msra.mxu0 %v2360_v37  ;;  %1217 = vmatpush1.bf16.msra.mxu1 %v2363_v38 }
 0x361   : > { %1177 = vmatprep.subr.bf16.mxu0 %v2368_v39  ;;  %1218 = vmatprep.subr.bf16.mxu1 %v2373_v40 }
 0x364   : > { %1178 = vmatpush1.bf16.msra.mxu0 %v2378_v41  ;;  %1219 = vmatpush1.bf16.msra.mxu1 %v2381_v42 }
 0x365   : > { %1179 = vmatprep.subr.bf16.mxu0 %v2386_v43  ;;  %1220 = vmatprep.subr.bf16.mxu1 %v2389_v44 }
 0x368   : > { %1180 = vmatpush1.bf16.msra.mxu0 %v2394_v45  ;;  %1221 = vmatpush1.bf16.msra.mxu1 %v2397_v46 }
 0x369   : > { %1181 = vmatprep.subr.bf16.mxu0 %v2402_v47  ;;  %1222 = vmatprep.subr.bf16.mxu1 %v2405_v48 }
 0x36c   : > { %1182 = vmatpush1.bf16.msra.mxu0 %v2410_v49  ;;  %1223 = vmatpush1.bf16.msra.mxu1 %v2413_v50 }
 0x36d   : > { %1309 = vmatprep.subr.bf16.mxu0 %v2285_v14  ;;  %1350 = vmatprep.subr.bf16.mxu1 %v2289_v16 }
 0x40f   : > { %v1060_v8 = vpop.f32.mrf.mxu0  ;;  %v1101_v15 = vpop.f32.mrf.mxu1 }
 0x411   : > { %v1062_v52 = vpop.f32.mrf.mxu0  ;;  %v1103_v54 = vpop.f32.mrf.mxu1 }
 0x412   : > { %v1113_v10 = vcombine.low %v1060_v8, %v1062_v52  ;;  %v1114_v55 = vcombine.low %v1101_v15, %v1103_v54 }
 0x413   : > { %v1064_v56 = vpop.f32.mrf.mxu0  ;;  %v1105_v57 = vpop.f32.mrf.mxu1 }
 0x414   : > { %v1121_v58 = vrot.slane %v1113_v10, %v2467_v61  ;;  %v1128_v62 = vrot.slane %v1114_v55, %v2467_v61 }
 0x415   : > { %v1065_v63 = vpop.f32.mrf.mxu0  ;;  %v1106_v1 = vpop.f32.mrf.mxu1 }
 0x416   : > { %v1129_v51 = vcombine.low %v1121_v58, %v1128_v62 }
 0x418   : > { %v1131_v2 = vadd.f32 %v1129_v51, %v1108_v60 }
 0x41a   : > { %v1930_v3 = vmul.f32 -1.442695, %v1131_v2  ;;  %v1139_v6 = vrot.slane %v1131_v2, 6 }
 0x41c   : > { %2061 = vpow2.f32 %v1930_v3 }
 0x429   : > { %v2062_v4 = vpop.eup %2061 }
 0x42a   : > { %v1135_v5 = vadd.f32 1.0, %v2062_v4 }
 0x42c   : > { %2063 = vrcp.f32 %v1135_v5 }
 0x42d   : > { %2065 = vtanh.f32 %v1139_v6 }
 0x439   : > { %v2064_v7 = vpop.eup %2063 }
 0x43a   : > { %v1143_v11 = vrot.slane %v2064_v7, 2  ;;  %v2066_v12 = vpop.eup %2065  ;;  %v1149_v8 = vrot.slane %v2064_v7, 4 }
 0x43b   : > { %v1146_v59 = vmul.f32 %v2066_v12, %v2064_v7  ;;  %v1299_v12 = vpop.permute.xlu0 %1298 }
 0x43c   : > { %v1145_v13 = vmul.f32 %v1143_v11, %v2577_v19  ;;  %vm1300_vm12 = vcmp.eq.s32.totalorder %v1299_v12, 1  ;;  %v2123_v12 = vld [vmem:[%s2279_s7 + $0x40] ss:$16 sps:$4 sm:$0xff]  }
 0x43e   : > { %v1147_v24 = vadd.f32 %v1146_v59, %v1145_v13 }
 0x440   : > { %2067 = vtanh.f32 %v1147_v24  ;;  %v2624_v33 = vsel %vm1159_vm11, %v1147_v24, %v2577_v19 }
 0x44d   : > { %v2068_v15 = vpop.eup %2067 }
 0x44e   : > { %v1151_v52 = vmul.f32 %v2068_v15, %v1149_v8 }
 0x450   : > { %v2627_v53 = vsel %vm1159_vm11, %v1151_v52, %v2580_v26 }
 0x451   : > { %v1166_v54 = vpack.c.bf16 %v2627_v53, %v2627_v53 }
 0x453   : > { %1200 = vmatmul.mubr.bf16.vlgmr.msra.gmra.mxu0 %v1166_v54  ;;  %1241 = vmatmul.mubr.bf16.vlgmr.msra.gmra.mxu1 %v1166_v54  ;;  %v2680_v54 = vld [vmem:[%s2279_s7 + $0xe0] ss:$16 sps:$4 sm:$0xff]  }
 0x454   : > { %1310 = vmatpush1.bf16.msra.mxu0 %v2294_v17  ;;  %1351 = vmatpush1.bf16.msra.mxu1 %v2297_v18 }
 0x455   : > { %1311 = vmatprep.subr.bf16.mxu0 %v2302_v20  ;;  %1352 = vmatprep.subr.bf16.mxu1 %v2308_v21  ;;  %v1165_v20 = vld [vmem:[%s1164_s21] sm:$0xf] }
 0x456   : > { %1341 = vmatprep.mubr.bf16.mxu0 %v2173_v9  ;;  %1382 = vmatprep.mubr.bf16.mxu1 %v2173_v9  ;;  %v1249_v57 = vunpack.c.l.bf16 %v1165_v20  ;;  %v1441_v20 = vpop.permute.xlu1 %1440 }
 0x457   : > { %vm1442_vm13 = vcmp.eq.s32.totalorder %v1441_v20, 1 }
 0x458   : > { %1312 = vmatpush1.bf16.msra.mxu0 %v2311_v22  ;;  %1353 = vmatpush1.bf16.msra.mxu1 %v2315_v23 }
 0x459   : > { %1313 = vmatprep.subr.bf16.mxu0 %v2319_v25  ;;  %1354 = vmatprep.subr.bf16.mxu1 %v2323_v27 }
 0x45c   : > { %1314 = vmatpush1.bf16.msra.mxu0 %v2326_v28  ;;  %1355 = vmatpush1.bf16.msra.mxu1 %v2329_v29 }
 0x45d   : > { %1315 = vmatprep.subr.bf16.mxu0 %v2334_v30  ;;  %1356 = vmatprep.subr.bf16.mxu1 %v2340_v31 }
 0x460   : > { %1316 = vmatpush1.bf16.msra.mxu0 %v2343_v32  ;;  %1357 = vmatpush1.bf16.msra.mxu1 %v2349_v34 }
 0x461   : > { %1317 = vmatprep.subr.bf16.mxu0 %v2352_v35  ;;  %1358 = vmatprep.subr.bf16.mxu1 %v2357_v36 }
 0x464   : > { %1318 = vmatpush1.bf16.msra.mxu0 %v2360_v37  ;;  %1359 = vmatpush1.bf16.msra.mxu1 %v2363_v38 }
 0x465   : > { %1319 = vmatprep.subr.bf16.mxu0 %v2368_v39  ;;  %1360 = vmatprep.subr.bf16.mxu1 %v2373_v40 }
 0x468   : > { %1320 = vmatpush1.bf16.msra.mxu0 %v2378_v41  ;;  %1361 = vmatpush1.bf16.msra.mxu1 %v2381_v42 }
 0x469   : > { %1321 = vmatprep.subr.bf16.mxu0 %v2386_v43  ;;  %1362 = vmatprep.subr.bf16.mxu1 %v2389_v44 }
 0x46c   : > { %1322 = vmatpush1.bf16.msra.mxu0 %v2394_v45  ;;  %1363 = vmatpush1.bf16.msra.mxu1 %v2397_v46 }
 0x46d   : > { %1323 = vmatprep.subr.bf16.mxu0 %v2402_v47  ;;  %1364 = vmatprep.subr.bf16.mxu1 %v2405_v48 }
 0x470   : > { %1324 = vmatpush1.bf16.msra.mxu0 %v2410_v49  ;;  %1365 = vmatpush1.bf16.msra.mxu1 %v2413_v50 }
 0x471   : > { %1451 = vmatprep.subr.bf16.mxu0 %v2285_v14  ;;  %1492 = vmatprep.subr.bf16.mxu1 %v2289_v16 }
 0x513   : > { %v1201_v17 = vpop.f32.mrf.mxu0  ;;  %v1242_v18 = vpop.f32.mrf.mxu1 }
 0x515   : > { %v1203_v22 = vpop.f32.mrf.mxu0  ;;  %v1244_v19 = vpop.f32.mrf.mxu1 }
 0x516   : > { %v1254_v26 = vcombine.low %v1201_v17, %v1203_v22  ;;  %v1255_v10 = vcombine.low %v1242_v18, %v1244_v19  ;;  %v2684_v17 = vld [vmem:[%s2279_s7 + $0xe8] ss:$16 sps:$4 sm:$0xff]  }
 0x517   : > { %v1205_v55 = vpop.f32.mrf.mxu0  ;;  %v1246_v56 = vpop.f32.mrf.mxu1 }
 0x518   : > { %v1262_v58 = vrot.slane %v1254_v26, %v2467_v61  ;;  %v1269_v60 = vrot.slane %v1255_v10, %v2467_v61 }
 0x519   : > { %v1206_v14 = vpop.f32.mrf.mxu0  ;;  %v1247_v62 = vpop.f32.mrf.mxu1 }
 0x51a   : > { %v1270_v16 = vcombine.low %v1262_v58, %v1269_v60  ;;  %v2107_v58 = vld [vmem:[%s2279_s7 + $0xcc] ss:$16 sps:$4 sm:$0xff]   ;;  %v2108_v60 = vld [vmem:[%s2279_s7 + $0xc8] ss:$16 sps:$4 sm:$0xff]   ;;  %v2109_v14 = vld [vmem:[%s2279_s7 + $0xa4] ss:$16 sps:$4 sm:$0xff]  }
 0x51b   : > { %v2110_v62 = vld [vmem:[%s2279_s7 + $0xac] ss:$16 sps:$4 sm:$0xff]  }
 0x51c   : > { %v1272_v63 = vadd.f32 %v1270_v16, %v1249_v57  ;;  %v2111_v16 = vld [vmem:[%s2279_s7 + $0xa0] ss:$16 sps:$4 sm:$0xff]  }
 0x51e   : > { %v1932_v1 = vmul.f32 -1.442695, %v1272_v63  ;;  %v1280_v3 = vrot.slane %v1272_v63, 6  ;;  %v2112_v63 = vld [vmem:[%s2279_s7 + $0xa8] ss:$16 sps:$4 sm:$0xff]  }
 0x520   : > { %2069 = vpow2.f32 %v1932_v1  ;;  %v2113_v1 = vld [vmem:[%s2279_s7 + $0x84] ss:$16 sps:$4 sm:$0xff]  }
 0x52d   : > { %v2070_v51 = vpop.eup %2069 }
 0x52e   : > { %v1276_v2 = vadd.f32 1.0, %v2070_v51  ;;  %v2115_v51 = vld [vmem:[%s2279_s7 + $0x80] ss:$16 sps:$4 sm:$0xff]  }
 0x530   : > { %2071 = vrcp.f32 %v1276_v2  ;;  %v2116_v2 = vld [vmem:[%s2279_s7 + $0x88] ss:$16 sps:$4 sm:$0xff]  }
 0x531   : > { %2073 = vtanh.f32 %v1280_v3  ;;  %v2117_v3 = vld [vmem:[%s2279_s7 + $0x64] ss:$16 sps:$4 sm:$0xff]  }
 0x53d   : > { %v2072_v4 = vpop.eup %2071 }
 0x53e   : > { %v1284_v5 = vrot.slane %v2072_v4, 2  ;;  %v2074_v6 = vpop.eup %2073  ;;  %v1290_v0 = vrot.slane %v2072_v4, 4 }
 0x53f   : > { %v1287_v11 = vmul.f32 %v2074_v6, %v2072_v4  ;;  %v2118_v4 = vld [vmem:[%s2279_s7 + $0x6c] ss:$16 sps:$4 sm:$0xff]   ;;  %v2120_v6 = vld [vmem:[%s2279_s7 + $0x68] ss:$16 sps:$4 sm:$0xff]  }
 0x540   : > { %v1286_v7 = vmul.f32 %v1284_v5, %v2624_v33  ;;  %v2119_v5 = vld [vmem:[%s2279_s7 + $0x60] ss:$16 sps:$4 sm:$0xff]  }
 0x542   : > { %v1288_v13 = vadd.f32 %v1287_v11, %v1286_v7  ;;  %v2121_v7 = vld [vmem:[%s2279_s7 + $0x44] ss:$16 sps:$4 sm:$0xff]   ;;  %v2122_v11 = vld [vmem:[%s2279_s7 + $0x4c] ss:$16 sps:$4 sm:$0xff]  }
 0x544   : > { %2075 = vtanh.f32 %v1288_v13  ;;  %v2672_v59 = vsel %vm1300_vm12, %v1288_v13, %v2624_v33  ;;  %v2688_v33 = vld [vmem:[%s2279_s7 + $0xc4] ss:$16 sps:$4 sm:$0xff]   ;;  %v2124_v13 = vld [vmem:[%s2279_s7 + $0x48] ss:$16 sps:$4 sm:$0xff]  }
 0x551   : > { %v2076_v24 = vpop.eup %2075 }
 0x552   : > { %v1292_v8 = vmul.f32 %v2076_v24, %v1290_v0  ;;  %v2126_v0 = vld [vmem:[%s2279_s7 + $0x2c] ss:$16 sps:$4 sm:$0xff]   ;;  %v2127_v24 = vld [vmem:[%s2279_s7 + $0x20] ss:$16 sps:$4 sm:$0xff]  }
 0x554   : > { %v2675_v15 = vsel %vm1300_vm12, %v1292_v8, %v2627_v53  ;;  %v2695_v53 = vld [vmem:[%s2279_s7 + $0xc0] ss:$16 sps:$4 sm:$0xff]   ;;  %v2128_v8 = vld [vmem:[%s2279_s7 + $0x28] ss:$16 sps:$4 sm:$0xff]  }
 0x555   : > { %v1308_v52 = vpack.c.bf16 %v2675_v15, %v2675_v15 }
 0x557   : > { %1342 = vmatmul.mubr.bf16.vlgmr.msra.gmra.mxu0 %v1308_v52  ;;  %1383 = vmatmul.mubr.bf16.vlgmr.msra.gmra.mxu1 %v1308_v52  ;;  %v2130_v52 = vld [vmem:[%s2279_s7 + $0xc] ss:$16 sps:$4 sm:$0xff]  }
 0x558   : > { %1452 = vmatpush1.bf16.msra.mxu0 %v2680_v54  ;;  %1493 = vmatpush1.bf16.msra.mxu1 %v2684_v17 }
 0x559   : > { %1453 = vmatprep.subr.bf16.mxu0 %v2688_v33  ;;  %1494 = vmatprep.subr.bf16.mxu1 %v2308_v21  ;;  %v2105_v21 = vld [vmem:[%s2279_s7 + $0xe4] ss:$16 sps:$4 sm:$0xff]  }
 0x55a   : > { %1483 = vmatprep.mubr.bf16.mxu0 %v2173_v9  ;;  %1524 = vmatprep.mubr.bf16.mxu1 %v2173_v9 }
 0x55c   : > { %1454 = vmatpush1.bf16.msra.mxu0 %v2695_v53  ;;  %1495 = vmatpush1.bf16.msra.mxu1 %v2315_v23  ;;  %v2106_v23 = vld [vmem:[%s2279_s7 + $0xec] ss:$16 sps:$4 sm:$0xff]  }
 0x55d   : > { %1455 = vmatprep.subr.bf16.mxu0 %v2319_v25  ;;  %1496 = vmatprep.subr.bf16.mxu1 %v2323_v27 }
 0x560   : > { %1456 = vmatpush1.bf16.msra.mxu0 %v2326_v28  ;;  %1497 = vmatpush1.bf16.msra.mxu1 %v2329_v29  ;;  %v1934_v29 = vld [vmem:[%s1811_s20 + $0x14] sm:$0xf] }
 0x561   : > { %1457 = vmatprep.subr.bf16.mxu0 %v2334_v30  ;;  %1498 = vmatprep.subr.bf16.mxu1 %v2340_v31 }
 0x564   : > { %1458 = vmatpush1.bf16.msra.mxu0 %v2343_v32  ;;  %1499 = vmatpush1.bf16.msra.mxu1 %v2349_v34 }
 0x565   : > { %1459 = vmatprep.subr.bf16.mxu0 %v2352_v35  ;;  %1500 = vmatprep.subr.bf16.mxu1 %v2357_v36 }
 0x568   : > { %1460 = vmatpush1.bf16.msra.mxu0 %v2360_v37  ;;  %1501 = vmatpush1.bf16.msra.mxu1 %v2363_v38  ;;  %v1391_v37 = vunpack.c.l.bf16 %v1934_v29 }
 0x569   : > { %1461 = vmatprep.subr.bf16.mxu0 %v2368_v39  ;;  %1502 = vmatprep.subr.bf16.mxu1 %v2373_v40 }
 0x56c   : > { %1462 = vmatpush1.bf16.msra.mxu0 %v2378_v41  ;;  %1503 = vmatpush1.bf16.msra.mxu1 %v2381_v42 }
 0x56d   : > { %1463 = vmatprep.subr.bf16.mxu0 %v2386_v43  ;;  %1504 = vmatprep.subr.bf16.mxu1 %v2389_v44 }
 0x570   : > { %1464 = vmatpush1.bf16.msra.mxu0 %v2394_v45  ;;  %1505 = vmatpush1.bf16.msra.mxu1 %v2397_v46 }
 0x571   : > { %1465 = vmatprep.subr.bf16.mxu0 %v2402_v47  ;;  %1506 = vmatprep.subr.bf16.mxu1 %v2405_v48 }
 0x574   : > { %1466 = vmatpush1.bf16.msra.mxu0 %v2410_v49  ;;  %1507 = vmatpush1.bf16.msra.mxu1 %v2413_v50 }
 0x575   : > { %1593 = vmatprep.subr.bf16.mxu0 %v2105_v21  ;;  %1634 = vmatprep.subr.bf16.mxu1 %v2106_v23  ;;  %v1937_v23 = vld [vmem:[%s1815_s28 + $0x18] sm:$0xf] }
 0x617   : > { %v1343_v25 = vpop.f32.mrf.mxu0  ;;  %v1384_v27 = vpop.f32.mrf.mxu1 }
 0x619   : > { %v1345_v28 = vpop.f32.mrf.mxu0  ;;  %v1386_v30 = vpop.f32.mrf.mxu1 }
 0x61a   : > { %v1396_v31 = vcombine.low %v1343_v25, %v1345_v28  ;;  %v1397_v32 = vcombine.low %v1384_v27, %v1386_v30 }
 0x61b   : > { %v1347_v34 = vpop.f32.mrf.mxu0  ;;  %v1388_v35 = vpop.f32.mrf.mxu1 }
 0x61c   : > { %v1404_v36 = vrot.slane %v1396_v31, %v2467_v61  ;;  %v1411_v38 = vrot.slane %v1397_v32, %v2467_v61  ;;  %v1533_v32 = vunpack.c.l.bf16 %v1937_v23 }
 0x61d   : > { %v1348_v39 = vpop.f32.mrf.mxu0  ;;  %v1389_v40 = vpop.f32.mrf.mxu1 }
 0x61e   : > { %v1412_v41 = vcombine.low %v1404_v36, %v1411_v38 }
 0x620   : > { %v1414_v42 = vadd.f32 %v1412_v41, %v1391_v37 }
 0x622   : > { %v1935_v43 = vmul.f32 -1.442695, %v1414_v42  ;;  %v1422_v46 = vrot.slane %v1414_v42, 6 }
 0x624   : > { %2077 = vpow2.f32 %v1935_v43 }
 0x631   : > { %v2078_v44 = vpop.eup %2077 }
 0x632   : > { %v1418_v45 = vadd.f32 1.0, %v2078_v44 }
 0x634   : > { %2079 = vrcp.f32 %v1418_v45 }
 0x635   : > { %2081 = vtanh.f32 %v1422_v46  ;;  %v1583_v46 = vpop.permute.xlu0 %1582 }
 0x636   : > { %vm1584_vm14 = vcmp.eq.s32.totalorder %v1583_v46, 1 }
 0x641   : > { %v2080_v47 = vpop.eup %2079 }
 0x642   : > { %v1426_v48 = vrot.slane %v2080_v47, 2  ;;  %v2082_v49 = vpop.eup %2081  ;;  %v1432_v26 = vrot.slane %v2080_v47, 4 }
 0x643   : > { %v1429_v18 = vmul.f32 %v2082_v49, %v2080_v47 }
 0x644   : > { %v1428_v50 = vmul.f32 %v1426_v48, %v2672_v59 }
 0x646   : > { %v1430_v22 = vadd.f32 %v1429_v18, %v1428_v50 }
 0x648   : > { %2083 = vtanh.f32 %v1430_v22  ;;  %v2731_v19 = vsel %vm1442_vm13, %v1430_v22, %v2672_v59  ;;  %v2125_v59 = vld [vmem:[%s2279_s7 + $0x24] ss:$16 sps:$4 sm:$0xff]  }
 0x655   : > { %v2084_v10 = vpop.eup %2083 }
 0x656   : > { %v1434_v55 = vmul.f32 %v2084_v10, %v1432_v26 }
 0x658   : > { %v2734_v56 = vsel %vm1442_vm13, %v1434_v55, %v2675_v15  ;;  %v2129_v15 = vld [vmem:[%s2279_s7 + $0x4] ss:$16 sps:$4 sm:$0xff]  }
 0x659   : > { %v1450_v57 = vpack.c.bf16 %v2734_v56, %v2734_v56 }
 0x65b   : > { %1484 = vmatmul.mubr.bf16.vlgmr.msra.gmra.mxu0 %v1450_v57  ;;  %1525 = vmatmul.mubr.bf16.vlgmr.msra.gmra.mxu1 %v1450_v57 }
 0x65c   : > { %1594 = vmatpush1.bf16.msra.mxu0 %v2680_v54  ;;  %1635 = vmatpush1.bf16.msra.mxu1 %v2684_v17  ;;  %v2131_v54 = vld [vmem:[%s2279_s7] ss:$16 sps:$4 sm:$0xff]   ;;  %v2132_v17 = vld [vmem:[%s2279_s7 + $0x8] ss:$16 sps:$4 sm:$0xff]  }
 0x65d   : > { %1595 = vmatprep.subr.bf16.mxu0 %v2688_v33  ;;  %1636 = vmatprep.subr.bf16.mxu1 %v2107_v58 }
 0x65e   : > { %1625 = vmatprep.mubr.bf16.mxu0 %v2173_v9  ;;  %1666 = vmatprep.mubr.bf16.mxu1 %v2173_v9  ;;  %v2114_v9 = vld [vmem:[%s2279_s7 + $0x8c] ss:$16 sps:$4 sm:$0xff]   ;;  %s1939_s7 = smul.u32 4294967268, %s2163_s23  ;;  %s1886_s23 = sshll.u32 %s2269_s19, 1 }
 0x65f   : > { %s386_s9 = scalar_lea.vmem %s2809_s6, %s1886_s23  ;;  %s382_s12 = scalar_lea.vmem %s2808_s5, %s1886_s23 }
 0x660   : > { %1596 = vmatpush1.bf16.msra.mxu0 %v2695_v53  ;;  %1637 = vmatpush1.bf16.msra.mxu1 %v2108_v60  ;;  %s1819_s30 = scalar_lea.vmem %s2464_s16, %s1939_s7 [#allocation4] }
 0x661   : > { %1597 = vmatprep.subr.bf16.mxu0 %v2109_v14  ;;  %1638 = vmatprep.subr.bf16.mxu1 %v2110_v62  ;;  %v1940_v60 = vld [vmem:[%s1819_s30 + $0x1c] sm:$0xf] }
 0x664   : > { %1598 = vmatpush1.bf16.msra.mxu0 %v2111_v16  ;;  %1639 = vmatpush1.bf16.msra.mxu1 %v2112_v63 }
 0x665   : > { %1599 = vmatprep.subr.bf16.mxu0 %v2113_v1  ;;  %1640 = vmatprep.subr.bf16.mxu1 %v2114_v9  ;;  %v1675_v9 = vunpack.c.l.bf16 %v1940_v60 }
 0x668   : > { %1600 = vmatpush1.bf16.msra.mxu0 %v2115_v51  ;;  %1641 = vmatpush1.bf16.msra.mxu1 %v2116_v2 }
 0x669   : > { %1601 = vmatprep.subr.bf16.mxu0 %v2117_v3  ;;  %1642 = vmatprep.subr.bf16.mxu1 %v2118_v4 }
 0x66c   : > { %1602 = vmatpush1.bf16.msra.mxu0 %v2119_v5  ;;  %1643 = vmatpush1.bf16.msra.mxu1 %v2120_v6 }
 0x66d   : > { %1603 = vmatprep.subr.bf16.mxu0 %v2121_v7  ;;  %1644 = vmatprep.subr.bf16.mxu1 %v2122_v11 }
 0x670   : > { %1604 = vmatpush1.bf16.msra.mxu0 %v2123_v12  ;;  %1645 = vmatpush1.bf16.msra.mxu1 %v2124_v13 }
 0x671   : > { %1605 = vmatprep.subr.bf16.mxu0 %v2125_v59  ;;  %1646 = vmatprep.subr.bf16.mxu1 %v2126_v0  ;;  %v1725_v0 = vpop.permute.xlu1 %1724 }
 0x672   : > { %vm1726_vm15 = vcmp.eq.s32.totalorder %v1725_v0, 1 }
 0x674   : > { %1606 = vmatpush1.bf16.msra.mxu0 %v2127_v24  ;;  %1647 = vmatpush1.bf16.msra.mxu1 %v2128_v8 }
 0x675   : > { %1607 = vmatprep.subr.bf16.mxu0 %v2129_v15  ;;  %1648 = vmatprep.subr.bf16.mxu1 %v2130_v52 }
 0x678   : > { %1608 = vmatpush1.bf16.msra.mxu0 %v2131_v54  ;;  %1649 = vmatpush1.bf16.msra.mxu1 %v2132_v17 }
 0x71b   : > { %v1485_v33 = vpop.f32.mrf.mxu0  ;;  %v1526_v53 = vpop.f32.mrf.mxu1 }
 0x71d   : > { %v1487_v21 = vpop.f32.mrf.mxu0  ;;  %v1528_v25 = vpop.f32.mrf.mxu1 }
 0x71e   : > { %v1538_v27 = vcombine.low %v1485_v33, %v1487_v21  ;;  %v1539_v28 = vcombine.low %v1526_v53, %v1528_v25 }
 0x71f   : > { %v1489_v29 = vpop.f32.mrf.mxu0  ;;  %v1530_v30 = vpop.f32.mrf.mxu1 }
 0x720   : > { %v1546_v31 = vrot.slane %v1538_v27, %v2467_v61  ;;  %v1553_v34 = vrot.slane %v1539_v28, %v2467_v61 }
 0x721   : > { %v1490_v35 = vpop.f32.mrf.mxu0  ;;  %v1531_v36 = vpop.f32.mrf.mxu1 }
 0x722   : > { %v1554_v37 = vcombine.low %v1546_v31, %v1553_v34 }
 0x724   : > { %v1556_v38 = vadd.f32 %v1554_v37, %v1533_v32 }
 0x726   : > { %v1938_v39 = vmul.f32 -1.442695, %v1556_v38  ;;  %v1564_v42 = vrot.slane %v1556_v38, 6 }
 0x728   : > { %2085 = vpow2.f32 %v1938_v39 }
 0x735   : > { %v2086_v40 = vpop.eup %2085 }
 0x736   : > { %v1560_v41 = vadd.f32 1.0, %v2086_v40 }
 0x738   : > { %2087 = vrcp.f32 %v1560_v41 }
 0x739   : > { %2089 = vtanh.f32 %v1564_v42 }
 0x745   : > { %v2088_v43 = vpop.eup %2087 }
 0x746   : > { %v1568_v44 = vrot.slane %v2088_v43, 2  ;;  %v2090_v45 = vpop.eup %2089  ;;  %v1574_v18 = vrot.slane %v2088_v43, 4 }
 0x747   : > { %v1571_v48 = vmul.f32 %v2090_v45, %v2088_v43 }
 0x748   : > { %v1570_v47 = vmul.f32 %v1568_v44, %v2731_v19 }
 0x74a   : > { %v1572_v49 = vadd.f32 %v1571_v48, %v1570_v47 }
 0x74c   : > { %2091 = vtanh.f32 %v1572_v49  ;;  %v1586_v50 = vsel %vm1584_vm14, %v1572_v49, %v2731_v19 }
 0x759   : > { %v2092_v20 = vpop.eup %2091 }
 0x75a   : > { %v1576_v22 = vmul.f32 %v2092_v20, %v1574_v18 }
 0x75c   : > { %v1585_v26 = vsel %vm1584_vm14, %v1576_v22, %v2734_v56 }
 0x75d   : > { %v1592_v10 = vpack.c.bf16 %v1585_v26, %v1585_v26 }
 0x75f   : > { %1626 = vmatmul.mubr.bf16.vlgmr.msra.gmra.mxu0 %v1592_v10  ;;  %1667 = vmatmul.mubr.bf16.vlgmr.msra.gmra.mxu1 %v1592_v10 }
 0x81f   : > { %v1627_v55 = vpop.f32.mrf.mxu0  ;;  %v1668_v57 = vpop.f32.mrf.mxu1 }
 0x821   : > { %v1629_v58 = vpop.f32.mrf.mxu0  ;;  %v1670_v14 = vpop.f32.mrf.mxu1 }
 0x822   : > { %v1680_v62 = vcombine.low %v1627_v55, %v1629_v58  ;;  %v1681_v16 = vcombine.low %v1668_v57, %v1670_v14 }
 0x823   : > { %v1631_v63 = vpop.f32.mrf.mxu0  ;;  %v1672_v1 = vpop.f32.mrf.mxu1 }
 0x824   : > { %v1688_v19 = vrot.slane %v1680_v62, %v2467_v61  ;;  %v1695_v56 = vrot.slane %v1681_v16, %v2467_v61 }
 0x825   : > { %v1632_v51 = vpop.f32.mrf.mxu0  ;;  %v1673_v2 = vpop.f32.mrf.mxu1 }
 0x826   : > { %v1696_v3 = vcombine.low %v1688_v19, %v1695_v56 }
 0x828   : > { %v1698_v4 = vadd.f32 %v1696_v3, %v1675_v9 }
 0x82a   : > { %v1941_v5 = vmul.f32 -1.442695, %v1698_v4  ;;  %v1706_v11 = vrot.slane %v1698_v4, 6 }
 0x82c   : > { %2093 = vpow2.f32 %v1941_v5 }
 0x839   : > { %v2094_v6 = vpop.eup %2093 }
 0x83a   : > { %v1702_v7 = vadd.f32 1.0, %v2094_v6 }
 0x83c   : > { %2095 = vrcp.f32 %v1702_v7 }
 0x83d   : > { %2097 = vtanh.f32 %v1706_v11 }
 0x849   : > { %v2096_v12 = vpop.eup %2095 }
 0x84a   : > { %v1710_v13 = vrot.slane %v2096_v12, 2  ;;  %v2098_v59 = vpop.eup %2097  ;;  %v1716_v52 = vrot.slane %v2096_v12, 4 }
 0x84b   : > { %v1713_v8 = vmul.f32 %v2098_v59, %v2096_v12 }
 0x84c   : > { %v1712_v24 = vmul.f32 %v1710_v13, %v1586_v50 }
 0x84e   : > { %v1714_v61 = vadd.f32 %v1713_v8, %v1712_v24 }
 0x850   : > { %2099 = vtanh.f32 %v1714_v61  ;;  %v1728_v15 = vsel %vm1726_vm15, %v1714_v61, %v1586_v50 }
 0x851   : > { %1730 = vst [vmem:[#allocation3] sm:$0x3] %v1728_v15  ;;  %1735 = vst [vmem:[%s386_s9] sm:$0x3] %v1728_v15 }
 0x85d   : > { %v2100_v54 = vpop.eup %2099 }
 0x85e   : > { %v1718_v17 = vmul.f32 %v2100_v54, %v1716_v52 }
 0x860   : > { %v1727_v33 = vsel %vm1726_vm15, %v1718_v17, %v1585_v26 }
 0x861   : > { %1729 = vst [vmem:[#allocation2] sm:$0x3] %v1727_v33  ;;  %1734 = vst [vmem:[%s382_s12] sm:$0x3] %v1727_v33 }
 0x862 PF: > { %s17_s25 = sadd.s32 1, %s2171_s25   ;;  %s2810_s21 = smov %s2159_s22 }
 0x863   : > { %p14_p10 = scmp.ge.s32.totalorder %s17_s25, 4   ;;  %s2811_s22 = smov %s2245_s29 }
 0x864   : > { %s2812_s23 = smov %s2167_s24  ;;  %s2813_s24 = smov %s2815_s26 }
 0x865   :  { %16 = sbr.rel (!%p14_p10) target bundleno = 3 (0x3), region = 147 }

// kernel: seq2seq_forward.9
= control target key start
LH: loop header
LB: loop body
LE: loop exit
PB: predicated region body
PF: predicated region fallthrough
CT: control target
= control target key end

     0   :  { %vm87_vm0 = vcmask 130048   ;;  %vm89_vm1 = vcmask 128000   ;;  %s147_s1 = inlined_call_operand.vmem [shape: bf16[16,256], index: 1, kind: input, shape index: {}]   ;;  %s148_s0 = inlined_call_operand.vmem [shape: bf16[14,256], index: 0, kind: input, shape index: {}]   ;;  %s149_s2 = inlined_call_operand.vmem [shape: f32[1,16], index: 2, kind: input, shape index: {}]   ;;  %s150_s3 = inlined_call_operand.vmem [shape: f32[14,16], index: 3, kind: output, shape index: {}]  }
   0x1   :  { %v100_v0 = vld [vmem:[%s147_s1 + $0x4] ss:$8 sps:$4 sm:$0xff]   ;;  %v102_v1 = vld [vmem:[%s147_s1] ss:$8 sps:$4 sm:$0xff]  }
   0x2   :  { %60 = vmatprep.subr.bf16.mxu0 %v100_v0  ;;  %v105_v2 = vld [vmem:[%s148_s0 + $0x4] ss:$8 sps:$4 sm:$0x7f]   ;;  %v103_v3 = vld [vmem:[%s148_s0] ss:$8 sps:$4 sm:$0x7f]  }
   0x3   :  { %61 = vmatpush1.bf16.xpose.msra.mxu0 %v102_v1  ;;  %78 = vmatprep.mubr.bf16.mxu0 %v105_v2  ;;  %v95_v4 = vld [vmem:[%s149_s2] ss:$0 sm:$0xff] }
   0xa   :  { %79 = vmatmul.mubr.bf16.vlgmr.msra.gmra.mxu0 %v103_v3 }
  0xca   :  { %v80_v5 = vpop.f32.mrf.mxu0 }
  0xcb   :  { %v81_v6 = vadd.f32 %v95_v4, %v80_v5 }
  0xcc   :  { %v82_v7 = vpop.f32.mrf.mxu0 }
  0xcd   :  { %88 = vst.msk [vmem:[%s150_s3] sm:$0xff] %vm87_vm0, %v81_v6 }
  0xce   :  { %v83_v8 = vpop.f32.mrf.mxu0 }
  0xcf   :  { %v84_v9 = vadd.f32 %v95_v4, %v83_v8 }
  0xd0   :  { %v85_v10 = vpop.f32.mrf.mxu0 }
  0xd1   :  { %90 = vst.msk [vmem:[%s150_s3 + $0x8] sm:$0x3f] %vm89_vm1, %v84_v9 }

// kernel: seq2seq_forward.8
= control target key start
LH: loop header
LB: loop body
LE: loop exit
PB: predicated region body
PF: predicated region fallthrough
CT: control target
= control target key end

     0   :  { %13 = vsyncpa [#allocation5], 0  ;;  %s11578_s0 = inlined_call_operand.vmem [shape: bf16[7,2,1024], index: 0, kind: input, shape index: {}]   ;;  %s11579_s1 = inlined_call_operand.vmem [shape: s32[2,1], index: 1, kind: input, shape index: {}]   ;;  %s11580_s2 = inlined_call_operand.vmem [shape: f32[2,256], index: 2, kind: input, shape index: {}]   ;;  %s11581_s3 = inlined_call_operand.vmem [shape: f32[2,256], index: 3, kind: input, shape index: {}]   ;;  %s11582_s4 = inlined_call_operand.vmem [shape: bf16[256,1024], index: 4, kind: input, shape index: {}]   ;;  %s11583_s5 = inlined_call_operand.vmem [shape: f32[7,2,256], index: 5, kind: output, shape index: {0}]   ;;  %s11584_s6 = inlined_call_operand.hbm [shape: f32[2,256], index: 6, kind: output, shape index: {1}]   ;;  %s11585_s7 = inlined_call_operand.hbm [shape: f32[2,256], index: 7, kind: output, shape index: {2}]  }
   0x1   :  { %v105_v0 = vld [vmem:[%s11582_s4 + $0x1c0] sm:$0xff]  ;;  %v106_v2 = vld [vmem:[%s11582_s4 + $0x1c8] sm:$0xff] }
   0x2   :  { %v109_v1 = vld [vmem:[%s11582_s4 + $0x1e0] sm:$0xff]  ;;  %v110_v4 = vld [vmem:[%s11582_s4 + $0x1e8] sm:$0xff] }
   0x3   :  { %v8325_v3 = vcombine.high %v105_v0, %v109_v1  ;;  %v8330_v5 = vcombine.low %v105_v0, %v109_v1  ;;  %v97_v6 = vld [vmem:[%s11582_s4 + $0x180] sm:$0xff]  ;;  %v8338_v8 = vcombine.high %v106_v2, %v110_v4  ;;  %v8340_v9 = vcombine.low %v106_v2, %v110_v4  ;;  %v98_v11 = vld [vmem:[%s11582_s4 + $0x188] sm:$0xff] }
   0x4   :  { %v101_v7 = vld [vmem:[%s11582_s4 + $0x1a0] sm:$0xff]  ;;  %v102_v12 = vld [vmem:[%s11582_s4 + $0x1a8] sm:$0xff] }
   0x5   :  { %v8342_v10 = vcombine.high %v97_v6, %v101_v7  ;;  %v89_v13 = vld [vmem:[%s11582_s4 + $0x140] sm:$0xff]  ;;  %817 = vmatprep.subr.bf16.mxu0 %v8325_v3  ;;  %v8354_v14 = vcombine.high %v98_v11, %v102_v12  ;;  %v90_v16 = vld [vmem:[%s11582_s4 + $0x148] sm:$0xff]  ;;  %858 = vmatprep.subr.bf16.mxu1 %v8338_v8  ;;  %v8367_v18 = vcombine.low %v97_v6, %v101_v7 }
   0x6   :  { %v93_v15 = vld [vmem:[%s11582_s4 + $0x160] sm:$0xff]  ;;  %v94_v17 = vld [vmem:[%s11582_s4 + $0x168] sm:$0xff]  ;;  %818 = vmatpush1.bf16.msra.mxu0 %v8330_v5  ;;  %859 = vmatpush1.bf16.msra.mxu1 %v8340_v9  ;;  %v8371_v19 = vcombine.low %v98_v11, %v102_v12 }
   0x7   :  { %819 = vmatprep.subr.bf16.mxu0 %v8342_v10  ;;  %v8373_v20 = vcombine.high %v89_v13, %v93_v15  ;;  %860 = vmatprep.subr.bf16.mxu1 %v8354_v14  ;;  %v8376_v21 = vcombine.high %v90_v16, %v94_v17  ;;  %v81_v22 = vld [vmem:[%s11582_s4 + $0x100] sm:$0xff]  ;;  %v82_v24 = vld [vmem:[%s11582_s4 + $0x108] sm:$0xff]  ;;  %v8391_v26 = vcombine.low %v89_v13, %v93_v15 }
   0x8   :  { %v85_v23 = vld [vmem:[%s11582_s4 + $0x120] sm:$0xff]  ;;  %v86_v25 = vld [vmem:[%s11582_s4 + $0x128] sm:$0xff]  ;;  %v8395_v27 = vcombine.low %v90_v16, %v94_v17 }
   0x9   :  { %v8397_v28 = vcombine.high %v81_v22, %v85_v23  ;;  %v8400_v29 = vcombine.high %v82_v24, %v86_v25  ;;  %v73_v30 = vld [vmem:[%s11582_s4 + $0xc0] sm:$0xff]  ;;  %v74_v32 = vld [vmem:[%s11582_s4 + $0xc8] sm:$0xff]  ;;  %v8415_v34 = vcombine.low %v81_v22, %v85_v23  ;;  %v8419_v35 = vcombine.low %v82_v24, %v86_v25 }
   0xa   :  { %820 = vmatpush1.bf16.msra.mxu0 %v8367_v18  ;;  %861 = vmatpush1.bf16.msra.mxu1 %v8371_v19  ;;  %v77_v31 = vld [vmem:[%s11582_s4 + $0xe0] sm:$0xff]  ;;  %v78_v33 = vld [vmem:[%s11582_s4 + $0xe8] sm:$0xff] }
   0xb   :  { %821 = vmatprep.subr.bf16.mxu0 %v8373_v20  ;;  %862 = vmatprep.subr.bf16.mxu1 %v8376_v21  ;;  %v8421_v36 = vcombine.high %v73_v30, %v77_v31  ;;  %v8424_v37 = vcombine.high %v74_v32, %v78_v33  ;;  %v65_v38 = vld [vmem:[%s11582_s4 + $0x80] sm:$0xff]  ;;  %v66_v40 = vld [vmem:[%s11582_s4 + $0x88] sm:$0xff]  ;;  %v8439_v42 = vcombine.low %v73_v30, %v77_v31 }
   0xc   :  { %v69_v39 = vld [vmem:[%s11582_s4 + $0xa0] sm:$0xff]  ;;  %v70_v41 = vld [vmem:[%s11582_s4 + $0xa8] sm:$0xff]  ;;  %v8443_v43 = vcombine.low %v74_v32, %v78_v33 }
   0xd   :  { %v8445_v44 = vcombine.high %v65_v38, %v69_v39  ;;  %v8448_v45 = vcombine.high %v66_v40, %v70_v41  ;;  %v57_v46 = vld [vmem:[%s11582_s4 + $0x40] sm:$0xff]  ;;  %v58_v48 = vld [vmem:[%s11582_s4 + $0x48] sm:$0xff]  ;;  %v8463_v50 = vcombine.low %v65_v38, %v69_v39  ;;  %v8467_v51 = vcombine.low %v66_v40, %v70_v41 }
   0xe   :  { %822 = vmatpush1.bf16.msra.mxu0 %v8391_v26  ;;  %863 = vmatpush1.bf16.msra.mxu1 %v8395_v27  ;;  %v61_v47 = vld [vmem:[%s11582_s4 + $0x60] sm:$0xff]  ;;  %v62_v49 = vld [vmem:[%s11582_s4 + $0x68] sm:$0xff] }
   0xf   :  { %823 = vmatprep.subr.bf16.mxu0 %v8397_v28  ;;  %864 = vmatprep.subr.bf16.mxu1 %v8400_v29  ;;  %v8469_v52 = vcombine.high %v57_v46, %v61_v47  ;;  %v29_v53 = vld [vmem:[%s11580_s2] sm:$0xf]  ;;  %v8475_v54 = vcombine.high %v58_v48, %v62_v49  ;;  %v50_v57 = vld [vmem:[%s11582_s4 + $0x8] sm:$0xff]  ;;  %v8490_v59 = vcombine.low %v57_v46, %v61_v47 }
  0x10   :  { %v49_v55 = vld [vmem:[%s11582_s4] sm:$0xff]  ;;  %30 = vst [vmem:[#allocation2] sm:$0xf] %v29_v53  ;;  %v54_v58 = vld [vmem:[%s11582_s4 + $0x28] sm:$0xff]  ;;  %v8494_v60 = vcombine.low %v58_v48, %v62_v49 }
  0x11   :  { %v53_v56 = vld [vmem:[%s11582_s4 + $0x20] sm:$0xff]  ;;  %v8499_v62 = vcombine.high %v50_v57, %v54_v58  ;;  %v170_v1 = vld [vmem:[%s11582_s4 + $0x3c8] sm:$0xff]  ;;  %v8518_v6 = vcombine.low %v50_v57, %v54_v58 }
  0x12   :  { %824 = vmatpush1.bf16.msra.mxu0 %v8415_v34  ;;  %865 = vmatpush1.bf16.msra.mxu1 %v8419_v35  ;;  %v8496_v61 = vcombine.high %v49_v55, %v53_v56  ;;  %v169_v63 = vld [vmem:[%s11582_s4 + $0x3c0] sm:$0xff]  ;;  %v174_v2 = vld [vmem:[%s11582_s4 + $0x3e8] sm:$0xff]  ;;  %v8514_v4 = vcombine.low %v49_v55, %v53_v56 }
  0x13   :  { %825 = vmatprep.subr.bf16.mxu0 %v8421_v36  ;;  %866 = vmatprep.subr.bf16.mxu1 %v8424_v37  ;;  %v173_v0 = vld [vmem:[%s11582_s4 + $0x3e0] sm:$0xff]  ;;  %v8525_v12 = vcombine.high %v170_v1, %v174_v2  ;;  %v162_v17 = vld [vmem:[%s11582_s4 + $0x388] sm:$0xff]  ;;  %v8548_v25 = vcombine.low %v170_v1, %v174_v2 }
  0x14   :  { %v8520_v7 = vcombine.high %v169_v63, %v173_v0  ;;  %v161_v13 = vld [vmem:[%s11582_s4 + $0x380] sm:$0xff]  ;;  %v166_v22 = vld [vmem:[%s11582_s4 + $0x3a8] sm:$0xff]  ;;  %v8542_v23 = vcombine.low %v169_v63, %v173_v0 }
  0x15   :  { %v165_v15 = vld [vmem:[%s11582_s4 + $0x3a0] sm:$0xff]  ;;  %v8553_v31 = vcombine.high %v162_v17, %v166_v22  ;;  %v154_v38 = vld [vmem:[%s11582_s4 + $0x348] sm:$0xff]  ;;  %v8574_v41 = vcombine.low %v162_v17, %v166_v22 }
  0x16   :  { %826 = vmatpush1.bf16.msra.mxu0 %v8439_v42  ;;  %867 = vmatpush1.bf16.msra.mxu1 %v8443_v43  ;;  %v8550_v30 = vcombine.high %v161_v13, %v165_v15  ;;  %v153_v32 = vld [vmem:[%s11582_s4 + $0x340] sm:$0xff]  ;;  %v158_v39 = vld [vmem:[%s11582_s4 + $0x368] sm:$0xff]  ;;  %v8570_v40 = vcombine.low %v161_v13, %v165_v15 }
  0x17   :  { %827 = vmatprep.subr.bf16.mxu0 %v8445_v44  ;;  %868 = vmatprep.subr.bf16.mxu1 %v8448_v45  ;;  %v8522_v11 = vld.sshfl [vmem:[#allocation2] sm:$0x33 pattern:$0x76325410]  ;;  %v8579_v47 = vcombine.high %v154_v38, %v158_v39  ;;  %v146_v53 = vld [vmem:[%s11582_s4 + $0x308] sm:$0xff]  ;;  %v8598_v57 = vcombine.low %v154_v38, %v158_v39 }
  0x18   :  { %v44_v16 = vcombine.high %v8522_v11, %v8522_v11  ;;  %v157_v33 = vld [vmem:[%s11582_s4 + $0x360] sm:$0xff]  ;;  %v150_v55 = vld [vmem:[%s11582_s4 + $0x328] sm:$0xff] }
  0x19   :  { %v8576_v46 = vcombine.high %v153_v32, %v157_v33  ;;  %v145_v48 = vld [vmem:[%s11582_s4 + $0x300] sm:$0xff]  ;;  %v8594_v56 = vcombine.low %v153_v32, %v157_v33  ;;  %v8603_v63 = vcombine.high %v146_v53, %v150_v55  ;;  %v138_v2 = vld [vmem:[%s11582_s4 + $0x2c8] sm:$0xff] }
  0x1a   :  { %828 = vmatpush1.bf16.msra.mxu0 %v8463_v50  ;;  %869 = vmatpush1.bf16.msra.mxu1 %v8467_v51  ;;  %v8544_v24 = vpack.c.bf16 %v44_v16, %v44_v16  ;;  %v149_v49 = vld [vmem:[%s11582_s4 + $0x320] sm:$0xff]  ;;  %v142_v13 = vld [vmem:[%s11582_s4 + $0x2e8] sm:$0xff] }
  0x1b   :  { %829 = vmatprep.subr.bf16.mxu0 %v8469_v52  ;;  %870 = vmatprep.subr.bf16.mxu1 %v8475_v54  ;;  %v8600_v58 = vcombine.high %v145_v48, %v149_v49  ;;  %11808 = vst [vmem:[#allocation10_spill] sm:$0xff] %v8603_v63  ;;  %v137_v0 = vld [vmem:[%s11582_s4 + $0x2c0] sm:$0xff] }
  0x1c   :  { %849 = vmatprep.mubr.bf16.mxu0 %v8544_v24  ;;  %890 = vmatprep.mubr.bf16.mxu1 %v8544_v24  ;;  %v141_v1 = vld [vmem:[%s11582_s4 + $0x2e0] sm:$0xff] }
  0x1e   :  { %830 = vmatpush1.bf16.msra.mxu0 %v8490_v59  ;;  %871 = vmatpush1.bf16.msra.mxu1 %v8494_v60 }
  0x1f   :  { %831 = vmatprep.subr.bf16.mxu0 %v8496_v61  ;;  %872 = vmatprep.subr.bf16.mxu1 %v8499_v62 }
  0x22   :  { %832 = vmatpush1.bf16.msra.mxu0 %v8514_v4  ;;  %873 = vmatpush1.bf16.msra.mxu1 %v8518_v6 }
  0x23   :  { %833 = vmatprep.subr.bf16.mxu0 %v8520_v7  ;;  %874 = vmatprep.subr.bf16.mxu1 %v8525_v12 }
  0x26   :  { %834 = vmatpush2.bf16.msra.mxu0 %v8542_v23  ;;  %875 = vmatpush2.bf16.msra.mxu1 %v8548_v25 }
  0x27   :  { %835 = vmatprep.subr.bf16.mxu0 %v8550_v30  ;;  %876 = vmatprep.subr.bf16.mxu1 %v8553_v31 }
  0x2a   :  { %836 = vmatpush2.bf16.msra.mxu0 %v8570_v40  ;;  %877 = vmatpush2.bf16.msra.mxu1 %v8574_v41 }
  0x2b   :  { %837 = vmatprep.subr.bf16.mxu0 %v8576_v46  ;;  %878 = vmatprep.subr.bf16.mxu1 %v8579_v47 }
  0x2c   :  { %14 = vsyncpa [#allocation7], 0  ;;  %v8618_v15 = vcombine.low %v145_v48, %v149_v49  ;;  %v8622_v16 = vcombine.low %v146_v53, %v150_v55  ;;  %v8624_v17 = vcombine.high %v137_v0, %v141_v1  ;;  %v8627_v22 = vcombine.high %v138_v2, %v142_v13  ;;  %v129_v32 = vld [vmem:[%s11582_s4 + $0x280] sm:$0xff]  ;;  %v130_v38 = vld [vmem:[%s11582_s4 + $0x288] sm:$0xff] }
  0x2d   :  { %v133_v33 = vld [vmem:[%s11582_s4 + $0x2a0] sm:$0xff]  ;;  %v134_v39 = vld [vmem:[%s11582_s4 + $0x2a8] sm:$0xff]  ;;  %v8642_v48 = vcombine.low %v137_v0, %v141_v1  ;;  %v8646_v49 = vcombine.low %v138_v2, %v142_v13 }
  0x2e   :  { %838 = vmatpush2.bf16.msra.mxu0 %v8594_v56  ;;  %11809 = vst [vmem:[#allocation11_spill] sm:$0xff] %v8618_v15  ;;  %879 = vmatpush2.bf16.msra.mxu1 %v8598_v57  ;;  %11810 = vst [vmem:[#allocation12_spill] sm:$0xff] %v8622_v16  ;;  %v8648_v53 = vcombine.high %v129_v32, %v133_v33  ;;  %v8651_v55 = vcombine.high %v130_v38, %v134_v39  ;;  %v125_v0 = vld [vmem:[%s11582_s4 + $0x260] sm:$0xff]  ;;  %v122_v1 = vld [vmem:[%s11582_s4 + $0x248] sm:$0xff] }
  0x2f   :  { %839 = vmatprep.subr.bf16.mxu0 %v8600_v58  ;;  %11811 = vst [vmem:[#allocation13_spill] sm:$0xff] %v8624_v17  ;;  %880 = vmatprep.subr.bf16.mxu1 %v8603_v63  ;;  %11812 = vst [vmem:[#allocation14_spill] sm:$0xff] %v8627_v22  ;;  %v121_v63 = vld [vmem:[%s11582_s4 + $0x240] sm:$0xff]  ;;  %v126_v2 = vld [vmem:[%s11582_s4 + $0x268] sm:$0xff]  ;;  %v8666_v13 = vcombine.low %v129_v32, %v133_v33 }
  0x30   :  { %11813 = vst [vmem:[#allocation15_spill] sm:$0xff] %v8642_v48  ;;  %11814 = vst [vmem:[#allocation16_spill] sm:$0xff] %v8646_v49  ;;  %v117_v32 = vld [vmem:[%s11582_s4 + $0x220] sm:$0xff]  ;;  %v114_v33 = vld [vmem:[%s11582_s4 + $0x208] sm:$0xff] }
  0x31   :  { %11815 = vst [vmem:[#allocation17_spill] sm:$0xff] %v8648_v53  ;;  %11816 = vst [vmem:[#allocation18_spill] sm:$0xff] %v8651_v55 }
  0x32   :  { %840 = vmatpush2.bf16.msra.mxu0 %v8618_v15  ;;  %881 = vmatpush2.bf16.msra.mxu1 %v8622_v16  ;;  %11817 = vst [vmem:[#allocation19_spill] sm:$0xff] %v8666_v13  ;;  %v8675_v16 = vcombine.high %v122_v1, %v126_v2  ;;  %v113_v15 = vld [vmem:[%s11582_s4 + $0x200] sm:$0xff] }
  0x33   :  { %841 = vmatprep.subr.bf16.mxu0 %v8624_v17  ;;  %882 = vmatprep.subr.bf16.mxu1 %v8627_v22  ;;  %v8670_v22 = vcombine.low %v130_v38, %v134_v39  ;;  %v8672_v17 = vcombine.high %v121_v63, %v125_v0  ;;  %v118_v38 = vld [vmem:[%s11582_s4 + $0x228] sm:$0xff]  ;;  %v8690_v39 = vcombine.low %v121_v63, %v125_v0  ;;  %v111_v63 = vld [vmem:[%s11582_s4 + $0x1f0] sm:$0xff]  ;;  %v108_v0 = vld [vmem:[%s11582_s4 + $0x1d8] sm:$0xff] }
  0x34   :  { %11820 = vst [vmem:[#allocation22_spill] sm:$0xff] %v8675_v16 }
  0x35   :  { %11818 = vst [vmem:[#allocation20_spill] sm:$0xff] %v8670_v22  ;;  %11819 = vst [vmem:[#allocation21_spill] sm:$0xff] %v8672_v17 }
  0x36   :  { %842 = vmatpush2.bf16.msra.mxu0 %v8642_v48  ;;  %883 = vmatpush2.bf16.msra.mxu1 %v8646_v49  ;;  %11821 = vst [vmem:[#allocation23_spill] sm:$0xff] %v8690_v39  ;;  %v8699_v49 = vcombine.high %v114_v33, %v118_v38  ;;  %v107_v48 = vld [vmem:[%s11582_s4 + $0x1d0] sm:$0xff] }
  0x37   :  { %843 = vmatprep.subr.bf16.mxu0 %v8648_v53  ;;  %884 = vmatprep.subr.bf16.mxu1 %v8651_v55  ;;  %v8694_v55 = vcombine.low %v122_v1, %v126_v2  ;;  %v8696_v53 = vcombine.high %v113_v15, %v117_v32  ;;  %v112_v1 = vld [vmem:[%s11582_s4 + $0x1f8] sm:$0xff]  ;;  %v8714_v2 = vcombine.low %v113_v15, %v117_v32  ;;  %v103_v15 = vld [vmem:[%s11582_s4 + $0x1b0] sm:$0xff] }
  0x38   :  { %11824 = vst [vmem:[#allocation26_spill] sm:$0xff] %v8699_v49  ;;  %v8733_v32 = vpack.c.bf16 %v8522_v11, %v8522_v11 }
  0x39   :  { %11822 = vst [vmem:[#allocation24_spill] sm:$0xff] %v8694_v55  ;;  %11823 = vst [vmem:[#allocation25_spill] sm:$0xff] %v8696_v53 }
  0x3a   :  { %844 = vmatpush2.bf16.msra.mxu0 %v8666_v13  ;;  %885 = vmatpush2.bf16.msra.mxu1 %v8670_v22  ;;  %11825 = vst [vmem:[#allocation27_spill] sm:$0xff] %v8714_v2  ;;  %v8723_v22 = vcombine.high %v108_v0, %v112_v1  ;;  %v99_v13 = vld [vmem:[%s11582_s4 + $0x190] sm:$0xff] }
  0x3b   :  { %845 = vmatprep.subr.bf16.mxu0 %v8672_v17  ;;  %886 = vmatprep.subr.bf16.mxu1 %v8675_v16  ;;  %v8718_v16 = vcombine.low %v114_v33, %v118_v38  ;;  %v8720_v17 = vcombine.high %v107_v48, %v111_v63  ;;  %v100_v33 = vld [vmem:[%s11582_s4 + $0x198] sm:$0xff]  ;;  %v8748_v11 = vcombine.high %v99_v13, %v103_v15 }
  0x3c   :  { %11828 = vst [vmem:[#allocation30_spill] sm:$0xff] %v8723_v22  ;;  %v104_v38 = vld [vmem:[%s11582_s4 + $0x1b8] sm:$0xff] }
  0x3d   :  { %11826 = vst [vmem:[#allocation28_spill] sm:$0xff] %v8718_v16  ;;  %11827 = vst [vmem:[#allocation29_spill] sm:$0xff] %v8720_v17 }
  0x3e   :  { %846 = vmatpush2.bf16.msra.mxu0 %v8690_v39  ;;  %887 = vmatpush2.bf16.msra.mxu1 %v8694_v55  ;;  %11830 = vst [vmem:[#allocation32_spill] sm:$0xff] %v8748_v11  ;;  %v8751_v55 = vcombine.high %v100_v33, %v104_v38  ;;  %v91_v39 = vld [vmem:[%s11582_s4 + $0x150] sm:$0xff] }
  0x3f   :  { %847 = vmatprep.subr.bf16.mxu0 %v8696_v53  ;;  %888 = vmatprep.subr.bf16.mxu1 %v8699_v49  ;;  %v8742_v49 = vcombine.low %v107_v48, %v111_v63  ;;  %v8746_v53 = vcombine.low %v108_v0, %v112_v1  ;;  %v95_v48 = vld [vmem:[%s11582_s4 + $0x170] sm:$0xff]  ;;  %v92_v63 = vld [vmem:[%s11582_s4 + $0x158] sm:$0xff]  ;;  %v8768_v1 = vcombine.low %v99_v13, %v103_v15 }
  0x40   :  { %11831 = vst [vmem:[#allocation33_spill] sm:$0xff] %v8751_v55  ;;  %v96_v0 = vld [vmem:[%s11582_s4 + $0x178] sm:$0xff]  ;;  %v87_v13 = vld [vmem:[%s11582_s4 + $0x130] sm:$0xff] }
  0x41   :  { %11829 = vst [vmem:[#allocation31_spill] sm:$0xff] %v8746_v53  ;;  %11832 = vst [vmem:[#allocation34_spill] sm:$0xff] %v8768_v1  ;;  %v84_v15 = vld [vmem:[%s11582_s4 + $0x118] sm:$0xff] }
  0x42   :  { %848 = vmatpush2.bf16.msra.mxu0 %v8714_v2  ;;  %889 = vmatpush2.bf16.msra.mxu1 %v8718_v16  ;;  %v8777_v16 = vcombine.high %v92_v63, %v96_v0  ;;  %v83_v2 = vld [vmem:[%s11582_s4 + $0x110] sm:$0xff] }
  0x43   :  { %899 = vmatprep.subr.bf16.mxu0 %v8720_v17  ;;  %940 = vmatprep.subr.bf16.mxu1 %v8723_v22  ;;  %v8772_v22 = vcombine.low %v100_v33, %v104_v38  ;;  %v8774_v17 = vcombine.high %v91_v39, %v95_v48  ;;  %v88_v33 = vld [vmem:[%s11582_s4 + $0x138] sm:$0xff]  ;;  %v8794_v38 = vcombine.low %v91_v39, %v95_v48  ;;  %v79_v39 = vld [vmem:[%s11582_s4 + $0xf0] sm:$0xff] }
  0x44   :  { %11835 = vst [vmem:[#allocation37_spill] sm:$0xff] %v8777_v16  ;;  %v76_v48 = vld [vmem:[%s11582_s4 + $0xd8] sm:$0xff] }
  0x45   :  { %850 = vmatmul.mubr.bf16.vlgmr.msra.gmra.mxu0 %v8733_v32  ;;  %891 = vmatmul.mubr.bf16.vlgmr.msra.gmra.mxu1 %v8733_v32  ;;  %11833 = vst [vmem:[#allocation35_spill] sm:$0xff] %v8772_v22  ;;  %11834 = vst [vmem:[#allocation36_spill] sm:$0xff] %v8774_v17 }
  0x46   :  { %900 = vmatpush1.bf16.msra.mxu0 %v8742_v49  ;;  %941 = vmatpush1.bf16.msra.mxu1 %v8746_v53  ;;  %11836 = vst [vmem:[#allocation38_spill] sm:$0xff] %v8794_v38  ;;  %v8803_v53 = vcombine.high %v84_v15, %v88_v33 }
  0x47   :  { %901 = vmatprep.subr.bf16.mxu0 %v8748_v11  ;;  %942 = vmatprep.subr.bf16.mxu1 %v8751_v55  ;;  %v8798_v55 = vcombine.low %v92_v63, %v96_v0  ;;  %v8800_v11 = vcombine.high %v83_v2, %v87_v13  ;;  %v80_v63 = vld [vmem:[%s11582_s4 + $0xf8] sm:$0xff]  ;;  %v8818_v0 = vcombine.low %v83_v2, %v87_v13  ;;  %v71_v2 = vld [vmem:[%s11582_s4 + $0xb0] sm:$0xff] }
  0x48   :  { %931 = vmatprep.mubr.bf16.mxu0 %v8544_v24  ;;  %972 = vmatprep.mubr.bf16.mxu1 %v8544_v24  ;;  %11839 = vst [vmem:[#allocation41_spill] sm:$0xff] %v8803_v53  ;;  %v75_v24 = vld [vmem:[%s11582_s4 + $0xd0] sm:$0xff]  ;;  %v68_v13 = vld [vmem:[%s11582_s4 + $0x98] sm:$0xff] }
  0x49   :  { %11837 = vst [vmem:[#allocation39_spill] sm:$0xff] %v8798_v55  ;;  %11838 = vst [vmem:[#allocation40_spill] sm:$0xff] %v8800_v11 }
  0x4a   :  { %902 = vmatpush1.bf16.msra.mxu0 %v8768_v1  ;;  %943 = vmatpush1.bf16.msra.mxu1 %v8772_v22  ;;  %11840 = vst [vmem:[#allocation42_spill] sm:$0xff] %v8818_v0  ;;  %v8827_v22 = vcombine.high %v76_v48, %v80_v63  ;;  %v67_v1 = vld [vmem:[%s11582_s4 + $0x90] sm:$0xff] }
  0x4b   :  { %903 = vmatprep.subr.bf16.mxu0 %v8774_v17  ;;  %944 = vmatprep.subr.bf16.mxu1 %v8777_v16  ;;  %v8822_v16 = vcombine.low %v84_v15, %v88_v33  ;;  %v8824_v17 = vcombine.high %v75_v24, %v79_v39  ;;  %v72_v15 = vld [vmem:[%s11582_s4 + $0xb8] sm:$0xff]  ;;  %v8842_v33 = vcombine.low %v75_v24, %v79_v39  ;;  %v63_v24 = vld [vmem:[%s11582_s4 + $0x70] sm:$0xff] }
  0x4c   :  { %11843 = vst [vmem:[#allocation45_spill] sm:$0xff] %v8827_v22  ;;  %v60_v39 = vld [vmem:[%s11582_s4 + $0x58] sm:$0xff] }
  0x4d   :  { %11841 = vst [vmem:[#allocation43_spill] sm:$0xff] %v8822_v16  ;;  %11842 = vst [vmem:[#allocation44_spill] sm:$0xff] %v8824_v17 }
  0x4e   :  { %904 = vmatpush1.bf16.msra.mxu0 %v8794_v38  ;;  %945 = vmatpush1.bf16.msra.mxu1 %v8798_v55  ;;  %11844 = vst [vmem:[#allocation46_spill] sm:$0xff] %v8842_v33  ;;  %v8851_v55 = vcombine.high %v68_v13, %v72_v15  ;;  %v59_v38 = vld [vmem:[%s11582_s4 + $0x50] sm:$0xff] }
  0x4f   :  { %905 = vmatprep.subr.bf16.mxu0 %v8800_v11  ;;  %946 = vmatprep.subr.bf16.mxu1 %v8803_v53  ;;  %v8846_v53 = vcombine.low %v76_v48, %v80_v63  ;;  %v8848_v11 = vcombine.high %v67_v1, %v71_v2  ;;  %v64_v48 = vld [vmem:[%s11582_s4 + $0x78] sm:$0xff]  ;;  %v8866_v63 = vcombine.low %v67_v1, %v71_v2  ;;  %v55_v1 = vld [vmem:[%s11582_s4 + $0x30] sm:$0xff] }
  0x50   :  { %11847 = vst [vmem:[#allocation49_spill] sm:$0xff] %v8851_v55  ;;  %v52_v2 = vld [vmem:[%s11582_s4 + $0x18] sm:$0xff] }
  0x51   :  { %11845 = vst [vmem:[#allocation47_spill] sm:$0xff] %v8846_v53  ;;  %11846 = vst [vmem:[#allocation48_spill] sm:$0xff] %v8848_v11 }
  0x52   :  { %906 = vmatpush1.bf16.msra.mxu0 %v8818_v0  ;;  %947 = vmatpush1.bf16.msra.mxu1 %v8822_v16  ;;  %11848 = vst [vmem:[#allocation50_spill] sm:$0xff] %v8866_v63  ;;  %v8875_v16 = vcombine.high %v60_v39, %v64_v48  ;;  %v51_v0 = vld [vmem:[%s11582_s4 + $0x10] sm:$0xff] }
  0x53   :  { %907 = vmatprep.subr.bf16.mxu0 %v8824_v17  ;;  %948 = vmatprep.subr.bf16.mxu1 %v8827_v22  ;;  %v8870_v22 = vcombine.low %v68_v13, %v72_v15  ;;  %v8872_v17 = vcombine.high %v59_v38, %v63_v24  ;;  %v56_v13 = vld [vmem:[%s11582_s4 + $0x38] sm:$0xff]  ;;  %v8890_v15 = vcombine.low %v59_v38, %v63_v24  ;;  %v175_v38 = vld [vmem:[%s11582_s4 + $0x3f0] sm:$0xff] }
  0x54   :  { %11851 = vst [vmem:[#allocation53_spill] sm:$0xff] %v8875_v16  ;;  %v172_v24 = vld [vmem:[%s11582_s4 + $0x3d8] sm:$0xff] }
  0x55   :  { %11849 = vst [vmem:[#allocation51_spill] sm:$0xff] %v8870_v22  ;;  %11850 = vst [vmem:[#allocation52_spill] sm:$0xff] %v8872_v17 }
  0x56   :  { %908 = vmatpush1.bf16.msra.mxu0 %v8842_v33  ;;  %949 = vmatpush1.bf16.msra.mxu1 %v8846_v53  ;;  %11852 = vst [vmem:[#allocation54_spill] sm:$0xff] %v8890_v15  ;;  %v8899_v53 = vcombine.high %v52_v2, %v56_v13  ;;  %v171_v33 = vld [vmem:[%s11582_s4 + $0x3d0] sm:$0xff] }
  0x57   :  { %909 = vmatprep.subr.bf16.mxu0 %v8848_v11  ;;  %950 = vmatprep.subr.bf16.mxu1 %v8851_v55  ;;  %v8894_v55 = vcombine.low %v60_v39, %v64_v48  ;;  %v8896_v11 = vcombine.high %v51_v0, %v55_v1  ;;  %v176_v39 = vld [vmem:[%s11582_s4 + $0x3f8] sm:$0xff]  ;;  %v8914_v48 = vcombine.low %v51_v0, %v55_v1  ;;  %v167_v0 = vld [vmem:[%s11582_s4 + $0x3b0] sm:$0xff] }
  0x58   :  { %11855 = vst [vmem:[#allocation57_spill] sm:$0xff] %v8899_v53  ;;  %v164_v1 = vld [vmem:[%s11582_s4 + $0x398] sm:$0xff] }
  0x59   :  { %11853 = vst [vmem:[#allocation55_spill] sm:$0xff] %v8894_v55  ;;  %11854 = vst [vmem:[#allocation56_spill] sm:$0xff] %v8896_v11 }
  0x5a   :  { %910 = vmatpush1.bf16.msra.mxu0 %v8866_v63  ;;  %951 = vmatpush1.bf16.msra.mxu1 %v8870_v22  ;;  %11856 = vst [vmem:[#allocation58_spill] sm:$0xff] %v8914_v48  ;;  %v8923_v22 = vcombine.high %v172_v24, %v176_v39  ;;  %v163_v63 = vld [vmem:[%s11582_s4 + $0x390] sm:$0xff] }
  0x5b   :  { %911 = vmatprep.subr.bf16.mxu0 %v8872_v17  ;;  %952 = vmatprep.subr.bf16.mxu1 %v8875_v16  ;;  %v8918_v16 = vcombine.low %v52_v2, %v56_v13  ;;  %v8920_v17 = vcombine.high %v171_v33, %v175_v38  ;;  %v168_v2 = vld [vmem:[%s11582_s4 + $0x3b8] sm:$0xff]  ;;  %v8938_v13 = vcombine.low %v171_v33, %v175_v38  ;;  %v159_v33 = vld [vmem:[%s11582_s4 + $0x370] sm:$0xff] }
  0x5c   :  { %11859 = vst [vmem:[#allocation61_spill] sm:$0xff] %v8923_v22  ;;  %v156_v38 = vld [vmem:[%s11582_s4 + $0x358] sm:$0xff] }
  0x5d   :  { %11857 = vst [vmem:[#allocation59_spill] sm:$0xff] %v8918_v16  ;;  %11858 = vst [vmem:[#allocation60_spill] sm:$0xff] %v8920_v17 }
  0x5e   :  { %912 = vmatpush1.bf16.msra.mxu0 %v8890_v15  ;;  %953 = vmatpush1.bf16.msra.mxu1 %v8894_v55  ;;  %11860 = vst [vmem:[#allocation62_spill] sm:$0xff] %v8938_v13  ;;  %v8947_v55 = vcombine.high %v164_v1, %v168_v2  ;;  %v155_v15 = vld [vmem:[%s11582_s4 + $0x350] sm:$0xff] }
  0x5f   :  { %913 = vmatprep.subr.bf16.mxu0 %v8896_v11  ;;  %954 = vmatprep.subr.bf16.mxu1 %v8899_v53  ;;  %v8942_v53 = vcombine.low %v172_v24, %v176_v39  ;;  %v8944_v11 = vcombine.high %v163_v63, %v167_v0  ;;  %v160_v24 = vld [vmem:[%s11582_s4 + $0x378] sm:$0xff]  ;;  %v8962_v39 = vcombine.low %v163_v63, %v167_v0  ;;  %v151_v63 = vld [vmem:[%s11582_s4 + $0x330] sm:$0xff] }
  0x60   :  { %11863 = vst [vmem:[#allocation65_spill] sm:$0xff] %v8947_v55  ;;  %v148_v0 = vld [vmem:[%s11582_s4 + $0x318] sm:$0xff] }
  0x61   :  { %11861 = vst [vmem:[#allocation63_spill] sm:$0xff] %v8942_v53  ;;  %11862 = vst [vmem:[#allocation64_spill] sm:$0xff] %v8944_v11 }
  0x62   :  { %914 = vmatpush1.bf16.msra.mxu0 %v8914_v48  ;;  %955 = vmatpush1.bf16.msra.mxu1 %v8918_v16  ;;  %11864 = vst [vmem:[#allocation66_spill] sm:$0xff] %v8962_v39  ;;  %v8971_v16 = vcombine.high %v156_v38, %v160_v24  ;;  %v147_v48 = vld [vmem:[%s11582_s4 + $0x310] sm:$0xff] }
  0x63   :  { %915 = vmatprep.subr.bf16.mxu0 %v8920_v17  ;;  %956 = vmatprep.subr.bf16.mxu1 %v8923_v22  ;;  %v8966_v22 = vcombine.low %v164_v1, %v168_v2  ;;  %v8968_v17 = vcombine.high %v155_v15, %v159_v33  ;;  %v152_v1 = vld [vmem:[%s11582_s4 + $0x338] sm:$0xff]  ;;  %v8986_v2 = vcombine.low %v155_v15, %v159_v33  ;;  %v143_v15 = vld [vmem:[%s11582_s4 + $0x2f0] sm:$0xff] }
  0x64   :  { %11867 = vst [vmem:[#allocation69_spill] sm:$0xff] %v8971_v16  ;;  %v140_v33 = vld [vmem:[%s11582_s4 + $0x2d8] sm:$0xff] }
  0x65   :  { %11865 = vst [vmem:[#allocation67_spill] sm:$0xff] %v8966_v22  ;;  %11866 = vst [vmem:[#allocation68_spill] sm:$0xff] %v8968_v17 }
  0x66   :  { %916 = vmatpush2.bf16.msra.mxu0 %v8938_v13  ;;  %957 = vmatpush2.bf16.msra.mxu1 %v8942_v53  ;;  %11868 = vst [vmem:[#allocation70_spill] sm:$0xff] %v8986_v2  ;;  %v8995_v53 = vcombine.high %v148_v0, %v152_v1  ;;  %v139_v13 = vld [vmem:[%s11582_s4 + $0x2d0] sm:$0xff] }
  0x67   :  { %917 = vmatprep.subr.bf16.mxu0 %v8944_v11  ;;  %958 = vmatprep.subr.bf16.mxu1 %v8947_v55  ;;  %v8990_v55 = vcombine.low %v156_v38, %v160_v24  ;;  %v8992_v11 = vcombine.high %v147_v48, %v151_v63  ;;  %v144_v38 = vld [vmem:[%s11582_s4 + $0x2f8] sm:$0xff]  ;;  %v9010_v24 = vcombine.low %v147_v48, %v151_v63  ;;  %v135_v48 = vld [vmem:[%s11582_s4 + $0x2b0] sm:$0xff] }
  0x68   :  { %11871 = vst [vmem:[#allocation73_spill] sm:$0xff] %v8995_v53  ;;  %v132_v63 = vld [vmem:[%s11582_s4 + $0x298] sm:$0xff] }
  0x69   :  { %11869 = vst [vmem:[#allocation71_spill] sm:$0xff] %v8990_v55  ;;  %11870 = vst [vmem:[#allocation72_spill] sm:$0xff] %v8992_v11 }
  0x6a   :  { %918 = vmatpush2.bf16.msra.mxu0 %v8962_v39  ;;  %959 = vmatpush2.bf16.msra.mxu1 %v8966_v22  ;;  %11872 = vst [vmem:[#allocation74_spill] sm:$0xff] %v9010_v24  ;;  %v9019_v22 = vcombine.high %v140_v33, %v144_v38  ;;  %v131_v39 = vld [vmem:[%s11582_s4 + $0x290] sm:$0xff] }
  0x6b   :  { %919 = vmatprep.subr.bf16.mxu0 %v8968_v17  ;;  %960 = vmatprep.subr.bf16.mxu1 %v8971_v16  ;;  %v9014_v16 = vcombine.low %v148_v0, %v152_v1  ;;  %v9016_v17 = vcombine.high %v139_v13, %v143_v15  ;;  %v136_v0 = vld [vmem:[%s11582_s4 + $0x2b8] sm:$0xff]  ;;  %v9034_v1 = vcombine.low %v139_v13, %v143_v15  ;;  %v127_v13 = vld [vmem:[%s11582_s4 + $0x270] sm:$0xff] }
  0x6c   :  { %11875 = vst [vmem:[#allocation77_spill] sm:$0xff] %v9019_v22  ;;  %v124_v15 = vld [vmem:[%s11582_s4 + $0x258] sm:$0xff] }
  0x6d   :  { %11873 = vst [vmem:[#allocation75_spill] sm:$0xff] %v9014_v16  ;;  %11874 = vst [vmem:[#allocation76_spill] sm:$0xff] %v9016_v17 }
  0x6e   :  { %920 = vmatpush2.bf16.msra.mxu0 %v8986_v2  ;;  %961 = vmatpush2.bf16.msra.mxu1 %v8990_v55  ;;  %11876 = vst [vmem:[#allocation78_spill] sm:$0xff] %v9034_v1  ;;  %v9043_v55 = vcombine.high %v132_v63, %v136_v0  ;;  %v123_v2 = vld [vmem:[%s11582_s4 + $0x250] sm:$0xff] }
  0x6f   :  { %921 = vmatprep.subr.bf16.mxu0 %v8992_v11  ;;  %962 = vmatprep.subr.bf16.mxu1 %v8995_v53  ;;  %v9038_v53 = vcombine.low %v140_v33, %v144_v38  ;;  %v9040_v11 = vcombine.high %v131_v39, %v135_v48  ;;  %v128_v33 = vld [vmem:[%s11582_s4 + $0x278] sm:$0xff]  ;;  %v9058_v38 = vcombine.low %v131_v39, %v135_v48  ;;  %v119_v39 = vld [vmem:[%s11582_s4 + $0x230] sm:$0xff] }
  0x70   :  { %11879 = vst [vmem:[#allocation81_spill] sm:$0xff] %v9043_v55  ;;  %v116_v48 = vld [vmem:[%s11582_s4 + $0x218] sm:$0xff] }
  0x71   :  { %11877 = vst [vmem:[#allocation79_spill] sm:$0xff] %v9038_v53  ;;  %11878 = vst [vmem:[#allocation80_spill] sm:$0xff] %v9040_v11 }
  0x72   :  { %922 = vmatpush2.bf16.msra.mxu0 %v9010_v24  ;;  %963 = vmatpush2.bf16.msra.mxu1 %v9014_v16  ;;  %v9067_v16 = vcombine.high %v124_v15, %v128_v33  ;;  %v115_v24 = vld [vmem:[%s11582_s4 + $0x210] sm:$0xff] }
  0x73   :  { %923 = vmatprep.subr.bf16.mxu0 %v9016_v17  ;;  %964 = vmatprep.subr.bf16.mxu1 %v9019_v22  ;;  %v9062_v22 = vcombine.low %v132_v63, %v136_v0  ;;  %v9064_v17 = vcombine.high %v123_v2, %v127_v13  ;;  %v120_v63 = vld [vmem:[%s11582_s4 + $0x238] sm:$0xff]  ;;  %v9082_v0 = vcombine.low %v123_v2, %v127_v13 }
  0x74   :  { %v9098_v2 = vcombine.low %v116_v48, %v120_v63 }
  0x76   :  { %924 = vmatpush2.bf16.msra.mxu0 %v9034_v1  ;;  %965 = vmatpush2.bf16.msra.mxu1 %v9038_v53  ;;  %v9091_v53 = vcombine.high %v116_v48, %v120_v63  ;;  %v9094_v1 = vcombine.low %v115_v24, %v119_v39 }
  0x77   :  { %925 = vmatprep.subr.bf16.mxu0 %v9040_v11  ;;  %966 = vmatprep.subr.bf16.mxu1 %v9043_v55  ;;  %v9086_v55 = vcombine.low %v124_v15, %v128_v33  ;;  %v9088_v11 = vcombine.high %v115_v24, %v119_v39 }
  0x7a   :  { %926 = vmatpush2.bf16.msra.mxu0 %v9058_v38  ;;  %967 = vmatpush2.bf16.msra.mxu1 %v9062_v22 }
  0x7b   :  { %927 = vmatprep.subr.bf16.mxu0 %v9064_v17  ;;  %968 = vmatprep.subr.bf16.mxu1 %v9067_v16 }
  0x7e   :  { %928 = vmatpush2.bf16.msra.mxu0 %v9082_v0  ;;  %969 = vmatpush2.bf16.msra.mxu1 %v9086_v55 }
  0x7f   :  { %929 = vmatprep.subr.bf16.mxu0 %v9088_v11  ;;  %970 = vmatprep.subr.bf16.mxu1 %v9091_v53 }
  0x82   :  { %930 = vmatpush2.bf16.msra.mxu0 %v9094_v1  ;;  %971 = vmatpush2.bf16.msra.mxu1 %v9098_v2 }
  0x83   :  { %1837 = vmatprep.subr.bf16.mxu0 %v8325_v3  ;;  %1878 = vmatprep.subr.bf16.mxu1 %v8338_v8  ;;  %v31_v3 = vld [vmem:[%s11581_s3] sm:$0xf]  ;;  %v11881_v8 = vld [vmem:[#allocation11_spill] sm:$0xff] }
  0x84   :  { %32 = vst [vmem:[#allocation3] sm:$0xf] %v31_v3 }
  0x85   :  { %932 = vmatmul.mubr.bf16.vlgmr.msra.gmra.mxu0 %v8733_v32  ;;  %973 = vmatmul.mubr.bf16.vlgmr.msra.gmra.mxu1 %v8733_v32 }
  0x86   :  { %1838 = vmatpush1.bf16.msra.mxu0 %v8330_v5  ;;  %1879 = vmatpush1.bf16.msra.mxu1 %v8340_v9  ;;  %v11880_v5 = vld [vmem:[#allocation10_spill] sm:$0xff]  ;;  %v11882_v9 = vld [vmem:[#allocation12_spill] sm:$0xff] }
  0x87   :  { %1839 = vmatprep.subr.bf16.mxu0 %v8342_v10  ;;  %1880 = vmatprep.subr.bf16.mxu1 %v8354_v14  ;;  %v11883_v10 = vld [vmem:[#allocation13_spill] sm:$0xff]  ;;  %v11884_v14 = vld [vmem:[#allocation14_spill] sm:$0xff] }
  0x8a   :  { %1840 = vmatpush1.bf16.msra.mxu0 %v8367_v18  ;;  %1881 = vmatpush1.bf16.msra.mxu1 %v8371_v19  ;;  %v11885_v18 = vld [vmem:[#allocation15_spill] sm:$0xff]  ;;  %v11886_v19 = vld [vmem:[#allocation16_spill] sm:$0xff] }
  0x8b   :  { %1841 = vmatprep.subr.bf16.mxu0 %v8373_v20  ;;  %1882 = vmatprep.subr.bf16.mxu1 %v8376_v21  ;;  %v11887_v20 = vld [vmem:[#allocation17_spill] sm:$0xff]  ;;  %v11888_v21 = vld [vmem:[#allocation18_spill] sm:$0xff] }
  0x8e   :  { %1842 = vmatpush1.bf16.msra.mxu0 %v8391_v26  ;;  %1883 = vmatpush1.bf16.msra.mxu1 %v8395_v27  ;;  %v11889_v26 = vld [vmem:[#allocation19_spill] sm:$0xff]  ;;  %v11890_v27 = vld [vmem:[#allocation20_spill] sm:$0xff] }
  0x8f   :  { %1843 = vmatprep.subr.bf16.mxu0 %v8397_v28  ;;  %1884 = vmatprep.subr.bf16.mxu1 %v8400_v29  ;;  %v11891_v28 = vld [vmem:[#allocation21_spill] sm:$0xff]  ;;  %v11892_v29 = vld [vmem:[#allocation22_spill] sm:$0xff] }
  0x92   :  { %1844 = vmatpush1.bf16.msra.mxu0 %v8415_v34  ;;  %1885 = vmatpush1.bf16.msra.mxu1 %v8419_v35  ;;  %v11893_v34 = vld [vmem:[#allocation23_spill] sm:$0xff]  ;;  %v11894_v35 = vld [vmem:[#allocation24_spill] sm:$0xff] }
  0x93   :  { %1845 = vmatprep.subr.bf16.mxu0 %v8421_v36  ;;  %1886 = vmatprep.subr.bf16.mxu1 %v8424_v37  ;;  %v11895_v36 = vld [vmem:[#allocation25_spill] sm:$0xff]  ;;  %v11896_v37 = vld [vmem:[#allocation26_spill] sm:$0xff] }
  0x96   :  { %1846 = vmatpush1.bf16.msra.mxu0 %v8439_v42  ;;  %1887 = vmatpush1.bf16.msra.mxu1 %v8443_v43  ;;  %v11897_v42 = vld [vmem:[#allocation27_spill] sm:$0xff]  ;;  %v11898_v43 = vld [vmem:[#allocation28_spill] sm:$0xff] }
  0x97   :  { %1847 = vmatprep.subr.bf16.mxu0 %v8445_v44  ;;  %1888 = vmatprep.subr.bf16.mxu1 %v8448_v45  ;;  %v11899_v44 = vld [vmem:[#allocation29_spill] sm:$0xff]  ;;  %v11900_v45 = vld [vmem:[#allocation30_spill] sm:$0xff] }
  0x9a   :  { %1848 = vmatpush1.bf16.msra.mxu0 %v8463_v50  ;;  %1889 = vmatpush1.bf16.msra.mxu1 %v8467_v51 }
  0x9b   :  { %1849 = vmatprep.subr.bf16.mxu0 %v8469_v52  ;;  %1890 = vmatprep.subr.bf16.mxu1 %v8475_v54 }
  0x9e   :  { %1850 = vmatpush1.bf16.msra.mxu0 %v8490_v59  ;;  %1891 = vmatpush1.bf16.msra.mxu1 %v8494_v60 }
  0x9f   :  { %1851 = vmatprep.subr.bf16.mxu0 %v8496_v61  ;;  %1892 = vmatprep.subr.bf16.mxu1 %v8499_v62 }
  0xa2   :  { %1852 = vmatpush1.bf16.msra.mxu0 %v8514_v4  ;;  %1893 = vmatpush1.bf16.msra.mxu1 %v8518_v6  ;;  %v8273_v4 = vmov 1983009808  }
  0xa3   :  { %1853 = vmatprep.subr.bf16.mxu0 %v8520_v7  ;;  %1894 = vmatprep.subr.bf16.mxu1 %v8525_v12  ;;  %v994_v6 = vunpack.c.l.s4 %v8273_v4  ;;  %v996_v7 = vlaneseq  ;;  %v11904_v4 = vld [vmem:[#allocation34_spill] sm:$0xff] }
  0xa5   :  { %v995_v12 = vunpack.c.0.s8 %v994_v6  ;;  %v11905_v6 = vld [vmem:[#allocation35_spill] sm:$0xff] }
  0xa6   :  { %1854 = vmatpush2.bf16.msra.mxu0 %v8542_v23  ;;  %1895 = vmatpush2.bf16.msra.mxu1 %v8548_v25  ;;  %v997_v23 = vshrl.u32 %v996_v7, 7  ;;  %v11906_v7 = vld [vmem:[#allocation36_spill] sm:$0xff] }
  0xa7   :  { %1855 = vmatprep.subr.bf16.mxu0 %v8550_v30  ;;  %1896 = vmatprep.subr.bf16.mxu1 %v8553_v31 }
  0xa8   :  { %v9174_v30 = vsub.s32 %v995_v12, %v997_v23  ;;  %v11907_v12 = vld [vmem:[#allocation37_spill] sm:$0xff]  ;;  %v11908_v23 = vld [vmem:[#allocation38_spill] sm:$0xff] }
  0xaa   :  { %1856 = vmatpush2.bf16.msra.mxu0 %v8570_v40  ;;  %1897 = vmatpush2.bf16.msra.mxu1 %v8574_v41 }
  0xab   :  { %1857 = vmatprep.subr.bf16.mxu0 %v8576_v46  ;;  %1898 = vmatprep.subr.bf16.mxu1 %v8579_v47  ;;  %v35_v46 = vld [vmem:[%s11578_s0] sm:$0xff] }
  0xac   :  { %v981_v47 = vunpack.c.l.bf16 %v35_v46 }
  0xae   :  { %1858 = vmatpush2.bf16.msra.mxu0 %v8594_v56  ;;  %1899 = vmatpush2.bf16.msra.mxu1 %v8598_v57 }
  0xaf   :  { %1859 = vmatprep.subr.bf16.mxu0 %v8600_v58  ;;  %1900 = vmatprep.subr.bf16.mxu1 %v11880_v5 }
  0xb2   :  { %1860 = vmatpush2.bf16.msra.mxu0 %v11881_v8  ;;  %1901 = vmatpush2.bf16.msra.mxu1 %v11882_v9  ;;  %v982_v9 = vunpack.c.h.bf16 %v35_v46  ;;  %v11914_v46 = vld [vmem:[#allocation44_spill] sm:$0xff] }
  0xb3   :  { %1861 = vmatprep.subr.bf16.mxu0 %v11883_v10  ;;  %1902 = vmatprep.subr.bf16.mxu1 %v11884_v14 }
  0xb6   :  { %1862 = vmatpush2.bf16.msra.mxu0 %v11885_v18  ;;  %1903 = vmatpush2.bf16.msra.mxu1 %v11886_v19 }
  0xb7   :  { %1863 = vmatprep.subr.bf16.mxu0 %v11887_v20  ;;  %1904 = vmatprep.subr.bf16.mxu1 %v11888_v21 }
  0xba   :  { %1864 = vmatpush2.bf16.msra.mxu0 %v11889_v26  ;;  %1905 = vmatpush2.bf16.msra.mxu1 %v11890_v27 }
  0xbb   :  { %1865 = vmatprep.subr.bf16.mxu0 %v11891_v28  ;;  %1906 = vmatprep.subr.bf16.mxu1 %v11892_v29  ;;  %v34_v29 = vld [vmem:[#allocation3] sm:$0xf] }
  0xbe   :  { %1866 = vmatpush2.bf16.msra.mxu0 %v11893_v34  ;;  %1907 = vmatpush2.bf16.msra.mxu1 %v11894_v35 }
  0xbf   :  { %1867 = vmatprep.subr.bf16.mxu0 %v11895_v36  ;;  %1908 = vmatprep.subr.bf16.mxu1 %v11896_v37 }
  0xc2   :  { %1868 = vmatpush2.bf16.msra.mxu0 %v11897_v42  ;;  %1909 = vmatpush2.bf16.msra.mxu1 %v11898_v43 }
  0xc3   :  { %1919 = vmatprep.subr.bf16.mxu0 %v11899_v44  ;;  %1960 = vmatprep.subr.bf16.mxu1 %v11900_v45 }
 0x105   :  { %v851_v50 = vpop.f32.mrf.mxu0  ;;  %v892_v51 = vpop.f32.mrf.mxu1 }
 0x107   :  { %v853_v52 = vpop.f32.mrf.mxu0  ;;  %v894_v54 = vpop.f32.mrf.mxu1 }
 0x108   :  { %v991_v25 = vcombine.low %v851_v50, %v853_v52  ;;  %v992_v31 = vcombine.low %v892_v51, %v894_v54 }
 0x109   :  { %v855_v59 = vpop.f32.mrf.mxu0  ;;  %v896_v60 = vpop.f32.mrf.mxu1 }
 0x10a   :  { %v999_v40 = vrot.slane %v991_v25, %v9174_v30  ;;  %v1006_v41 = vrot.slane %v992_v31, %v9174_v30  ;;  %v11901_v60 = vld [vmem:[#allocation31_spill] sm:$0xff]  ;;  %v11911_v31 = vld [vmem:[#allocation41_spill] sm:$0xff] }
 0x10b   :  { %v856_v61 = vpop.f32.mrf.mxu0  ;;  %v897_v62 = vpop.f32.mrf.mxu1  ;;  %v11909_v25 = vld [vmem:[#allocation39_spill] sm:$0xff] }
 0x10c   :  { %v1007_v56 = vcombine.low %v999_v40, %v1006_v41  ;;  %v11902_v61 = vld [vmem:[#allocation32_spill] sm:$0xff]  ;;  %v11903_v62 = vld [vmem:[#allocation33_spill] sm:$0xff]  ;;  %v11912_v40 = vld [vmem:[#allocation42_spill] sm:$0xff] }
 0x10d   :  { %v11913_v41 = vld [vmem:[#allocation43_spill] sm:$0xff] }
 0x10e   :  { %v1027_v57 = vadd.f32 %v1007_v56, %v981_v47  ;;  %v11915_v47 = vld [vmem:[#allocation45_spill] sm:$0xff]  ;;  %v11916_v56 = vld [vmem:[#allocation46_spill] sm:$0xff] }
 0x110   :  { %v7348_v58 = vmul.f32 -1.442695, %v1027_v57  ;;  %v11917_v57 = vld [vmem:[#allocation47_spill] sm:$0xff] }
 0x112   :  { %8145 = vpow2.f32 %v7348_v58  ;;  %v11918_v58 = vld [vmem:[#allocation48_spill] sm:$0xff] }
 0x11f   :  { %v8146_v13 = vpop.eup %8145 }
 0x120   :  { %v1035_v3 = vadd.f32 1.0, %v8146_v13  ;;  %v11921_v13 = vld [vmem:[#allocation51_spill] sm:$0xff] }
 0x122   :  { %8147 = vrcp.f32 %v1035_v3  ;;  %v11927_v3 = vld [vmem:[#allocation57_spill] sm:$0xff] }
 0x12f   :  { %v8148_v27 = vpop.eup %8147 }
 0x130   :  { %v1046_v28 = vrot.slane %v8148_v27, 4 }
 0x132   :  { %v1048_v37 = vmul.f32 %v1046_v28, %v34_v29  ;;  %v11939_v28 = vld [vmem:[#allocation69_spill] sm:$0xff]  ;;  %v11940_v29 = vld [vmem:[#allocation70_spill] sm:$0xff] }
 0x145   :  { %v933_v32 = vpop.f32.mrf.mxu0  ;;  %v974_v24 = vpop.f32.mrf.mxu1 }
 0x147   :  { %v935_v15 = vpop.f32.mrf.mxu0  ;;  %v976_v39 = vpop.f32.mrf.mxu1 }
 0x148   :  { %v1008_v33 = vcombine.low %v933_v32, %v935_v15  ;;  %v1009_v48 = vcombine.low %v974_v24, %v976_v39  ;;  %v11919_v32 = vld [vmem:[#allocation49_spill] sm:$0xff]  ;;  %v11920_v24 = vld [vmem:[#allocation50_spill] sm:$0xff]  ;;  %v11922_v15 = vld [vmem:[#allocation52_spill] sm:$0xff] }
 0x149   :  { %v937_v63 = vpop.f32.mrf.mxu0  ;;  %v978_v8 = vpop.f32.mrf.mxu1  ;;  %v11924_v39 = vld [vmem:[#allocation54_spill] sm:$0xff] }
 0x14a   :  { %v1016_v5 = vrot.slane %v1008_v33, %v9174_v30  ;;  %v1023_v10 = vrot.slane %v1009_v48, %v9174_v30  ;;  %v11923_v33 = vld [vmem:[#allocation53_spill] sm:$0xff]  ;;  %v11925_v48 = vld [vmem:[#allocation55_spill] sm:$0xff]  ;;  %v11926_v63 = vld [vmem:[#allocation56_spill] sm:$0xff] }
 0x14b   :  { %v938_v14 = vpop.f32.mrf.mxu0  ;;  %v979_v18 = vpop.f32.mrf.mxu1  ;;  %v11929_v8 = vld [vmem:[#allocation59_spill] sm:$0xff] }
 0x14c   :  { %v1024_v19 = vcombine.low %v1016_v5, %v1023_v10  ;;  %v11928_v5 = vld [vmem:[#allocation58_spill] sm:$0xff]  ;;  %v11931_v10 = vld [vmem:[#allocation61_spill] sm:$0xff]  ;;  %v11933_v18 = vld [vmem:[#allocation63_spill] sm:$0xff] }
 0x14d   :  { %v11932_v14 = vld [vmem:[#allocation62_spill] sm:$0xff] }
 0x14e   :  { %v1028_v20 = vadd.f32 %v1024_v19, %v982_v9  ;;  %v11930_v9 = vld [vmem:[#allocation60_spill] sm:$0xff] }
 0x14f   :  { %v11934_v19 = vld [vmem:[#allocation64_spill] sm:$0xff] }
 0x150   :  { %v7349_v21 = vmul.f32 -1.442695, %v1028_v20  ;;  %v1042_v26 = vrot.slane %v1028_v20, 4  ;;  %v11935_v20 = vld [vmem:[#allocation65_spill] sm:$0xff] }
 0x152   :  { %8149 = vpow2.f32 %v7349_v21  ;;  %v11936_v21 = vld [vmem:[#allocation66_spill] sm:$0xff] }
 0x153   :  { %8151 = vtanh.f32 %v1042_v26  ;;  %v11937_v26 = vld [vmem:[#allocation67_spill] sm:$0xff] }
 0x15f   :  { %v8150_v34 = vpop.eup %8149 }
 0x160   :  { %v8152_v35 = vpop.eup %8151  ;;  %v1036_v36 = vadd.f32 1.0, %v8150_v34  ;;  %v11941_v34 = vld [vmem:[#allocation71_spill] sm:$0xff] }
 0x161   :  { %v1049_v42 = vmul.f32 %v8152_v35, %v8148_v27  ;;  %v11938_v27 = vld [vmem:[#allocation68_spill] sm:$0xff] }
 0x162   :  { %8153 = vrcp.f32 %v1036_v36  ;;  %v11942_v35 = vld [vmem:[#allocation72_spill] sm:$0xff]  ;;  %v11943_v36 = vld [vmem:[#allocation73_spill] sm:$0xff] }
 0x163   :  { %v9183_v43 = vadd.f32 %v1049_v42, %v1048_v37  ;;  %v11944_v37 = vld [vmem:[#allocation74_spill] sm:$0xff]  ;;  %v11945_v42 = vld [vmem:[#allocation75_spill] sm:$0xff] }
 0x165   :  { %8155 = vtanh.f32 %v9183_v43 }
 0x16f   :  { %v8154_v44 = vpop.eup %8153 }
 0x172   :  { %v8156_v45 = vpop.eup %8155 }
 0x173   :  { %v1052_v50 = vmul.f32 %v8156_v45, %v8154_v44  ;;  %v11946_v44 = vld [vmem:[#allocation76_spill] sm:$0xff]  ;;  %v11947_v45 = vld [vmem:[#allocation77_spill] sm:$0xff] }
 0x175   :  { %1053 = vst [vmem:[%s11583_s5] sm:$0xf] %v1052_v50  ;;  %v1063_v51 = vrot.slane %v1052_v50, %v9174_v30  ;;  %v11948_v50 = vld [vmem:[#allocation78_spill] sm:$0xff] }
 0x177   :  { %v1064_v52 = vcombine.high %v1063_v51, %v1063_v51  ;;  %v9190_v59 = vpack.c.bf16 %v1063_v51, %v1063_v51  ;;  %v11949_v51 = vld [vmem:[#allocation79_spill] sm:$0xff] }
 0x179   :  { %v1068_v54 = vpack.c.bf16 %v1064_v52, %v1064_v52  ;;  %v11950_v52 = vld [vmem:[#allocation80_spill] sm:$0xff] }
 0x17b   :  { %1869 = vmatprep.mubr.bf16.mxu0 %v1068_v54  ;;  %1910 = vmatprep.mubr.bf16.mxu1 %v1068_v54 }
 0x17c   :  { %1870 = vmatmul.mubr.bf16.vlgmr.msra.gmra.mxu0 %v9190_v59  ;;  %1911 = vmatmul.mubr.bf16.vlgmr.msra.gmra.mxu1 %v9190_v59 }
 0x17d   :  { %1920 = vmatpush1.bf16.msra.mxu0 %v8742_v49  ;;  %1961 = vmatpush1.bf16.msra.mxu1 %v11901_v60  ;;  %v11910_v49 = vld [vmem:[#allocation40_spill] sm:$0xff]  ;;  %v2139_v60 = vld [vmem:[%s11582_s4 + $0x188] sm:$0xff] }
 0x17e   :  { %1951 = vmatprep.mubr.bf16.mxu0 %v1068_v54  ;;  %1992 = vmatprep.mubr.bf16.mxu1 %v1068_v54  ;;  %v11951_v54 = vld [vmem:[#allocation81_spill] sm:$0xff] }
 0x17f   :  { %1921 = vmatprep.subr.bf16.mxu0 %v11902_v61  ;;  %1962 = vmatprep.subr.bf16.mxu1 %v11903_v62  ;;  %v2143_v61 = vld [vmem:[%s11582_s4 + $0x1a8] sm:$0xff]  ;;  %v2130_v62 = vld [vmem:[%s11582_s4 + $0x140] sm:$0xff] }
 0x181   :  { %1922 = vmatpush1.bf16.msra.mxu0 %v11904_v4  ;;  %1963 = vmatpush1.bf16.msra.mxu1 %v11905_v6  ;;  %v9296_v4 = vcombine.high %v2139_v60, %v2143_v61  ;;  %v2134_v6 = vld [vmem:[%s11582_s4 + $0x160] sm:$0xff] }
 0x182   :  { %1923 = vmatprep.subr.bf16.mxu0 %v11906_v7  ;;  %1964 = vmatprep.subr.bf16.mxu1 %v11907_v12  ;;  %v2131_v7 = vld [vmem:[%s11582_s4 + $0x148] sm:$0xff] }
 0x183   :  { %v2135_v12 = vld [vmem:[%s11582_s4 + $0x168] sm:$0xff] }
 0x185   :  { %1924 = vmatpush1.bf16.msra.mxu0 %v11908_v23  ;;  %1965 = vmatpush1.bf16.msra.mxu1 %v11909_v25  ;;  %v9313_v25 = vcombine.low %v2139_v60, %v2143_v61  ;;  %v2215_v60 = vld [vmem:[%s11582_s4 + $0x3e8] sm:$0xff] }
 0x186   :  { %1925 = vmatprep.subr.bf16.mxu0 %v11910_v49  ;;  %1966 = vmatprep.subr.bf16.mxu1 %v11911_v31  ;;  %v9315_v49 = vcombine.high %v2130_v62, %v2134_v6  ;;  %v9318_v31 = vcombine.high %v2131_v7, %v2135_v12 }
 0x189   :  { %1926 = vmatpush1.bf16.msra.mxu0 %v11912_v40  ;;  %1967 = vmatpush1.bf16.msra.mxu1 %v11913_v41  ;;  %v9321_v40 = vcombine.low %v2130_v62, %v2134_v6  ;;  %v9325_v41 = vcombine.low %v2131_v7, %v2135_v12  ;;  %v2202_v7 = vld [vmem:[%s11582_s4 + $0x380] sm:$0xff] }
 0x18a   :  { %1927 = vmatprep.subr.bf16.mxu0 %v11914_v46  ;;  %1968 = vmatprep.subr.bf16.mxu1 %v11915_v47  ;;  %v2122_v46 = vld [vmem:[%s11582_s4 + $0x100] sm:$0xff] }
 0x18b   :  { %v2126_v47 = vld [vmem:[%s11582_s4 + $0x120] sm:$0xff] }
 0x18c   :  { %v2206_v12 = vld [vmem:[%s11582_s4 + $0x3a0] sm:$0xff] }
 0x18d   :  { %1928 = vmatpush1.bf16.msra.mxu0 %v11916_v56  ;;  %1969 = vmatpush1.bf16.msra.mxu1 %v11917_v57  ;;  %v2123_v56 = vld [vmem:[%s11582_s4 + $0x108] sm:$0xff]  ;;  %v9339_v57 = vcombine.high %v2122_v46, %v2126_v47 }
 0x18e   :  { %1929 = vmatprep.subr.bf16.mxu0 %v11918_v58  ;;  %1970 = vmatprep.subr.bf16.mxu1 %v11919_v32  ;;  %v2127_v58 = vld [vmem:[%s11582_s4 + $0x128] sm:$0xff]  ;;  %v9344_v32 = vcombine.low %v2122_v46, %v2126_v47  ;;  %v9483_v47 = vcombine.high %v2202_v7, %v2206_v12 }
 0x18f   :  { %v2203_v46 = vld [vmem:[%s11582_s4 + $0x388] sm:$0xff] }
 0x191   :  { %1930 = vmatpush1.bf16.msra.mxu0 %v11920_v24  ;;  %1971 = vmatpush1.bf16.msra.mxu1 %v11921_v13  ;;  %v9346_v24 = vcombine.low %v2123_v56, %v2127_v58  ;;  %v9348_v13 = vcombine.high %v2123_v56, %v2127_v58  ;;  %v2207_v56 = vld [vmem:[%s11582_s4 + $0x3a8] sm:$0xff]  ;;  %v9488_v58 = vcombine.low %v2202_v7, %v2206_v12 }
 0x192   :  { %1931 = vmatprep.subr.bf16.mxu0 %v11922_v15  ;;  %1972 = vmatprep.subr.bf16.mxu1 %v11923_v33  ;;  %v2114_v15 = vld [vmem:[%s11582_s4 + $0xc0] sm:$0xff]  ;;  %v2179_v12 = vld [vmem:[%s11582_s4 + $0x2c8] sm:$0xff] }
 0x193   :  { %v2118_v33 = vld [vmem:[%s11582_s4 + $0xe0] sm:$0xff] }
 0x195   :  { %1932 = vmatpush1.bf16.msra.mxu0 %v11924_v39  ;;  %1973 = vmatpush1.bf16.msra.mxu1 %v11925_v48  ;;  %v2115_v39 = vld [vmem:[%s11582_s4 + $0xc8] sm:$0xff]  ;;  %v9363_v48 = vcombine.high %v2114_v15, %v2118_v33 }
 0x196   :  { %1933 = vmatprep.subr.bf16.mxu0 %v11926_v63  ;;  %1974 = vmatprep.subr.bf16.mxu1 %v11927_v3  ;;  %v2119_v63 = vld [vmem:[%s11582_s4 + $0xe8] sm:$0xff]  ;;  %v9368_v3 = vcombine.low %v2114_v15, %v2118_v33  ;;  %v9490_v15 = vcombine.low %v2203_v46, %v2207_v56  ;;  %v9492_v33 = vcombine.high %v2203_v46, %v2207_v56 }
 0x197   :  { %v2183_v46 = vld [vmem:[%s11582_s4 + $0x2e8] sm:$0xff] }
 0x198   :  { %11952 = vst [vmem:[#allocation10_spill] sm:$0xff] %v9490_v15  ;;  %v9557_v56 = vcombine.high %v2179_v12, %v2183_v46 }
 0x199   :  { %1934 = vmatpush1.bf16.msra.mxu0 %v11928_v5  ;;  %1975 = vmatpush1.bf16.msra.mxu1 %v11929_v8  ;;  %v9370_v5 = vcombine.low %v2115_v39, %v2119_v63  ;;  %v9372_v8 = vcombine.high %v2115_v39, %v2119_v63  ;;  %v2194_v39 = vld [vmem:[%s11582_s4 + $0x340] sm:$0xff] }
 0x19a   :  { %1935 = vmatprep.subr.bf16.mxu0 %v11930_v9  ;;  %1976 = vmatprep.subr.bf16.mxu1 %v11931_v10  ;;  %v2106_v9 = vld [vmem:[%s11582_s4 + $0x80] sm:$0xff]  ;;  %11962 = vst [vmem:[#allocation20_spill] sm:$0xff] %v9557_v56 }
 0x19b   :  { %v2110_v10 = vld [vmem:[%s11582_s4 + $0xa0] sm:$0xff] }
 0x19c   :  { %v2198_v63 = vld [vmem:[%s11582_s4 + $0x360] sm:$0xff] }
 0x19d   :  { %1936 = vmatpush2.bf16.msra.mxu0 %v11932_v14  ;;  %1977 = vmatpush2.bf16.msra.mxu1 %v11933_v18  ;;  %v2107_v14 = vld [vmem:[%s11582_s4 + $0x88] sm:$0xff]  ;;  %v9387_v18 = vcombine.high %v2106_v9, %v2110_v10 }
 0x19e   :  { %1937 = vmatprep.subr.bf16.mxu0 %v11934_v19  ;;  %1978 = vmatprep.subr.bf16.mxu1 %v11935_v20  ;;  %v2111_v19 = vld [vmem:[%s11582_s4 + $0xa8] sm:$0xff]  ;;  %v9392_v20 = vcombine.low %v2106_v9, %v2110_v10  ;;  %v9507_v10 = vcombine.high %v2194_v39, %v2198_v63 }
 0x19f   :  { %v2195_v9 = vld [vmem:[%s11582_s4 + $0x348] sm:$0xff] }
 0x1a0   :  { %11953 = vst [vmem:[#allocation11_spill] sm:$0xff] %v9507_v10 }
 0x1a1   :  { %1938 = vmatpush2.bf16.msra.mxu0 %v11936_v21  ;;  %1979 = vmatpush2.bf16.msra.mxu1 %v11937_v26  ;;  %v9394_v21 = vcombine.low %v2107_v14, %v2111_v19  ;;  %v9396_v26 = vcombine.high %v2107_v14, %v2111_v19  ;;  %v2199_v14 = vld [vmem:[%s11582_s4 + $0x368] sm:$0xff]  ;;  %v9512_v19 = vcombine.low %v2194_v39, %v2198_v63  ;;  %v2170_v39 = vld [vmem:[%s11582_s4 + $0x280] sm:$0xff] }
 0x1a2   :  { %1939 = vmatprep.subr.bf16.mxu0 %v11938_v27  ;;  %1980 = vmatprep.subr.bf16.mxu1 %v11939_v28  ;;  %v2098_v27 = vld [vmem:[%s11582_s4 + $0x40] sm:$0xff] }
 0x1a3   :  { %v2102_v28 = vld [vmem:[%s11582_s4 + $0x60] sm:$0xff]  ;;  %11954 = vst [vmem:[#allocation12_spill] sm:$0xff] %v9512_v19 }
 0x1a4   :  { %v2174_v63 = vld [vmem:[%s11582_s4 + $0x2a0] sm:$0xff] }
 0x1a5   :  { %1940 = vmatpush2.bf16.msra.mxu0 %v11940_v29  ;;  %1981 = vmatpush2.bf16.msra.mxu1 %v11941_v34  ;;  %v2099_v29 = vld [vmem:[%s11582_s4 + $0x48] sm:$0xff]  ;;  %v9411_v34 = vcombine.high %v2098_v27, %v2102_v28 }
 0x1a6   :  { %1941 = vmatprep.subr.bf16.mxu0 %v11942_v35  ;;  %1982 = vmatprep.subr.bf16.mxu1 %v11943_v36  ;;  %v2103_v35 = vld [vmem:[%s11582_s4 + $0x68] sm:$0xff]  ;;  %v9416_v36 = vcombine.low %v2098_v27, %v2102_v28  ;;  %v9514_v27 = vcombine.low %v2195_v9, %v2199_v14  ;;  %v9516_v28 = vcombine.high %v2195_v9, %v2199_v14 }
 0x1a7   :  { %v2171_v9 = vld [vmem:[%s11582_s4 + $0x288] sm:$0xff] }
 0x1a8   :  { %11955 = vst [vmem:[#allocation13_spill] sm:$0xff] %v9514_v27  ;;  %11956 = vst [vmem:[#allocation14_spill] sm:$0xff] %v9516_v28  ;;  %v2175_v14 = vld [vmem:[%s11582_s4 + $0x2a8] sm:$0xff] }
 0x1a9   :  { %1942 = vmatpush2.bf16.msra.mxu0 %v11944_v37  ;;  %1983 = vmatpush2.bf16.msra.mxu1 %v11945_v42  ;;  %v9418_v37 = vcombine.low %v2099_v29, %v2103_v35  ;;  %v9420_v42 = vcombine.high %v2099_v29, %v2103_v35  ;;  %v2186_v29 = vld [vmem:[%s11582_s4 + $0x300] sm:$0xff] }
 0x1aa   :  { %1943 = vmatprep.subr.bf16.mxu0 %v11946_v44  ;;  %1984 = vmatprep.subr.bf16.mxu1 %v11947_v45  ;;  %v2090_v44 = vld [vmem:[%s11582_s4] sm:$0xff] }
 0x1ab   :  { %v2094_v45 = vld [vmem:[%s11582_s4 + $0x20] sm:$0xff] }
 0x1ac   :  { %v2190_v35 = vld [vmem:[%s11582_s4 + $0x320] sm:$0xff] }
 0x1ad   :  { %1944 = vmatpush2.bf16.msra.mxu0 %v11948_v50  ;;  %1985 = vmatpush2.bf16.msra.mxu1 %v11949_v51  ;;  %v2091_v50 = vld [vmem:[%s11582_s4 + $0x8] sm:$0xff]  ;;  %v9435_v51 = vcombine.high %v2090_v44, %v2094_v45 }
 0x1ae   :  { %1945 = vmatprep.subr.bf16.mxu0 %v11950_v52  ;;  %1986 = vmatprep.subr.bf16.mxu1 %v11951_v54  ;;  %v2095_v52 = vld [vmem:[%s11582_s4 + $0x28] sm:$0xff]  ;;  %v9440_v54 = vcombine.low %v2090_v44, %v2094_v45  ;;  %v9530_v45 = vcombine.low %v2186_v29, %v2190_v35 }
 0x1af   :  { %v2187_v44 = vld [vmem:[%s11582_s4 + $0x308] sm:$0xff] }
 0x1b0   :  { %11957 = vst [vmem:[#allocation15_spill] sm:$0xff] %v9530_v45 }
 0x1b1   :  { %1946 = vmatpush2.bf16.msra.mxu0 %v9058_v38  ;;  %1987 = vmatpush2.bf16.msra.mxu1 %v9062_v22  ;;  %v2147_v22 = vld [vmem:[%s11582_s4 + $0x1c8] sm:$0xff]  ;;  %v2142_v38 = vld [vmem:[%s11582_s4 + $0x1a0] sm:$0xff] }
 0x1b2   :  { %1947 = vmatprep.subr.bf16.mxu0 %v9064_v17  ;;  %1988 = vmatprep.subr.bf16.mxu1 %v9067_v16  ;;  %v2146_v16 = vld [vmem:[%s11582_s4 + $0x1c0] sm:$0xff] }
 0x1b3   :  { %v2150_v17 = vld [vmem:[%s11582_s4 + $0x1e0] sm:$0xff] }
 0x1b5   :  { %1948 = vmatpush2.bf16.msra.mxu0 %v9082_v0  ;;  %1989 = vmatpush2.bf16.msra.mxu1 %v9086_v55  ;;  %v9269_v55 = vcombine.high %v2146_v16, %v2150_v17 }
 0x1b6   :  { %1949 = vmatprep.subr.bf16.mxu0 %v9088_v11  ;;  %1990 = vmatprep.subr.bf16.mxu1 %v9091_v53  ;;  %v9267_v53 = vcombine.low %v2146_v16, %v2150_v17  ;;  %v2151_v11 = vld [vmem:[%s11582_s4 + $0x1e8] sm:$0xff]  ;;  %v9442_v16 = vcombine.low %v2091_v50, %v2095_v52  ;;  %v9444_v17 = vcombine.high %v2091_v50, %v2095_v52 }
 0x1b7   :  { %v9280_v0 = vcombine.low %v2147_v22, %v2151_v11  ;;  %v9532_v50 = vcombine.high %v2186_v29, %v2190_v35  ;;  %v2191_v52 = vld [vmem:[%s11582_s4 + $0x328] sm:$0xff]  ;;  %v9577_v35 = vcombine.low %v2179_v12, %v2183_v46  ;;  %v9597_v46 = vcombine.low %v2170_v39, %v2174_v63 }
 0x1b8   :  { %v2167_v12 = vld [vmem:[%s11582_s4 + $0x268] sm:$0xff] }
 0x1b9   :  { %1950 = vmatpush2.bf16.msra.mxu0 %v9094_v1  ;;  %1991 = vmatpush2.bf16.msra.mxu1 %v9098_v2  ;;  %v2138_v1 = vld [vmem:[%s11582_s4 + $0x180] sm:$0xff]  ;;  %v9282_v2 = vcombine.high %v2147_v22, %v2151_v11  ;;  %11958 = vst [vmem:[#allocation16_spill] sm:$0xff] %v9532_v50  ;;  %11964 = vst [vmem:[#allocation22_spill] sm:$0xff] %v9577_v35 }
 0x1ba   :  { %2858 = vmatprep.subr.bf16.mxu0 %v9269_v55  ;;  %v9309_v23 = vcombine.low %v2138_v1, %v2142_v38  ;;  %v2210_v22 = vld [vmem:[%s11582_s4 + $0x3c0] sm:$0xff]  ;;  %11967 = vst [vmem:[#allocation25_spill] sm:$0xff] %v9597_v46 }
 0x1bb   :  { %2899 = vmatprep.subr.bf16.mxu1 %v9282_v2  ;;  %v2214_v11 = vld [vmem:[%s11582_s4 + $0x3e0] sm:$0xff] }
 0x1bc   :  { %1952 = vmatmul.mubr.bf16.vlgmr.msra.gmra.mxu0 %v9190_v59  ;;  %1993 = vmatmul.mubr.bf16.vlgmr.msra.gmra.mxu1 %v9190_v59  ;;  %v9284_v59 = vcombine.high %v2138_v1, %v2142_v38  ;;  %v2211_v1 = vld [vmem:[%s11582_s4 + $0x3c8] sm:$0xff]  ;;  %v9459_v38 = vcombine.high %v2210_v22, %v2214_v11  ;;  %v9464_v61 = vcombine.low %v2210_v22, %v2214_v11  ;;  %v2178_v22 = vld [vmem:[%s11582_s4 + $0x2c0] sm:$0xff] }
 0x1bd   :  { %2859 = vmatpush1.bf16.msra.mxu0 %v9267_v53  ;;  %2900 = vmatpush1.bf16.msra.mxu1 %v9280_v0  ;;  %v9466_v62 = vcombine.low %v2211_v1, %v2215_v60  ;;  %v9468_v6 = vcombine.high %v2211_v1, %v2215_v60  ;;  %v2182_v11 = vld [vmem:[%s11582_s4 + $0x2e0] sm:$0xff]  ;;  %v9544_v1 = vcombine.low %v2187_v44, %v2191_v52 }
 0x1be   :  { %2860 = vmatprep.subr.bf16.mxu0 %v9284_v59  ;;  %2901 = vmatprep.subr.bf16.mxu1 %v9296_v4  ;;  %v9546_v60 = vcombine.high %v2187_v44, %v2191_v52  ;;  %v9548_v7 = vcombine.high %v2178_v22, %v2182_v11  ;;  %v9573_v29 = vcombine.low %v2178_v22, %v2182_v11  ;;  %v2166_v22 = vld [vmem:[%s11582_s4 + $0x260] sm:$0xff]  ;;  %v2163_v11 = vld [vmem:[%s11582_s4 + $0x248] sm:$0xff] }
 0x1bf   :  { %11959 = vst [vmem:[#allocation17_spill] sm:$0xff] %v9544_v1  ;;  %v9579_v44 = vcombine.high %v2170_v39, %v2174_v63  ;;  %v9582_v52 = vcombine.high %v2171_v9, %v2175_v14  ;;  %v2158_v39 = vld [vmem:[%s11582_s4 + $0x220] sm:$0xff]  ;;  %v2155_v63 = vld [vmem:[%s11582_s4 + $0x208] sm:$0xff] }
 0x1c0   :  { %11960 = vst [vmem:[#allocation18_spill] sm:$0xff] %v9546_v60  ;;  %11961 = vst [vmem:[#allocation19_spill] sm:$0xff] %v9548_v7 }
 0x1c1   :  { %2861 = vmatpush1.bf16.msra.mxu0 %v9309_v23  ;;  %2902 = vmatpush1.bf16.msra.mxu1 %v9313_v25  ;;  %11963 = vst [vmem:[#allocation21_spill] sm:$0xff] %v9573_v29  ;;  %11965 = vst [vmem:[#allocation23_spill] sm:$0xff] %v9579_v44 }
 0x1c2   :  { %2862 = vmatprep.subr.bf16.mxu0 %v9315_v49  ;;  %2903 = vmatprep.subr.bf16.mxu1 %v9318_v31  ;;  %11966 = vst [vmem:[#allocation24_spill] sm:$0xff] %v9582_v52 }
 0x1c5   :  { %2863 = vmatpush1.bf16.msra.mxu0 %v9321_v40  ;;  %2904 = vmatpush1.bf16.msra.mxu1 %v9325_v41 }
 0x1c6   :  { %2864 = vmatprep.subr.bf16.mxu0 %v9339_v57  ;;  %2905 = vmatprep.subr.bf16.mxu1 %v9348_v13 }
 0x1c9   :  { %2865 = vmatpush1.bf16.msra.mxu0 %v9344_v32  ;;  %2906 = vmatpush1.bf16.msra.mxu1 %v9346_v24 }
 0x1ca   :  { %2866 = vmatprep.subr.bf16.mxu0 %v9363_v48  ;;  %2907 = vmatprep.subr.bf16.mxu1 %v9372_v8 }
 0x1cd   :  { %2867 = vmatpush1.bf16.msra.mxu0 %v9368_v3  ;;  %2908 = vmatpush1.bf16.msra.mxu1 %v9370_v5 }
 0x1ce   :  { %2868 = vmatprep.subr.bf16.mxu0 %v9387_v18  ;;  %2909 = vmatprep.subr.bf16.mxu1 %v9396_v26 }
 0x1d1   :  { %2869 = vmatpush1.bf16.msra.mxu0 %v9392_v20  ;;  %2910 = vmatpush1.bf16.msra.mxu1 %v9394_v21 }
 0x1d2   :  { %2870 = vmatprep.subr.bf16.mxu0 %v9411_v34  ;;  %2911 = vmatprep.subr.bf16.mxu1 %v9420_v42 }
 0x1d5   :  { %2871 = vmatpush1.bf16.msra.mxu0 %v9416_v36  ;;  %2912 = vmatpush1.bf16.msra.mxu1 %v9418_v37 }
 0x1d6   :  { %2872 = vmatprep.subr.bf16.mxu0 %v9435_v51  ;;  %2913 = vmatprep.subr.bf16.mxu1 %v9444_v17 }
 0x1d9   :  { %2873 = vmatpush1.bf16.msra.mxu0 %v9440_v54  ;;  %2914 = vmatpush1.bf16.msra.mxu1 %v9442_v16 }
 0x1da   :  { %2874 = vmatprep.subr.bf16.mxu0 %v9459_v38  ;;  %2915 = vmatprep.subr.bf16.mxu1 %v9468_v6 }
 0x1dd   :  { %2875 = vmatpush2.bf16.msra.mxu0 %v9464_v61  ;;  %2916 = vmatpush2.bf16.msra.mxu1 %v9466_v62 }
 0x1de   :  { %2876 = vmatprep.subr.bf16.mxu0 %v9483_v47  ;;  %2917 = vmatprep.subr.bf16.mxu1 %v9492_v33 }
 0x1e1   :  { %2877 = vmatpush2.bf16.msra.mxu0 %v9488_v58  ;;  %2918 = vmatpush2.bf16.msra.mxu1 %v9490_v15 }
 0x1e2   :  { %2878 = vmatprep.subr.bf16.mxu0 %v9507_v10  ;;  %2919 = vmatprep.subr.bf16.mxu1 %v9516_v28 }
 0x1e5   :  { %2879 = vmatpush2.bf16.msra.mxu0 %v9512_v19  ;;  %2920 = vmatpush2.bf16.msra.mxu1 %v9514_v27 }
 0x1e6   :  { %2880 = vmatprep.subr.bf16.mxu0 %v9532_v50  ;;  %2921 = vmatprep.subr.bf16.mxu1 %v9546_v60  ;;  %v2162_v60 = vld [vmem:[%s11582_s4 + $0x240] sm:$0xff] }
 0x1e9   :  { %2881 = vmatpush2.bf16.msra.mxu0 %v9530_v45  ;;  %2922 = vmatpush2.bf16.msra.mxu1 %v9544_v1  ;;  %v9606_v1 = vcombine.high %v2163_v11, %v2167_v12  ;;  %v2154_v45 = vld [vmem:[%s11582_s4 + $0x200] sm:$0xff] }
 0x1ea   :  { %2882 = vmatprep.subr.bf16.mxu0 %v9548_v7  ;;  %2923 = vmatprep.subr.bf16.mxu1 %v9557_v56  ;;  %v9601_v56 = vcombine.low %v2171_v9, %v2175_v14  ;;  %v9603_v7 = vcombine.high %v2162_v60, %v2166_v22  ;;  %v2159_v9 = vld [vmem:[%s11582_s4 + $0x228] sm:$0xff]  ;;  %v9621_v14 = vcombine.low %v2162_v60, %v2166_v22  ;;  %v2148_v22 = vld [vmem:[%s11582_s4 + $0x1d0] sm:$0xff] }
 0x1eb   :  { %11970 = vst [vmem:[#allocation28_spill] sm:$0xff] %v9606_v1  ;;  %v9637_v60 = vcombine.low %v2155_v63, %v2159_v9 }
 0x1ec   :  { %11968 = vst [vmem:[#allocation26_spill] sm:$0xff] %v9601_v56  ;;  %11969 = vst [vmem:[#allocation27_spill] sm:$0xff] %v9603_v7 }
 0x1ed   :  { %2883 = vmatpush2.bf16.msra.mxu0 %v9573_v29  ;;  %2924 = vmatpush2.bf16.msra.mxu1 %v9577_v35  ;;  %11971 = vst [vmem:[#allocation29_spill] sm:$0xff] %v9621_v14  ;;  %v9630_v35 = vcombine.high %v2155_v63, %v2159_v9  ;;  %v9633_v29 = vcombine.low %v2154_v45, %v2158_v39  ;;  %11976 = vst [vmem:[#allocation34_spill] sm:$0xff] %v9637_v60 }
 0x1ee   :  { %2884 = vmatprep.subr.bf16.mxu0 %v9579_v44  ;;  %2925 = vmatprep.subr.bf16.mxu1 %v9582_v52  ;;  %v9625_v52 = vcombine.low %v2163_v11, %v2167_v12  ;;  %v9627_v44 = vcombine.high %v2154_v45, %v2158_v39  ;;  %v2152_v11 = vld [vmem:[%s11582_s4 + $0x1f0] sm:$0xff]  ;;  %v2149_v45 = vld [vmem:[%s11582_s4 + $0x1d8] sm:$0xff] }
 0x1ef   :  { %11974 = vst [vmem:[#allocation32_spill] sm:$0xff] %v9630_v35  ;;  %11975 = vst [vmem:[#allocation33_spill] sm:$0xff] %v9633_v29  ;;  %v9651_v12 = vcombine.high %v2148_v22, %v2152_v11  ;;  %v2153_v39 = vld [vmem:[%s11582_s4 + $0x1f8] sm:$0xff]  ;;  %v9656_v63 = vcombine.low %v2148_v22, %v2152_v11 }
 0x1f0   :  { %11972 = vst [vmem:[#allocation30_spill] sm:$0xff] %v9625_v52  ;;  %11973 = vst [vmem:[#allocation31_spill] sm:$0xff] %v9627_v44  ;;  %v9658_v9 = vcombine.low %v2149_v45, %v2153_v39 }
 0x1f1   :  { %2885 = vmatpush2.bf16.msra.mxu0 %v9597_v46  ;;  %2926 = vmatpush2.bf16.msra.mxu1 %v9601_v56  ;;  %11977 = vst [vmem:[#allocation35_spill] sm:$0xff] %v9651_v12 }
 0x1f2   :  { %2886 = vmatprep.subr.bf16.mxu0 %v9603_v7  ;;  %2927 = vmatprep.subr.bf16.mxu1 %v9606_v1 }
 0x1f5   :  { %2887 = vmatpush2.bf16.msra.mxu0 %v9621_v14  ;;  %2928 = vmatpush2.bf16.msra.mxu1 %v9625_v52 }
 0x1f6   :  { %2888 = vmatprep.subr.bf16.mxu0 %v9627_v44  ;;  %2929 = vmatprep.subr.bf16.mxu1 %v9630_v35 }
 0x1f9   :  { %2889 = vmatpush2.bf16.msra.mxu0 %v9633_v29  ;;  %2930 = vmatpush2.bf16.msra.mxu1 %v9637_v60  ;;  %v9660_v29 = vcombine.high %v2149_v45, %v2153_v39  ;;  %v7350_v45 = vld [vmem:[%s11578_s0 + $0x8] sm:$0xff] }
 0x1fa   :  { %2940 = vmatprep.subr.bf16.mxu0 %v9651_v12  ;;  %v2001_v39 = vunpack.c.l.bf16 %v7350_v45  ;;  %v2002_v28 = vunpack.c.h.bf16 %v7350_v45 }
 0x1fb   :  { %11978 = vst [vmem:[#allocation36_spill] sm:$0xff] %v9660_v29  ;;  %2981 = vmatprep.subr.bf16.mxu1 %v9660_v29 }
 0x23c   :  { %v1871_v35 = vpop.f32.mrf.mxu0  ;;  %v1912_v44 = vpop.f32.mrf.mxu1 }
 0x23e   :  { %v1873_v52 = vpop.f32.mrf.mxu0  ;;  %v1914_v60 = vpop.f32.mrf.mxu1 }
 0x23f   :  { %v2011_v46 = vcombine.low %v1871_v35, %v1873_v52  ;;  %v2012_v50 = vcombine.low %v1912_v44, %v1914_v60 }
 0x240   :  { %v1875_v14 = vpop.f32.mrf.mxu0  ;;  %v1916_v1 = vpop.f32.mrf.mxu1 }
 0x241   :  { %v2019_v22 = vrot.slane %v2011_v46, %v9174_v30  ;;  %v2026_v11 = vrot.slane %v2012_v50, %v9174_v30 }
 0x242   :  { %v1876_v7 = vpop.f32.mrf.mxu0  ;;  %v1917_v56 = vpop.f32.mrf.mxu1 }
 0x243   :  { %v2027_v29 = vcombine.low %v2019_v22, %v2026_v11 }
 0x245   :  { %v2047_v12 = vadd.f32 %v2027_v29, %v2001_v39 }
 0x247   :  { %v7479_v27 = vmul.f32 -1.442695, %v2047_v12 }
 0x249   :  { %8157 = vpow2.f32 %v7479_v27 }
 0x256   :  { %v8158_v1 = vpop.eup %8157 }
 0x257   :  { %v2055_v52 = vadd.f32 1.0, %v8158_v1 }
 0x259   :  { %8159 = vrcp.f32 %v2055_v52 }
 0x266   :  { %v8160_v39 = vpop.eup %8159 }
 0x27c   :  { %v1953_v19 = vpop.f32.mrf.mxu0  ;;  %v1994_v14 = vpop.f32.mrf.mxu1 }
 0x27e   :  { %v1955_v7 = vpop.f32.mrf.mxu0  ;;  %v1996_v56 = vpop.f32.mrf.mxu1 }
 0x27f   :  { %v2028_v35 = vcombine.low %v1953_v19, %v1955_v7  ;;  %v2029_v44 = vcombine.low %v1994_v14, %v1996_v56  ;;  %v2066_v19 = vrot.slane %v8160_v39, 4 }
 0x280   :  { %v1957_v46 = vpop.f32.mrf.mxu0  ;;  %v1998_v60 = vpop.f32.mrf.mxu1 }
 0x281   :  { %v2036_v50 = vrot.slane %v2028_v35, %v9174_v30  ;;  %v2043_v10 = vrot.slane %v2029_v44, %v9174_v30  ;;  %v2068_v56 = vmul.f32 %v2066_v19, %v9183_v43  ;;  %v2140_v43 = vld [vmem:[%s11582_s4 + $0x190] sm:$0xff]  ;;  %v2141_v60 = vld [vmem:[%s11582_s4 + $0x198] sm:$0xff] }
 0x282   :  { %v1958_v15 = vpop.f32.mrf.mxu0  ;;  %v1999_v22 = vpop.f32.mrf.mxu1  ;;  %v2144_v46 = vld [vmem:[%s11582_s4 + $0x1b0] sm:$0xff]  ;;  %v2133_v19 = vld [vmem:[%s11582_s4 + $0x158] sm:$0xff] }
 0x283   :  { %v2044_v29 = vcombine.low %v2036_v50, %v2043_v10  ;;  %v2145_v50 = vld [vmem:[%s11582_s4 + $0x1b8] sm:$0xff] }
 0x285   :  { %v2048_v27 = vadd.f32 %v2044_v29, %v2002_v28 }
 0x287   :  { %v7480_v12 = vmul.f32 -1.442695, %v2048_v27  ;;  %v2062_v11 = vrot.slane %v2048_v27, 4  ;;  %v2132_v27 = vld [vmem:[%s11582_s4 + $0x150] sm:$0xff] }
 0x289   :  { %8161 = vpow2.f32 %v7480_v12  ;;  %v9696_v12 = vcombine.high %v2140_v43, %v2144_v46 }
 0x28a   :  { %8163 = vtanh.f32 %v2062_v11  ;;  %v9698_v11 = vcombine.high %v2141_v60, %v2145_v50 }
 0x296   :  { %v8162_v14 = vpop.eup %8161 }
 0x297   :  { %v8164_v1 = vpop.eup %8163  ;;  %v2056_v7 = vadd.f32 1.0, %v8162_v14  ;;  %v2137_v14 = vld [vmem:[%s11582_s4 + $0x178] sm:$0xff] }
 0x298   :  { %v2069_v35 = vmul.f32 %v8164_v1, %v8160_v39  ;;  %v2136_v39 = vld [vmem:[%s11582_s4 + $0x170] sm:$0xff]  ;;  %v9713_v1 = vcombine.low %v2140_v43, %v2144_v46  ;;  %v9739_v43 = vcombine.low %v2133_v19, %v2137_v14 }
 0x299   :  { %8165 = vrcp.f32 %v2056_v7  ;;  %v9715_v7 = vcombine.low %v2141_v60, %v2145_v50  ;;  %v2116_v50 = vld [vmem:[%s11582_s4 + $0xd0] sm:$0xff] }
 0x29a   :  { %v9672_v45 = vadd.f32 %v2069_v35, %v2068_v56  ;;  %v9717_v56 = vcombine.high %v2132_v27, %v2136_v39  ;;  %v9719_v35 = vcombine.high %v2133_v19, %v2137_v14  ;;  %11983 = vst [vmem:[#allocation41_spill] sm:$0xff] %v9739_v43 }
 0x29b   :  { %11979 = vst [vmem:[#allocation37_spill] sm:$0xff] %v9715_v7 }
 0x29c   :  { %8167 = vtanh.f32 %v9672_v45  ;;  %11980 = vst [vmem:[#allocation38_spill] sm:$0xff] %v9717_v56  ;;  %11981 = vst [vmem:[#allocation39_spill] sm:$0xff] %v9719_v35 }
 0x2a6   :  { %v8166_v15 = vpop.eup %8165 }
 0x2a9   :  { %v8168_v10 = vpop.eup %8167 }
 0x2aa   :  { %v2072_v28 = vmul.f32 %v8168_v10, %v8166_v15  ;;  %v2124_v15 = vld [vmem:[%s11582_s4 + $0x110] sm:$0xff] }
 0x2ab   :  { %v2128_v10 = vld [vmem:[%s11582_s4 + $0x130] sm:$0xff] }
 0x2ac   :  { %7481 = vst [vmem:[%s11583_s5 + $0x4] sm:$0xf] %v2072_v28  ;;  %v2084_v44 = vrot.slane %v2072_v28, %v9174_v30  ;;  %v2125_v28 = vld [vmem:[%s11582_s4 + $0x118] sm:$0xff]  ;;  %v9743_v46 = vcombine.high %v2124_v15, %v2128_v10  ;;  %v9761_v19 = vcombine.low %v2124_v15, %v2128_v10 }
 0x2ad   :  { %v2109_v15 = vld [vmem:[%s11582_s4 + $0x98] sm:$0xff] }
 0x2ae   :  { %v2085_v52 = vcombine.high %v2084_v44, %v2084_v44  ;;  %v9691_v29 = vpack.c.bf16 %v2084_v44, %v2084_v44  ;;  %v2129_v44 = vld [vmem:[%s11582_s4 + $0x138] sm:$0xff]  ;;  %11984 = vst [vmem:[#allocation42_spill] sm:$0xff] %v9743_v46  ;;  %11986 = vst [vmem:[#allocation44_spill] sm:$0xff] %v9761_v19 }
 0x2af   :  { %v9745_v60 = vcombine.high %v2125_v28, %v2129_v44  ;;  %v9763_v14 = vcombine.low %v2125_v28, %v2129_v44  ;;  %v2113_v10 = vld [vmem:[%s11582_s4 + $0xb8] sm:$0xff] }
 0x2b0   :  { %v2089_v22 = vpack.c.bf16 %v2085_v52, %v2085_v52  ;;  %v9737_v52 = vcombine.low %v2132_v27, %v2136_v39  ;;  %v2117_v27 = vld [vmem:[%s11582_s4 + $0xd8] sm:$0xff] }
 0x2b1   :  { %11985 = vst [vmem:[#allocation43_spill] sm:$0xff] %v9745_v60  ;;  %v2121_v39 = vld [vmem:[%s11582_s4 + $0xf8] sm:$0xff]  ;;  %11987 = vst [vmem:[#allocation45_spill] sm:$0xff] %v9763_v14 }
 0x2b2   :  { %2890 = vmatprep.mubr.bf16.mxu0 %v2089_v22  ;;  %2931 = vmatprep.mubr.bf16.mxu1 %v2089_v22  ;;  %11982 = vst [vmem:[#allocation40_spill] sm:$0xff] %v9737_v52  ;;  %v9787_v44 = vcombine.low %v2117_v27, %v2121_v39 }
 0x2b3   :  { %2891 = vmatmul.mubr.bf16.vlgmr.msra.gmra.mxu0 %v9691_v29  ;;  %2932 = vmatmul.mubr.bf16.vlgmr.msra.gmra.mxu1 %v9691_v29 }
 0x2b4   :  { %2941 = vmatpush1.bf16.msra.mxu0 %v9656_v63  ;;  %2982 = vmatpush1.bf16.msra.mxu1 %v9658_v9  ;;  %11991 = vst [vmem:[#allocation49_spill] sm:$0xff] %v9787_v44 }
 0x2b5   :  { %2972 = vmatprep.mubr.bf16.mxu0 %v2089_v22  ;;  %3013 = vmatprep.mubr.bf16.mxu1 %v2089_v22  ;;  %v2120_v22 = vld [vmem:[%s11582_s4 + $0xf0] sm:$0xff] }
 0x2b6   :  { %2942 = vmatprep.subr.bf16.mxu0 %v9696_v12  ;;  %2983 = vmatprep.subr.bf16.mxu1 %v9698_v11  ;;  %v9785_v28 = vcombine.low %v2116_v50, %v2120_v22 }
 0x2b8   :  { %2943 = vmatpush1.bf16.msra.mxu0 %v9713_v1  ;;  %2984 = vmatpush1.bf16.msra.mxu1 %v9715_v7  ;;  %v2108_v7 = vld [vmem:[%s11582_s4 + $0x90] sm:$0xff]  ;;  %11990 = vst [vmem:[#allocation48_spill] sm:$0xff] %v9785_v28 }
 0x2b9   :  { %2944 = vmatprep.subr.bf16.mxu0 %v9717_v56  ;;  %2985 = vmatprep.subr.bf16.mxu1 %v9719_v35  ;;  %v9767_v35 = vcombine.high %v2116_v50, %v2120_v22  ;;  %v9769_v56 = vcombine.high %v2117_v27, %v2121_v39  ;;  %v2101_v50 = vld [vmem:[%s11582_s4 + $0x58] sm:$0xff]  ;;  %v9811_v39 = vcombine.low %v2109_v15, %v2113_v10 }
 0x2ba   :  { %v2105_v22 = vld [vmem:[%s11582_s4 + $0x78] sm:$0xff] }
 0x2bb   :  { %11988 = vst [vmem:[#allocation46_spill] sm:$0xff] %v9767_v35  ;;  %11989 = vst [vmem:[#allocation47_spill] sm:$0xff] %v9769_v56 }
 0x2bc   :  { %2945 = vmatpush1.bf16.msra.mxu0 %v9737_v52  ;;  %2986 = vmatpush1.bf16.msra.mxu1 %v9739_v43  ;;  %v2112_v43 = vld [vmem:[%s11582_s4 + $0xb0] sm:$0xff]  ;;  %11995 = vst [vmem:[#allocation53_spill] sm:$0xff] %v9811_v39 }
 0x2bd   :  { %2946 = vmatprep.subr.bf16.mxu0 %v9743_v46  ;;  %2987 = vmatprep.subr.bf16.mxu1 %v9745_v60  ;;  %v9791_v60 = vcombine.high %v2108_v7, %v2112_v43  ;;  %v9793_v46 = vcombine.high %v2109_v15, %v2113_v10  ;;  %v2100_v52 = vld [vmem:[%s11582_s4 + $0x50] sm:$0xff]  ;;  %v9809_v27 = vcombine.low %v2108_v7, %v2112_v43  ;;  %v2093_v7 = vld [vmem:[%s11582_s4 + $0x18] sm:$0xff] }
 0x2be   :  { %v2097_v43 = vld [vmem:[%s11582_s4 + $0x38] sm:$0xff]  ;;  %v9835_v10 = vcombine.low %v2101_v50, %v2105_v22 }
 0x2bf   :  { %11992 = vst [vmem:[#allocation50_spill] sm:$0xff] %v9791_v60  ;;  %11993 = vst [vmem:[#allocation51_spill] sm:$0xff] %v9793_v46 }
 0x2c0   :  { %2947 = vmatpush1.bf16.msra.mxu0 %v9761_v19  ;;  %2988 = vmatpush1.bf16.msra.mxu1 %v9763_v14  ;;  %v2104_v14 = vld [vmem:[%s11582_s4 + $0x70] sm:$0xff]  ;;  %11994 = vst [vmem:[#allocation52_spill] sm:$0xff] %v9809_v27  ;;  %11999 = vst [vmem:[#allocation57_spill] sm:$0xff] %v9835_v10 }
 0x2c1   :  { %2948 = vmatprep.subr.bf16.mxu0 %v9767_v35  ;;  %2989 = vmatprep.subr.bf16.mxu1 %v9769_v56  ;;  %v9815_v56 = vcombine.high %v2100_v52, %v2104_v14  ;;  %v9817_v35 = vcombine.high %v2101_v50, %v2105_v22  ;;  %v2092_v19 = vld [vmem:[%s11582_s4 + $0x10] sm:$0xff]  ;;  %v9833_v15 = vcombine.low %v2100_v52, %v2104_v14  ;;  %v2213_v52 = vld [vmem:[%s11582_s4 + $0x3d8] sm:$0xff] }
 0x2c2   :  { %v2217_v14 = vld [vmem:[%s11582_s4 + $0x3f8] sm:$0xff]  ;;  %v9859_v22 = vcombine.low %v2093_v7, %v2097_v43 }
 0x2c3   :  { %11996 = vst [vmem:[#allocation54_spill] sm:$0xff] %v9815_v56  ;;  %11997 = vst [vmem:[#allocation55_spill] sm:$0xff] %v9817_v35 }
 0x2c4   :  { %2949 = vmatpush1.bf16.msra.mxu0 %v9785_v28  ;;  %2990 = vmatpush1.bf16.msra.mxu1 %v9787_v44  ;;  %v2096_v44 = vld [vmem:[%s11582_s4 + $0x30] sm:$0xff]  ;;  %11998 = vst [vmem:[#allocation56_spill] sm:$0xff] %v9833_v15  ;;  %12003 = vst [vmem:[#allocation61_spill] sm:$0xff] %v9859_v22 }
 0x2c5   :  { %2950 = vmatprep.subr.bf16.mxu0 %v9791_v60  ;;  %2991 = vmatprep.subr.bf16.mxu1 %v9793_v46  ;;  %v9839_v46 = vcombine.high %v2092_v19, %v2096_v44  ;;  %v9841_v60 = vcombine.high %v2093_v7, %v2097_v43  ;;  %v2212_v28 = vld [vmem:[%s11582_s4 + $0x3d0] sm:$0xff]  ;;  %v9857_v50 = vcombine.low %v2092_v19, %v2096_v44  ;;  %v2205_v19 = vld [vmem:[%s11582_s4 + $0x398] sm:$0xff] }
 0x2c6   :  { %v2209_v44 = vld [vmem:[%s11582_s4 + $0x3b8] sm:$0xff]  ;;  %v9883_v43 = vcombine.low %v2213_v52, %v2217_v14 }
 0x2c7   :  { %12000 = vst [vmem:[#allocation58_spill] sm:$0xff] %v9839_v46  ;;  %12001 = vst [vmem:[#allocation59_spill] sm:$0xff] %v9841_v60 }
 0x2c8   :  { %2951 = vmatpush1.bf16.msra.mxu0 %v9809_v27  ;;  %2992 = vmatpush1.bf16.msra.mxu1 %v9811_v39  ;;  %v2216_v39 = vld [vmem:[%s11582_s4 + $0x3f0] sm:$0xff]  ;;  %12002 = vst [vmem:[#allocation60_spill] sm:$0xff] %v9857_v50  ;;  %12007 = vst [vmem:[#allocation65_spill] sm:$0xff] %v9883_v43 }
 0x2c9   :  { %2952 = vmatprep.subr.bf16.mxu0 %v9815_v56  ;;  %2993 = vmatprep.subr.bf16.mxu1 %v9817_v35  ;;  %v9863_v35 = vcombine.high %v2212_v28, %v2216_v39  ;;  %v9865_v56 = vcombine.high %v2213_v52, %v2217_v14  ;;  %v2204_v27 = vld [vmem:[%s11582_s4 + $0x390] sm:$0xff]  ;;  %v9881_v7 = vcombine.low %v2212_v28, %v2216_v39  ;;  %v2197_v28 = vld [vmem:[%s11582_s4 + $0x358] sm:$0xff] }
 0x2ca   :  { %v2201_v39 = vld [vmem:[%s11582_s4 + $0x378] sm:$0xff]  ;;  %v9907_v14 = vcombine.low %v2205_v19, %v2209_v44 }
 0x2cb   :  { %12004 = vst [vmem:[#allocation62_spill] sm:$0xff] %v9863_v35  ;;  %12005 = vst [vmem:[#allocation63_spill] sm:$0xff] %v9865_v56 }
 0x2cc   :  { %2953 = vmatpush1.bf16.msra.mxu0 %v9833_v15  ;;  %2994 = vmatpush1.bf16.msra.mxu1 %v9835_v10  ;;  %v2208_v10 = vld [vmem:[%s11582_s4 + $0x3b0] sm:$0xff]  ;;  %12006 = vst [vmem:[#allocation64_spill] sm:$0xff] %v9881_v7  ;;  %12011 = vst [vmem:[#allocation69_spill] sm:$0xff] %v9907_v14 }
 0x2cd   :  { %2954 = vmatprep.subr.bf16.mxu0 %v9839_v46  ;;  %2995 = vmatprep.subr.bf16.mxu1 %v9841_v60  ;;  %v9887_v60 = vcombine.high %v2204_v27, %v2208_v10  ;;  %v9889_v46 = vcombine.high %v2205_v19, %v2209_v44  ;;  %v2196_v15 = vld [vmem:[%s11582_s4 + $0x350] sm:$0xff]  ;;  %v9905_v52 = vcombine.low %v2204_v27, %v2208_v10  ;;  %v2189_v27 = vld [vmem:[%s11582_s4 + $0x318] sm:$0xff] }
 0x2ce   :  { %v2193_v10 = vld [vmem:[%s11582_s4 + $0x338] sm:$0xff]  ;;  %v9931_v44 = vcombine.low %v2197_v28, %v2201_v39 }
 0x2cf   :  { %12008 = vst [vmem:[#allocation66_spill] sm:$0xff] %v9887_v60  ;;  %12009 = vst [vmem:[#allocation67_spill] sm:$0xff] %v9889_v46 }
 0x2d0   :  { %2955 = vmatpush1.bf16.msra.mxu0 %v9857_v50  ;;  %2996 = vmatpush1.bf16.msra.mxu1 %v9859_v22  ;;  %v2200_v22 = vld [vmem:[%s11582_s4 + $0x370] sm:$0xff]  ;;  %12010 = vst [vmem:[#allocation68_spill] sm:$0xff] %v9905_v52  ;;  %12015 = vst [vmem:[#allocation73_spill] sm:$0xff] %v9931_v44 }
 0x2d1   :  { %2956 = vmatprep.subr.bf16.mxu0 %v9863_v35  ;;  %2997 = vmatprep.subr.bf16.mxu1 %v9865_v56  ;;  %v9911_v56 = vcombine.high %v2196_v15, %v2200_v22  ;;  %v9913_v35 = vcombine.high %v2197_v28, %v2201_v39  ;;  %v2188_v50 = vld [vmem:[%s11582_s4 + $0x310] sm:$0xff]  ;;  %v9929_v19 = vcombine.low %v2196_v15, %v2200_v22  ;;  %v2181_v15 = vld [vmem:[%s11582_s4 + $0x2d8] sm:$0xff] }
 0x2d2   :  { %v2185_v22 = vld [vmem:[%s11582_s4 + $0x2f8] sm:$0xff]  ;;  %v9955_v39 = vcombine.low %v2189_v27, %v2193_v10 }
 0x2d3   :  { %12012 = vst [vmem:[#allocation70_spill] sm:$0xff] %v9911_v56  ;;  %12013 = vst [vmem:[#allocation71_spill] sm:$0xff] %v9913_v35 }
 0x2d4   :  { %2957 = vmatpush2.bf16.msra.mxu0 %v9881_v7  ;;  %2998 = vmatpush2.bf16.msra.mxu1 %v9883_v43  ;;  %v2192_v43 = vld [vmem:[%s11582_s4 + $0x330] sm:$0xff]  ;;  %12014 = vst [vmem:[#allocation72_spill] sm:$0xff] %v9929_v19  ;;  %12019 = vst [vmem:[#allocation77_spill] sm:$0xff] %v9955_v39 }
 0x2d5   :  { %2958 = vmatprep.subr.bf16.mxu0 %v9887_v60  ;;  %2999 = vmatprep.subr.bf16.mxu1 %v9889_v46  ;;  %v9935_v46 = vcombine.high %v2188_v50, %v2192_v43  ;;  %v9937_v60 = vcombine.high %v2189_v27, %v2193_v10  ;;  %v2180_v7 = vld [vmem:[%s11582_s4 + $0x2d0] sm:$0xff]  ;;  %v9953_v28 = vcombine.low %v2188_v50, %v2192_v43  ;;  %v2173_v50 = vld [vmem:[%s11582_s4 + $0x298] sm:$0xff] }
 0x2d6   :  { %v2177_v43 = vld [vmem:[%s11582_s4 + $0x2b8] sm:$0xff]  ;;  %v9979_v10 = vcombine.low %v2181_v15, %v2185_v22 }
 0x2d7   :  { %12016 = vst [vmem:[#allocation74_spill] sm:$0xff] %v9935_v46  ;;  %12017 = vst [vmem:[#allocation75_spill] sm:$0xff] %v9937_v60 }
 0x2d8   :  { %2959 = vmatpush2.bf16.msra.mxu0 %v9905_v52  ;;  %3000 = vmatpush2.bf16.msra.mxu1 %v9907_v14  ;;  %v2184_v14 = vld [vmem:[%s11582_s4 + $0x2f0] sm:$0xff]  ;;  %12018 = vst [vmem:[#allocation76_spill] sm:$0xff] %v9953_v28  ;;  %12023 = vst [vmem:[#allocation81_spill] sm:$0xff] %v9979_v10 }
 0x2d9   :  { %2960 = vmatprep.subr.bf16.mxu0 %v9911_v56  ;;  %3001 = vmatprep.subr.bf16.mxu1 %v9913_v35  ;;  %v9959_v35 = vcombine.high %v2180_v7, %v2184_v14  ;;  %v9961_v56 = vcombine.high %v2181_v15, %v2185_v22  ;;  %v2172_v52 = vld [vmem:[%s11582_s4 + $0x290] sm:$0xff]  ;;  %v9977_v27 = vcombine.low %v2180_v7, %v2184_v14  ;;  %v2165_v7 = vld [vmem:[%s11582_s4 + $0x258] sm:$0xff] }
 0x2da   :  { %v2169_v14 = vld [vmem:[%s11582_s4 + $0x278] sm:$0xff]  ;;  %v10003_v22 = vcombine.low %v2173_v50, %v2177_v43 }
 0x2db   :  { %12020 = vst [vmem:[#allocation78_spill] sm:$0xff] %v9959_v35  ;;  %12021 = vst [vmem:[#allocation79_spill] sm:$0xff] %v9961_v56 }
 0x2dc   :  { %2961 = vmatpush2.bf16.msra.mxu0 %v9929_v19  ;;  %3002 = vmatpush2.bf16.msra.mxu1 %v9931_v44  ;;  %v2176_v44 = vld [vmem:[%s11582_s4 + $0x2b0] sm:$0xff]  ;;  %12022 = vst [vmem:[#allocation80_spill] sm:$0xff] %v9977_v27 }
 0x2dd   :  { %2962 = vmatprep.subr.bf16.mxu0 %v9935_v46  ;;  %3003 = vmatprep.subr.bf16.mxu1 %v9937_v60  ;;  %v9983_v60 = vcombine.high %v2172_v52, %v2176_v44  ;;  %v9985_v46 = vcombine.high %v2173_v50, %v2177_v43  ;;  %v2164_v19 = vld [vmem:[%s11582_s4 + $0x250] sm:$0xff]  ;;  %v10001_v15 = vcombine.low %v2172_v52, %v2176_v44  ;;  %v2157_v52 = vld [vmem:[%s11582_s4 + $0x218] sm:$0xff] }
 0x2de   :  { %v2161_v44 = vld [vmem:[%s11582_s4 + $0x238] sm:$0xff]  ;;  %v10027_v43 = vcombine.low %v2165_v7, %v2169_v14 }
 0x2df   :  { %12024 = vst [vmem:[#allocation82_spill] sm:$0xff] %v9983_v60  ;;  %12025 = vst [vmem:[#allocation83_spill] sm:$0xff] %v9985_v46 }
 0x2e0   :  { %2963 = vmatpush2.bf16.msra.mxu0 %v9953_v28  ;;  %3004 = vmatpush2.bf16.msra.mxu1 %v9955_v39  ;;  %v2168_v39 = vld [vmem:[%s11582_s4 + $0x270] sm:$0xff]  ;;  %12026 = vst [vmem:[#allocation84_spill] sm:$0xff] %v10001_v15 }
 0x2e1   :  { %2964 = vmatprep.subr.bf16.mxu0 %v9959_v35  ;;  %3005 = vmatprep.subr.bf16.mxu1 %v9961_v56  ;;  %v10007_v56 = vcombine.high %v2164_v19, %v2168_v39  ;;  %v10009_v35 = vcombine.high %v2165_v7, %v2169_v14  ;;  %v2156_v28 = vld [vmem:[%s11582_s4 + $0x210] sm:$0xff]  ;;  %v10025_v50 = vcombine.low %v2164_v19, %v2168_v39 }
 0x2e4   :  { %2965 = vmatpush2.bf16.msra.mxu0 %v9977_v27  ;;  %3006 = vmatpush2.bf16.msra.mxu1 %v9979_v10  ;;  %v2160_v10 = vld [vmem:[%s11582_s4 + $0x230] sm:$0xff] }
 0x2e5   :  { %2966 = vmatprep.subr.bf16.mxu0 %v9983_v60  ;;  %3007 = vmatprep.subr.bf16.mxu1 %v9985_v46  ;;  %v10031_v46 = vcombine.high %v2156_v28, %v2160_v10  ;;  %v10033_v60 = vcombine.high %v2157_v52, %v2161_v44  ;;  %v10037_v27 = vcombine.low %v2156_v28, %v2160_v10 }
 0x2e8   :  { %2967 = vmatpush2.bf16.msra.mxu0 %v10001_v15  ;;  %3008 = vmatpush2.bf16.msra.mxu1 %v10003_v22  ;;  %v10039_v15 = vcombine.low %v2157_v52, %v2161_v44 }
 0x2e9   :  { %2968 = vmatprep.subr.bf16.mxu0 %v10007_v56  ;;  %3009 = vmatprep.subr.bf16.mxu1 %v10009_v35 }
 0x2ec   :  { %2969 = vmatpush2.bf16.msra.mxu0 %v10025_v50  ;;  %3010 = vmatpush2.bf16.msra.mxu1 %v10027_v43 }
 0x2ed   :  { %2970 = vmatprep.subr.bf16.mxu0 %v10031_v46  ;;  %3011 = vmatprep.subr.bf16.mxu1 %v10033_v60 }
 0x2f0   :  { %2971 = vmatpush2.bf16.msra.mxu0 %v10037_v27  ;;  %3012 = vmatpush2.bf16.msra.mxu1 %v10039_v15 }
 0x2f1   :  { %3879 = vmatprep.subr.bf16.mxu0 %v9269_v55  ;;  %3920 = vmatprep.subr.bf16.mxu1 %v9282_v2  ;;  %v12028_v55 = vld [vmem:[#allocation11_spill] sm:$0xff]  ;;  %v12030_v2 = vld [vmem:[#allocation12_spill] sm:$0xff] }
 0x2f3   :  { %2973 = vmatmul.mubr.bf16.vlgmr.msra.gmra.mxu0 %v9691_v29  ;;  %3014 = vmatmul.mubr.bf16.vlgmr.msra.gmra.mxu1 %v9691_v29  ;;  %v7482_v29 = vld [vmem:[%s11578_s0 + $0x10] sm:$0xff] }
 0x2f4   :  { %3880 = vmatpush1.bf16.msra.mxu0 %v9267_v53  ;;  %3921 = vmatpush1.bf16.msra.mxu1 %v9280_v0  ;;  %v12027_v53 = vld [vmem:[#allocation10_spill] sm:$0xff]  ;;  %v3022_v19 = vunpack.c.l.bf16 %v7482_v29 }
 0x2f5   :  { %3881 = vmatprep.subr.bf16.mxu0 %v9284_v59  ;;  %3922 = vmatprep.subr.bf16.mxu1 %v9296_v4  ;;  %v12029_v0 = vld [vmem:[#allocation14_spill] sm:$0xff]  ;;  %v12031_v59 = vld [vmem:[#allocation13_spill] sm:$0xff]  ;;  %v12032_v4 = vld [vmem:[#allocation16_spill] sm:$0xff] }
 0x2f8   :  { %3882 = vmatpush1.bf16.msra.mxu0 %v9309_v23  ;;  %3923 = vmatpush1.bf16.msra.mxu1 %v9313_v25  ;;  %v12033_v23 = vld [vmem:[#allocation18_spill] sm:$0xff]  ;;  %v12034_v25 = vld [vmem:[#allocation15_spill] sm:$0xff] }
 0x2f9   :  { %3883 = vmatprep.subr.bf16.mxu0 %v9315_v49  ;;  %3924 = vmatprep.subr.bf16.mxu1 %v9318_v31  ;;  %v12035_v49 = vld [vmem:[#allocation17_spill] sm:$0xff]  ;;  %v12036_v31 = vld [vmem:[#allocation19_spill] sm:$0xff] }
 0x2fc   :  { %3884 = vmatpush1.bf16.msra.mxu0 %v9321_v40  ;;  %3925 = vmatpush1.bf16.msra.mxu1 %v9325_v41  ;;  %v12037_v40 = vld [vmem:[#allocation20_spill] sm:$0xff]  ;;  %v12038_v41 = vld [vmem:[#allocation21_spill] sm:$0xff] }
 0x2fd   :  { %3885 = vmatprep.subr.bf16.mxu0 %v9339_v57  ;;  %3926 = vmatprep.subr.bf16.mxu1 %v9348_v13  ;;  %v12039_v57 = vld [vmem:[#allocation22_spill] sm:$0xff]  ;;  %v12042_v13 = vld [vmem:[#allocation25_spill] sm:$0xff] }
 0x300   :  { %3886 = vmatpush1.bf16.msra.mxu0 %v9344_v32  ;;  %3927 = vmatpush1.bf16.msra.mxu1 %v9346_v24  ;;  %v12040_v32 = vld [vmem:[#allocation23_spill] sm:$0xff]  ;;  %v12041_v24 = vld [vmem:[#allocation24_spill] sm:$0xff] }
 0x301   :  { %3887 = vmatprep.subr.bf16.mxu0 %v9363_v48  ;;  %3928 = vmatprep.subr.bf16.mxu1 %v9372_v8  ;;  %v12043_v48 = vld [vmem:[#allocation26_spill] sm:$0xff]  ;;  %v12046_v8 = vld [vmem:[#allocation29_spill] sm:$0xff] }
 0x304   :  { %3888 = vmatpush1.bf16.msra.mxu0 %v9368_v3  ;;  %3929 = vmatpush1.bf16.msra.mxu1 %v9370_v5  ;;  %v12044_v3 = vld [vmem:[#allocation27_spill] sm:$0xff]  ;;  %v12045_v5 = vld [vmem:[#allocation28_spill] sm:$0xff] }
 0x305   :  { %3889 = vmatprep.subr.bf16.mxu0 %v9387_v18  ;;  %3930 = vmatprep.subr.bf16.mxu1 %v9396_v26  ;;  %v12047_v18 = vld [vmem:[#allocation30_spill] sm:$0xff]  ;;  %v12050_v26 = vld [vmem:[#allocation33_spill] sm:$0xff] }
 0x308   :  { %3890 = vmatpush1.bf16.msra.mxu0 %v9392_v20  ;;  %3931 = vmatpush1.bf16.msra.mxu1 %v9394_v21  ;;  %v12048_v20 = vld [vmem:[#allocation31_spill] sm:$0xff]  ;;  %v12049_v21 = vld [vmem:[#allocation32_spill] sm:$0xff] }
 0x309   :  { %3891 = vmatprep.subr.bf16.mxu0 %v9411_v34  ;;  %3932 = vmatprep.subr.bf16.mxu1 %v9420_v42  ;;  %v12051_v34 = vld [vmem:[#allocation34_spill] sm:$0xff] }
 0x30c   :  { %3892 = vmatpush1.bf16.msra.mxu0 %v9416_v36  ;;  %3933 = vmatpush1.bf16.msra.mxu1 %v9418_v37  ;;  %v12052_v36 = vld [vmem:[#allocation35_spill] sm:$0xff]  ;;  %v12053_v37 = vld [vmem:[#allocation36_spill] sm:$0xff] }
 0x30d   :  { %3893 = vmatprep.subr.bf16.mxu0 %v9435_v51  ;;  %3934 = vmatprep.subr.bf16.mxu1 %v9444_v17 }
 0x310   :  { %3894 = vmatpush1.bf16.msra.mxu0 %v9440_v54  ;;  %3935 = vmatpush1.bf16.msra.mxu1 %v9442_v16 }
 0x311   :  { %3895 = vmatprep.subr.bf16.mxu0 %v9459_v38  ;;  %3936 = vmatprep.subr.bf16.mxu1 %v9468_v6 }
 0x314   :  { %3896 = vmatpush2.bf16.msra.mxu0 %v9464_v61  ;;  %3937 = vmatpush2.bf16.msra.mxu1 %v9466_v62 }
 0x315   :  { %3897 = vmatprep.subr.bf16.mxu0 %v9483_v47  ;;  %3938 = vmatprep.subr.bf16.mxu1 %v9492_v33 }
 0x318   :  { %3898 = vmatpush2.bf16.msra.mxu0 %v9488_v58  ;;  %3939 = vmatpush2.bf16.msra.mxu1 %v12027_v53 }
 0x319   :  { %3899 = vmatprep.subr.bf16.mxu0 %v12028_v55  ;;  %3940 = vmatprep.subr.bf16.mxu1 %v12029_v0 }
 0x31c   :  { %3900 = vmatpush2.bf16.msra.mxu0 %v12030_v2  ;;  %3941 = vmatpush2.bf16.msra.mxu1 %v12031_v59 }
 0x31d   :  { %3901 = vmatprep.subr.bf16.mxu0 %v12032_v4  ;;  %3942 = vmatprep.subr.bf16.mxu1 %v12033_v23 }
 0x320   :  { %3902 = vmatpush2.bf16.msra.mxu0 %v12034_v25  ;;  %3943 = vmatpush2.bf16.msra.mxu1 %v12035_v49  ;;  %v3023_v25 = vunpack.c.h.bf16 %v7482_v29  ;;  %v12069_v29 = vld [vmem:[#allocation52_spill] sm:$0xff] }
 0x321   :  { %3903 = vmatprep.subr.bf16.mxu0 %v12036_v31  ;;  %3944 = vmatprep.subr.bf16.mxu1 %v12037_v40 }
 0x324   :  { %3904 = vmatpush2.bf16.msra.mxu0 %v12038_v41  ;;  %3945 = vmatpush2.bf16.msra.mxu1 %v12039_v57 }
 0x325   :  { %3905 = vmatprep.subr.bf16.mxu0 %v12040_v32  ;;  %3946 = vmatprep.subr.bf16.mxu1 %v12041_v24 }
 0x328   :  { %3906 = vmatpush2.bf16.msra.mxu0 %v12042_v13  ;;  %3947 = vmatpush2.bf16.msra.mxu1 %v12043_v48 }
 0x329   :  { %3907 = vmatprep.subr.bf16.mxu0 %v12044_v3  ;;  %3948 = vmatprep.subr.bf16.mxu1 %v12045_v5 }
 0x32c   :  { %3908 = vmatpush2.bf16.msra.mxu0 %v12046_v8  ;;  %3949 = vmatpush2.bf16.msra.mxu1 %v12047_v18 }
 0x32d   :  { %3909 = vmatprep.subr.bf16.mxu0 %v12048_v20  ;;  %3950 = vmatprep.subr.bf16.mxu1 %v12049_v21 }
 0x330   :  { %3910 = vmatpush2.bf16.msra.mxu0 %v12050_v26  ;;  %3951 = vmatpush2.bf16.msra.mxu1 %v12051_v34 }
 0x331   :  { %3961 = vmatprep.subr.bf16.mxu0 %v12052_v36  ;;  %4002 = vmatprep.subr.bf16.mxu1 %v12053_v37 }
 0x373   :  { %v2892_v42 = vpop.f32.mrf.mxu0  ;;  %v2933_v51 = vpop.f32.mrf.mxu1 }
 0x375   :  { %v2894_v54 = vpop.f32.mrf.mxu0  ;;  %v2935_v16 = vpop.f32.mrf.mxu1 }
 0x376   :  { %v3032_v6 = vcombine.low %v2892_v42, %v2894_v54  ;;  %v3033_v47 = vcombine.low %v2933_v51, %v2935_v16  ;;  %v12055_v16 = vld [vmem:[#allocation38_spill] sm:$0xff] }
 0x377   :  { %v2896_v17 = vpop.f32.mrf.mxu0  ;;  %v2937_v38 = vpop.f32.mrf.mxu1 }
 0x378   :  { %v3040_v58 = vrot.slane %v3032_v6, %v9174_v30  ;;  %v3047_v33 = vrot.slane %v3033_v47, %v9174_v30  ;;  %v12056_v17 = vld [vmem:[#allocation39_spill] sm:$0xff]  ;;  %v12057_v38 = vld [vmem:[#allocation40_spill] sm:$0xff]  ;;  %v12066_v47 = vld [vmem:[#allocation49_spill] sm:$0xff] }
 0x379   :  { %v2897_v61 = vpop.f32.mrf.mxu0  ;;  %v2938_v62 = vpop.f32.mrf.mxu1  ;;  %v12065_v6 = vld [vmem:[#allocation48_spill] sm:$0xff] }
 0x37a   :  { %v3048_v28 = vcombine.low %v3040_v58, %v3047_v33  ;;  %v12058_v61 = vld [vmem:[#allocation41_spill] sm:$0xff]  ;;  %v12061_v62 = vld [vmem:[#allocation44_spill] sm:$0xff]  ;;  %v12067_v58 = vld [vmem:[#allocation50_spill] sm:$0xff] }
 0x37b   :  { %v12068_v33 = vld [vmem:[#allocation51_spill] sm:$0xff] }
 0x37c   :  { %v3068_v39 = vadd.f32 %v3048_v28, %v3022_v19  ;;  %v12070_v19 = vld [vmem:[#allocation53_spill] sm:$0xff]  ;;  %v12071_v28 = vld [vmem:[#allocation54_spill] sm:$0xff] }
 0x37e   :  { %v7611_v10 = vmul.f32 -1.442695, %v3068_v39  ;;  %v12072_v39 = vld [vmem:[#allocation55_spill] sm:$0xff] }
 0x380   :  { %8169 = vpow2.f32 %v7611_v10  ;;  %v12073_v10 = vld [vmem:[#allocation56_spill] sm:$0xff] }
 0x38d   :  { %v8170_v52 = vpop.eup %8169 }
 0x38e   :  { %v3076_v2 = vadd.f32 1.0, %v8170_v52  ;;  %v12076_v52 = vld [vmem:[#allocation59_spill] sm:$0xff] }
 0x390   :  { %8171 = vrcp.f32 %v3076_v2  ;;  %v12081_v2 = vld [vmem:[#allocation64_spill] sm:$0xff] }
 0x39d   :  { %v8172_v13 = vpop.eup %8171 }
 0x39e   :  { %v3087_v48 = vrot.slane %v8172_v13, 4 }
 0x3a0   :  { %v3089_v18 = vmul.f32 %v3087_v48, %v9672_v45  ;;  %v12054_v45 = vld [vmem:[#allocation37_spill] sm:$0xff] }
 0x3a1   :  { %v12094_v48 = vld [vmem:[#allocation77_spill] sm:$0xff] }
 0x3b3   :  { %v2974_v7 = vpop.f32.mrf.mxu0  ;;  %v3015_v14 = vpop.f32.mrf.mxu1 }
 0x3b5   :  { %v2976_v44 = vpop.f32.mrf.mxu0  ;;  %v3017_v53 = vpop.f32.mrf.mxu1 }
 0x3b6   :  { %v3049_v55 = vcombine.low %v2974_v7, %v2976_v44  ;;  %v3050_v0 = vcombine.low %v3015_v14, %v3017_v53  ;;  %v12074_v7 = vld [vmem:[#allocation57_spill] sm:$0xff]  ;;  %v12075_v14 = vld [vmem:[#allocation58_spill] sm:$0xff]  ;;  %v12077_v44 = vld [vmem:[#allocation60_spill] sm:$0xff] }
 0x3b7   :  { %v2978_v59 = vpop.f32.mrf.mxu0  ;;  %v3019_v4 = vpop.f32.mrf.mxu1  ;;  %v12078_v53 = vld [vmem:[#allocation61_spill] sm:$0xff] }
 0x3b8   :  { %v3057_v23 = vrot.slane %v3049_v55, %v9174_v30  ;;  %v3064_v49 = vrot.slane %v3050_v0, %v9174_v30  ;;  %v12079_v55 = vld [vmem:[#allocation62_spill] sm:$0xff]  ;;  %v12080_v0 = vld [vmem:[#allocation63_spill] sm:$0xff]  ;;  %v12082_v59 = vld [vmem:[#allocation65_spill] sm:$0xff] }
 0x3b9   :  { %v2979_v31 = vpop.f32.mrf.mxu0  ;;  %v3020_v40 = vpop.f32.mrf.mxu1  ;;  %v12083_v4 = vld [vmem:[#allocation66_spill] sm:$0xff] }
 0x3ba   :  { %v3065_v41 = vcombine.low %v3057_v23, %v3064_v49  ;;  %v12084_v23 = vld [vmem:[#allocation67_spill] sm:$0xff]  ;;  %v12086_v49 = vld [vmem:[#allocation69_spill] sm:$0xff]  ;;  %v12087_v31 = vld [vmem:[#allocation70_spill] sm:$0xff] }
 0x3bb   :  { %v12088_v40 = vld [vmem:[#allocation71_spill] sm:$0xff] }
 0x3bc   :  { %v3069_v57 = vadd.f32 %v3065_v41, %v3023_v25  ;;  %v12085_v25 = vld [vmem:[#allocation68_spill] sm:$0xff] }
 0x3bd   :  { %v12089_v41 = vld [vmem:[#allocation72_spill] sm:$0xff] }
 0x3be   :  { %v7612_v32 = vmul.f32 -1.442695, %v3069_v57  ;;  %v3083_v24 = vrot.slane %v3069_v57, 4  ;;  %v12090_v57 = vld [vmem:[#allocation73_spill] sm:$0xff] }
 0x3c0   :  { %8173 = vpow2.f32 %v7612_v32  ;;  %v12091_v32 = vld [vmem:[#allocation74_spill] sm:$0xff] }
 0x3c1   :  { %8175 = vtanh.f32 %v3083_v24  ;;  %v12092_v24 = vld [vmem:[#allocation75_spill] sm:$0xff] }
 0x3cd   :  { %v8174_v3 = vpop.eup %8173 }
 0x3ce   :  { %v8176_v5 = vpop.eup %8175  ;;  %v3077_v8 = vadd.f32 1.0, %v8174_v3  ;;  %v12095_v3 = vld [vmem:[#allocation78_spill] sm:$0xff] }
 0x3cf   :  { %v3090_v20 = vmul.f32 %v8176_v5, %v8172_v13  ;;  %v12093_v13 = vld [vmem:[#allocation76_spill] sm:$0xff]  ;;  %v12096_v5 = vld [vmem:[#allocation79_spill] sm:$0xff] }
 0x3d0   :  { %8177 = vrcp.f32 %v3077_v8  ;;  %v12097_v8 = vld [vmem:[#allocation80_spill] sm:$0xff] }
 0x3d1   :  { %v10121_v21 = vadd.f32 %v3090_v20, %v3089_v18  ;;  %v12098_v18 = vld [vmem:[#allocation81_spill] sm:$0xff]  ;;  %v12099_v20 = vld [vmem:[#allocation82_spill] sm:$0xff] }
 0x3d3   :  { %8179 = vtanh.f32 %v10121_v21 }
 0x3dd   :  { %v8178_v26 = vpop.eup %8177 }
 0x3e0   :  { %v8180_v34 = vpop.eup %8179 }
 0x3e1   :  { %v3093_v36 = vmul.f32 %v8180_v34, %v8178_v26  ;;  %v12100_v26 = vld [vmem:[#allocation83_spill] sm:$0xff]  ;;  %v12101_v34 = vld [vmem:[#allocation84_spill] sm:$0xff] }
 0x3e3   :  { %7613 = vst [vmem:[%s11583_s5 + $0x8] sm:$0xf] %v3093_v36  ;;  %v3105_v37 = vrot.slane %v3093_v36, %v9174_v30 }
 0x3e5   :  { %v3106_v42 = vcombine.high %v3105_v37, %v3105_v37  ;;  %v10128_v54 = vpack.c.bf16 %v3105_v37, %v3105_v37 }
 0x3e7   :  { %v3110_v51 = vpack.c.bf16 %v3106_v42, %v3106_v42  ;;  %v4181_v42 = vld [vmem:[%s11582_s4 + $0x188] sm:$0xff] }
 0x3e9   :  { %3911 = vmatprep.mubr.bf16.mxu0 %v3110_v51  ;;  %3952 = vmatprep.mubr.bf16.mxu1 %v3110_v51 }
 0x3ea   :  { %3912 = vmatmul.mubr.bf16.vlgmr.msra.gmra.mxu0 %v10128_v54  ;;  %3953 = vmatmul.mubr.bf16.vlgmr.msra.gmra.mxu1 %v10128_v54 }
 0x3eb   :  { %3962 = vmatpush1.bf16.msra.mxu0 %v9656_v63  ;;  %4003 = vmatpush1.bf16.msra.mxu1 %v9658_v9  ;;  %v12059_v63 = vld [vmem:[#allocation42_spill] sm:$0xff]  ;;  %v12060_v9 = vld [vmem:[#allocation43_spill] sm:$0xff] }
 0x3ec   :  { %3993 = vmatprep.mubr.bf16.mxu0 %v3110_v51  ;;  %4034 = vmatprep.mubr.bf16.mxu1 %v3110_v51  ;;  %v4185_v51 = vld [vmem:[%s11582_s4 + $0x1a8] sm:$0xff] }
 0x3ed   :  { %3963 = vmatprep.subr.bf16.mxu0 %v9696_v12  ;;  %4004 = vmatprep.subr.bf16.mxu1 %v9698_v11  ;;  %v12062_v12 = vld [vmem:[#allocation45_spill] sm:$0xff]  ;;  %v12063_v11 = vld [vmem:[#allocation46_spill] sm:$0xff] }
 0x3ef   :  { %3964 = vmatpush1.bf16.msra.mxu0 %v9713_v1  ;;  %4005 = vmatpush1.bf16.msra.mxu1 %v12054_v45  ;;  %v12064_v1 = vld [vmem:[#allocation47_spill] sm:$0xff]  ;;  %v10234_v45 = vcombine.high %v4181_v42, %v4185_v51 }
 0x3f0   :  { %3965 = vmatprep.subr.bf16.mxu0 %v12055_v16  ;;  %4006 = vmatprep.subr.bf16.mxu1 %v12056_v17  ;;  %v4176_v16 = vld [vmem:[%s11582_s4 + $0x160] sm:$0xff]  ;;  %v4173_v17 = vld [vmem:[%s11582_s4 + $0x148] sm:$0xff] }
 0x3f3   :  { %3966 = vmatpush1.bf16.msra.mxu0 %v12057_v38  ;;  %4007 = vmatpush1.bf16.msra.mxu1 %v12058_v61  ;;  %v4177_v38 = vld [vmem:[%s11582_s4 + $0x168] sm:$0xff] }
 0x3f4   :  { %3967 = vmatprep.subr.bf16.mxu0 %v12059_v63  ;;  %4008 = vmatprep.subr.bf16.mxu1 %v12060_v9  ;;  %v10251_v63 = vcombine.low %v4181_v42, %v4185_v51  ;;  %v4257_v42 = vld [vmem:[%s11582_s4 + $0x3e8] sm:$0xff] }
 0x3f7   :  { %3968 = vmatpush1.bf16.msra.mxu0 %v12061_v62  ;;  %4009 = vmatpush1.bf16.msra.mxu1 %v12062_v12  ;;  %v10256_v62 = vcombine.high %v4173_v17, %v4177_v38 }
 0x3f8   :  { %3969 = vmatprep.subr.bf16.mxu0 %v12063_v11  ;;  %4010 = vmatprep.subr.bf16.mxu1 %v12064_v1  ;;  %v10263_v11 = vcombine.low %v4173_v17, %v4177_v38  ;;  %v4164_v1 = vld [vmem:[%s11582_s4 + $0x100] sm:$0xff] }
 0x3f9   :  { %v4244_v17 = vld [vmem:[%s11582_s4 + $0x380] sm:$0xff] }
 0x3fa   :  { %v4248_v38 = vld [vmem:[%s11582_s4 + $0x3a0] sm:$0xff] }
 0x3fb   :  { %3970 = vmatpush1.bf16.msra.mxu0 %v12065_v6  ;;  %4011 = vmatpush1.bf16.msra.mxu1 %v12066_v47  ;;  %v4168_v6 = vld [vmem:[%s11582_s4 + $0x120] sm:$0xff]  ;;  %v4165_v47 = vld [vmem:[%s11582_s4 + $0x108] sm:$0xff] }
 0x3fc   :  { %3971 = vmatprep.subr.bf16.mxu0 %v12067_v58  ;;  %4012 = vmatprep.subr.bf16.mxu1 %v12068_v33  ;;  %v10277_v58 = vcombine.high %v4164_v1, %v4168_v6  ;;  %v4169_v33 = vld [vmem:[%s11582_s4 + $0x128] sm:$0xff] }
 0x3ff   :  { %3972 = vmatpush1.bf16.msra.mxu0 %v12069_v29  ;;  %4013 = vmatpush1.bf16.msra.mxu1 %v12070_v19  ;;  %v10282_v29 = vcombine.low %v4164_v1, %v4168_v6  ;;  %v10284_v19 = vcombine.low %v4165_v47, %v4169_v33  ;;  %v4245_v1 = vld [vmem:[%s11582_s4 + $0x388] sm:$0xff]  ;;  %v10421_v6 = vcombine.high %v4244_v17, %v4248_v38 }
 0x400   :  { %3973 = vmatprep.subr.bf16.mxu0 %v12071_v28  ;;  %4014 = vmatprep.subr.bf16.mxu1 %v12072_v39  ;;  %v10286_v28 = vcombine.high %v4165_v47, %v4169_v33  ;;  %v4156_v39 = vld [vmem:[%s11582_s4 + $0xc0] sm:$0xff]  ;;  %v4249_v47 = vld [vmem:[%s11582_s4 + $0x3a8] sm:$0xff]  ;;  %v10426_v33 = vcombine.low %v4244_v17, %v4248_v38 }
 0x401   :  { %v4221_v38 = vld [vmem:[%s11582_s4 + $0x2c8] sm:$0xff] }
 0x403   :  { %3974 = vmatpush1.bf16.msra.mxu0 %v12073_v10  ;;  %4015 = vmatpush1.bf16.msra.mxu1 %v12074_v7  ;;  %v4160_v10 = vld [vmem:[%s11582_s4 + $0xe0] sm:$0xff]  ;;  %v4157_v7 = vld [vmem:[%s11582_s4 + $0xc8] sm:$0xff] }
 0x404   :  { %3975 = vmatprep.subr.bf16.mxu0 %v12075_v14  ;;  %4016 = vmatprep.subr.bf16.mxu1 %v12076_v52  ;;  %v10301_v14 = vcombine.high %v4156_v39, %v4160_v10  ;;  %v4161_v52 = vld [vmem:[%s11582_s4 + $0xe8] sm:$0xff] }
 0x407   :  { %3976 = vmatpush1.bf16.msra.mxu0 %v12077_v44  ;;  %4017 = vmatpush1.bf16.msra.mxu1 %v12078_v53  ;;  %v10306_v44 = vcombine.low %v4156_v39, %v4160_v10  ;;  %v10308_v53 = vcombine.low %v4157_v7, %v4161_v52  ;;  %v10428_v39 = vcombine.low %v4245_v1, %v4249_v47 }
 0x408   :  { %3977 = vmatprep.subr.bf16.mxu0 %v12079_v55  ;;  %4018 = vmatprep.subr.bf16.mxu1 %v12080_v0  ;;  %v10310_v55 = vcombine.high %v4157_v7, %v4161_v52  ;;  %v4148_v0 = vld [vmem:[%s11582_s4 + $0x80] sm:$0xff]  ;;  %v10430_v10 = vcombine.high %v4245_v1, %v4249_v47  ;;  %v4225_v1 = vld [vmem:[%s11582_s4 + $0x2e8] sm:$0xff] }
 0x409   :  { %12102 = vst [vmem:[#allocation10_spill] sm:$0xff] %v10428_v39  ;;  %v4236_v7 = vld [vmem:[%s11582_s4 + $0x340] sm:$0xff]  ;;  %v10495_v47 = vcombine.high %v4221_v38, %v4225_v1 }
 0x40a   :  { %v4240_v52 = vld [vmem:[%s11582_s4 + $0x360] sm:$0xff] }
 0x40b   :  { %3978 = vmatpush2.bf16.msra.mxu0 %v12081_v2  ;;  %4019 = vmatpush2.bf16.msra.mxu1 %v12082_v59  ;;  %v4152_v2 = vld [vmem:[%s11582_s4 + $0xa0] sm:$0xff]  ;;  %v4149_v59 = vld [vmem:[%s11582_s4 + $0x88] sm:$0xff]  ;;  %12112 = vst [vmem:[#allocation20_spill] sm:$0xff] %v10495_v47 }
 0x40c   :  { %3979 = vmatprep.subr.bf16.mxu0 %v12083_v4  ;;  %4020 = vmatprep.subr.bf16.mxu1 %v12084_v23  ;;  %v10325_v4 = vcombine.high %v4148_v0, %v4152_v2  ;;  %v4153_v23 = vld [vmem:[%s11582_s4 + $0xa8] sm:$0xff] }
 0x40f   :  { %3980 = vmatpush2.bf16.msra.mxu0 %v12085_v25  ;;  %4021 = vmatpush2.bf16.msra.mxu1 %v12086_v49  ;;  %v10330_v25 = vcombine.low %v4148_v0, %v4152_v2  ;;  %v10332_v49 = vcombine.low %v4149_v59, %v4153_v23  ;;  %v4237_v0 = vld [vmem:[%s11582_s4 + $0x348] sm:$0xff]  ;;  %v10445_v2 = vcombine.high %v4236_v7, %v4240_v52 }
 0x410   :  { %3981 = vmatprep.subr.bf16.mxu0 %v12087_v31  ;;  %4022 = vmatprep.subr.bf16.mxu1 %v12088_v40  ;;  %v10334_v31 = vcombine.high %v4149_v59, %v4153_v23  ;;  %v4140_v40 = vld [vmem:[%s11582_s4 + $0x40] sm:$0xff]  ;;  %v4241_v59 = vld [vmem:[%s11582_s4 + $0x368] sm:$0xff]  ;;  %v10450_v23 = vcombine.low %v4236_v7, %v4240_v52 }
 0x411   :  { %12103 = vst [vmem:[#allocation11_spill] sm:$0xff] %v10445_v2  ;;  %v4212_v7 = vld [vmem:[%s11582_s4 + $0x280] sm:$0xff] }
 0x412   :  { %12104 = vst [vmem:[#allocation14_spill] sm:$0xff] %v10450_v23  ;;  %v4216_v52 = vld [vmem:[%s11582_s4 + $0x2a0] sm:$0xff] }
 0x413   :  { %3982 = vmatpush2.bf16.msra.mxu0 %v12089_v41  ;;  %4023 = vmatpush2.bf16.msra.mxu1 %v12090_v57  ;;  %v4144_v41 = vld [vmem:[%s11582_s4 + $0x60] sm:$0xff]  ;;  %v4141_v57 = vld [vmem:[%s11582_s4 + $0x48] sm:$0xff] }
 0x414   :  { %3983 = vmatprep.subr.bf16.mxu0 %v12091_v32  ;;  %4024 = vmatprep.subr.bf16.mxu1 %v12092_v24  ;;  %v10349_v32 = vcombine.high %v4140_v40, %v4144_v41  ;;  %v4145_v24 = vld [vmem:[%s11582_s4 + $0x68] sm:$0xff] }
 0x417   :  { %3984 = vmatpush2.bf16.msra.mxu0 %v12093_v13  ;;  %4025 = vmatpush2.bf16.msra.mxu1 %v12094_v48  ;;  %v10354_v13 = vcombine.low %v4140_v40, %v4144_v41  ;;  %v10356_v48 = vcombine.low %v4141_v57, %v4145_v24  ;;  %v10452_v40 = vcombine.low %v4237_v0, %v4241_v59 }
 0x418   :  { %3985 = vmatprep.subr.bf16.mxu0 %v12095_v3  ;;  %4026 = vmatprep.subr.bf16.mxu1 %v12096_v5  ;;  %v10358_v3 = vcombine.high %v4141_v57, %v4145_v24  ;;  %v4132_v5 = vld [vmem:[%s11582_s4] sm:$0xff]  ;;  %v10454_v41 = vcombine.high %v4237_v0, %v4241_v59  ;;  %v4213_v0 = vld [vmem:[%s11582_s4 + $0x288] sm:$0xff] }
 0x419   :  { %12105 = vst [vmem:[#allocation12_spill] sm:$0xff] %v10452_v40  ;;  %v4228_v57 = vld [vmem:[%s11582_s4 + $0x300] sm:$0xff]  ;;  %v4217_v59 = vld [vmem:[%s11582_s4 + $0x2a8] sm:$0xff] }
 0x41a   :  { %12106 = vst [vmem:[#allocation13_spill] sm:$0xff] %v10454_v41  ;;  %v4232_v24 = vld [vmem:[%s11582_s4 + $0x320] sm:$0xff] }
 0x41b   :  { %3986 = vmatpush2.bf16.msra.mxu0 %v12097_v8  ;;  %4027 = vmatpush2.bf16.msra.mxu1 %v12098_v18  ;;  %v4136_v8 = vld [vmem:[%s11582_s4 + $0x20] sm:$0xff]  ;;  %v4133_v18 = vld [vmem:[%s11582_s4 + $0x8] sm:$0xff] }
 0x41c   :  { %3987 = vmatprep.subr.bf16.mxu0 %v12099_v20  ;;  %4028 = vmatprep.subr.bf16.mxu1 %v12100_v26  ;;  %v10373_v20 = vcombine.high %v4132_v5, %v4136_v8  ;;  %v4137_v26 = vld [vmem:[%s11582_s4 + $0x28] sm:$0xff] }
 0x41f   :  { %3988 = vmatpush2.bf16.msra.mxu0 %v12101_v34  ;;  %4029 = vmatpush2.bf16.msra.mxu1 %v10003_v22  ;;  %v4180_v22 = vld [vmem:[%s11582_s4 + $0x180] sm:$0xff]  ;;  %v10378_v34 = vcombine.low %v4132_v5, %v4136_v8  ;;  %v4229_v5 = vld [vmem:[%s11582_s4 + $0x308] sm:$0xff]  ;;  %v10468_v8 = vcombine.low %v4228_v57, %v4232_v24 }
 0x420   :  { %3989 = vmatprep.subr.bf16.mxu0 %v10007_v56  ;;  %4030 = vmatprep.subr.bf16.mxu1 %v10009_v35  ;;  %v4188_v56 = vld [vmem:[%s11582_s4 + $0x1c0] sm:$0xff] }
 0x421   :  { %v4192_v35 = vld [vmem:[%s11582_s4 + $0x1e0] sm:$0xff]  ;;  %12107 = vst [vmem:[#allocation16_spill] sm:$0xff] %v10468_v8 }
 0x423   :  { %3990 = vmatpush2.bf16.msra.mxu0 %v10025_v50  ;;  %4031 = vmatpush2.bf16.msra.mxu1 %v10027_v43  ;;  %v4184_v50 = vld [vmem:[%s11582_s4 + $0x1a0] sm:$0xff] }
 0x424   :  { %3991 = vmatprep.subr.bf16.mxu0 %v10031_v46  ;;  %4032 = vmatprep.subr.bf16.mxu1 %v10033_v60  ;;  %v4189_v46 = vld [vmem:[%s11582_s4 + $0x1c8] sm:$0xff]  ;;  %v10205_v60 = vcombine.low %v4188_v56, %v4192_v35  ;;  %v10222_v37 = vcombine.high %v4180_v22, %v4184_v50  ;;  %v10247_v61 = vcombine.low %v4180_v22, %v4184_v50 }
 0x425   :  { %v4253_v22 = vld [vmem:[%s11582_s4 + $0x3c8] sm:$0xff] }
 0x427   :  { %3992 = vmatpush2.bf16.msra.mxu0 %v10037_v27  ;;  %4033 = vmatpush2.bf16.msra.mxu1 %v10039_v15  ;;  %v10207_v27 = vcombine.high %v4188_v56, %v4192_v35  ;;  %v4193_v15 = vld [vmem:[%s11582_s4 + $0x1e8] sm:$0xff]  ;;  %v10380_v56 = vcombine.low %v4133_v18, %v4137_v26  ;;  %v10382_v35 = vcombine.high %v4133_v18, %v4137_v26 }
 0x428   :  { %v10218_v43 = vcombine.low %v4189_v46, %v4193_v15  ;;  %v10220_v36 = vcombine.high %v4189_v46, %v4193_v15  ;;  %v4252_v46 = vld [vmem:[%s11582_s4 + $0x3c0] sm:$0xff]  ;;  %v10470_v18 = vcombine.high %v4228_v57, %v4232_v24  ;;  %v4233_v26 = vld [vmem:[%s11582_s4 + $0x328] sm:$0xff]  ;;  %v10515_v24 = vcombine.low %v4221_v38, %v4225_v1 }
 0x429   :  { %4900 = vmatprep.subr.bf16.mxu0 %v10207_v27  ;;  %v4256_v15 = vld [vmem:[%s11582_s4 + $0x3e0] sm:$0xff]  ;;  %v4209_v38 = vld [vmem:[%s11582_s4 + $0x268] sm:$0xff]  ;;  %v10535_v1 = vcombine.low %v4212_v7, %v4216_v52 }
 0x42a   :  { %3994 = vmatmul.mubr.bf16.vlgmr.msra.gmra.mxu0 %v10128_v54  ;;  %4035 = vmatmul.mubr.bf16.vlgmr.msra.gmra.mxu1 %v10128_v54  ;;  %v4172_v54 = vld [vmem:[%s11582_s4 + $0x140] sm:$0xff]  ;;  %v10397_v50 = vcombine.high %v4252_v46, %v4256_v15  ;;  %v10402_v51 = vcombine.low %v4252_v46, %v4256_v15  ;;  %12108 = vst [vmem:[#allocation18_spill] sm:$0xff] %v10470_v18  ;;  %12114 = vst [vmem:[#allocation22_spill] sm:$0xff] %v10515_v24 }
 0x42b   :  { %4941 = vmatprep.subr.bf16.mxu1 %v10220_v36  ;;  %4901 = vmatpush1.bf16.msra.mxu0 %v10205_v60  ;;  %v10253_v9 = vcombine.high %v4172_v54, %v4176_v16  ;;  %v10259_v12 = vcombine.low %v4172_v54, %v4176_v16  ;;  %v10404_v54 = vcombine.low %v4253_v22, %v4257_v42  ;;  %v4220_v46 = vld [vmem:[%s11582_s4 + $0x2c0] sm:$0xff] }
 0x42c   :  { %4942 = vmatpush1.bf16.msra.mxu1 %v10218_v43  ;;  %4902 = vmatprep.subr.bf16.mxu0 %v10222_v37  ;;  %v10406_v16 = vcombine.high %v4253_v22, %v4257_v42  ;;  %v4224_v15 = vld [vmem:[%s11582_s4 + $0x2e0] sm:$0xff]  ;;  %v10482_v22 = vcombine.low %v4229_v5, %v4233_v26  ;;  %v10484_v42 = vcombine.high %v4229_v5, %v4233_v26 }
 0x42d   :  { %4943 = vmatprep.subr.bf16.mxu1 %v10234_v45  ;;  %v10486_v17 = vcombine.high %v4220_v46, %v4224_v15  ;;  %v10511_v57 = vcombine.low %v4220_v46, %v4224_v15  ;;  %v10517_v5 = vcombine.high %v4212_v7, %v4216_v52  ;;  %v10520_v26 = vcombine.high %v4213_v0, %v4217_v59  ;;  %v4208_v46 = vld [vmem:[%s11582_s4 + $0x260] sm:$0xff]  ;;  %v4205_v15 = vld [vmem:[%s11582_s4 + $0x248] sm:$0xff] }
 0x42e   :  { %12109 = vst [vmem:[#allocation15_spill] sm:$0xff] %v10482_v22  ;;  %12110 = vst [vmem:[#allocation17_spill] sm:$0xff] %v10484_v42  ;;  %v4200_v7 = vld [vmem:[%s11582_s4 + $0x220] sm:$0xff]  ;;  %v4197_v52 = vld [vmem:[%s11582_s4 + $0x208] sm:$0xff] }
 0x42f   :  { %4903 = vmatpush1.bf16.msra.mxu0 %v10247_v61  ;;  %12111 = vst [vmem:[#allocation19_spill] sm:$0xff] %v10486_v17  ;;  %12113 = vst [vmem:[#allocation21_spill] sm:$0xff] %v10511_v57 }
 0x430   :  { %4944 = vmatpush1.bf16.msra.mxu1 %v10251_v63  ;;  %4904 = vmatprep.subr.bf16.mxu0 %v10253_v9  ;;  %12115 = vst [vmem:[#allocation23_spill] sm:$0xff] %v10517_v5  ;;  %12116 = vst [vmem:[#allocation24_spill] sm:$0xff] %v10520_v26 }
 0x431   :  { %4945 = vmatprep.subr.bf16.mxu1 %v10256_v62  ;;  %12117 = vst [vmem:[#allocation25_spill] sm:$0xff] %v10535_v1 }
 0x433   :  { %4905 = vmatpush1.bf16.msra.mxu0 %v10259_v12 }
 0x434   :  { %4946 = vmatpush1.bf16.msra.mxu1 %v10263_v11  ;;  %4906 = vmatprep.subr.bf16.mxu0 %v10277_v58 }
 0x435   :  { %4947 = vmatprep.subr.bf16.mxu1 %v10286_v28 }
 0x437   :  { %4907 = vmatpush1.bf16.msra.mxu0 %v10282_v29 }
 0x438   :  { %4948 = vmatpush1.bf16.msra.mxu1 %v10284_v19  ;;  %4908 = vmatprep.subr.bf16.mxu0 %v10301_v14 }
 0x439   :  { %4949 = vmatprep.subr.bf16.mxu1 %v10310_v55 }
 0x43b   :  { %4909 = vmatpush1.bf16.msra.mxu0 %v10306_v44 }
 0x43c   :  { %4950 = vmatpush1.bf16.msra.mxu1 %v10308_v53  ;;  %4910 = vmatprep.subr.bf16.mxu0 %v10325_v4 }
 0x43d   :  { %4951 = vmatprep.subr.bf16.mxu1 %v10334_v31 }
 0x43f   :  { %4911 = vmatpush1.bf16.msra.mxu0 %v10330_v25 }
 0x440   :  { %4952 = vmatpush1.bf16.msra.mxu1 %v10332_v49  ;;  %4912 = vmatprep.subr.bf16.mxu0 %v10349_v32 }
 0x441   :  { %4953 = vmatprep.subr.bf16.mxu1 %v10358_v3 }
 0x443   :  { %4913 = vmatpush1.bf16.msra.mxu0 %v10354_v13 }
 0x444   :  { %4954 = vmatpush1.bf16.msra.mxu1 %v10356_v48  ;;  %4914 = vmatprep.subr.bf16.mxu0 %v10373_v20 }
 0x445   :  { %4955 = vmatprep.subr.bf16.mxu1 %v10382_v35 }
 0x447   :  { %4915 = vmatpush1.bf16.msra.mxu0 %v10378_v34 }
 0x448   :  { %4956 = vmatpush1.bf16.msra.mxu1 %v10380_v56  ;;  %4916 = vmatprep.subr.bf16.mxu0 %v10397_v50 }
 0x449   :  { %4957 = vmatprep.subr.bf16.mxu1 %v10406_v16 }
 0x44b   :  { %4917 = vmatpush2.bf16.msra.mxu0 %v10402_v51 }
 0x44c   :  { %4958 = vmatpush2.bf16.msra.mxu1 %v10404_v54  ;;  %4918 = vmatprep.subr.bf16.mxu0 %v10421_v6 }
 0x44d   :  { %4959 = vmatprep.subr.bf16.mxu1 %v10430_v10 }
 0x44f   :  { %4919 = vmatpush2.bf16.msra.mxu0 %v10426_v33 }
 0x450   :  { %4960 = vmatpush2.bf16.msra.mxu1 %v10428_v39  ;;  %4920 = vmatprep.subr.bf16.mxu0 %v10445_v2 }
 0x451   :  { %4961 = vmatprep.subr.bf16.mxu1 %v10454_v41 }
 0x453   :  { %4921 = vmatpush2.bf16.msra.mxu0 %v10450_v23 }
 0x454   :  { %4962 = vmatpush2.bf16.msra.mxu1 %v10452_v40  ;;  %4922 = vmatprep.subr.bf16.mxu0 %v10470_v18 }
 0x455   :  { %4963 = vmatprep.subr.bf16.mxu1 %v10484_v42  ;;  %v4204_v42 = vld [vmem:[%s11582_s4 + $0x240] sm:$0xff] }
 0x457   :  { %4923 = vmatpush2.bf16.msra.mxu0 %v10468_v8  ;;  %v4196_v8 = vld [vmem:[%s11582_s4 + $0x200] sm:$0xff] }
 0x458   :  { %4964 = vmatpush2.bf16.msra.mxu1 %v10482_v22  ;;  %4924 = vmatprep.subr.bf16.mxu0 %v10486_v17  ;;  %v10541_v17 = vcombine.high %v4204_v42, %v4208_v46  ;;  %v10544_v22 = vcombine.high %v4205_v15, %v4209_v38 }
 0x459   :  { %4965 = vmatprep.subr.bf16.mxu1 %v10495_v47  ;;  %v10539_v47 = vcombine.low %v4213_v0, %v4217_v59  ;;  %v4201_v0 = vld [vmem:[%s11582_s4 + $0x228] sm:$0xff]  ;;  %v10559_v59 = vcombine.low %v4204_v42, %v4208_v46  ;;  %v4190_v46 = vld [vmem:[%s11582_s4 + $0x1d0] sm:$0xff] }
 0x45a   :  { %12119 = vst [vmem:[#allocation27_spill] sm:$0xff] %v10541_v17  ;;  %12120 = vst [vmem:[#allocation28_spill] sm:$0xff] %v10544_v22  ;;  %v10575_v42 = vcombine.low %v4197_v52, %v4201_v0 }
 0x45b   :  { %4925 = vmatpush2.bf16.msra.mxu0 %v10511_v57  ;;  %12118 = vst [vmem:[#allocation26_spill] sm:$0xff] %v10539_v47  ;;  %12121 = vst [vmem:[#allocation29_spill] sm:$0xff] %v10559_v59  ;;  %v10571_v57 = vcombine.low %v4196_v8, %v4200_v7 }
 0x45c   :  { %4966 = vmatpush2.bf16.msra.mxu1 %v10515_v24  ;;  %4926 = vmatprep.subr.bf16.mxu0 %v10517_v5  ;;  %v10565_v5 = vcombine.high %v4196_v8, %v4200_v7  ;;  %v10568_v24 = vcombine.high %v4197_v52, %v4201_v0  ;;  %12126 = vst [vmem:[#allocation34_spill] sm:$0xff] %v10575_v42  ;;  %v4191_v8 = vld [vmem:[%s11582_s4 + $0x1d8] sm:$0xff] }
 0x45d   :  { %4967 = vmatprep.subr.bf16.mxu1 %v10520_v26  ;;  %v10563_v26 = vcombine.low %v4205_v15, %v4209_v38  ;;  %12125 = vst [vmem:[#allocation33_spill] sm:$0xff] %v10571_v57  ;;  %v4194_v15 = vld [vmem:[%s11582_s4 + $0x1f0] sm:$0xff]  ;;  %v4195_v7 = vld [vmem:[%s11582_s4 + $0x1f8] sm:$0xff] }
 0x45e   :  { %12123 = vst [vmem:[#allocation31_spill] sm:$0xff] %v10565_v5  ;;  %12124 = vst [vmem:[#allocation32_spill] sm:$0xff] %v10568_v24  ;;  %v10589_v38 = vcombine.high %v4190_v46, %v4194_v15  ;;  %v10594_v52 = vcombine.low %v4190_v46, %v4194_v15  ;;  %v10596_v0 = vcombine.low %v4191_v8, %v4195_v7 }
 0x45f   :  { %4927 = vmatpush2.bf16.msra.mxu0 %v10535_v1  ;;  %12122 = vst [vmem:[#allocation30_spill] sm:$0xff] %v10563_v26 }
 0x460   :  { %4968 = vmatpush2.bf16.msra.mxu1 %v10539_v47  ;;  %4928 = vmatprep.subr.bf16.mxu0 %v10541_v17  ;;  %12127 = vst [vmem:[#allocation35_spill] sm:$0xff] %v10589_v38 }
 0x461   :  { %4969 = vmatprep.subr.bf16.mxu1 %v10544_v22 }
 0x463   :  { %4929 = vmatpush2.bf16.msra.mxu0 %v10559_v59 }
 0x464   :  { %4970 = vmatpush2.bf16.msra.mxu1 %v10563_v26  ;;  %4930 = vmatprep.subr.bf16.mxu0 %v10565_v5 }
 0x465   :  { %4971 = vmatprep.subr.bf16.mxu1 %v10568_v24 }
 0x467   :  { %4931 = vmatpush2.bf16.msra.mxu0 %v10571_v57  ;;  %v10598_v57 = vcombine.high %v4191_v8, %v4195_v7  ;;  %v7614_v8 = vld [vmem:[%s11578_s0 + $0x18] sm:$0xff] }
 0x468   :  { %4972 = vmatpush2.bf16.msra.mxu1 %v10575_v42  ;;  %4982 = vmatprep.subr.bf16.mxu0 %v10589_v38  ;;  %v4043_v7 = vunpack.c.l.bf16 %v7614_v8  ;;  %v4044_v41 = vunpack.c.h.bf16 %v7614_v8 }
 0x469   :  { %12128 = vst [vmem:[#allocation36_spill] sm:$0xff] %v10598_v57  ;;  %5023 = vmatprep.subr.bf16.mxu1 %v10598_v57 }
 0x4aa   :  { %v3913_v24 = vpop.f32.mrf.mxu0  ;;  %v3954_v5 = vpop.f32.mrf.mxu1 }
 0x4ac   :  { %v3915_v26 = vpop.f32.mrf.mxu0  ;;  %v3956_v42 = vpop.f32.mrf.mxu1 }
 0x4ad   :  { %v4053_v1 = vcombine.low %v3913_v24, %v3915_v26  ;;  %v4054_v18 = vcombine.low %v3954_v5, %v3956_v42 }
 0x4ae   :  { %v3917_v59 = vpop.f32.mrf.mxu0  ;;  %v3958_v22 = vpop.f32.mrf.mxu1 }
 0x4af   :  { %v4061_v46 = vrot.slane %v4053_v1, %v9174_v30  ;;  %v4068_v15 = vrot.slane %v4054_v18, %v9174_v30 }
 0x4b0   :  { %v3918_v17 = vpop.f32.mrf.mxu0  ;;  %v3959_v47 = vpop.f32.mrf.mxu1 }
 0x4b1   :  { %v4069_v57 = vcombine.low %v4061_v46, %v4068_v15 }
 0x4b3   :  { %v4089_v38 = vadd.f32 %v4069_v57, %v4043_v7 }
 0x4b5   :  { %v7743_v40 = vmul.f32 -1.442695, %v4089_v38 }
 0x4b7   :  { %8181 = vpow2.f32 %v7743_v40 }
 0x4c4   :  { %v8182_v22 = vpop.eup %8181 }
 0x4c5   :  { %v4097_v26 = vadd.f32 1.0, %v8182_v22 }
 0x4c7   :  { %8183 = vrcp.f32 %v4097_v26 }
 0x4d4   :  { %v8184_v7 = vpop.eup %8183 }
 0x4ea   :  { %v3995_v23 = vpop.f32.mrf.mxu0  ;;  %v4036_v59 = vpop.f32.mrf.mxu1 }
 0x4ec   :  { %v3997_v17 = vpop.f32.mrf.mxu0  ;;  %v4038_v47 = vpop.f32.mrf.mxu1 }
 0x4ed   :  { %v4070_v24 = vcombine.low %v3995_v23, %v3997_v17  ;;  %v4071_v5 = vcombine.low %v4036_v59, %v4038_v47  ;;  %v4108_v23 = vrot.slane %v8184_v7, 4 }
 0x4ee   :  { %v3999_v1 = vpop.f32.mrf.mxu0  ;;  %v4040_v42 = vpop.f32.mrf.mxu1 }
 0x4ef   :  { %v4078_v18 = vrot.slane %v4070_v24, %v9174_v30  ;;  %v4085_v2 = vrot.slane %v4071_v5, %v9174_v30  ;;  %v4110_v47 = vmul.f32 %v4108_v23, %v10121_v21  ;;  %v4182_v21 = vld [vmem:[%s11582_s4 + $0x190] sm:$0xff]  ;;  %v4183_v42 = vld [vmem:[%s11582_s4 + $0x198] sm:$0xff] }
 0x4f0   :  { %v4000_v39 = vpop.f32.mrf.mxu0  ;;  %v4041_v46 = vpop.f32.mrf.mxu1  ;;  %v4186_v1 = vld [vmem:[%s11582_s4 + $0x1b0] sm:$0xff]  ;;  %v4175_v23 = vld [vmem:[%s11582_s4 + $0x158] sm:$0xff] }
 0x4f1   :  { %v4086_v57 = vcombine.low %v4078_v18, %v4085_v2  ;;  %v4187_v18 = vld [vmem:[%s11582_s4 + $0x1b8] sm:$0xff] }
 0x4f3   :  { %v4090_v40 = vadd.f32 %v4086_v57, %v4044_v41 }
 0x4f5   :  { %v7744_v38 = vmul.f32 -1.442695, %v4090_v40  ;;  %v4104_v15 = vrot.slane %v4090_v40, 4  ;;  %v4174_v40 = vld [vmem:[%s11582_s4 + $0x150] sm:$0xff] }
 0x4f7   :  { %8185 = vpow2.f32 %v7744_v38  ;;  %v10634_v38 = vcombine.high %v4182_v21, %v4186_v1 }
 0x4f8   :  { %8187 = vtanh.f32 %v4104_v15  ;;  %v10636_v15 = vcombine.high %v4183_v42, %v4187_v18 }
 0x504   :  { %v8186_v59 = vpop.eup %8185 }
 0x505   :  { %v8188_v22 = vpop.eup %8187  ;;  %v4098_v17 = vadd.f32 1.0, %v8186_v59  ;;  %v4179_v59 = vld [vmem:[%s11582_s4 + $0x178] sm:$0xff] }
 0x506   :  { %v4111_v24 = vmul.f32 %v8188_v22, %v8184_v7  ;;  %v4178_v7 = vld [vmem:[%s11582_s4 + $0x170] sm:$0xff]  ;;  %v10651_v22 = vcombine.low %v4182_v21, %v4186_v1  ;;  %v10677_v21 = vcombine.low %v4175_v23, %v4179_v59 }
 0x507   :  { %8189 = vrcp.f32 %v4098_v17  ;;  %v10653_v17 = vcombine.low %v4183_v42, %v4187_v18  ;;  %v4158_v18 = vld [vmem:[%s11582_s4 + $0xd0] sm:$0xff] }
 0x508   :  { %v10610_v8 = vadd.f32 %v4111_v24, %v4110_v47  ;;  %v10655_v47 = vcombine.high %v4174_v40, %v4178_v7  ;;  %v10657_v24 = vcombine.high %v4175_v23, %v4179_v59  ;;  %12133 = vst [vmem:[#allocation41_spill] sm:$0xff] %v10677_v21 }
 0x509   :  { %12129 = vst [vmem:[#allocation37_spill] sm:$0xff] %v10653_v17 }
 0x50a   :  { %8191 = vtanh.f32 %v10610_v8  ;;  %12130 = vst [vmem:[#allocation38_spill] sm:$0xff] %v10655_v47  ;;  %12131 = vst [vmem:[#allocation39_spill] sm:$0xff] %v10657_v24 }
 0x514   :  { %v8190_v39 = vpop.eup %8189 }
 0x517   :  { %v8192_v2 = vpop.eup %8191 }
 0x518   :  { %v4114_v41 = vmul.f32 %v8192_v2, %v8190_v39  ;;  %v4166_v39 = vld [vmem:[%s11582_s4 + $0x110] sm:$0xff] }
 0x519   :  { %v4170_v2 = vld [vmem:[%s11582_s4 + $0x130] sm:$0xff] }
 0x51a   :  { %7745 = vst [vmem:[%s11583_s5 + $0xc] sm:$0xf] %v4114_v41  ;;  %v4126_v5 = vrot.slane %v4114_v41, %v9174_v30  ;;  %v4167_v41 = vld [vmem:[%s11582_s4 + $0x118] sm:$0xff]  ;;  %v10681_v1 = vcombine.high %v4166_v39, %v4170_v2  ;;  %v10699_v23 = vcombine.low %v4166_v39, %v4170_v2 }
 0x51b   :  { %v4151_v39 = vld [vmem:[%s11582_s4 + $0x98] sm:$0xff] }
 0x51c   :  { %v4127_v26 = vcombine.high %v4126_v5, %v4126_v5  ;;  %v10629_v57 = vpack.c.bf16 %v4126_v5, %v4126_v5  ;;  %v4171_v5 = vld [vmem:[%s11582_s4 + $0x138] sm:$0xff]  ;;  %12134 = vst [vmem:[#allocation42_spill] sm:$0xff] %v10681_v1  ;;  %12136 = vst [vmem:[#allocation44_spill] sm:$0xff] %v10699_v23 }
 0x51d   :  { %v10683_v42 = vcombine.high %v4167_v41, %v4171_v5  ;;  %v10701_v59 = vcombine.low %v4167_v41, %v4171_v5  ;;  %v4155_v2 = vld [vmem:[%s11582_s4 + $0xb8] sm:$0xff] }
 0x51e   :  { %v4131_v46 = vpack.c.bf16 %v4127_v26, %v4127_v26  ;;  %v10675_v26 = vcombine.low %v4174_v40, %v4178_v7  ;;  %v4159_v40 = vld [vmem:[%s11582_s4 + $0xd8] sm:$0xff] }
 0x51f   :  { %12135 = vst [vmem:[#allocation43_spill] sm:$0xff] %v10683_v42  ;;  %v4163_v7 = vld [vmem:[%s11582_s4 + $0xf8] sm:$0xff]  ;;  %12137 = vst [vmem:[#allocation45_spill] sm:$0xff] %v10701_v59 }
 0x520   :  { %4932 = vmatprep.mubr.bf16.mxu0 %v4131_v46  ;;  %4973 = vmatprep.mubr.bf16.mxu1 %v4131_v46  ;;  %12132 = vst [vmem:[#allocation40_spill] sm:$0xff] %v10675_v26  ;;  %v10725_v5 = vcombine.low %v4159_v40, %v4163_v7 }
 0x521   :  { %4933 = vmatmul.mubr.bf16.vlgmr.msra.gmra.mxu0 %v10629_v57  ;;  %4974 = vmatmul.mubr.bf16.vlgmr.msra.gmra.mxu1 %v10629_v57 }
 0x522   :  { %4983 = vmatpush1.bf16.msra.mxu0 %v10594_v52  ;;  %5024 = vmatpush1.bf16.msra.mxu1 %v10596_v0  ;;  %12141 = vst [vmem:[#allocation49_spill] sm:$0xff] %v10725_v5 }
 0x523   :  { %5014 = vmatprep.mubr.bf16.mxu0 %v4131_v46  ;;  %5055 = vmatprep.mubr.bf16.mxu1 %v4131_v46  ;;  %v4162_v46 = vld [vmem:[%s11582_s4 + $0xf0] sm:$0xff] }
 0x524   :  { %4984 = vmatprep.subr.bf16.mxu0 %v10634_v38  ;;  %5025 = vmatprep.subr.bf16.mxu1 %v10636_v15  ;;  %v10723_v41 = vcombine.low %v4158_v18, %v4162_v46 }
 0x526   :  { %4985 = vmatpush1.bf16.msra.mxu0 %v10651_v22  ;;  %5026 = vmatpush1.bf16.msra.mxu1 %v10653_v17  ;;  %v4150_v17 = vld [vmem:[%s11582_s4 + $0x90] sm:$0xff]  ;;  %12140 = vst [vmem:[#allocation48_spill] sm:$0xff] %v10723_v41 }
 0x527   :  { %4986 = vmatprep.subr.bf16.mxu0 %v10655_v47  ;;  %5027 = vmatprep.subr.bf16.mxu1 %v10657_v24  ;;  %v10705_v24 = vcombine.high %v4158_v18, %v4162_v46  ;;  %v10707_v47 = vcombine.high %v4159_v40, %v4163_v7  ;;  %v4143_v18 = vld [vmem:[%s11582_s4 + $0x58] sm:$0xff]  ;;  %v10749_v7 = vcombine.low %v4151_v39, %v4155_v2 }
 0x528   :  { %v4147_v46 = vld [vmem:[%s11582_s4 + $0x78] sm:$0xff] }
 0x529   :  { %12138 = vst [vmem:[#allocation46_spill] sm:$0xff] %v10705_v24  ;;  %12139 = vst [vmem:[#allocation47_spill] sm:$0xff] %v10707_v47 }
 0x52a   :  { %4987 = vmatpush1.bf16.msra.mxu0 %v10675_v26  ;;  %5028 = vmatpush1.bf16.msra.mxu1 %v10677_v21  ;;  %v4154_v21 = vld [vmem:[%s11582_s4 + $0xb0] sm:$0xff]  ;;  %12145 = vst [vmem:[#allocation53_spill] sm:$0xff] %v10749_v7 }
 0x52b   :  { %4988 = vmatprep.subr.bf16.mxu0 %v10681_v1  ;;  %5029 = vmatprep.subr.bf16.mxu1 %v10683_v42  ;;  %v10729_v42 = vcombine.high %v4150_v17, %v4154_v21  ;;  %v10731_v1 = vcombine.high %v4151_v39, %v4155_v2  ;;  %v4142_v26 = vld [vmem:[%s11582_s4 + $0x50] sm:$0xff]  ;;  %v10747_v40 = vcombine.low %v4150_v17, %v4154_v21  ;;  %v4135_v17 = vld [vmem:[%s11582_s4 + $0x18] sm:$0xff] }
 0x52c   :  { %v4139_v21 = vld [vmem:[%s11582_s4 + $0x38] sm:$0xff]  ;;  %v10773_v2 = vcombine.low %v4143_v18, %v4147_v46 }
 0x52d   :  { %12142 = vst [vmem:[#allocation50_spill] sm:$0xff] %v10729_v42  ;;  %12143 = vst [vmem:[#allocation51_spill] sm:$0xff] %v10731_v1 }
 0x52e   :  { %4989 = vmatpush1.bf16.msra.mxu0 %v10699_v23  ;;  %5030 = vmatpush1.bf16.msra.mxu1 %v10701_v59  ;;  %v4146_v59 = vld [vmem:[%s11582_s4 + $0x70] sm:$0xff]  ;;  %12144 = vst [vmem:[#allocation52_spill] sm:$0xff] %v10747_v40  ;;  %12149 = vst [vmem:[#allocation57_spill] sm:$0xff] %v10773_v2 }
 0x52f   :  { %4990 = vmatprep.subr.bf16.mxu0 %v10705_v24  ;;  %5031 = vmatprep.subr.bf16.mxu1 %v10707_v47  ;;  %v10753_v47 = vcombine.high %v4142_v26, %v4146_v59  ;;  %v10755_v24 = vcombine.high %v4143_v18, %v4147_v46  ;;  %v4134_v23 = vld [vmem:[%s11582_s4 + $0x10] sm:$0xff]  ;;  %v10771_v39 = vcombine.low %v4142_v26, %v4146_v59  ;;  %v4255_v26 = vld [vmem:[%s11582_s4 + $0x3d8] sm:$0xff] }
 0x530   :  { %v4259_v59 = vld [vmem:[%s11582_s4 + $0x3f8] sm:$0xff]  ;;  %v10797_v46 = vcombine.low %v4135_v17, %v4139_v21 }
 0x531   :  { %12146 = vst [vmem:[#allocation54_spill] sm:$0xff] %v10753_v47  ;;  %12147 = vst [vmem:[#allocation55_spill] sm:$0xff] %v10755_v24 }
 0x532   :  { %4991 = vmatpush1.bf16.msra.mxu0 %v10723_v41  ;;  %5032 = vmatpush1.bf16.msra.mxu1 %v10725_v5  ;;  %v4138_v5 = vld [vmem:[%s11582_s4 + $0x30] sm:$0xff]  ;;  %12148 = vst [vmem:[#allocation56_spill] sm:$0xff] %v10771_v39  ;;  %12153 = vst [vmem:[#allocation61_spill] sm:$0xff] %v10797_v46 }
 0x533   :  { %4992 = vmatprep.subr.bf16.mxu0 %v10729_v42  ;;  %5033 = vmatprep.subr.bf16.mxu1 %v10731_v1  ;;  %v10777_v1 = vcombine.high %v4134_v23, %v4138_v5  ;;  %v10779_v42 = vcombine.high %v4135_v17, %v4139_v21  ;;  %v4254_v41 = vld [vmem:[%s11582_s4 + $0x3d0] sm:$0xff]  ;;  %v10795_v18 = vcombine.low %v4134_v23, %v4138_v5  ;;  %v4247_v23 = vld [vmem:[%s11582_s4 + $0x398] sm:$0xff] }
 0x534   :  { %v4251_v5 = vld [vmem:[%s11582_s4 + $0x3b8] sm:$0xff]  ;;  %v10821_v21 = vcombine.low %v4255_v26, %v4259_v59 }
 0x535   :  { %12150 = vst [vmem:[#allocation58_spill] sm:$0xff] %v10777_v1  ;;  %12151 = vst [vmem:[#allocation59_spill] sm:$0xff] %v10779_v42 }
 0x536   :  { %4993 = vmatpush1.bf16.msra.mxu0 %v10747_v40  ;;  %5034 = vmatpush1.bf16.msra.mxu1 %v10749_v7  ;;  %v4258_v7 = vld [vmem:[%s11582_s4 + $0x3f0] sm:$0xff]  ;;  %12152 = vst [vmem:[#allocation60_spill] sm:$0xff] %v10795_v18  ;;  %12157 = vst [vmem:[#allocation65_spill] sm:$0xff] %v10821_v21 }
 0x537   :  { %4994 = vmatprep.subr.bf16.mxu0 %v10753_v47  ;;  %5035 = vmatprep.subr.bf16.mxu1 %v10755_v24  ;;  %v10801_v24 = vcombine.high %v4254_v41, %v4258_v7  ;;  %v10803_v47 = vcombine.high %v4255_v26, %v4259_v59  ;;  %v4246_v40 = vld [vmem:[%s11582_s4 + $0x390] sm:$0xff]  ;;  %v10819_v17 = vcombine.low %v4254_v41, %v4258_v7  ;;  %v4239_v41 = vld [vmem:[%s11582_s4 + $0x358] sm:$0xff] }
 0x538   :  { %v4243_v7 = vld [vmem:[%s11582_s4 + $0x378] sm:$0xff]  ;;  %v10845_v59 = vcombine.low %v4247_v23, %v4251_v5 }
 0x539   :  { %12154 = vst [vmem:[#allocation62_spill] sm:$0xff] %v10801_v24  ;;  %12155 = vst [vmem:[#allocation63_spill] sm:$0xff] %v10803_v47 }
 0x53a   :  { %4995 = vmatpush1.bf16.msra.mxu0 %v10771_v39  ;;  %5036 = vmatpush1.bf16.msra.mxu1 %v10773_v2  ;;  %v4250_v2 = vld [vmem:[%s11582_s4 + $0x3b0] sm:$0xff]  ;;  %12156 = vst [vmem:[#allocation64_spill] sm:$0xff] %v10819_v17  ;;  %12161 = vst [vmem:[#allocation69_spill] sm:$0xff] %v10845_v59 }
 0x53b   :  { %4996 = vmatprep.subr.bf16.mxu0 %v10777_v1  ;;  %5037 = vmatprep.subr.bf16.mxu1 %v10779_v42  ;;  %v10825_v42 = vcombine.high %v4246_v40, %v4250_v2  ;;  %v10827_v1 = vcombine.high %v4247_v23, %v4251_v5  ;;  %v4238_v39 = vld [vmem:[%s11582_s4 + $0x350] sm:$0xff]  ;;  %v10843_v26 = vcombine.low %v4246_v40, %v4250_v2  ;;  %v4231_v40 = vld [vmem:[%s11582_s4 + $0x318] sm:$0xff] }
 0x53c   :  { %v4235_v2 = vld [vmem:[%s11582_s4 + $0x338] sm:$0xff]  ;;  %v10869_v5 = vcombine.low %v4239_v41, %v4243_v7 }
 0x53d   :  { %12158 = vst [vmem:[#allocation66_spill] sm:$0xff] %v10825_v42  ;;  %12159 = vst [vmem:[#allocation67_spill] sm:$0xff] %v10827_v1 }
 0x53e   :  { %4997 = vmatpush1.bf16.msra.mxu0 %v10795_v18  ;;  %5038 = vmatpush1.bf16.msra.mxu1 %v10797_v46  ;;  %v4242_v46 = vld [vmem:[%s11582_s4 + $0x370] sm:$0xff]  ;;  %12160 = vst [vmem:[#allocation68_spill] sm:$0xff] %v10843_v26  ;;  %12165 = vst [vmem:[#allocation73_spill] sm:$0xff] %v10869_v5 }
 0x53f   :  { %4998 = vmatprep.subr.bf16.mxu0 %v10801_v24  ;;  %5039 = vmatprep.subr.bf16.mxu1 %v10803_v47  ;;  %v10849_v47 = vcombine.high %v4238_v39, %v4242_v46  ;;  %v10851_v24 = vcombine.high %v4239_v41, %v4243_v7  ;;  %v4230_v18 = vld [vmem:[%s11582_s4 + $0x310] sm:$0xff]  ;;  %v10867_v23 = vcombine.low %v4238_v39, %v4242_v46  ;;  %v4223_v39 = vld [vmem:[%s11582_s4 + $0x2d8] sm:$0xff] }
 0x540   :  { %v4227_v46 = vld [vmem:[%s11582_s4 + $0x2f8] sm:$0xff]  ;;  %v10893_v7 = vcombine.low %v4231_v40, %v4235_v2 }
 0x541   :  { %12162 = vst [vmem:[#allocation70_spill] sm:$0xff] %v10849_v47  ;;  %12163 = vst [vmem:[#allocation71_spill] sm:$0xff] %v10851_v24 }
 0x542   :  { %4999 = vmatpush2.bf16.msra.mxu0 %v10819_v17  ;;  %5040 = vmatpush2.bf16.msra.mxu1 %v10821_v21  ;;  %v4234_v21 = vld [vmem:[%s11582_s4 + $0x330] sm:$0xff]  ;;  %12164 = vst [vmem:[#allocation72_spill] sm:$0xff] %v10867_v23  ;;  %12169 = vst [vmem:[#allocation77_spill] sm:$0xff] %v10893_v7 }
 0x543   :  { %5000 = vmatprep.subr.bf16.mxu0 %v10825_v42  ;;  %5041 = vmatprep.subr.bf16.mxu1 %v10827_v1  ;;  %v10873_v1 = vcombine.high %v4230_v18, %v4234_v21  ;;  %v10875_v42 = vcombine.high %v4231_v40, %v4235_v2  ;;  %v4222_v17 = vld [vmem:[%s11582_s4 + $0x2d0] sm:$0xff]  ;;  %v10891_v41 = vcombine.low %v4230_v18, %v4234_v21  ;;  %v4215_v18 = vld [vmem:[%s11582_s4 + $0x298] sm:$0xff] }
 0x544   :  { %v4219_v21 = vld [vmem:[%s11582_s4 + $0x2b8] sm:$0xff]  ;;  %v10917_v2 = vcombine.low %v4223_v39, %v4227_v46 }
 0x545   :  { %12166 = vst [vmem:[#allocation74_spill] sm:$0xff] %v10873_v1  ;;  %12167 = vst [vmem:[#allocation75_spill] sm:$0xff] %v10875_v42 }
 0x546   :  { %5001 = vmatpush2.bf16.msra.mxu0 %v10843_v26  ;;  %5042 = vmatpush2.bf16.msra.mxu1 %v10845_v59  ;;  %v4226_v59 = vld [vmem:[%s11582_s4 + $0x2f0] sm:$0xff]  ;;  %12168 = vst [vmem:[#allocation76_spill] sm:$0xff] %v10891_v41  ;;  %12173 = vst [vmem:[#allocation81_spill] sm:$0xff] %v10917_v2 }
 0x547   :  { %5002 = vmatprep.subr.bf16.mxu0 %v10849_v47  ;;  %5043 = vmatprep.subr.bf16.mxu1 %v10851_v24  ;;  %v10897_v24 = vcombine.high %v4222_v17, %v4226_v59  ;;  %v10899_v47 = vcombine.high %v4223_v39, %v4227_v46  ;;  %v4214_v26 = vld [vmem:[%s11582_s4 + $0x290] sm:$0xff]  ;;  %v10915_v40 = vcombine.low %v4222_v17, %v4226_v59  ;;  %v4207_v17 = vld [vmem:[%s11582_s4 + $0x258] sm:$0xff] }
 0x548   :  { %v4211_v59 = vld [vmem:[%s11582_s4 + $0x278] sm:$0xff]  ;;  %v10941_v46 = vcombine.low %v4215_v18, %v4219_v21 }
 0x549   :  { %12170 = vst [vmem:[#allocation78_spill] sm:$0xff] %v10897_v24  ;;  %12171 = vst [vmem:[#allocation79_spill] sm:$0xff] %v10899_v47 }
 0x54a   :  { %5003 = vmatpush2.bf16.msra.mxu0 %v10867_v23  ;;  %5044 = vmatpush2.bf16.msra.mxu1 %v10869_v5  ;;  %v4218_v5 = vld [vmem:[%s11582_s4 + $0x2b0] sm:$0xff]  ;;  %12172 = vst [vmem:[#allocation80_spill] sm:$0xff] %v10915_v40 }
 0x54b   :  { %5004 = vmatprep.subr.bf16.mxu0 %v10873_v1  ;;  %5045 = vmatprep.subr.bf16.mxu1 %v10875_v42  ;;  %v10921_v42 = vcombine.high %v4214_v26, %v4218_v5  ;;  %v10923_v1 = vcombine.high %v4215_v18, %v4219_v21  ;;  %v4206_v23 = vld [vmem:[%s11582_s4 + $0x250] sm:$0xff]  ;;  %v10939_v39 = vcombine.low %v4214_v26, %v4218_v5  ;;  %v4199_v26 = vld [vmem:[%s11582_s4 + $0x218] sm:$0xff] }
 0x54c   :  { %v4203_v5 = vld [vmem:[%s11582_s4 + $0x238] sm:$0xff]  ;;  %v10965_v21 = vcombine.low %v4207_v17, %v4211_v59 }
 0x54d   :  { %12174 = vst [vmem:[#allocation82_spill] sm:$0xff] %v10921_v42  ;;  %12175 = vst [vmem:[#allocation83_spill] sm:$0xff] %v10923_v1 }
 0x54e   :  { %5005 = vmatpush2.bf16.msra.mxu0 %v10891_v41  ;;  %5046 = vmatpush2.bf16.msra.mxu1 %v10893_v7  ;;  %v4210_v7 = vld [vmem:[%s11582_s4 + $0x270] sm:$0xff]  ;;  %12176 = vst [vmem:[#allocation84_spill] sm:$0xff] %v10939_v39 }
 0x54f   :  { %5006 = vmatprep.subr.bf16.mxu0 %v10897_v24  ;;  %5047 = vmatprep.subr.bf16.mxu1 %v10899_v47  ;;  %v10945_v47 = vcombine.high %v4206_v23, %v4210_v7  ;;  %v10947_v24 = vcombine.high %v4207_v17, %v4211_v59  ;;  %v4198_v41 = vld [vmem:[%s11582_s4 + $0x210] sm:$0xff]  ;;  %v10963_v18 = vcombine.low %v4206_v23, %v4210_v7 }
 0x552   :  { %5007 = vmatpush2.bf16.msra.mxu0 %v10915_v40  ;;  %5048 = vmatpush2.bf16.msra.mxu1 %v10917_v2  ;;  %v4202_v2 = vld [vmem:[%s11582_s4 + $0x230] sm:$0xff] }
 0x553   :  { %5008 = vmatprep.subr.bf16.mxu0 %v10921_v42  ;;  %5049 = vmatprep.subr.bf16.mxu1 %v10923_v1  ;;  %v10969_v1 = vcombine.high %v4198_v41, %v4202_v2  ;;  %v10971_v42 = vcombine.high %v4199_v26, %v4203_v5  ;;  %v10975_v40 = vcombine.low %v4198_v41, %v4202_v2 }
 0x556   :  { %5009 = vmatpush2.bf16.msra.mxu0 %v10939_v39  ;;  %5050 = vmatpush2.bf16.msra.mxu1 %v10941_v46  ;;  %v10977_v39 = vcombine.low %v4199_v26, %v4203_v5 }
 0x557   :  { %5010 = vmatprep.subr.bf16.mxu0 %v10945_v47  ;;  %5051 = vmatprep.subr.bf16.mxu1 %v10947_v24 }
 0x55a   :  { %5011 = vmatpush2.bf16.msra.mxu0 %v10963_v18  ;;  %5052 = vmatpush2.bf16.msra.mxu1 %v10965_v21 }
 0x55b   :  { %5012 = vmatprep.subr.bf16.mxu0 %v10969_v1  ;;  %5053 = vmatprep.subr.bf16.mxu1 %v10971_v42 }
 0x55e   :  { %5013 = vmatpush2.bf16.msra.mxu0 %v10975_v40  ;;  %5054 = vmatpush2.bf16.msra.mxu1 %v10977_v39 }
 0x55f   :  { %5921 = vmatprep.subr.bf16.mxu0 %v10207_v27  ;;  %5962 = vmatprep.subr.bf16.mxu1 %v10220_v36  ;;  %v12178_v27 = vld [vmem:[#allocation11_spill] sm:$0xff]  ;;  %v12180_v36 = vld [vmem:[#allocation14_spill] sm:$0xff] }
 0x561   :  { %5015 = vmatmul.mubr.bf16.vlgmr.msra.gmra.mxu0 %v10629_v57  ;;  %5056 = vmatmul.mubr.bf16.vlgmr.msra.gmra.mxu1 %v10629_v57  ;;  %v7746_v57 = vld [vmem:[%s11578_s0 + $0x20] sm:$0xff] }
 0x562   :  { %5922 = vmatpush1.bf16.msra.mxu0 %v10205_v60  ;;  %5963 = vmatpush1.bf16.msra.mxu1 %v10218_v43  ;;  %v12177_v60 = vld [vmem:[#allocation10_spill] sm:$0xff]  ;;  %v12179_v43 = vld [vmem:[#allocation13_spill] sm:$0xff]  ;;  %v5064_v23 = vunpack.c.l.bf16 %v7746_v57 }
 0x563   :  { %5923 = vmatprep.subr.bf16.mxu0 %v10222_v37  ;;  %5964 = vmatprep.subr.bf16.mxu1 %v10234_v45  ;;  %v12181_v37 = vld [vmem:[#allocation12_spill] sm:$0xff]  ;;  %v12182_v45 = vld [vmem:[#allocation18_spill] sm:$0xff] }
 0x566   :  { %5924 = vmatpush1.bf16.msra.mxu0 %v10247_v61  ;;  %5965 = vmatpush1.bf16.msra.mxu1 %v10251_v63  ;;  %v12183_v61 = vld [vmem:[#allocation17_spill] sm:$0xff]  ;;  %v12184_v63 = vld [vmem:[#allocation16_spill] sm:$0xff] }
 0x567   :  { %5925 = vmatprep.subr.bf16.mxu0 %v10253_v9  ;;  %5966 = vmatprep.subr.bf16.mxu1 %v10256_v62  ;;  %v12185_v9 = vld [vmem:[#allocation15_spill] sm:$0xff] }
 0x568   :  { %v12186_v62 = vld [vmem:[#allocation19_spill] sm:$0xff] }
 0x56a   :  { %5926 = vmatpush1.bf16.msra.mxu0 %v10259_v12  ;;  %5967 = vmatpush1.bf16.msra.mxu1 %v10263_v11  ;;  %v12187_v12 = vld [vmem:[#allocation20_spill] sm:$0xff]  ;;  %v12188_v11 = vld [vmem:[#allocation21_spill] sm:$0xff] }
 0x56b   :  { %5927 = vmatprep.subr.bf16.mxu0 %v10277_v58  ;;  %5968 = vmatprep.subr.bf16.mxu1 %v10286_v28  ;;  %v12189_v58 = vld [vmem:[#allocation22_spill] sm:$0xff]  ;;  %v12192_v28 = vld [vmem:[#allocation25_spill] sm:$0xff] }
 0x56e   :  { %5928 = vmatpush1.bf16.msra.mxu0 %v10282_v29  ;;  %5969 = vmatpush1.bf16.msra.mxu1 %v10284_v19  ;;  %v12190_v29 = vld [vmem:[#allocation23_spill] sm:$0xff]  ;;  %v12191_v19 = vld [vmem:[#allocation24_spill] sm:$0xff] }
 0x56f   :  { %5929 = vmatprep.subr.bf16.mxu0 %v10301_v14  ;;  %5970 = vmatprep.subr.bf16.mxu1 %v10310_v55  ;;  %v12193_v14 = vld [vmem:[#allocation26_spill] sm:$0xff]  ;;  %v12196_v55 = vld [vmem:[#allocation29_spill] sm:$0xff] }
 0x572   :  { %5930 = vmatpush1.bf16.msra.mxu0 %v10306_v44  ;;  %5971 = vmatpush1.bf16.msra.mxu1 %v10308_v53  ;;  %v12194_v44 = vld [vmem:[#allocation27_spill] sm:$0xff]  ;;  %v12195_v53 = vld [vmem:[#allocation28_spill] sm:$0xff] }
 0x573   :  { %5931 = vmatprep.subr.bf16.mxu0 %v10325_v4  ;;  %5972 = vmatprep.subr.bf16.mxu1 %v10334_v31  ;;  %v12197_v4 = vld [vmem:[#allocation30_spill] sm:$0xff]  ;;  %v12200_v31 = vld [vmem:[#allocation33_spill] sm:$0xff] }
 0x576   :  { %5932 = vmatpush1.bf16.msra.mxu0 %v10330_v25  ;;  %5973 = vmatpush1.bf16.msra.mxu1 %v10332_v49  ;;  %v12198_v25 = vld [vmem:[#allocation31_spill] sm:$0xff]  ;;  %v12199_v49 = vld [vmem:[#allocation32_spill] sm:$0xff] }
 0x577   :  { %5933 = vmatprep.subr.bf16.mxu0 %v10349_v32  ;;  %5974 = vmatprep.subr.bf16.mxu1 %v10358_v3  ;;  %v12201_v32 = vld [vmem:[#allocation34_spill] sm:$0xff] }
 0x57a   :  { %5934 = vmatpush1.bf16.msra.mxu0 %v10354_v13  ;;  %5975 = vmatpush1.bf16.msra.mxu1 %v10356_v48  ;;  %v12202_v13 = vld [vmem:[#allocation35_spill] sm:$0xff]  ;;  %v12203_v48 = vld [vmem:[#allocation36_spill] sm:$0xff] }
 0x57b   :  { %5935 = vmatprep.subr.bf16.mxu0 %v10373_v20  ;;  %5976 = vmatprep.subr.bf16.mxu1 %v10382_v35 }
 0x57e   :  { %5936 = vmatpush1.bf16.msra.mxu0 %v10378_v34  ;;  %5977 = vmatpush1.bf16.msra.mxu1 %v10380_v56 }
 0x57f   :  { %5937 = vmatprep.subr.bf16.mxu0 %v10397_v50  ;;  %5978 = vmatprep.subr.bf16.mxu1 %v10406_v16 }
 0x582   :  { %5938 = vmatpush2.bf16.msra.mxu0 %v10402_v51  ;;  %5979 = vmatpush2.bf16.msra.mxu1 %v10404_v54 }
 0x583   :  { %5939 = vmatprep.subr.bf16.mxu0 %v10421_v6  ;;  %5980 = vmatprep.subr.bf16.mxu1 %v10430_v10 }
 0x586   :  { %5940 = vmatpush2.bf16.msra.mxu0 %v10426_v33  ;;  %5981 = vmatpush2.bf16.msra.mxu1 %v12177_v60 }
 0x587   :  { %5941 = vmatprep.subr.bf16.mxu0 %v12178_v27  ;;  %5982 = vmatprep.subr.bf16.mxu1 %v12179_v43 }
 0x58a   :  { %5942 = vmatpush2.bf16.msra.mxu0 %v12180_v36  ;;  %5983 = vmatpush2.bf16.msra.mxu1 %v12181_v37 }
 0x58b   :  { %5943 = vmatprep.subr.bf16.mxu0 %v12182_v45  ;;  %5984 = vmatprep.subr.bf16.mxu1 %v12183_v61 }
 0x58e   :  { %5944 = vmatpush2.bf16.msra.mxu0 %v12184_v63  ;;  %5985 = vmatpush2.bf16.msra.mxu1 %v12185_v9  ;;  %v5065_v63 = vunpack.c.h.bf16 %v7746_v57  ;;  %v12219_v57 = vld [vmem:[#allocation52_spill] sm:$0xff] }
 0x58f   :  { %5945 = vmatprep.subr.bf16.mxu0 %v12186_v62  ;;  %5986 = vmatprep.subr.bf16.mxu1 %v12187_v12 }
 0x592   :  { %5946 = vmatpush2.bf16.msra.mxu0 %v12188_v11  ;;  %5987 = vmatpush2.bf16.msra.mxu1 %v12189_v58 }
 0x593   :  { %5947 = vmatprep.subr.bf16.mxu0 %v12190_v29  ;;  %5988 = vmatprep.subr.bf16.mxu1 %v12191_v19 }
 0x596   :  { %5948 = vmatpush2.bf16.msra.mxu0 %v12192_v28  ;;  %5989 = vmatpush2.bf16.msra.mxu1 %v12193_v14 }
 0x597   :  { %5949 = vmatprep.subr.bf16.mxu0 %v12194_v44  ;;  %5990 = vmatprep.subr.bf16.mxu1 %v12195_v53 }
 0x59a   :  { %5950 = vmatpush2.bf16.msra.mxu0 %v12196_v55  ;;  %5991 = vmatpush2.bf16.msra.mxu1 %v12197_v4 }
 0x59b   :  { %5951 = vmatprep.subr.bf16.mxu0 %v12198_v25  ;;  %5992 = vmatprep.subr.bf16.mxu1 %v12199_v49 }
 0x59e   :  { %5952 = vmatpush2.bf16.msra.mxu0 %v12200_v31  ;;  %5993 = vmatpush2.bf16.msra.mxu1 %v12201_v32 }
 0x59f   :  { %6003 = vmatprep.subr.bf16.mxu0 %v12202_v13  ;;  %6044 = vmatprep.subr.bf16.mxu1 %v12203_v48 }
 0x5e1   :  { %v4934_v3 = vpop.f32.mrf.mxu0  ;;  %v4975_v20 = vpop.f32.mrf.mxu1 }
 0x5e3   :  { %v4936_v34 = vpop.f32.mrf.mxu0  ;;  %v4977_v56 = vpop.f32.mrf.mxu1 }
 0x5e4   :  { %v5074_v16 = vcombine.low %v4934_v3, %v4936_v34  ;;  %v5075_v6 = vcombine.low %v4975_v20, %v4977_v56  ;;  %v12205_v56 = vld [vmem:[#allocation38_spill] sm:$0xff] }
 0x5e5   :  { %v4938_v35 = vpop.f32.mrf.mxu0  ;;  %v4979_v50 = vpop.f32.mrf.mxu1 }
 0x5e6   :  { %v5082_v33 = vrot.slane %v5074_v16, %v9174_v30  ;;  %v5089_v10 = vrot.slane %v5075_v6, %v9174_v30  ;;  %v12206_v35 = vld [vmem:[#allocation39_spill] sm:$0xff]  ;;  %v12207_v50 = vld [vmem:[#allocation40_spill] sm:$0xff]  ;;  %v12216_v6 = vld [vmem:[#allocation49_spill] sm:$0xff] }
 0x5e7   :  { %v4939_v51 = vpop.f32.mrf.mxu0  ;;  %v4980_v54 = vpop.f32.mrf.mxu1  ;;  %v12215_v16 = vld [vmem:[#allocation48_spill] sm:$0xff] }
 0x5e8   :  { %v5090_v41 = vcombine.low %v5082_v33, %v5089_v10  ;;  %v12208_v51 = vld [vmem:[#allocation41_spill] sm:$0xff]  ;;  %v12211_v54 = vld [vmem:[#allocation44_spill] sm:$0xff]  ;;  %v12217_v33 = vld [vmem:[#allocation50_spill] sm:$0xff] }
 0x5e9   :  { %v12218_v10 = vld [vmem:[#allocation51_spill] sm:$0xff] }
 0x5ea   :  { %v5110_v7 = vadd.f32 %v5090_v41, %v5064_v23  ;;  %v12220_v23 = vld [vmem:[#allocation53_spill] sm:$0xff]  ;;  %v12221_v41 = vld [vmem:[#allocation54_spill] sm:$0xff] }
 0x5ec   :  { %v7875_v2 = vmul.f32 -1.442695, %v5110_v7  ;;  %v12222_v7 = vld [vmem:[#allocation55_spill] sm:$0xff] }
 0x5ee   :  { %8193 = vpow2.f32 %v7875_v2  ;;  %v12223_v2 = vld [vmem:[#allocation56_spill] sm:$0xff] }
 0x5fb   :  { %v8194_v26 = vpop.eup %8193 }
 0x5fc   :  { %v5118_v36 = vadd.f32 1.0, %v8194_v26  ;;  %v12226_v26 = vld [vmem:[#allocation59_spill] sm:$0xff] }
 0x5fe   :  { %8195 = vrcp.f32 %v5118_v36  ;;  %v12231_v36 = vld [vmem:[#allocation64_spill] sm:$0xff] }
 0x60b   :  { %v8196_v28 = vpop.eup %8195 }
 0x60c   :  { %v5129_v14 = vrot.slane %v8196_v28, 4 }
 0x60e   :  { %v5131_v4 = vmul.f32 %v5129_v14, %v10610_v8  ;;  %v12204_v8 = vld [vmem:[#allocation37_spill] sm:$0xff] }
 0x60f   :  { %v12244_v14 = vld [vmem:[#allocation77_spill] sm:$0xff] }
 0x621   :  { %v5016_v17 = vpop.f32.mrf.mxu0  ;;  %v5057_v59 = vpop.f32.mrf.mxu1 }
 0x623   :  { %v5018_v5 = vpop.f32.mrf.mxu0  ;;  %v5059_v60 = vpop.f32.mrf.mxu1 }
 0x624   :  { %v5091_v27 = vcombine.low %v5016_v17, %v5018_v5  ;;  %v5092_v43 = vcombine.low %v5057_v59, %v5059_v60  ;;  %v12224_v17 = vld [vmem:[#allocation57_spill] sm:$0xff]  ;;  %v12225_v59 = vld [vmem:[#allocation58_spill] sm:$0xff]  ;;  %v12227_v5 = vld [vmem:[#allocation60_spill] sm:$0xff] }
 0x625   :  { %v5020_v37 = vpop.f32.mrf.mxu0  ;;  %v5061_v45 = vpop.f32.mrf.mxu1  ;;  %v12228_v60 = vld [vmem:[#allocation61_spill] sm:$0xff] }
 0x626   :  { %v5099_v61 = vrot.slane %v5091_v27, %v9174_v30  ;;  %v5106_v9 = vrot.slane %v5092_v43, %v9174_v30  ;;  %v12229_v27 = vld [vmem:[#allocation62_spill] sm:$0xff]  ;;  %v12230_v43 = vld [vmem:[#allocation63_spill] sm:$0xff]  ;;  %v12232_v37 = vld [vmem:[#allocation65_spill] sm:$0xff] }
 0x627   :  { %v5021_v62 = vpop.f32.mrf.mxu0  ;;  %v5062_v12 = vpop.f32.mrf.mxu1  ;;  %v12233_v45 = vld [vmem:[#allocation66_spill] sm:$0xff] }
 0x628   :  { %v5107_v11 = vcombine.low %v5099_v61, %v5106_v9  ;;  %v12234_v61 = vld [vmem:[#allocation67_spill] sm:$0xff]  ;;  %v12236_v9 = vld [vmem:[#allocation69_spill] sm:$0xff]  ;;  %v12237_v62 = vld [vmem:[#allocation70_spill] sm:$0xff] }
 0x629   :  { %v12238_v12 = vld [vmem:[#allocation71_spill] sm:$0xff] }
 0x62a   :  { %v5111_v58 = vadd.f32 %v5107_v11, %v5065_v63  ;;  %v12235_v63 = vld [vmem:[#allocation68_spill] sm:$0xff] }
 0x62b   :  { %v12239_v11 = vld [vmem:[#allocation72_spill] sm:$0xff] }
 0x62c   :  { %v7876_v29 = vmul.f32 -1.442695, %v5111_v58  ;;  %v5125_v19 = vrot.slane %v5111_v58, 4  ;;  %v12240_v58 = vld [vmem:[#allocation73_spill] sm:$0xff] }
 0x62e   :  { %8197 = vpow2.f32 %v7876_v29  ;;  %v12241_v29 = vld [vmem:[#allocation74_spill] sm:$0xff] }
 0x62f   :  { %8199 = vtanh.f32 %v5125_v19  ;;  %v12242_v19 = vld [vmem:[#allocation75_spill] sm:$0xff] }
 0x63b   :  { %v8198_v44 = vpop.eup %8197 }
 0x63c   :  { %v8200_v53 = vpop.eup %8199  ;;  %v5119_v55 = vadd.f32 1.0, %v8198_v44  ;;  %v12245_v44 = vld [vmem:[#allocation78_spill] sm:$0xff] }
 0x63d   :  { %v5132_v25 = vmul.f32 %v8200_v53, %v8196_v28  ;;  %v12243_v28 = vld [vmem:[#allocation76_spill] sm:$0xff]  ;;  %v12246_v53 = vld [vmem:[#allocation79_spill] sm:$0xff] }
 0x63e   :  { %8201 = vrcp.f32 %v5119_v55  ;;  %v12247_v55 = vld [vmem:[#allocation80_spill] sm:$0xff] }
 0x63f   :  { %v11059_v49 = vadd.f32 %v5132_v25, %v5131_v4  ;;  %v12248_v4 = vld [vmem:[#allocation81_spill] sm:$0xff]  ;;  %v12249_v25 = vld [vmem:[#allocation82_spill] sm:$0xff] }
 0x641   :  { %8203 = vtanh.f32 %v11059_v49 }
 0x64b   :  { %v8202_v31 = vpop.eup %8201 }
 0x64e   :  { %v8204_v32 = vpop.eup %8203 }
 0x64f   :  { %v5135_v13 = vmul.f32 %v8204_v32, %v8202_v31  ;;  %v12250_v31 = vld [vmem:[#allocation83_spill] sm:$0xff]  ;;  %v12251_v32 = vld [vmem:[#allocation84_spill] sm:$0xff] }
 0x651   :  { %7877 = vst [vmem:[%s11583_s5 + $0x10] sm:$0xf] %v5135_v13  ;;  %v5147_v48 = vrot.slane %v5135_v13, %v9174_v30 }
 0x653   :  { %v5148_v3 = vcombine.high %v5147_v48, %v5147_v48  ;;  %v11066_v34 = vpack.c.bf16 %v5147_v48, %v5147_v48 }
 0x655   :  { %v5152_v20 = vpack.c.bf16 %v5148_v3, %v5148_v3  ;;  %v6223_v3 = vld [vmem:[%s11582_s4 + $0x188] sm:$0xff] }
 0x657   :  { %5953 = vmatprep.mubr.bf16.mxu0 %v5152_v20  ;;  %5994 = vmatprep.mubr.bf16.mxu1 %v5152_v20 }
 0x658   :  { %5954 = vmatmul.mubr.bf16.vlgmr.msra.gmra.mxu0 %v11066_v34  ;;  %5995 = vmatmul.mubr.bf16.vlgmr.msra.gmra.mxu1 %v11066_v34 }
 0x659   :  { %6004 = vmatpush1.bf16.msra.mxu0 %v10594_v52  ;;  %6045 = vmatpush1.bf16.msra.mxu1 %v10596_v0  ;;  %v12209_v52 = vld [vmem:[#allocation42_spill] sm:$0xff]  ;;  %v12210_v0 = vld [vmem:[#allocation43_spill] sm:$0xff] }
 0x65a   :  { %6035 = vmatprep.mubr.bf16.mxu0 %v5152_v20  ;;  %6076 = vmatprep.mubr.bf16.mxu1 %v5152_v20  ;;  %v6227_v20 = vld [vmem:[%s11582_s4 + $0x1a8] sm:$0xff] }
 0x65b   :  { %6005 = vmatprep.subr.bf16.mxu0 %v10634_v38  ;;  %6046 = vmatprep.subr.bf16.mxu1 %v10636_v15  ;;  %v12212_v38 = vld [vmem:[#allocation45_spill] sm:$0xff]  ;;  %v12213_v15 = vld [vmem:[#allocation46_spill] sm:$0xff] }
 0x65d   :  { %6006 = vmatpush1.bf16.msra.mxu0 %v10651_v22  ;;  %6047 = vmatpush1.bf16.msra.mxu1 %v12204_v8  ;;  %v12214_v22 = vld [vmem:[#allocation47_spill] sm:$0xff]  ;;  %v8062_v8 = vcombine.high %v6223_v3, %v6227_v20 }
 0x65e   :  { %6007 = vmatprep.subr.bf16.mxu0 %v12205_v56  ;;  %6048 = vmatprep.subr.bf16.mxu1 %v12206_v35  ;;  %v6218_v56 = vld [vmem:[%s11582_s4 + $0x160] sm:$0xff]  ;;  %v6215_v35 = vld [vmem:[%s11582_s4 + $0x148] sm:$0xff] }
 0x661   :  { %6008 = vmatpush1.bf16.msra.mxu0 %v12207_v50  ;;  %6049 = vmatpush1.bf16.msra.mxu1 %v12208_v51  ;;  %v6219_v50 = vld [vmem:[%s11582_s4 + $0x168] sm:$0xff] }
 0x662   :  { %6009 = vmatprep.subr.bf16.mxu0 %v12209_v52  ;;  %6050 = vmatprep.subr.bf16.mxu1 %v12210_v0  ;;  %v8061_v52 = vcombine.low %v6223_v3, %v6227_v20  ;;  %v6290_v3 = vld [vmem:[%s11582_s4 + $0x3a0] sm:$0xff]  ;;  %v6287_v20 = vld [vmem:[%s11582_s4 + $0x388] sm:$0xff] }
 0x665   :  { %6010 = vmatpush1.bf16.msra.mxu0 %v12211_v54  ;;  %6051 = vmatpush1.bf16.msra.mxu1 %v12212_v38  ;;  %v8054_v54 = vcombine.high %v6215_v35, %v6219_v50 }
 0x666   :  { %6011 = vmatprep.subr.bf16.mxu0 %v12213_v15  ;;  %6052 = vmatprep.subr.bf16.mxu1 %v12214_v22  ;;  %v8053_v15 = vcombine.low %v6215_v35, %v6219_v50  ;;  %v6206_v22 = vld [vmem:[%s11582_s4 + $0x100] sm:$0xff] }
 0x669   :  { %6012 = vmatpush1.bf16.msra.mxu0 %v12215_v16  ;;  %6053 = vmatpush1.bf16.msra.mxu1 %v12216_v6  ;;  %v6210_v16 = vld [vmem:[%s11582_s4 + $0x120] sm:$0xff]  ;;  %v6207_v6 = vld [vmem:[%s11582_s4 + $0x108] sm:$0xff] }
 0x66a   :  { %6013 = vmatprep.subr.bf16.mxu0 %v12217_v33  ;;  %6054 = vmatprep.subr.bf16.mxu1 %v12218_v10  ;;  %v8044_v33 = vcombine.high %v6206_v22, %v6210_v16  ;;  %v6211_v10 = vld [vmem:[%s11582_s4 + $0x128] sm:$0xff] }
 0x66d   :  { %6014 = vmatpush1.bf16.msra.mxu0 %v12219_v57  ;;  %6055 = vmatpush1.bf16.msra.mxu1 %v12220_v23  ;;  %v8043_v57 = vcombine.low %v6206_v22, %v6210_v16  ;;  %v8045_v23 = vcombine.low %v6207_v6, %v6211_v10 }
 0x66e   :  { %6015 = vmatprep.subr.bf16.mxu0 %v12221_v41  ;;  %6056 = vmatprep.subr.bf16.mxu1 %v12222_v7  ;;  %v8046_v41 = vcombine.high %v6207_v6, %v6211_v10  ;;  %v6198_v7 = vld [vmem:[%s11582_s4 + $0xc0] sm:$0xff]  ;;  %v6271_v10 = vld [vmem:[%s11582_s4 + $0x308] sm:$0xff] }
 0x66f   :  { %v6270_v6 = vld [vmem:[%s11582_s4 + $0x300] sm:$0xff] }
 0x671   :  { %6016 = vmatpush1.bf16.msra.mxu0 %v12223_v2  ;;  %6057 = vmatpush1.bf16.msra.mxu1 %v12224_v17  ;;  %v6202_v2 = vld [vmem:[%s11582_s4 + $0xe0] sm:$0xff]  ;;  %v6199_v17 = vld [vmem:[%s11582_s4 + $0xc8] sm:$0xff] }
 0x672   :  { %6017 = vmatprep.subr.bf16.mxu0 %v12225_v59  ;;  %6058 = vmatprep.subr.bf16.mxu1 %v12226_v26  ;;  %v8036_v59 = vcombine.high %v6198_v7, %v6202_v2  ;;  %v6203_v26 = vld [vmem:[%s11582_s4 + $0xe8] sm:$0xff] }
 0x675   :  { %6018 = vmatpush1.bf16.msra.mxu0 %v12227_v5  ;;  %6059 = vmatpush1.bf16.msra.mxu1 %v12228_v60  ;;  %v8035_v5 = vcombine.low %v6198_v7, %v6202_v2  ;;  %v8037_v60 = vcombine.low %v6199_v17, %v6203_v26  ;;  %v6262_v7 = vld [vmem:[%s11582_s4 + $0x2c0] sm:$0xff] }
 0x676   :  { %6019 = vmatprep.subr.bf16.mxu0 %v12229_v27  ;;  %6060 = vmatprep.subr.bf16.mxu1 %v12230_v43  ;;  %v8038_v27 = vcombine.high %v6199_v17, %v6203_v26  ;;  %v6190_v43 = vld [vmem:[%s11582_s4 + $0x80] sm:$0xff] }
 0x677   :  { %v6266_v2 = vld [vmem:[%s11582_s4 + $0x2e0] sm:$0xff] }
 0x678   :  { %v8100_v26 = vcombine.high %v6262_v7, %v6266_v2 }
 0x679   :  { %6020 = vmatpush2.bf16.msra.mxu0 %v12231_v36  ;;  %6061 = vmatpush2.bf16.msra.mxu1 %v12232_v37  ;;  %v6194_v36 = vld [vmem:[%s11582_s4 + $0xa0] sm:$0xff]  ;;  %v6191_v37 = vld [vmem:[%s11582_s4 + $0x88] sm:$0xff] }
 0x67a   :  { %6021 = vmatprep.subr.bf16.mxu0 %v12233_v45  ;;  %6062 = vmatprep.subr.bf16.mxu1 %v12234_v61  ;;  %v8028_v45 = vcombine.high %v6190_v43, %v6194_v36  ;;  %v6195_v61 = vld [vmem:[%s11582_s4 + $0xa8] sm:$0xff] }
 0x67d   :  { %6022 = vmatpush2.bf16.msra.mxu0 %v12235_v63  ;;  %6063 = vmatpush2.bf16.msra.mxu1 %v12236_v9  ;;  %v8027_v63 = vcombine.low %v6190_v43, %v6194_v36  ;;  %v8029_v9 = vcombine.low %v6191_v37, %v6195_v61  ;;  %v6254_v43 = vld [vmem:[%s11582_s4 + $0x280] sm:$0xff] }
 0x67e   :  { %6023 = vmatprep.subr.bf16.mxu0 %v12237_v62  ;;  %6064 = vmatprep.subr.bf16.mxu1 %v12238_v12  ;;  %v8030_v62 = vcombine.high %v6191_v37, %v6195_v61  ;;  %v6182_v12 = vld [vmem:[%s11582_s4 + $0x40] sm:$0xff]  ;;  %v6255_v37 = vld [vmem:[%s11582_s4 + $0x288] sm:$0xff]  ;;  %v8099_v61 = vcombine.low %v6262_v7, %v6266_v2 }
 0x67f   :  { %v6258_v36 = vld [vmem:[%s11582_s4 + $0x2a0] sm:$0xff] }
 0x681   :  { %6024 = vmatpush2.bf16.msra.mxu0 %v12239_v11  ;;  %6065 = vmatpush2.bf16.msra.mxu1 %v12240_v58  ;;  %v6186_v11 = vld [vmem:[%s11582_s4 + $0x60] sm:$0xff]  ;;  %v6183_v58 = vld [vmem:[%s11582_s4 + $0x48] sm:$0xff] }
 0x682   :  { %6025 = vmatprep.subr.bf16.mxu0 %v12241_v29  ;;  %6066 = vmatprep.subr.bf16.mxu1 %v12242_v19  ;;  %v8020_v29 = vcombine.high %v6182_v12, %v6186_v11  ;;  %v6187_v19 = vld [vmem:[%s11582_s4 + $0x68] sm:$0xff] }
 0x685   :  { %6026 = vmatpush2.bf16.msra.mxu0 %v12243_v28  ;;  %6067 = vmatpush2.bf16.msra.mxu1 %v12244_v14  ;;  %v8019_v28 = vcombine.low %v6182_v12, %v6186_v11  ;;  %v8021_v14 = vcombine.low %v6183_v58, %v6187_v19  ;;  %v6246_v12 = vld [vmem:[%s11582_s4 + $0x240] sm:$0xff] }
 0x686   :  { %6027 = vmatprep.subr.bf16.mxu0 %v12245_v44  ;;  %6068 = vmatprep.subr.bf16.mxu1 %v12246_v53  ;;  %v8022_v44 = vcombine.high %v6183_v58, %v6187_v19  ;;  %v6174_v53 = vld [vmem:[%s11582_s4] sm:$0xff]  ;;  %v6247_v58 = vld [vmem:[%s11582_s4 + $0x248] sm:$0xff]  ;;  %v8091_v19 = vcombine.low %v6254_v43, %v6258_v36 }
 0x687   :  { %v6250_v11 = vld [vmem:[%s11582_s4 + $0x260] sm:$0xff] }
 0x689   :  { %6028 = vmatpush2.bf16.msra.mxu0 %v12247_v55  ;;  %6069 = vmatpush2.bf16.msra.mxu1 %v12248_v4  ;;  %v6178_v55 = vld [vmem:[%s11582_s4 + $0x20] sm:$0xff]  ;;  %v6175_v4 = vld [vmem:[%s11582_s4 + $0x8] sm:$0xff] }
 0x68a   :  { %6029 = vmatprep.subr.bf16.mxu0 %v12249_v25  ;;  %6070 = vmatprep.subr.bf16.mxu1 %v12250_v31  ;;  %v8012_v25 = vcombine.high %v6174_v53, %v6178_v55  ;;  %v6179_v31 = vld [vmem:[%s11582_s4 + $0x28] sm:$0xff] }
 0x68d   :  { %6030 = vmatpush2.bf16.msra.mxu0 %v12251_v32  ;;  %6071 = vmatpush2.bf16.msra.mxu1 %v10941_v46  ;;  %v6222_v46 = vld [vmem:[%s11582_s4 + $0x180] sm:$0xff]  ;;  %v8011_v32 = vcombine.low %v6174_v53, %v6178_v55 }
 0x68e   :  { %6031 = vmatprep.subr.bf16.mxu0 %v10945_v47  ;;  %6072 = vmatprep.subr.bf16.mxu1 %v10947_v24  ;;  %v6230_v47 = vld [vmem:[%s11582_s4 + $0x1c0] sm:$0xff] }
 0x68f   :  { %v6234_v24 = vld [vmem:[%s11582_s4 + $0x1e0] sm:$0xff] }
 0x690   :  { %v6238_v53 = vld [vmem:[%s11582_s4 + $0x200] sm:$0xff] }
 0x691   :  { %6032 = vmatpush2.bf16.msra.mxu0 %v10963_v18  ;;  %6073 = vmatpush2.bf16.msra.mxu1 %v10965_v21  ;;  %v6226_v18 = vld [vmem:[%s11582_s4 + $0x1a0] sm:$0xff] }
 0x692   :  { %6033 = vmatprep.subr.bf16.mxu0 %v10969_v1  ;;  %6074 = vmatprep.subr.bf16.mxu1 %v10971_v42  ;;  %v6231_v1 = vld [vmem:[%s11582_s4 + $0x1c8] sm:$0xff]  ;;  %v8067_v42 = vcombine.low %v6230_v47, %v6234_v24  ;;  %v8060_v48 = vcombine.high %v6222_v46, %v6226_v18  ;;  %v8059_v51 = vcombine.low %v6222_v46, %v6226_v18  ;;  %v6242_v55 = vld [vmem:[%s11582_s4 + $0x220] sm:$0xff] }
 0x693   :  { %v6299_v46 = vld [vmem:[%s11582_s4 + $0x3e8] sm:$0xff] }
 0x695   :  { %6034 = vmatpush2.bf16.msra.mxu0 %v10975_v40  ;;  %6075 = vmatpush2.bf16.msra.mxu1 %v10977_v39  ;;  %v8068_v40 = vcombine.high %v6230_v47, %v6234_v24  ;;  %v6235_v39 = vld [vmem:[%s11582_s4 + $0x1e8] sm:$0xff]  ;;  %v8013_v47 = vcombine.low %v6175_v4, %v6179_v31  ;;  %v8014_v24 = vcombine.high %v6175_v4, %v6179_v31 }
 0x696   :  { %v8069_v21 = vcombine.low %v6231_v1, %v6235_v39  ;;  %v8070_v13 = vcombine.high %v6231_v1, %v6235_v39  ;;  %v6294_v1 = vld [vmem:[%s11582_s4 + $0x3c0] sm:$0xff]  ;;  %v6239_v4 = vld [vmem:[%s11582_s4 + $0x208] sm:$0xff]  ;;  %v8083_v31 = vcombine.low %v6246_v12, %v6250_v11 }
 0x697   :  { %6942 = vmatprep.subr.bf16.mxu0 %v8068_v40  ;;  %v6295_v40 = vld [vmem:[%s11582_s4 + $0x3c8] sm:$0xff] }
 0x698   :  { %6036 = vmatmul.mubr.bf16.vlgmr.msra.gmra.mxu0 %v11066_v34  ;;  %6077 = vmatmul.mubr.bf16.vlgmr.msra.gmra.mxu1 %v11066_v34  ;;  %v6214_v34 = vld [vmem:[%s11582_s4 + $0x140] sm:$0xff] }
 0x699   :  { %6983 = vmatprep.subr.bf16.mxu1 %v8070_v13  ;;  %6943 = vmatpush1.bf16.msra.mxu0 %v8067_v42  ;;  %v8052_v0 = vcombine.high %v6214_v34, %v6218_v56  ;;  %v8051_v38 = vcombine.low %v6214_v34, %v6218_v56  ;;  %v6298_v42 = vld [vmem:[%s11582_s4 + $0x3e0] sm:$0xff]  ;;  %v8134_v13 = vcombine.high %v6295_v40, %v6299_v46 }
 0x69a   :  { %6984 = vmatpush1.bf16.msra.mxu1 %v8069_v21  ;;  %6944 = vmatprep.subr.bf16.mxu0 %v8060_v48  ;;  %v8132_v39 = vcombine.high %v6294_v1, %v6298_v42  ;;  %v8131_v18 = vcombine.low %v6294_v1, %v6298_v42  ;;  %v8133_v21 = vcombine.low %v6295_v40, %v6299_v46  ;;  %v6286_v48 = vld [vmem:[%s11582_s4 + $0x380] sm:$0xff]  ;;  %v11329_v40 = vld [vmem:[%s11582_s4 + $0x1d0] sm:$0xff]  ;;  %v11339_v46 = vld [vmem:[%s11582_s4 + $0x1d8] sm:$0xff] }
 0x69b   :  { %6985 = vmatprep.subr.bf16.mxu1 %v8062_v8  ;;  %v8124_v34 = vcombine.high %v6286_v48, %v6290_v3  ;;  %v6291_v8 = vld [vmem:[%s11582_s4 + $0x3a8] sm:$0xff]  ;;  %v8123_v56 = vcombine.low %v6286_v48, %v6290_v3  ;;  %v8075_v1 = vcombine.low %v6238_v53, %v6242_v55 }
 0x69c   :  { %v8125_v35 = vcombine.low %v6287_v20, %v6291_v8  ;;  %v8126_v50 = vcombine.high %v6287_v20, %v6291_v8 }
 0x69d   :  { %6945 = vmatpush1.bf16.msra.mxu0 %v8059_v51  ;;  %v6278_v51 = vld [vmem:[%s11582_s4 + $0x340] sm:$0xff] }
 0x69e   :  { %6986 = vmatpush1.bf16.msra.mxu1 %v8061_v52  ;;  %6946 = vmatprep.subr.bf16.mxu0 %v8052_v0  ;;  %v6282_v52 = vld [vmem:[%s11582_s4 + $0x360] sm:$0xff]  ;;  %v6279_v0 = vld [vmem:[%s11582_s4 + $0x348] sm:$0xff] }
 0x69f   :  { %6987 = vmatprep.subr.bf16.mxu1 %v8054_v54  ;;  %v8116_v54 = vcombine.high %v6278_v51, %v6282_v52 }
 0x6a1   :  { %6947 = vmatpush1.bf16.msra.mxu0 %v8051_v38  ;;  %v6283_v38 = vld [vmem:[%s11582_s4 + $0x368] sm:$0xff] }
 0x6a2   :  { %6988 = vmatpush1.bf16.msra.mxu1 %v8053_v15  ;;  %6948 = vmatprep.subr.bf16.mxu0 %v8044_v33  ;;  %v8115_v15 = vcombine.low %v6278_v51, %v6282_v52  ;;  %v8117_v22 = vcombine.low %v6279_v0, %v6283_v38  ;;  %v8118_v16 = vcombine.high %v6279_v0, %v6283_v38  ;;  %v6274_v33 = vld [vmem:[%s11582_s4 + $0x320] sm:$0xff] }
 0x6a3   :  { %6989 = vmatprep.subr.bf16.mxu1 %v8046_v41  ;;  %v6275_v41 = vld [vmem:[%s11582_s4 + $0x328] sm:$0xff] }
 0x6a4   :  { %v8109_v17 = vcombine.low %v6271_v10, %v6275_v41 }
 0x6a5   :  { %6949 = vmatpush1.bf16.msra.mxu0 %v8043_v57  ;;  %v8107_v57 = vcombine.low %v6270_v6, %v6274_v33 }
 0x6a6   :  { %6990 = vmatpush1.bf16.msra.mxu1 %v8045_v23  ;;  %6950 = vmatprep.subr.bf16.mxu0 %v8036_v59  ;;  %v8108_v23 = vcombine.high %v6270_v6, %v6274_v33  ;;  %v8110_v59 = vcombine.high %v6271_v10, %v6275_v41 }
 0x6a7   :  { %6991 = vmatprep.subr.bf16.mxu1 %v8038_v27 }
 0x6a9   :  { %6951 = vmatpush1.bf16.msra.mxu0 %v8035_v5  ;;  %v6263_v5 = vld [vmem:[%s11582_s4 + $0x2c8] sm:$0xff] }
 0x6aa   :  { %6992 = vmatpush1.bf16.msra.mxu1 %v8037_v60  ;;  %6952 = vmatprep.subr.bf16.mxu0 %v8028_v45  ;;  %v6267_v60 = vld [vmem:[%s11582_s4 + $0x2e8] sm:$0xff] }
 0x6ab   :  { %6993 = vmatprep.subr.bf16.mxu1 %v8030_v62  ;;  %v8102_v27 = vcombine.high %v6263_v5, %v6267_v60  ;;  %v6259_v45 = vld [vmem:[%s11582_s4 + $0x2a8] sm:$0xff] }
 0x6ac   :  { %v8094_v62 = vcombine.high %v6255_v37, %v6259_v45 }
 0x6ad   :  { %6953 = vmatpush1.bf16.msra.mxu0 %v8027_v63  ;;  %v8101_v63 = vcombine.low %v6263_v5, %v6267_v60 }
 0x6ae   :  { %6994 = vmatpush1.bf16.msra.mxu1 %v8029_v9  ;;  %6954 = vmatprep.subr.bf16.mxu0 %v8020_v29  ;;  %v8092_v9 = vcombine.high %v6254_v43, %v6258_v36  ;;  %v6251_v29 = vld [vmem:[%s11582_s4 + $0x268] sm:$0xff] }
 0x6af   :  { %6995 = vmatprep.subr.bf16.mxu1 %v8022_v44  ;;  %v8086_v44 = vcombine.high %v6247_v58, %v6251_v29 }
 0x6b1   :  { %6955 = vmatpush1.bf16.msra.mxu0 %v8019_v28  ;;  %v8093_v28 = vcombine.low %v6255_v37, %v6259_v45 }
 0x6b2   :  { %6996 = vmatpush1.bf16.msra.mxu1 %v8021_v14  ;;  %6956 = vmatprep.subr.bf16.mxu0 %v8012_v25  ;;  %v8084_v14 = vcombine.high %v6246_v12, %v6250_v11  ;;  %v6243_v25 = vld [vmem:[%s11582_s4 + $0x228] sm:$0xff] }
 0x6b3   :  { %6997 = vmatprep.subr.bf16.mxu1 %v8014_v24  ;;  %v8078_v24 = vcombine.high %v6239_v4, %v6243_v25  ;;  %v8077_v42 = vcombine.low %v6239_v4, %v6243_v25 }
 0x6b5   :  { %6957 = vmatpush1.bf16.msra.mxu0 %v8011_v32  ;;  %v8085_v32 = vcombine.low %v6247_v58, %v6251_v29 }
 0x6b6   :  { %6998 = vmatpush1.bf16.msra.mxu1 %v8013_v47  ;;  %6958 = vmatprep.subr.bf16.mxu0 %v8132_v39  ;;  %v8076_v47 = vcombine.high %v6238_v53, %v6242_v55  ;;  %v11334_v39 = vld [vmem:[%s11582_s4 + $0x1f0] sm:$0xff] }
 0x6b7   :  { %6999 = vmatprep.subr.bf16.mxu1 %v8134_v13  ;;  %v8071_v13 = vcombine.low %v11329_v40, %v11334_v39 }
 0x6b9   :  { %6959 = vmatpush2.bf16.msra.mxu0 %v8131_v18  ;;  %v8072_v18 = vcombine.high %v11329_v40, %v11334_v39  ;;  %v6212_v40 = vld [vmem:[%s11582_s4 + $0x130] sm:$0xff]  ;;  %v6209_v39 = vld [vmem:[%s11582_s4 + $0x118] sm:$0xff] }
 0x6ba   :  { %7000 = vmatpush2.bf16.msra.mxu1 %v8133_v21  ;;  %6960 = vmatprep.subr.bf16.mxu0 %v8124_v34  ;;  %v11346_v21 = vld [vmem:[%s11582_s4 + $0x1f8] sm:$0xff] }
 0x6bb   :  { %7001 = vmatprep.subr.bf16.mxu1 %v8126_v50  ;;  %v8073_v48 = vcombine.low %v11339_v46, %v11346_v21  ;;  %v8074_v3 = vcombine.high %v11339_v46, %v11346_v21  ;;  %v6213_v46 = vld [vmem:[%s11582_s4 + $0x138] sm:$0xff] }
 0x6bd   :  { %6961 = vmatpush2.bf16.msra.mxu0 %v8123_v56 }
 0x6be   :  { %7002 = vmatpush2.bf16.msra.mxu1 %v8125_v35  ;;  %6962 = vmatprep.subr.bf16.mxu0 %v8116_v54 }
 0x6bf   :  { %7003 = vmatprep.subr.bf16.mxu1 %v8118_v16 }
 0x6c1   :  { %6963 = vmatpush2.bf16.msra.mxu0 %v8115_v15 }
 0x6c2   :  { %7004 = vmatpush2.bf16.msra.mxu1 %v8117_v22  ;;  %6964 = vmatprep.subr.bf16.mxu0 %v8108_v23  ;;  %v7878_v22 = vld [vmem:[%s11578_s0 + $0x28] sm:$0xff] }
 0x6c3   :  { %7005 = vmatprep.subr.bf16.mxu1 %v8110_v59  ;;  %v6085_v16 = vunpack.c.l.bf16 %v7878_v22  ;;  %v6086_v43 = vunpack.c.h.bf16 %v7878_v22  ;;  %v6201_v22 = vld [vmem:[%s11582_s4 + $0xd8] sm:$0xff] }
 0x6c5   :  { %6965 = vmatpush2.bf16.msra.mxu0 %v8107_v57 }
 0x6c6   :  { %7006 = vmatpush2.bf16.msra.mxu1 %v8109_v17  ;;  %6966 = vmatprep.subr.bf16.mxu0 %v8100_v26 }
 0x6c7   :  { %7007 = vmatprep.subr.bf16.mxu1 %v8102_v27 }
 0x6c9   :  { %6967 = vmatpush2.bf16.msra.mxu0 %v8099_v61 }
 0x6ca   :  { %7008 = vmatpush2.bf16.msra.mxu1 %v8101_v63  ;;  %6968 = vmatprep.subr.bf16.mxu0 %v8092_v9 }
 0x6cb   :  { %7009 = vmatprep.subr.bf16.mxu1 %v8094_v62 }
 0x6cd   :  { %6969 = vmatpush2.bf16.msra.mxu0 %v8091_v19 }
 0x6ce   :  { %7010 = vmatpush2.bf16.msra.mxu1 %v8093_v28  ;;  %6970 = vmatprep.subr.bf16.mxu0 %v8084_v14 }
 0x6cf   :  { %7011 = vmatprep.subr.bf16.mxu1 %v8086_v44 }
 0x6d1   :  { %6971 = vmatpush2.bf16.msra.mxu0 %v8083_v31 }
 0x6d2   :  { %7012 = vmatpush2.bf16.msra.mxu1 %v8085_v32  ;;  %6972 = vmatprep.subr.bf16.mxu0 %v8076_v47  ;;  %v6228_v32 = vld [vmem:[%s11582_s4 + $0x1b0] sm:$0xff]  ;;  %v6225_v47 = vld [vmem:[%s11582_s4 + $0x198] sm:$0xff] }
 0x6d3   :  { %7013 = vmatprep.subr.bf16.mxu1 %v8078_v24  ;;  %v6229_v24 = vld [vmem:[%s11582_s4 + $0x1b8] sm:$0xff] }
 0x6d5   :  { %6973 = vmatpush2.bf16.msra.mxu0 %v8075_v1 }
 0x6d6   :  { %7014 = vmatpush2.bf16.msra.mxu1 %v8077_v42  ;;  %7024 = vmatprep.subr.bf16.mxu0 %v8072_v18  ;;  %v6216_v18 = vld [vmem:[%s11582_s4 + $0x150] sm:$0xff] }
 0x6d7   :  { %7065 = vmatprep.subr.bf16.mxu1 %v8074_v3 }
 0x718   :  { %v5955_v20 = vpop.f32.mrf.mxu0  ;;  %v5996_v34 = vpop.f32.mrf.mxu1 }
 0x71a   :  { %v5957_v8 = vpop.f32.mrf.mxu0  ;;  %v5998_v56 = vpop.f32.mrf.mxu1 }
 0x71b   :  { %v6095_v0 = vcombine.low %v5955_v20, %v5957_v8  ;;  %v6096_v54 = vcombine.low %v5996_v34, %v5998_v56  ;;  %v8066_v20 = vcombine.high %v6225_v47, %v6229_v24  ;;  %v6220_v34 = vld [vmem:[%s11582_s4 + $0x170] sm:$0xff]  ;;  %v6217_v8 = vld [vmem:[%s11582_s4 + $0x158] sm:$0xff] }
 0x71c   :  { %v5959_v35 = vpop.f32.mrf.mxu0  ;;  %v6000_v50 = vpop.f32.mrf.mxu1  ;;  %v6221_v56 = vld [vmem:[%s11582_s4 + $0x178] sm:$0xff]  ;;  %v8055_v21 = vcombine.low %v6216_v18, %v6220_v34 }
 0x71d   :  { %v6103_v38 = vrot.slane %v6095_v0, %v9174_v30  ;;  %v6110_v15 = vrot.slane %v6096_v54, %v9174_v30  ;;  %v8065_v50 = vcombine.low %v6225_v47, %v6229_v24  ;;  %v6208_v0 = vld [vmem:[%s11582_s4 + $0x110] sm:$0xff]  ;;  %v8050_v54 = vcombine.high %v6209_v39, %v6213_v46 }
 0x71e   :  { %v5960_v51 = vpop.f32.mrf.mxu0  ;;  %v6001_v52 = vpop.f32.mrf.mxu1  ;;  %v6288_v47 = vld [vmem:[%s11582_s4 + $0x390] sm:$0xff] }
 0x71f   :  { %v6111_v6 = vcombine.low %v6103_v38, %v6110_v15  ;;  %v8056_v51 = vcombine.high %v6216_v18, %v6220_v34  ;;  %v8058_v52 = vcombine.high %v6217_v8, %v6221_v56  ;;  %v6200_v38 = vld [vmem:[%s11582_s4 + $0xd0] sm:$0xff]  ;;  %v6293_v18 = vld [vmem:[%s11582_s4 + $0x3b8] sm:$0xff] }
 0x720   :  { %v6204_v15 = vld [vmem:[%s11582_s4 + $0xf0] sm:$0xff] }
 0x721   :  { %v6131_v33 = vadd.f32 %v6111_v6, %v6085_v16  ;;  %v6205_v16 = vld [vmem:[%s11582_s4 + $0xf8] sm:$0xff]  ;;  %v8047_v6 = vcombine.low %v6208_v0, %v6212_v40  ;;  %v6292_v24 = vld [vmem:[%s11582_s4 + $0x3b0] sm:$0xff] }
 0x722   :  { %v8128_v34 = vcombine.high %v6288_v47, %v6292_v24 }
 0x723   :  { %v8007_v10 = vmul.f32 -1.442695, %v6131_v33  ;;  %v8049_v33 = vcombine.low %v6209_v39, %v6213_v46  ;;  %v6272_v46 = vld [vmem:[%s11582_s4 + $0x310] sm:$0xff] }
 0x725   :  { %8205 = vpow2.f32 %v8007_v10  ;;  %v8040_v10 = vcombine.high %v6200_v38, %v6204_v15 }
 0x732   :  { %v8206_v41 = vpop.eup %8205 }
 0x733   :  { %v6139_v26 = vadd.f32 1.0, %v8206_v41  ;;  %v6196_v41 = vld [vmem:[%s11582_s4 + $0xb0] sm:$0xff] }
 0x735   :  { %8207 = vrcp.f32 %v6139_v26 }
 0x742   :  { %v8208_v12 = vpop.eup %8207 }
 0x743   :  { %v6150_v11 = vrot.slane %v8208_v12, 4 }
 0x745   :  { %v6152_v28 = vmul.f32 %v6150_v11, %v11059_v49  ;;  %v6224_v49 = vld [vmem:[%s11582_s4 + $0x190] sm:$0xff]  ;;  %v6181_v11 = vld [vmem:[%s11582_s4 + $0x38] sm:$0xff] }
 0x746   :  { %v8064_v3 = vcombine.high %v6224_v49, %v6228_v32  ;;  %v8063_v35 = vcombine.low %v6224_v49, %v6228_v32 }
 0x758   :  { %v6037_v57 = vpop.f32.mrf.mxu0  ;;  %v6078_v23 = vpop.f32.mrf.mxu1 }
 0x75a   :  { %v6039_v7 = vpop.f32.mrf.mxu0  ;;  %v6080_v2 = vpop.f32.mrf.mxu1 }
 0x75b   :  { %v6112_v17 = vcombine.low %v6037_v57, %v6039_v7  ;;  %v6113_v59 = vcombine.low %v6078_v23, %v6080_v2  ;;  %v8042_v57 = vcombine.high %v6201_v22, %v6205_v16  ;;  %v6192_v23 = vld [vmem:[%s11582_s4 + $0x90] sm:$0xff]  ;;  %v6193_v7 = vld [vmem:[%s11582_s4 + $0x98] sm:$0xff] }
 0x75c   :  { %v6041_v5 = vpop.f32.mrf.mxu0  ;;  %v6082_v60 = vpop.f32.mrf.mxu1  ;;  %v6197_v2 = vld [vmem:[%s11582_s4 + $0xb8] sm:$0xff]  ;;  %v8032_v26 = vcombine.high %v6192_v23, %v6196_v41 }
 0x75d   :  { %v6120_v27 = vrot.slane %v6112_v17, %v9174_v30  ;;  %v6127_v36 = vrot.slane %v6113_v59, %v9174_v30  ;;  %v8039_v17 = vcombine.low %v6200_v38, %v6204_v15  ;;  %v8041_v59 = vcombine.low %v6201_v22, %v6205_v16  ;;  %v6184_v60 = vld [vmem:[%s11582_s4 + $0x50] sm:$0xff] }
 0x75e   :  { %v6042_v37 = vpop.f32.mrf.mxu0  ;;  %v6083_v45 = vpop.f32.mrf.mxu1  ;;  %v8034_v5 = vcombine.high %v6193_v7, %v6197_v2  ;;  %v6264_v16 = vld [vmem:[%s11582_s4 + $0x2d0] sm:$0xff] }
 0x75f   :  { %v6128_v61 = vcombine.low %v6120_v27, %v6127_v36  ;;  %v6188_v27 = vld [vmem:[%s11582_s4 + $0x70] sm:$0xff]  ;;  %v6189_v36 = vld [vmem:[%s11582_s4 + $0x78] sm:$0xff]  ;;  %v8031_v37 = vcombine.low %v6192_v23, %v6196_v41  ;;  %v8033_v45 = vcombine.low %v6193_v7, %v6197_v2 }
 0x760   :  { %v6256_v2 = vld [vmem:[%s11582_s4 + $0x290] sm:$0xff] }
 0x761   :  { %v6132_v63 = vadd.f32 %v6128_v61, %v6086_v43  ;;  %v6185_v43 = vld [vmem:[%s11582_s4 + $0x58] sm:$0xff]  ;;  %v8024_v61 = vcombine.high %v6184_v60, %v6188_v27 }
 0x763   :  { %v8008_v9 = vmul.f32 -1.442695, %v6132_v63  ;;  %v6146_v62 = vrot.slane %v6132_v63, 4  ;;  %v8026_v63 = vcombine.high %v6185_v43, %v6189_v36 }
 0x765   :  { %8209 = vpow2.f32 %v8008_v9  ;;  %v6176_v9 = vld [vmem:[%s11582_s4 + $0x10] sm:$0xff] }
 0x766   :  { %8211 = vtanh.f32 %v6146_v62  ;;  %v6180_v62 = vld [vmem:[%s11582_s4 + $0x30] sm:$0xff] }
 0x772   :  { %v8210_v58 = vpop.eup %8209 }
 0x773   :  { %v8212_v29 = vpop.eup %8211  ;;  %v6140_v19 = vadd.f32 1.0, %v8210_v58  ;;  %v8023_v58 = vcombine.low %v6184_v60, %v6188_v27 }
 0x774   :  { %v6153_v14 = vmul.f32 %v8212_v29, %v8208_v12  ;;  %v6177_v12 = vld [vmem:[%s11582_s4 + $0x18] sm:$0xff]  ;;  %v8025_v29 = vcombine.low %v6185_v43, %v6189_v36  ;;  %v6248_v36 = vld [vmem:[%s11582_s4 + $0x250] sm:$0xff] }
 0x775   :  { %8213 = vrcp.f32 %v6140_v19  ;;  %v8016_v19 = vcombine.high %v6176_v9, %v6180_v62 }
 0x776   :  { %v11362_v44 = vadd.f32 %v6153_v14, %v6152_v28  ;;  %v8018_v28 = vcombine.high %v6177_v12, %v6181_v11  ;;  %v6296_v14 = vld [vmem:[%s11582_s4 + $0x3d0] sm:$0xff] }
 0x778   :  { %8215 = vtanh.f32 %v11362_v44 }
 0x782   :  { %v8214_v53 = vpop.eup %8213 }
 0x785   :  { %v8216_v55 = vpop.eup %8215 }
 0x786   :  { %v6156_v4 = vmul.f32 %v8216_v55, %v8214_v53  ;;  %v6300_v53 = vld [vmem:[%s11582_s4 + $0x3f0] sm:$0xff]  ;;  %v6297_v55 = vld [vmem:[%s11582_s4 + $0x3d8] sm:$0xff] }
 0x787   :  { %v8136_v49 = vcombine.high %v6296_v14, %v6300_v53 }
 0x788   :  { %8009 = vst [vmem:[%s11583_s5 + $0x14] sm:$0xf] %v6156_v4  ;;  %v6168_v25 = vrot.slane %v6156_v4, %v9174_v30  ;;  %v6301_v4 = vld [vmem:[%s11582_s4 + $0x3f8] sm:$0xff] }
 0x789   :  { %v8138_v32 = vcombine.high %v6297_v55, %v6301_v4 }
 0x78a   :  { %v6169_v31 = vcombine.high %v6168_v25, %v6168_v25  ;;  %v11381_v42 = vpack.c.bf16 %v6168_v25, %v6168_v25  ;;  %v8015_v25 = vcombine.low %v6176_v9, %v6180_v62 }
 0x78c   :  { %v6173_v1 = vpack.c.bf16 %v6169_v31, %v6169_v31  ;;  %v8017_v31 = vcombine.low %v6177_v12, %v6181_v11  ;;  %v6240_v11 = vld [vmem:[%s11582_s4 + $0x210] sm:$0xff] }
 0x78e   :  { %6974 = vmatprep.mubr.bf16.mxu0 %v6173_v1  ;;  %7015 = vmatprep.mubr.bf16.mxu1 %v6173_v1 }
 0x78f   :  { %6975 = vmatmul.mubr.bf16.vlgmr.msra.gmra.mxu0 %v11381_v42  ;;  %7016 = vmatmul.mubr.bf16.vlgmr.msra.gmra.mxu1 %v11381_v42 }
 0x790   :  { %7025 = vmatpush1.bf16.msra.mxu0 %v8071_v13  ;;  %7066 = vmatpush1.bf16.msra.mxu1 %v8073_v48  ;;  %v8057_v13 = vcombine.low %v6217_v8, %v6221_v56  ;;  %v8048_v48 = vcombine.high %v6208_v0, %v6212_v40  ;;  %v6280_v56 = vld [vmem:[%s11582_s4 + $0x350] sm:$0xff] }
 0x791   :  { %7056 = vmatprep.mubr.bf16.mxu0 %v6173_v1  ;;  %7097 = vmatprep.mubr.bf16.mxu1 %v6173_v1  ;;  %v6289_v1 = vld [vmem:[%s11582_s4 + $0x398] sm:$0xff] }
 0x792   :  { %7026 = vmatprep.subr.bf16.mxu0 %v8064_v3  ;;  %7067 = vmatprep.subr.bf16.mxu1 %v8066_v20  ;;  %v8135_v3 = vcombine.low %v6296_v14, %v6300_v53  ;;  %v8137_v20 = vcombine.low %v6297_v55, %v6301_v4  ;;  %v8130_v8 = vcombine.high %v6289_v1, %v6293_v18 }
 0x793   :  { %v8129_v0 = vcombine.low %v6289_v1, %v6293_v18 }
 0x794   :  { %7027 = vmatpush1.bf16.msra.mxu0 %v8063_v35  ;;  %7068 = vmatpush1.bf16.msra.mxu1 %v8065_v50  ;;  %v6284_v35 = vld [vmem:[%s11582_s4 + $0x370] sm:$0xff]  ;;  %v6281_v50 = vld [vmem:[%s11582_s4 + $0x358] sm:$0xff] }
 0x795   :  { %7028 = vmatprep.subr.bf16.mxu0 %v8056_v51  ;;  %7069 = vmatprep.subr.bf16.mxu1 %v8058_v52  ;;  %v6285_v51 = vld [vmem:[%s11582_s4 + $0x378] sm:$0xff]  ;;  %v8127_v52 = vcombine.low %v6288_v47, %v6292_v24  ;;  %v8120_v40 = vcombine.high %v6280_v56, %v6284_v35 }
 0x796   :  { %v8122_v39 = vcombine.high %v6281_v50, %v6285_v51  ;;  %v8121_v38 = vcombine.low %v6281_v50, %v6285_v51 }
 0x798   :  { %7029 = vmatpush1.bf16.msra.mxu0 %v8055_v21  ;;  %7070 = vmatpush1.bf16.msra.mxu1 %v8057_v13  ;;  %v6276_v21 = vld [vmem:[%s11582_s4 + $0x330] sm:$0xff]  ;;  %v6273_v13 = vld [vmem:[%s11582_s4 + $0x318] sm:$0xff] }
 0x799   :  { %7030 = vmatprep.subr.bf16.mxu0 %v8048_v48  ;;  %7071 = vmatprep.subr.bf16.mxu1 %v8050_v54  ;;  %v6277_v48 = vld [vmem:[%s11582_s4 + $0x338] sm:$0xff]  ;;  %v8119_v54 = vcombine.low %v6280_v56, %v6284_v35  ;;  %v8112_v15 = vcombine.high %v6272_v46, %v6276_v21  ;;  %v8010_v35 = vld [vmem:[%s11578_s0 + $0x30] sm:$0xff]  ;;  %s8274_s0 = smov [#allocation6]  }
 0x79a   :  { %v8114_v22 = vcombine.high %v6273_v13, %v6277_v48  ;;  %v8113_v23 = vcombine.low %v6273_v13, %v6277_v48  ;;  %v7106_v50 = vunpack.c.l.bf16 %v8010_v35  ;;  %s7205_s23 = sshll.u32 %s8274_s0, 4  ;;  %s7206_s23 = int_to_ptr.vmem [resolvable:$true] %s7205_s23 }
 0x79b   :  { %s8229_s1 = scalar_lea.vmem %s7206_s23, 64  ;;  %p8234_p1 = scmp.lt.s32.totalorder %s7206_s23, %s7206_s23 }
 0x79c   :  { %7031 = vmatpush1.bf16.msra.mxu0 %v8047_v6  ;;  %7072 = vmatpush1.bf16.msra.mxu1 %v8049_v33  ;;  %v6268_v6 = vld [vmem:[%s11582_s4 + $0x2f0] sm:$0xff]  ;;  %v6265_v33 = vld [vmem:[%s11582_s4 + $0x2d8] sm:$0xff]  ;;  %p8230_p0 = scmp.ne.s32.totalorder %s7206_s23, %s8229_s1  ;;  %p8235_p2 = scmp.lt.s32.totalorder %s8229_s1, %s8229_s1 }
 0x79d   :  { %7032 = vmatprep.subr.bf16.mxu0 %v8040_v10  ;;  %7073 = vmatprep.subr.bf16.mxu1 %v8042_v57  ;;  %v6269_v10 = vld [vmem:[%s11582_s4 + $0x2f8] sm:$0xff]  ;;  %v8111_v57 = vcombine.low %v6272_v46, %v6276_v21  ;;  %v8104_v41 = vcombine.high %v6264_v16, %v6268_v6 }
 0x79e   :  { %v8106_v7 = vcombine.high %v6265_v33, %v6269_v10  ;;  %v8105_v60 = vcombine.low %v6265_v33, %v6269_v10  ;;  %p8236_p3 = por %p8235_p2, %p8234_p1 }
 0x7a0   :  { %7033 = vmatpush1.bf16.msra.mxu0 %v8039_v17  ;;  %7074 = vmatpush1.bf16.msra.mxu1 %v8041_v59  ;;  %v6260_v17 = vld [vmem:[%s11582_s4 + $0x2b0] sm:$0xff]  ;;  %v6257_v59 = vld [vmem:[%s11582_s4 + $0x298] sm:$0xff]  ;;  %p8237_p4 = pnand %p8236_p3, %p8230_p0 }
 0x7a1   :  { %7034 = vmatprep.subr.bf16.mxu0 %v8032_v26  ;;  %7075 = vmatprep.subr.bf16.mxu1 %v8034_v5  ;;  %v6261_v26 = vld [vmem:[%s11582_s4 + $0x2b8] sm:$0xff]  ;;  %v8103_v5 = vcombine.low %v6264_v16, %v6268_v6  ;;  %v8096_v27 = vcombine.high %v6256_v2, %v6260_v17  ;;  %v7107_v16 = vunpack.c.h.bf16 %v8010_v35 }
 0x7a2   :  { %v8098_v43 = vcombine.high %v6257_v59, %v6261_v26  ;;  %v8097_v9 = vcombine.low %v6257_v59, %v6261_v26 }
 0x7a4   :  { %7035 = vmatpush1.bf16.msra.mxu0 %v8031_v37  ;;  %7076 = vmatpush1.bf16.msra.mxu1 %v8033_v45  ;;  %v6252_v37 = vld [vmem:[%s11582_s4 + $0x270] sm:$0xff]  ;;  %v6249_v45 = vld [vmem:[%s11582_s4 + $0x258] sm:$0xff] }
 0x7a5   :  { %7036 = vmatprep.subr.bf16.mxu0 %v8024_v61  ;;  %7077 = vmatprep.subr.bf16.mxu1 %v8026_v63  ;;  %v6253_v61 = vld [vmem:[%s11582_s4 + $0x278] sm:$0xff]  ;;  %v8095_v63 = vcombine.low %v6256_v2, %v6260_v17  ;;  %v8088_v62 = vcombine.high %v6248_v36, %v6252_v37 }
 0x7a6   :  { %v8090_v12 = vcombine.high %v6249_v45, %v6253_v61  ;;  %v8089_v14 = vcombine.low %v6249_v45, %v6253_v61 }
 0x7a8   :  { %7037 = vmatpush1.bf16.msra.mxu0 %v8023_v58  ;;  %7078 = vmatpush1.bf16.msra.mxu1 %v8025_v29  ;;  %v6244_v58 = vld [vmem:[%s11582_s4 + $0x230] sm:$0xff]  ;;  %v6241_v29 = vld [vmem:[%s11582_s4 + $0x218] sm:$0xff] }
 0x7a9   :  { %7038 = vmatprep.subr.bf16.mxu0 %v8016_v19  ;;  %7079 = vmatprep.subr.bf16.mxu1 %v8018_v28  ;;  %v6245_v19 = vld [vmem:[%s11582_s4 + $0x238] sm:$0xff]  ;;  %v8087_v28 = vcombine.low %v6248_v36, %v6252_v37  ;;  %v8080_v53 = vcombine.high %v6240_v11, %v6244_v58  ;;  %v8079_v4 = vcombine.low %v6240_v11, %v6244_v58 }
 0x7aa   :  { %v8082_v55 = vcombine.high %v6241_v29, %v6245_v19 }
 0x7ac   :  { %7039 = vmatpush1.bf16.msra.mxu0 %v8015_v25  ;;  %7080 = vmatpush1.bf16.msra.mxu1 %v8017_v31  ;;  %v8081_v25 = vcombine.low %v6241_v29, %v6245_v19 }
 0x7ad   :  { %7040 = vmatprep.subr.bf16.mxu0 %v8136_v49  ;;  %7081 = vmatprep.subr.bf16.mxu1 %v8138_v32 }
 0x7b0   :  { %7041 = vmatpush2.bf16.msra.mxu0 %v8135_v3  ;;  %7082 = vmatpush2.bf16.msra.mxu1 %v8137_v20 }
 0x7b1   :  { %7042 = vmatprep.subr.bf16.mxu0 %v8128_v34  ;;  %7083 = vmatprep.subr.bf16.mxu1 %v8130_v8 }
 0x7b4   :  { %7043 = vmatpush2.bf16.msra.mxu0 %v8127_v52  ;;  %7084 = vmatpush2.bf16.msra.mxu1 %v8129_v0 }
 0x7b5   :  { %7044 = vmatprep.subr.bf16.mxu0 %v8120_v40  ;;  %7085 = vmatprep.subr.bf16.mxu1 %v8122_v39 }
 0x7b8   :  { %7045 = vmatpush2.bf16.msra.mxu0 %v8119_v54  ;;  %7086 = vmatpush2.bf16.msra.mxu1 %v8121_v38 }
 0x7b9   :  { %7046 = vmatprep.subr.bf16.mxu0 %v8112_v15  ;;  %7087 = vmatprep.subr.bf16.mxu1 %v8114_v22 }
 0x7bc   :  { %7047 = vmatpush2.bf16.msra.mxu0 %v8111_v57  ;;  %7088 = vmatpush2.bf16.msra.mxu1 %v8113_v23 }
 0x7bd   :  { %7048 = vmatprep.subr.bf16.mxu0 %v8104_v41  ;;  %7089 = vmatprep.subr.bf16.mxu1 %v8106_v7 }
 0x7c0   :  { %7049 = vmatpush2.bf16.msra.mxu0 %v8103_v5  ;;  %7090 = vmatpush2.bf16.msra.mxu1 %v8105_v60 }
 0x7c1   :  { %7050 = vmatprep.subr.bf16.mxu0 %v8096_v27  ;;  %7091 = vmatprep.subr.bf16.mxu1 %v8098_v43 }
 0x7c4   :  { %7051 = vmatpush2.bf16.msra.mxu0 %v8095_v63  ;;  %7092 = vmatpush2.bf16.msra.mxu1 %v8097_v9 }
 0x7c5   :  { %7052 = vmatprep.subr.bf16.mxu0 %v8088_v62  ;;  %7093 = vmatprep.subr.bf16.mxu1 %v8090_v12 }
 0x7c8   :  { %7053 = vmatpush2.bf16.msra.mxu0 %v8087_v28  ;;  %7094 = vmatpush2.bf16.msra.mxu1 %v8089_v14 }
 0x7c9   :  { %7054 = vmatprep.subr.bf16.mxu0 %v8080_v53  ;;  %7095 = vmatprep.subr.bf16.mxu1 %v8082_v55 }
 0x7cc   :  { %7055 = vmatpush2.bf16.msra.mxu0 %v8079_v4  ;;  %7096 = vmatpush2.bf16.msra.mxu1 %v8081_v25 }
 0x7cf   :  { %7057 = vmatmul.mubr.bf16.vlgmr.msra.gmra.mxu0 %v11381_v42  ;;  %7098 = vmatmul.mubr.bf16.vlgmr.msra.gmra.mxu1 %v11381_v42 }
 0x84f   :  { %v6976_v31 = vpop.f32.mrf.mxu0  ;;  %v7017_v49 = vpop.f32.mrf.mxu1 }
 0x851   :  { %v6978_v32 = vpop.f32.mrf.mxu0  ;;  %v7019_v47 = vpop.f32.mrf.mxu1 }
 0x852   :  { %v7116_v20 = vcombine.low %v6976_v31, %v6978_v32  ;;  %v7117_v34 = vcombine.low %v7017_v49, %v7019_v47 }
 0x853   :  { %v6980_v24 = vpop.f32.mrf.mxu0  ;;  %v7021_v1 = vpop.f32.mrf.mxu1 }
 0x854   :  { %v7124_v8 = vrot.slane %v7116_v20, %v9174_v30  ;;  %v7131_v56 = vrot.slane %v7117_v34, %v9174_v30 }
 0x855   :  { %v6981_v18 = vpop.f32.mrf.mxu0  ;;  %v7022_v3 = vpop.f32.mrf.mxu1 }
 0x856   :  { %v7132_v42 = vcombine.low %v7124_v8, %v7131_v56 }
 0x858   :  { %v7152_v51 = vadd.f32 %v7132_v42, %v7106_v50 }
 0x85a   :  { %v8139_v52 = vmul.f32 -1.442695, %v7152_v51 }
 0x85c   :  { %8217 = vpow2.f32 %v8139_v52 }
 0x869   :  { %v8218_v39 = vpop.eup %8217 }
 0x86a   :  { %v7160_v54 = vadd.f32 1.0, %v8218_v39 }
 0x86c   :  { %8219 = vrcp.f32 %v7160_v54 }
 0x879   :  { %v8220_v2 = vpop.eup %8219 }
 0x87a   :  { %v7171_v17 = vrot.slane %v8220_v2, 4 }
 0x87c   :  { %v7173_v27 = vmul.f32 %v7171_v17, %v11362_v44 }
 0x88f   :  { %v7058_v0 = vpop.f32.mrf.mxu0  ;;  %v7099_v40 = vpop.f32.mrf.mxu1 }
 0x891   :  { %v7060_v46 = vpop.f32.mrf.mxu0  ;;  %v7101_v21 = vpop.f32.mrf.mxu1 }
 0x892   :  { %v7133_v13 = vcombine.low %v7058_v0, %v7060_v46  ;;  %v7134_v48 = vcombine.low %v7099_v40, %v7101_v21 }
 0x893   :  { %v7062_v38 = vpop.f32.mrf.mxu0  ;;  %v7103_v15 = vpop.f32.mrf.mxu1 }
 0x894   :  { %v7141_v22 = vrot.slane %v7133_v13, %v9174_v30  ;;  %v7148_v6 = vrot.slane %v7134_v48, %v9174_v30 }
 0x895   :  { %v7063_v33 = vpop.f32.mrf.mxu0  ;;  %v7104_v10 = vpop.f32.mrf.mxu1 }
 0x896   :  { %v7149_v57 = vcombine.low %v7141_v22, %v7148_v6 }
 0x898   :  { %v7153_v23 = vadd.f32 %v7149_v57, %v7107_v16 }
 0x89a   :  { %v8140_v41 = vmul.f32 -1.442695, %v7153_v23  ;;  %v7167_v7 = vrot.slane %v7153_v23, 4 }
 0x89c   :  { %8221 = vpow2.f32 %v8140_v41 }
 0x89d   :  { %8223 = vtanh.f32 %v7167_v7 }
 0x8a9   :  { %v8222_v59 = vpop.eup %8221 }
 0x8aa   :  { %v8224_v26 = vpop.eup %8223  ;;  %v7161_v5 = vadd.f32 1.0, %v8222_v59 }
 0x8ab   :  { %v7174_v60 = vmul.f32 %v8224_v26, %v8220_v2 }
 0x8ac   :  { %8225 = vrcp.f32 %v7161_v5 }
 0x8ad   :  { %v7175_v30 = vadd.f32 %v7174_v60, %v7173_v27 }
 0x8af   :  { %8227 = vtanh.f32 %v7175_v30  ;;  %7181 = vst [vmem:[#allocation3] sm:$0xf] %v7175_v30  ;;  %7186 = vst [vmem:[#allocation6] sm:$0xf] %v7175_v30 }
 0x8b0   :  { %8240 = shalt.err (!%p8237_p4)
}
 0x8b1   :  { %7208 = dma.vmem_to_hbm [thread:$0]  %s7206_s23, 64, %s11585_s7, [#allocation7]  }
 0x8b2   :  { %s8275_s26 = smov [#allocation4]  }
 0x8b3   :  { %s7195_s27 = sshll.u32 %s8275_s26, 4  ;;  %s7196_s27 = int_to_ptr.vmem [resolvable:$true] %s7195_s27 }
 0x8b4   :  { %s8249_s30 = scalar_lea.vmem %s7196_s27, 64  ;;  %p8254_p6 = scmp.lt.s32.totalorder %s7196_s27, %s7196_s27 }
 0x8b5   :  { %p8250_p5 = scmp.ne.s32.totalorder %s7196_s27, %s8249_s30  ;;  %p8255_p7 = scmp.lt.s32.totalorder %s8249_s30, %s8249_s30 }
 0x8b7   :  { %p8256_p8 = por %p8255_p7, %p8254_p6 }
 0x8b9   :  { %v8226_v44 = vpop.eup %8225  ;;  %p8257_p9 = pnand %p8256_p8, %p8250_p5 }
 0x8bc   :  { %v8228_v43 = vpop.eup %8227 }
 0x8bd   :  { %v7177_v36 = vmul.f32 %v8228_v43, %v8226_v44 }
 0x8bf   :  { %8141 = vst [vmem:[%s11583_s5 + $0x18] sm:$0xf] %v7177_v36  ;;  %7180 = vst [vmem:[#allocation2] sm:$0xf] %v7177_v36 }
 0x8c0   :  { %7185 = vst [vmem:[#allocation4] sm:$0xf] %v7177_v36 }
 0x8c1   :  { %8260 = shalt.err (!%p8257_p9)
}
 0x8c2   :  { %7198 = dma.vmem_to_hbm [thread:$0]  %s7196_s27, 64, %s11584_s6, [#allocation5]  }
 0x8c3   :  { %8269 = dma.done.wait [#allocation5], 64  }
 0x8c4   :  { %8270 = vsyncadd [#allocation5], 4294967232 }
 0x8c5   :  { %8271 = dma.done.wait [#allocation7], 64  }
 0x8c6   :  { %8272 = vsyncadd [#allocation7], 4294967232 }
 0x8c7   :  { %7217 = vsyncpa [#allocation5], 1 }
 0x8c8   :  { %7218 = vsyncpa [#allocation7], 1 }

</bundles_post_ra>
